<compile_context>
chip_gen: v5e
topology: v5e:2x2
jax: 0.10.0
libtpu: 0.0.40
codegen_flags: <defaults>
</compile_context>

<pallas_src>
import math

import jax
import jax.numpy as jnp
from jax.experimental import pallas as pl
from jax.experimental.pallas import tpu as pltpu

EPS = 1e-5


def _vmem_limit_bytes():
    """Per-generation scoped-VMEM request (~3/4 of physical, capped at 96 MiB)."""
    try:
        cap = int(pltpu.get_tpu_info().vmem_capacity_bytes)
    except Exception:
        cap = 64 * 1024 * 1024  # conservative fallback (fits all generations)
    return max(32 * 1024 * 1024, min(cap * 3 // 4, 96 * 1024 * 1024))


def _conv3x3_im2col(xv, w_flat, patch_ref, out_h, out_w, c):
    """3x3 conv on one pre-padded tile as a single K=9C MXU matmul.

    xv:        (out_h+2, out_w+2, C) float value (zero halo already present)
    w_flat:    (9*C, Co) bf16, rows ordered (dy, dx, cin) row-major
    patch_ref: (out_h*out_w, 9*C) f32 VMEM scratch (im2col staging)
    returns    (out_h*out_w, Co) f32 (MXU accumulates in f32)
    """
    k = 0
    for dy in range(3):
        for dx in range(3):
            piece = xv[dy:dy + out_h, dx:dx + out_w, :].reshape(out_h * out_w, c)
            patch_ref[:, k * c:(k + 1) * c] = piece.astype(jnp.float32)
            k += 1
    return jnp.dot(patch_ref[...].astype(jnp.bfloat16), w_flat,
                   preferred_element_type=jnp.float32)


def _write_stats(st_ref, t, n_elems):
    """st_ref (2, C): row 0 = per-image sum, row 1 = per-image centered sumsq."""
    s = jnp.sum(t, axis=0, keepdims=True)                  # (1, C)
    mean = s * (1.0 / n_elems)
    css = jnp.sum((t - mean) ** 2, axis=0, keepdims=True)  # (1, C)
    st_ref[0:1, :] = s
    st_ref[1:2, :] = css


def _conv1_stats_kernel(xp_ref, w_ref, y_ref, st_ref, patch):
    # xp_ref: (H+2, W+2, C) bf16 (pre-padded input)   w_ref: (9C, C) bf16
    # y_ref : (H, W, C) bf16                          st_ref: (2, C) f32
    h, w, c = y_ref.shape
    y = _conv3x3_im2col(xp_ref[...], w_ref[...], patch, h, w, c)   # (H*W, C) f32
    y_ref[...] = y.reshape(h, w, c).astype(y_ref.dtype)
    _write_stats(st_ref, y, h * w)


def _bn1_relu_conv2_stats_kernel(y_ref, sc_ref, sh_ref, w_ref, z_ref, st_ref,
                                 a_pad, patch):
    # y_ref : (H, W, C) bf16 (conv1 output, unpadded)   sc/sh: (1, C) f32
    # w_ref : (9C, C) bf16    z_ref: (H, W, C) bf16     st_ref: (2, C) f32
    # a_pad : (H+2, W+2, C) f32 VMEM scratch (in-kernel zero-halo padding)
    # patch : (H*W, 9C) f32 VMEM scratch (im2col staging)
    h, w, c = z_ref.shape
    sc = sc_ref[...].reshape(1, 1, c)
    sh = sh_ref[...].reshape(1, 1, c)
    a = jnp.maximum(y_ref[...].astype(jnp.float32) * sc + sh, 0.0)  # BN1 + ReLU

    # Re-zero the scratch every step (cheap VMEM fill) instead of only on
    # program 0: under megacore sharding each core owns its own scratch and
    # may never see program_id == 0.
    a_pad[...] = jnp.zeros_like(a_pad)
    a_pad[1:h + 1, 1:w + 1, :] = a

    z = _conv3x3_im2col(a_pad[...], w_ref[...], patch, h, w, c)
    z_ref[...] = z.reshape(h, w, c).astype(z_ref.dtype)
    _write_stats(st_ref, z, h * w)


def _bn2_res_relu_kernel(z_ref, x_ref, sc_ref, sh_ref, o_ref):
    # Lane-dense elementwise pass on (tile_rows, lane) slabs; math in f32.
    o_ref[...] = jnp.maximum(
        z_ref[...].astype(jnp.float32) * sc_ref[...] + sh_ref[...] + x_ref[...],
        0.0).astype(o_ref.dtype)


def _finalize_bn(stats, gamma, beta, per_image, count):
    """Combine per-image (sum, centered sumsq) into BN scale/shift (f32).

    Chan's pooled-variance combine -> no E[x^2]-E[x]^2 cancellation.
    """
    sums = stats[:, 0, :]                                  # (N, C)
    css = stats[:, 1, :]                                   # (N, C)
    mean_i = sums / per_image
    mean = jnp.sum(sums, axis=0) / count
    var = (jnp.sum(css, axis=0)
           + per_image * jnp.sum((mean_i - mean[None, :]) ** 2, axis=0)) / count
    var = jnp.maximum(var, 0.0)                            # biased batch variance
    scale = gamma.astype(jnp.float32) * jax.lax.rsqrt(var + EPS)
    shift = beta.astype(jnp.float32) - mean * scale
    return scale, shift


def _choose_flat_tiling(total, c, w):
    """(rows, lane, tile_rows) for the flattened elementwise pass 3.

    lane is a multiple of 128 (unmasked vector stores) and of C (so the
    channel of a column is column % C), widened up to 2048 while it divides
    `total`.  tile_rows targets ~2 MiB per f32 buffer (the pipeline
    double-buffers each input/output).
    """
    lane = (128 * c) // math.gcd(128, c)                   # lcm(128, C)
    if total % lane == 0:
        while lane < 2048 and total % (lane * 2) == 0:
            lane *= 2
    else:
        lane = w * c                                       # fallback layout
    rows = total // lane
    target = max(1, (2 * 1024 * 1024) // (lane * 4))
    tr = rows
    if rows > target:
        for cand in range(target, 0, -1):
            if rows % cand == 0 and cand % 8 == 0:
                tr = cand
                break
        # If no multiple-of-8 divisor exists we keep tr = rows (single block):
        # correct, just not byte-optimal.
    return rows, lane, tr


def resblock_nhwc(x, w1, g1, b1, w2, g2, b2):
    """x: (N,H,W,C) f32, w*: (3,3,C,C) HWIO, g*/b*: (C,). Returns (N,H,W,C) f32."""
    n, h, w, c = x.shape
    hp, wp = h + 2, w + 2
    x = x.astype(jnp.float32)
    per_image = h * w
    count = n * per_image

    cp = pltpu.CompilerParams(dimension_semantics=("parallel",),
                              vmem_limit_bytes=_vmem_limit_bytes())

    # im2col weights: (3,3,C,Co) -> (9*C, Co); bf16 MXU operands.
    w1f = w1.astype(jnp.bfloat16).reshape(9 * c, c)
    w2f = w2.astype(jnp.bfloat16).reshape(9 * c, c)
    # Spatial zero-padding of the network input is done once, in bf16.
    xp = jnp.pad(x, ((0, 0), (1, 1), (1, 1), (0, 0))).astype(jnp.bfloat16)

    # TODO(synk): for very large H*W on v7x (64 MiB VMEM, 2 TensorCores) add a
    # spatial row-strip grid axis with halo reads; per-image blocks are fine
    # at these sizes.

    # ---- pass 1: conv1 (single K=9C matmul) + per-image BN1 partial stats ---
    y1, st1 = pl.pallas_call(
        _conv1_stats_kernel,
        out_shape=(jax.ShapeDtypeStruct((n, h, w, c), jnp.bfloat16),
                   jax.ShapeDtypeStruct((n, 2, c), jnp.float32)),
        grid=(n,),
        in_specs=[
            pl.BlockSpec((None, hp, wp, c), lambda i: (i, 0, 0, 0)),
            pl.BlockSpec((9 * c, c), lambda i: (0, 0)),
        ],
        out_specs=(
            pl.BlockSpec((None, h, w, c), lambda i: (i, 0, 0, 0)),
            pl.BlockSpec((None, 2, c), lambda i: (i, 0, 0)),
        ),
        scratch_shapes=[pltpu.VMEM((h * w, 9 * c), jnp.float32)],
        compiler_params=cp,
    )(xp, w1f)

    scale1, shift1 = _finalize_bn(st1, g1, b1, per_image, count)

    # ---- pass 2: BN1-apply + ReLU + conv2 + per-image BN2 partial stats -----
    # (zero-halo padding happens in a VMEM scratch; no HBM pad round trip)
    z2, st2 = pl.pallas_call(
        _bn1_relu_conv2_stats_kernel,
        out_shape=(jax.ShapeDtypeStruct((n, h, w, c), jnp.bfloat16),
                   jax.ShapeDtypeStruct((n, 2, c), jnp.float32)),
        grid=(n,),
        in_specs=[
            pl.BlockSpec((None, h, w, c), lambda i: (i, 0, 0, 0)),
            pl.BlockSpec((1, c), lambda i: (0, 0)),
            pl.BlockSpec((1, c), lambda i: (0, 0)),
            pl.BlockSpec((9 * c, c), lambda i: (0, 0)),
        ],
        out_specs=(
            pl.BlockSpec((None, h, w, c), lambda i: (i, 0, 0, 0)),
            pl.BlockSpec((None, 2, c), lambda i: (i, 0, 0)),
        ),
        scratch_shapes=[pltpu.VMEM((hp, wp, c), jnp.float32),
                        pltpu.VMEM((h * w, 9 * c), jnp.float32)],
        compiler_params=cp,
    )(y1, scale1.reshape(1, c), shift1.reshape(1, c), w2f)

    scale2, shift2 = _finalize_bn(st2, g2, b2, per_image, count)

    # ---- pass 3: BN2-apply + residual + ReLU on a lane-dense (rows, lane) view
    total = n * h * w * c
    rows, lane, tr = _choose_flat_tiling(total, c, w)
    z2f = z2.reshape(rows, lane)
    xf = x.reshape(rows, lane)
    sc_row = jnp.tile(scale2, lane // c).reshape(1, lane)   # channel = col % C
    sh_row = jnp.tile(shift2, lane // c).reshape(1, lane)

    of = pl.pallas_call(
        _bn2_res_relu_kernel,
        out_shape=jax.ShapeDtypeStruct((rows, lane), jnp.float32),
        grid=(rows // tr,),
        in_specs=[
            pl.BlockSpec((tr, lane), lambda i: (i, 0)),
            pl.BlockSpec((tr, lane), lambda i: (i, 0)),
            pl.BlockSpec((1, lane), lambda i: (0, 0)),
            pl.BlockSpec((1, lane), lambda i: (0, 0)),
        ],
        out_specs=pl.BlockSpec((tr, lane), lambda i: (i, 0)),
        input_output_aliases={1: 0},   # write the result into x's buffer
        compiler_params=cp,
    )(z2f, xf, sc_row, sh_row)

    return of.reshape(n, h, w, c)


def resblock_nchw(x_nchw, w1_oihw, g1, b1, w2_oihw, g2, b2):
    """PyTorch-convention entry point: x (N,C,H,W), weights (O,I,3,3)."""
    x = jnp.transpose(x_nchw, (0, 2, 3, 1))        # NCHW -> NHWC
    w1 = jnp.transpose(w1_oihw, (2, 3, 1, 0))      # OIHW -> HWIO
    w2 = jnp.transpose(w2_oihw, (2, 3, 1, 0))
    out = resblock_nhwc(x, w1, g1, b1, w2, g2, b2)
    return jnp.transpose(out, (0, 3, 1, 2))        # NHWC -> NCHW


def _reference_nchw(x_nchw, w1_oihw, g1, b1, w2_oihw, g2, b2):
    """Pure-JAX reference mirroring the kernel's precision policy
    (bf16 conv operands, bf16 inter-pass activations, f32 everywhere else)."""
    x = jnp.transpose(x_nchw, (0, 2, 3, 1)).astype(jnp.float32)
    w1 = jnp.transpose(w1_oihw, (2, 3, 1, 0))
    w2 = jnp.transpose(w2_oihw, (2, 3, 1, 0))

    def conv(a_bf16, wgt):
        return jax.lax.conv_general_dilated(
            a_bf16, wgt.astype(jnp.bfloat16), (1, 1), ((1, 1), (1, 1)),
            dimension_numbers=("NHWC", "HWIO", "NHWC"),
            preferred_element_type=jnp.float32)

    def bn_affine(t, g, b):
        m = jnp.mean(t, axis=(0, 1, 2))
        v = jnp.mean((t - m) ** 2, axis=(0, 1, 2))
        s = g.astype(jnp.float32) * jax.lax.rsqrt(v + EPS)
        return s, b.astype(jnp.float32) - m * s

    y = conv(x.astype(jnp.bfloat16), w1)                 # f32
    s1, t1 = bn_affine(y, g1, b1)
    yb = y.astype(jnp.bfloat16).astype(jnp.float32)      # kernel stores y1 in bf16
    a = jnp.maximum(yb * s1 + t1, 0.0).astype(jnp.bfloat16)
    z = conv(a, w2)
    s2, t2 = bn_affine(z, g2, b2)
    zb = z.astype(jnp.bfloat16).astype(jnp.float32)      # kernel stores z2 in bf16
    out = jnp.maximum(zb * s2 + t2 + x, 0.0)
    return jnp.transpose(out, (0, 3, 1, 2))


if __name__ == "__main__":
    key = jax.random.PRNGKey(0)
    kx, kw1, kw2 = jax.random.split(key, 3)

    N, C, H, W = 2, 4, 16, 16
    x_nchw = jax.random.normal(kx, (N, C, H, W), jnp.float32)

    # Conv2d default init: kaiming_uniform(a=sqrt(5)) == U(-1/sqrt(fan_in), +)
    fan_in = C * 3 * 3
    bound = 1.0 / (fan_in ** 0.5)
    w1_oihw = jax.random.uniform(kw1, (C, C, 3, 3), jnp.float32, -bound, bound)
    w2_oihw = jax.random.uniform(kw2, (C, C, 3, 3), jnp.float32, -bound, bound)
    # BatchNorm2d default init
    g1 = jnp.ones((C,), jnp.float32)
    b1 = jnp.zeros((C,), jnp.float32)
    g2 = jnp.ones((C,), jnp.float32)
    b2 = jnp.zeros((C,), jnp.float32)

    fn = jax.jit(resblock_nchw)
    out = jax.block_until_ready(fn(x_nchw, w1_oihw, g1, b1, w2_oihw, g2, b2))

    ref = _reference_nchw(x_nchw, w1_oihw, g1, b1, w2_oihw, g2, b2)
    max_err = float(jnp.max(jnp.abs(out - ref)))
    assert jnp.allclose(out, ref, rtol=2e-3, atol=2e-3), max_err
    print("KERNEL_OK")
</pallas_src>

<mosaic_0001>
module attributes {stable_mosaic.version = 11 : i64} {
  func.func @_conv1_stats_kernel(%arg0: i32, %arg1: memref<1x18x18x4xbf16, #tpu.memory_space<vmem>>, %arg2: memref<36x4xbf16, #tpu.memory_space<vmem>>, %arg3: memref<1x16x16x4xbf16, #tpu.memory_space<vmem>>, %arg4: memref<1x2x4xf32, #tpu.memory_space<vmem>>, %arg5: memref<256x36xf32, #tpu.memory_space<vmem>>) attributes {dimension_semantics = [#tpu.dimension_semantics<parallel>], iteration_bounds = array<i64: 2>, scalar_prefetch = 0 : i64, scratch_operands = 1 : i64, tpu.core_type = #tpu.core_type<tc>, window_params = [{transform_indices = @transform_0, window_bounds = array<i64: 1, 18, 18, 4>}, {pipeline_mode = #tpu.pipeline_mode<synchronous>, transform_indices = @transform_1, window_bounds = array<i64: 36, 4>}, {transform_indices = @transform_2, window_bounds = array<i64: 1, 16, 16, 4>}, {transform_indices = @transform_3, window_bounds = array<i64: 1, 2, 4>}]} {
    %c0 = arith.constant 0 : index
    %c0_0 = arith.constant 0 : index
    %c0_1 = arith.constant 0 : index
    %c0_2 = arith.constant 0 : index
    %0 = vector.load %arg1[%c0, %c0_0, %c0_1, %c0_2] : memref<1x18x18x4xbf16, #tpu.memory_space<vmem>>, vector<1x18x18x4xbf16>
    %1 = vector.shape_cast %0 : vector<1x18x18x4xbf16> to vector<18x18x4xbf16>
    %c0_3 = arith.constant 0 : index
    %c0_4 = arith.constant 0 : index
    %2 = vector.load %arg2[%c0_3, %c0_4] : memref<36x4xbf16, #tpu.memory_space<vmem>>, vector<36x4xbf16>
    %3 = vector.extract_strided_slice %1 {offsets = [0, 0, 0], sizes = [16, 16, 4], strides = [1, 1, 1]} : vector<18x18x4xbf16> to vector<16x16x4xbf16>
    %4 = vector.shape_cast %3 : vector<16x16x4xbf16> to vector<256x4xbf16>
    %5 = arith.extf %4 : vector<256x4xbf16> to vector<256x4xf32>
    %c0_5 = arith.constant 0 : index
    %c0_6 = arith.constant 0 : index
    %6 = vector.load %arg5[%c0_5, %c0_6] : memref<256x36xf32, #tpu.memory_space<vmem>>, vector<256x4xf32>
    tpu.vector_store %arg5[%c0_5, %c0_6], %5 {strides = array<i32>} : memref<256x36xf32, #tpu.memory_space<vmem>>, vector<256x4xf32>,
    %7 = vector.extract_strided_slice %1 {offsets = [0, 1, 0], sizes = [16, 16, 4], strides = [1, 1, 1]} : vector<18x18x4xbf16> to vector<16x16x4xbf16>
    %8 = vector.shape_cast %7 : vector<16x16x4xbf16> to vector<256x4xbf16>
    %9 = arith.extf %8 : vector<256x4xbf16> to vector<256x4xf32>
    %c0_7 = arith.constant 0 : index
    %c4 = arith.constant 4 : index
    %10 = vector.load %arg5[%c0_7, %c4] : memref<256x36xf32, #tpu.memory_space<vmem>>, vector<256x4xf32>
    tpu.vector_store %arg5[%c0_7, %c4], %9 {strides = array<i32>} : memref<256x36xf32, #tpu.memory_space<vmem>>, vector<256x4xf32>,
    %11 = vector.extract_strided_slice %1 {offsets = [0, 2, 0], sizes = [16, 16, 4], strides = [1, 1, 1]} : vector<18x18x4xbf16> to vector<16x16x4xbf16>
    %12 = vector.shape_cast %11 : vector<16x16x4xbf16> to vector<256x4xbf16>
    %13 = arith.extf %12 : vector<256x4xbf16> to vector<256x4xf32>
    %c0_8 = arith.constant 0 : index
    %c8 = arith.constant 8 : index
    %14 = vector.load %arg5[%c0_8, %c8] : memref<256x36xf32, #tpu.memory_space<vmem>>, vector<256x4xf32>
    tpu.vector_store %arg5[%c0_8, %c8], %13 {strides = array<i32>} : memref<256x36xf32, #tpu.memory_space<vmem>>, vector<256x4xf32>,
    %15 = vector.extract_strided_slice %1 {offsets = [1, 0, 0], sizes = [16, 16, 4], strides = [1, 1, 1]} : vector<18x18x4xbf16> to vector<16x16x4xbf16>
    %16 = vector.shape_cast %15 : vector<16x16x4xbf16> to vector<256x4xbf16>
    %17 = arith.extf %16 : vector<256x4xbf16> to vector<256x4xf32>
    %c0_9 = arith.constant 0 : index
    %c12 = arith.constant 12 : index
    %18 = vector.load %arg5[%c0_9, %c12] : memref<256x36xf32, #tpu.memory_space<vmem>>, vector<256x4xf32>
    tpu.vector_store %arg5[%c0_9, %c12], %17 {strides = array<i32>} : memref<256x36xf32, #tpu.memory_space<vmem>>, vector<256x4xf32>,
    %19 = vector.extract_strided_slice %1 {offsets = [1, 1, 0], sizes = [16, 16, 4], strides = [1, 1, 1]} : vector<18x18x4xbf16> to vector<16x16x4xbf16>
    %20 = vector.shape_cast %19 : vector<16x16x4xbf16> to vector<256x4xbf16>
    %21 = arith.extf %20 : vector<256x4xbf16> to vector<256x4xf32>
    %c0_10 = arith.constant 0 : index
    %c16 = arith.constant 16 : index
    %22 = vector.load %arg5[%c0_10, %c16] : memref<256x36xf32, #tpu.memory_space<vmem>>, vector<256x4xf32>
    tpu.vector_store %arg5[%c0_10, %c16], %21 {strides = array<i32>} : memref<256x36xf32, #tpu.memory_space<vmem>>, vector<256x4xf32>,
    %23 = vector.extract_strided_slice %1 {offsets = [1, 2, 0], sizes = [16, 16, 4], strides = [1, 1, 1]} : vector<18x18x4xbf16> to vector<16x16x4xbf16>
    %24 = vector.shape_cast %23 : vector<16x16x4xbf16> to vector<256x4xbf16>
    %25 = arith.extf %24 : vector<256x4xbf16> to vector<256x4xf32>
    %c0_11 = arith.constant 0 : index
    %c20 = arith.constant 20 : index
    %26 = vector.load %arg5[%c0_11, %c20] : memref<256x36xf32, #tpu.memory_space<vmem>>, vector<256x4xf32>
    tpu.vector_store %arg5[%c0_11, %c20], %25 {strides = array<i32>} : memref<256x36xf32, #tpu.memory_space<vmem>>, vector<256x4xf32>,
    %27 = vector.extract_strided_slice %1 {offsets = [2, 0, 0], sizes = [16, 16, 4], strides = [1, 1, 1]} : vector<18x18x4xbf16> to vector<16x16x4xbf16>
    %28 = vector.shape_cast %27 : vector<16x16x4xbf16> to vector<256x4xbf16>
    %29 = arith.extf %28 : vector<256x4xbf16> to vector<256x4xf32>
    %c0_12 = arith.constant 0 : index
    %c24 = arith.constant 24 : index
    %30 = vector.load %arg5[%c0_12, %c24] : memref<256x36xf32, #tpu.memory_space<vmem>>, vector<256x4xf32>
    tpu.vector_store %arg5[%c0_12, %c24], %29 {strides = array<i32>} : memref<256x36xf32, #tpu.memory_space<vmem>>, vector<256x4xf32>,
    %31 = vector.extract_strided_slice %1 {offsets = [2, 1, 0], sizes = [16, 16, 4], strides = [1, 1, 1]} : vector<18x18x4xbf16> to vector<16x16x4xbf16>
    %32 = vector.shape_cast %31 : vector<16x16x4xbf16> to vector<256x4xbf16>
    %33 = arith.extf %32 : vector<256x4xbf16> to vector<256x4xf32>
    %c0_13 = arith.constant 0 : index
    %c28 = arith.constant 28 : index
    %34 = vector.load %arg5[%c0_13, %c28] : memref<256x36xf32, #tpu.memory_space<vmem>>, vector<256x4xf32>
    tpu.vector_store %arg5[%c0_13, %c28], %33 {strides = array<i32>} : memref<256x36xf32, #tpu.memory_space<vmem>>, vector<256x4xf32>,
    %35 = vector.extract_strided_slice %1 {offsets = [2, 2, 0], sizes = [16, 16, 4], strides = [1, 1, 1]} : vector<18x18x4xbf16> to vector<16x16x4xbf16>
    %36 = vector.shape_cast %35 : vector<16x16x4xbf16> to vector<256x4xbf16>
    %37 = arith.extf %36 : vector<256x4xbf16> to vector<256x4xf32>
    %c0_14 = arith.constant 0 : index
    %c32 = arith.constant 32 : index
    %38 = vector.load %arg5[%c0_14, %c32] : memref<256x36xf32, #tpu.memory_space<vmem>>, vector<256x4xf32>
    tpu.vector_store %arg5[%c0_14, %c32], %37 {strides = array<i32>} : memref<256x36xf32, #tpu.memory_space<vmem>>, vector<256x4xf32>,
    %c0_15 = arith.constant 0 : index
    %c0_16 = arith.constant 0 : index
    %39 = vector.load %arg5[%c0_15, %c0_16] : memref<256x36xf32, #tpu.memory_space<vmem>>, vector<256x36xf32>
    %40 = arith.truncf %39 : vector<256x36xf32> to vector<256x36xbf16>
    %cst = arith.constant dense<0.000000e+00> : vector<256x4xf32>
    %41 = tpu.matmul %40, %2, %cst {dimension_numbers = #tpu.dot_dimension_numbers<[1], [0], [0], [1], [0, 0, 1, 1], [], []>} : vector<256x36xbf16>, vector<36x4xbf16>, vector<256x4xf32> -> vector<256x4xf32>
    %42 = vector.shape_cast %41 : vector<256x4xf32> to vector<16x16x4xf32>
    %43 = arith.truncf %42 : vector<16x16x4xf32> to vector<16x16x4xbf16>
    %c0_17 = arith.constant 0 : index
    %c0_18 = arith.constant 0 : index
    %c0_19 = arith.constant 0 : index
    %c0_20 = arith.constant 0 : index
    %44 = vector.load %arg3[%c0_17, %c0_18, %c0_19, %c0_20] : memref<1x16x16x4xbf16, #tpu.memory_space<vmem>>, vector<1x16x16x4xbf16>
    %45 = vector.shape_cast %44 : vector<1x16x16x4xbf16> to vector<16x16x4xbf16>
    %46 = vector.shape_cast %43 : vector<16x16x4xbf16> to vector<1x16x16x4xbf16>
    tpu.vector_store %arg3[%c0_17, %c0_18, %c0_19, %c0_20], %46 {strides = array<i32>} : memref<1x16x16x4xbf16, #tpu.memory_space<vmem>>, vector<1x16x16x4xbf16>,
    %cst_21 = arith.constant dense<0.000000e+00> : vector<4xf32>
    %47 = vector.multi_reduction <add>, %41, %cst_21 [0] : vector<256x4xf32> to vector<4xf32>
    %48 = vector.shape_cast %47 : vector<4xf32> to vector<1x4xf32>
    %cst_22 = arith.constant 3.906250e-03 : f32
    %49 = vector.broadcast %cst_22 : f32 to vector<1x4xf32>
    %50 = arith.mulf %48, %49 : vector<1x4xf32>
    %51 = vector.broadcast %50 : vector<1x4xf32> to vector<256x4xf32>
    %52 = arith.subf %41, %51 : vector<256x4xf32>
    %53 = arith.mulf %52, %52 : vector<256x4xf32>
    %cst_23 = arith.constant dense<0.000000e+00> : vector<4xf32>
    %54 = vector.multi_reduction <add>, %53, %cst_23 [0] : vector<256x4xf32> to vector<4xf32>
    %55 = vector.shape_cast %54 : vector<4xf32> to vector<1x4xf32>
    %c0_24 = arith.constant 0 : index
    %c0_25 = arith.constant 0 : index
    %c0_26 = arith.constant 0 : index
    %56 = vector.load %arg4[%c0_24, %c0_25, %c0_26] : memref<1x2x4xf32, #tpu.memory_space<vmem>>, vector<1x1x4xf32>
    %57 = vector.shape_cast %56 : vector<1x1x4xf32> to vector<1x4xf32>
    %58 = vector.shape_cast %48 : vector<1x4xf32> to vector<1x1x4xf32>
    tpu.vector_store %arg4[%c0_24, %c0_25, %c0_26], %58 {strides = array<i32>} : memref<1x2x4xf32, #tpu.memory_space<vmem>>, vector<1x1x4xf32>,
    %c0_27 = arith.constant 0 : index
    %c1 = arith.constant 1 : index
    %c0_28 = arith.constant 0 : index
    %59 = vector.load %arg4[%c0_27, %c1, %c0_28] : memref<1x2x4xf32, #tpu.memory_space<vmem>>, vector<1x1x4xf32>
    %60 = vector.shape_cast %59 : vector<1x1x4xf32> to vector<1x4xf32>
    %61 = vector.shape_cast %55 : vector<1x4xf32> to vector<1x1x4xf32>
    tpu.vector_store %arg4[%c0_27, %c1, %c0_28], %61 {strides = array<i32>} : memref<1x2x4xf32, #tpu.memory_space<vmem>>, vector<1x1x4xf32>,
    return
  }
  func.func @transform_0(%arg0: i32) -> (i32, i32, i32, i32) {
    %c0_i32 = arith.constant 0 : i32
    %c0_i32_0 = arith.constant 0 : i32
    %c0_i32_1 = arith.constant 0 : i32
    %c0_i32_2 = arith.constant 0 : i32
    return %arg0, %c0_i32, %c0_i32_0, %c0_i32_1 : i32, i32, i32, i32
  }
  func.func @transform_1(%arg0: i32) -> (i32, i32) {
    %c0_i32 = arith.constant 0 : i32
    %c0_i32_0 = arith.constant 0 : i32
    %c0_i32_1 = arith.constant 0 : i32
    return %c0_i32, %c0_i32_0 : i32, i32
  }
  func.func @transform_2(%arg0: i32) -> (i32, i32, i32, i32) {
    %c0_i32 = arith.constant 0 : i32
    %c0_i32_0 = arith.constant 0 : i32
    %c0_i32_1 = arith.constant 0 : i32
    %c0_i32_2 = arith.constant 0 : i32
    return %arg0, %c0_i32, %c0_i32_0, %c0_i32_1 : i32, i32, i32, i32
  }
  func.func @transform_3(%arg0: i32) -> (i32, i32, i32) {
    %c0_i32 = arith.constant 0 : i32
    %c0_i32_0 = arith.constant 0 : i32
    %c0_i32_1 = arith.constant 0 : i32
    return %arg0, %c0_i32, %c0_i32_0 : i32, i32, i32
  }
}

module attributes {stable_mosaic.version = 11 : i64} {
  func.func @_bn1_relu_conv2_stats_kernel(%arg0: i32, %arg1: memref<1x16x16x4xbf16, #tpu.memory_space<vmem>>, %arg2: memref<1x4xf32, #tpu.memory_space<vmem>>, %arg3: memref<1x4xf32, #tpu.memory_space<vmem>>, %arg4: memref<36x4xbf16, #tpu.memory_space<vmem>>, %arg5: memref<1x16x16x4xbf16, #tpu.memory_space<vmem>>, %arg6: memref<1x2x4xf32, #tpu.memory_space<vmem>>, %arg7: memref<18x18x4xf32, #tpu.memory_space<vmem>>, %arg8: memref<256x36xf32, #tpu.memory_space<vmem>>) attributes {dimension_semantics = [#tpu.dimension_semantics<parallel>], iteration_bounds = array<i64: 2>, scalar_prefetch = 0 : i64, scratch_operands = 2 : i64, tpu.core_type = #tpu.core_type<tc>, window_params = [{transform_indices = @transform_0, window_bounds = array<i64: 1, 16, 16, 4>}, {pipeline_mode = #tpu.pipeline_mode<synchronous>, transform_indices = @transform_1, window_bounds = array<i64: 1, 4>}, {pipeline_mode = #tpu.pipeline_mode<synchronous>, transform_indices = @transform_2, window_bounds = array<i64: 1, 4>}, {pipeline_mode = #tpu.pipeline_mode<synchronous>, transform_indices = @transform_3, window_bounds = array<i64: 36, 4>}, {transform_indices = @transform_4, window_bounds = array<i64: 1, 16, 16, 4>}, {transform_indices = @transform_5, window_bounds = array<i64: 1, 2, 4>}]} {
    %c0 = arith.constant 0 : index
    %c0_0 = arith.constant 0 : index
    %0 = vector.load %arg2[%c0, %c0_0] : memref<1x4xf32, #tpu.memory_space<vmem>>, vector<1x4xf32>
    %1 = vector.shape_cast %0 : vector<1x4xf32> to vector<1x1x4xf32>
    %c0_1 = arith.constant 0 : index
    %c0_2 = arith.constant 0 : index
    %2 = vector.load %arg3[%c0_1, %c0_2] : memref<1x4xf32, #tpu.memory_space<vmem>>, vector<1x4xf32>
    %3 = vector.shape_cast %2 : vector<1x4xf32> to vector<1x1x4xf32>
    %c0_3 = arith.constant 0 : index
    %c0_4 = arith.constant 0 : index
    %c0_5 = arith.constant 0 : index
    %c0_6 = arith.constant 0 : index
    %4 = vector.load %arg1[%c0_3, %c0_4, %c0_5, %c0_6] : memref<1x16x16x4xbf16, #tpu.memory_space<vmem>>, vector<1x16x16x4xbf16>
    %5 = vector.shape_cast %4 : vector<1x16x16x4xbf16> to vector<16x16x4xbf16>
    %6 = arith.extf %5 : vector<16x16x4xbf16> to vector<16x16x4xf32>
    %7 = vector.broadcast %1 : vector<1x1x4xf32> to vector<16x16x4xf32>
    %8 = arith.mulf %6, %7 : vector<16x16x4xf32>
    %9 = vector.broadcast %3 : vector<1x1x4xf32> to vector<16x16x4xf32>
    %10 = arith.addf %8, %9 : vector<16x16x4xf32>
    %cst = arith.constant 0.000000e+00 : f32
    %11 = vector.broadcast %cst : f32 to vector<16x16x4xf32>
    %12 = arith.maximumf %10, %11 : vector<16x16x4xf32>
    %cst_7 = arith.constant 0.000000e+00 : f32
    %13 = vector.broadcast %cst_7 : f32 to vector<18x18x4xf32>
    %c0_8 = arith.constant 0 : index
    %c0_9 = arith.constant 0 : index
    %c0_10 = arith.constant 0 : index
    %14 = vector.load %arg7[%c0_8, %c0_9, %c0_10] : memref<18x18x4xf32, #tpu.memory_space<vmem>>, vector<18x18x4xf32>
    tpu.vector_store %arg7[%c0_8, %c0_9, %c0_10], %13 {strides = array<i32>} : memref<18x18x4xf32, #tpu.memory_space<vmem>>, vector<18x18x4xf32>,
    %c1 = arith.constant 1 : index
    %c1_11 = arith.constant 1 : index
    %c0_12 = arith.constant 0 : index
    %15 = vector.load %arg7[%c1, %c1_11, %c0_12] : memref<18x18x4xf32, #tpu.memory_space<vmem>>, vector<16x16x4xf32>
    tpu.vector_store %arg7[%c1, %c1_11, %c0_12], %12 {strides = array<i32>} : memref<18x18x4xf32, #tpu.memory_space<vmem>>, vector<16x16x4xf32>,
    %c0_13 = arith.constant 0 : index
    %c0_14 = arith.constant 0 : index
    %c0_15 = arith.constant 0 : index
    %16 = vector.load %arg7[%c0_13, %c0_14, %c0_15] : memref<18x18x4xf32, #tpu.memory_space<vmem>>, vector<18x18x4xf32>
    %c0_16 = arith.constant 0 : index
    %c0_17 = arith.constant 0 : index
    %17 = vector.load %arg4[%c0_16, %c0_17] : memref<36x4xbf16, #tpu.memory_space<vmem>>, vector<36x4xbf16>
    %18 = vector.extract_strided_slice %16 {offsets = [0, 0, 0], sizes = [16, 16, 4], strides = [1, 1, 1]} : vector<18x18x4xf32> to vector<16x16x4xf32>
    %19 = vector.shape_cast %18 : vector<16x16x4xf32> to vector<256x4xf32>
    %c0_18 = arith.constant 0 : index
    %c0_19 = arith.constant 0 : index
    %20 = vector.load %arg8[%c0_18, %c0_19] : memref<256x36xf32, #tpu.memory_space<vmem>>, vector<256x4xf32>
    tpu.vector_store %arg8[%c0_18, %c0_19], %19 {strides = array<i32>} : memref<256x36xf32, #tpu.memory_space<vmem>>, vector<256x4xf32>,
    %21 = vector.extract_strided_slice %16 {offsets = [0, 1, 0], sizes = [16, 16, 4], strides = [1, 1, 1]} : vector<18x18x4xf32> to vector<16x16x4xf32>
    %22 = vector.shape_cast %21 : vector<16x16x4xf32> to vector<256x4xf32>
    %c0_20 = arith.constant 0 : index
    %c4 = arith.constant 4 : index
    %23 = vector.load %arg8[%c0_20, %c4] : memref<256x36xf32, #tpu.memory_space<vmem>>, vector<256x4xf32>
    tpu.vector_store %arg8[%c0_20, %c4], %22 {strides = array<i32>} : memref<256x36xf32, #tpu.memory_space<vmem>>, vector<256x4xf32>,
    %24 = vector.extract_strided_slice %16 {offsets = [0, 2, 0], sizes = [16, 16, 4], strides = [1, 1, 1]} : vector<18x18x4xf32> to vector<16x16x4xf32>
    %25 = vector.shape_cast %24 : vector<16x16x4xf32> to vector<256x4xf32>
    %c0_21 = arith.constant 0 : index
    %c8 = arith.constant 8 : index
    %26 = vector.load %arg8[%c0_21, %c8] : memref<256x36xf32, #tpu.memory_space<vmem>>, vector<256x4xf32>
    tpu.vector_store %arg8[%c0_21, %c8], %25 {strides = array<i32>} : memref<256x36xf32, #tpu.memory_space<vmem>>, vector<256x4xf32>,
    %27 = vector.extract_strided_slice %16 {offsets = [1, 0, 0], sizes = [16, 16, 4], strides = [1, 1, 1]} : vector<18x18x4xf32> to vector<16x16x4xf32>
    %28 = vector.shape_cast %27 : vector<16x16x4xf32> to vector<256x4xf32>
    %c0_22 = arith.constant 0 : index
    %c12 = arith.constant 12 : index
    %29 = vector.load %arg8[%c0_22, %c12] : memref<256x36xf32, #tpu.memory_space<vmem>>, vector<256x4xf32>
    tpu.vector_store %arg8[%c0_22, %c12], %28 {strides = array<i32>} : memref<256x36xf32, #tpu.memory_space<vmem>>, vector<256x4xf32>,
    %30 = vector.extract_strided_slice %16 {offsets = [1, 1, 0], sizes = [16, 16, 4], strides = [1, 1, 1]} : vector<18x18x4xf32> to vector<16x16x4xf32>
    %31 = vector.shape_cast %30 : vector<16x16x4xf32> to vector<256x4xf32>
    %c0_23 = arith.constant 0 : index
    %c16 = arith.constant 16 : index
    %32 = vector.load %arg8[%c0_23, %c16] : memref<256x36xf32, #tpu.memory_space<vmem>>, vector<256x4xf32>
    tpu.vector_store %arg8[%c0_23, %c16], %31 {strides = array<i32>} : memref<256x36xf32, #tpu.memory_space<vmem>>, vector<256x4xf32>,
    %33 = vector.extract_strided_slice %16 {offsets = [1, 2, 0], sizes = [16, 16, 4], strides = [1, 1, 1]} : vector<18x18x4xf32> to vector<16x16x4xf32>
    %34 = vector.shape_cast %33 : vector<16x16x4xf32> to vector<256x4xf32>
    %c0_24 = arith.constant 0 : index
    %c20 = arith.constant 20 : index
    %35 = vector.load %arg8[%c0_24, %c20] : memref<256x36xf32, #tpu.memory_space<vmem>>, vector<256x4xf32>
    tpu.vector_store %arg8[%c0_24, %c20], %34 {strides = array<i32>} : memref<256x36xf32, #tpu.memory_space<vmem>>, vector<256x4xf32>,
    %36 = vector.extract_strided_slice %16 {offsets = [2, 0, 0], sizes = [16, 16, 4], strides = [1, 1, 1]} : vector<18x18x4xf32> to vector<16x16x4xf32>
    %37 = vector.shape_cast %36 : vector<16x16x4xf32> to vector<256x4xf32>
    %c0_25 = arith.constant 0 : index
    %c24 = arith.constant 24 : index
    %38 = vector.load %arg8[%c0_25, %c24] : memref<256x36xf32, #tpu.memory_space<vmem>>, vector<256x4xf32>
    tpu.vector_store %arg8[%c0_25, %c24], %37 {strides = array<i32>} : memref<256x36xf32, #tpu.memory_space<vmem>>, vector<256x4xf32>,
    %39 = vector.extract_strided_slice %16 {offsets = [2, 1, 0], sizes = [16, 16, 4], strides = [1, 1, 1]} : vector<18x18x4xf32> to vector<16x16x4xf32>
    %40 = vector.shape_cast %39 : vector<16x16x4xf32> to vector<256x4xf32>
    %c0_26 = arith.constant 0 : index
    %c28 = arith.constant 28 : index
    %41 = vector.load %arg8[%c0_26, %c28] : memref<256x36xf32, #tpu.memory_space<vmem>>, vector<256x4xf32>
    tpu.vector_store %arg8[%c0_26, %c28], %40 {strides = array<i32>} : memref<256x36xf32, #tpu.memory_space<vmem>>, vector<256x4xf32>,
    %42 = vector.extract_strided_slice %16 {offsets = [2, 2, 0], sizes = [16, 16, 4], strides = [1, 1, 1]} : vector<18x18x4xf32> to vector<16x16x4xf32>
    %43 = vector.shape_cast %42 : vector<16x16x4xf32> to vector<256x4xf32>
    %c0_27 = arith.constant 0 : index
    %c32 = arith.constant 32 : index
    %44 = vector.load %arg8[%c0_27, %c32] : memref<256x36xf32, #tpu.memory_space<vmem>>, vector<256x4xf32>
    tpu.vector_store %arg8[%c0_27, %c32], %43 {strides = array<i32>} : memref<256x36xf32, #tpu.memory_space<vmem>>, vector<256x4xf32>,
    %c0_28 = arith.constant 0 : index
    %c0_29 = arith.constant 0 : index
    %45 = vector.load %arg8[%c0_28, %c0_29] : memref<256x36xf32, #tpu.memory_space<vmem>>, vector<256x36xf32>
    %46 = arith.truncf %45 : vector<256x36xf32> to vector<256x36xbf16>
    %cst_30 = arith.constant dense<0.000000e+00> : vector<256x4xf32>
    %47 = tpu.matmul %46, %17, %cst_30 {dimension_numbers = #tpu.dot_dimension_numbers<[1], [0], [0], [1], [0, 0, 1, 1], [], []>} : vector<256x36xbf16>, vector<36x4xbf16>, vector<256x4xf32> -> vector<256x4xf32>
    %48 = vector.shape_cast %47 : vector<256x4xf32> to vector<16x16x4xf32>
    %49 = arith.truncf %48 : vector<16x16x4xf32> to vector<16x16x4xbf16>
    %c0_31 = arith.constant 0 : index
    %c0_32 = arith.constant 0 : index
    %c0_33 = arith.constant 0 : index
    %c0_34 = arith.constant 0 : index
    %50 = vector.load %arg5[%c0_31, %c0_32, %c0_33, %c0_34] : memref<1x16x16x4xbf16, #tpu.memory_space<vmem>>, vector<1x16x16x4xbf16>
    %51 = vector.shape_cast %50 : vector<1x16x16x4xbf16> to vector<16x16x4xbf16>
    %52 = vector.shape_cast %49 : vector<16x16x4xbf16> to vector<1x16x16x4xbf16>
    tpu.vector_store %arg5[%c0_31, %c0_32, %c0_33, %c0_34], %52 {strides = array<i32>} : memref<1x16x16x4xbf16, #tpu.memory_space<vmem>>, vector<1x16x16x4xbf16>,
    %cst_35 = arith.constant dense<0.000000e+00> : vector<4xf32>
    %53 = vector.multi_reduction <add>, %47, %cst_35 [0] : vector<256x4xf32> to vector<4xf32>
    %54 = vector.shape_cast %53 : vector<4xf32> to vector<1x4xf32>
    %cst_36 = arith.constant 3.906250e-03 : f32
    %55 = vector.broadcast %cst_36 : f32 to vector<1x4xf32>
    %56 = arith.mulf %54, %55 : vector<1x4xf32>
    %57 = vector.broadcast %56 : vector<1x4xf32> to vector<256x4xf32>
    %58 = arith.subf %47, %57 : vector<256x4xf32>
    %59 = arith.mulf %58, %58 : vector<256x4xf32>
    %cst_37 = arith.constant dense<0.000000e+00> : vector<4xf32>
    %60 = vector.multi_reduction <add>, %59, %cst_37 [0] : vector<256x4xf32> to vector<4xf32>
    %61 = vector.shape_cast %60 : vector<4xf32> to vector<1x4xf32>
    %c0_38 = arith.constant 0 : index
    %c0_39 = arith.constant 0 : index
    %c0_40 = arith.constant 0 : index
    %62 = vector.load %arg6[%c0_38, %c0_39, %c0_40] : memref<1x2x4xf32, #tpu.memory_space<vmem>>, vector<1x1x4xf32>
    %63 = vector.shape_cast %62 : vector<1x1x4xf32> to vector<1x4xf32>
    %64 = vector.shape_cast %54 : vector<1x4xf32> to vector<1x1x4xf32>
    tpu.vector_store %arg6[%c0_38, %c0_39, %c0_40], %64 {strides = array<i32>} : memref<1x2x4xf32, #tpu.memory_space<vmem>>, vector<1x1x4xf32>,
    %c0_41 = arith.constant 0 : index
    %c1_42 = arith.constant 1 : index
    %c0_43 = arith.constant 0 : index
    %65 = vector.load %arg6[%c0_41, %c1_42, %c0_43] : memref<1x2x4xf32, #tpu.memory_space<vmem>>, vector<1x1x4xf32>
    %66 = vector.shape_cast %65 : vector<1x1x4xf32> to vector<1x4xf32>
    %67 = vector.shape_cast %61 : vector<1x4xf32> to vector<1x1x4xf32>
    tpu.vector_store %arg6[%c0_41, %c1_42, %c0_43], %67 {strides = array<i32>} : memref<1x2x4xf32, #tpu.memory_space<vmem>>, vector<1x1x4xf32>,
    return
  }
  func.func @transform_0(%arg0: i32) -> (i32, i32, i32, i32) {
    %c0_i32 = arith.constant 0 : i32
    %c0_i32_0 = arith.constant 0 : i32
    %c0_i32_1 = arith.constant 0 : i32
    %c0_i32_2 = arith.constant 0 : i32
    return %arg0, %c0_i32, %c0_i32_0, %c0_i32_1 : i32, i32, i32, i32
  }
  func.func @transform_1(%arg0: i32) -> (i32, i32) {
    %c0_i32 = arith.constant 0 : i32
    %c0_i32_0 = arith.constant 0 : i32
    %c0_i32_1 = arith.constant 0 : i32
    return %c0_i32, %c0_i32_0 : i32, i32
  }
  func.func @transform_2(%arg0: i32) -> (i32, i32) {
    %c0_i32 = arith.constant 0 : i32
    %c0_i32_0 = arith.constant 0 : i32
    %c0_i32_1 = arith.constant 0 : i32
    return %c0_i32, %c0_i32_0 : i32, i32
  }
  func.func @transform_3(%arg0: i32) -> (i32, i32) {
    %c0_i32 = arith.constant 0 : i32
    %c0_i32_0 = arith.constant 0 : i32
    %c0_i32_1 = arith.constant 0 : i32
    return %c0_i32, %c0_i32_0 : i32, i32
  }
  func.func @transform_4(%arg0: i32) -> (i32, i32, i32, i32) {
    %c0_i32 = arith.constant 0 : i32
    %c0_i32_0 = arith.constant 0 : i32
    %c0_i32_1 = arith.constant 0 : i32
    %c0_i32_2 = arith.constant 0 : i32
    return %arg0, %c0_i32, %c0_i32_0, %c0_i32_1 : i32, i32, i32, i32
  }
  func.func @transform_5(%arg0: i32) -> (i32, i32, i32) {
    %c0_i32 = arith.constant 0 : i32
    %c0_i32_0 = arith.constant 0 : i32
    %c0_i32_1 = arith.constant 0 : i32
    return %arg0, %c0_i32, %c0_i32_0 : i32, i32, i32
  }
}

module attributes {stable_mosaic.version = 11 : i64} {
  func.func @_bn2_res_relu_kernel(%arg0: i32, %arg1: memref<1x2048xbf16, #tpu.memory_space<vmem>>, %arg2: memref<1x2048xf32, #tpu.memory_space<vmem>>, %arg3: memref<1x2048xf32, #tpu.memory_space<vmem>>, %arg4: memref<1x2048xf32, #tpu.memory_space<vmem>>, %arg5: memref<1x2048xf32, #tpu.memory_space<vmem>>) attributes {dimension_semantics = [#tpu.dimension_semantics<parallel>], iteration_bounds = array<i64: 1>, scalar_prefetch = 0 : i64, scratch_operands = 0 : i64, tpu.core_type = #tpu.core_type<tc>, window_params = [{transform_indices = @transform_0, window_bounds = array<i64: 1, 2048>}, {transform_indices = @transform_1, window_bounds = array<i64: 1, 2048>}, {pipeline_mode = #tpu.pipeline_mode<synchronous>, transform_indices = @transform_2, window_bounds = array<i64: 1, 2048>}, {pipeline_mode = #tpu.pipeline_mode<synchronous>, transform_indices = @transform_3, window_bounds = array<i64: 1, 2048>}, {transform_indices = @transform_4, window_bounds = array<i64: 1, 2048>}]} {
    %c0 = arith.constant 0 : index
    %c0_0 = arith.constant 0 : index
    %0 = vector.load %arg1[%c0, %c0_0] : memref<1x2048xbf16, #tpu.memory_space<vmem>>, vector<1x2048xbf16>
    %1 = arith.extf %0 : vector<1x2048xbf16> to vector<1x2048xf32>
    %c0_1 = arith.constant 0 : index
    %c0_2 = arith.constant 0 : index
    %2 = vector.load %arg3[%c0_1, %c0_2] : memref<1x2048xf32, #tpu.memory_space<vmem>>, vector<1x2048xf32>
    %3 = arith.mulf %1, %2 : vector<1x2048xf32>
    %c0_3 = arith.constant 0 : index
    %c0_4 = arith.constant 0 : index
    %4 = vector.load %arg4[%c0_3, %c0_4] : memref<1x2048xf32, #tpu.memory_space<vmem>>, vector<1x2048xf32>
    %5 = arith.addf %3, %4 : vector<1x2048xf32>
    %c0_5 = arith.constant 0 : index
    %c0_6 = arith.constant 0 : index
    %6 = vector.load %arg2[%c0_5, %c0_6] : memref<1x2048xf32, #tpu.memory_space<vmem>>, vector<1x2048xf32>
    %7 = arith.addf %5, %6 : vector<1x2048xf32>
    %cst = arith.constant 0.000000e+00 : f32
    %8 = vector.broadcast %cst : f32 to vector<1x2048xf32>
    %9 = arith.maximumf %7, %8 : vector<1x2048xf32>
    %c0_7 = arith.constant 0 : index
    %c0_8 = arith.constant 0 : index
    %10 = vector.load %arg5[%c0_7, %c0_8] : memref<1x2048xf32, #tpu.memory_space<vmem>>, vector<1x2048xf32>
    tpu.vector_store %arg5[%c0_7, %c0_8], %9 {strides = array<i32>} : memref<1x2048xf32, #tpu.memory_space<vmem>>, vector<1x2048xf32>,
    return
  }
  func.func @transform_0(%arg0: i32) -> (i32, i32) {
    %c0_i32 = arith.constant 0 : i32
    %c0_i32_0 = arith.constant 0 : i32
    return %arg0, %c0_i32 : i32, i32
  }
  func.func @transform_1(%arg0: i32) -> (i32, i32) {
    %c0_i32 = arith.constant 0 : i32
    %c0_i32_0 = arith.constant 0 : i32
    return %arg0, %c0_i32 : i32, i32
  }
  func.func @transform_2(%arg0: i32) -> (i32, i32) {
    %c0_i32 = arith.constant 0 : i32
    %c0_i32_0 = arith.constant 0 : i32
    %c0_i32_1 = arith.constant 0 : i32
    return %c0_i32, %c0_i32_0 : i32, i32
  }
  func.func @transform_3(%arg0: i32) -> (i32, i32) {
    %c0_i32 = arith.constant 0 : i32
    %c0_i32_0 = arith.constant 0 : i32
    %c0_i32_1 = arith.constant 0 : i32
    return %c0_i32, %c0_i32_0 : i32, i32
  }
  func.func @transform_4(%arg0: i32) -> (i32, i32) {
    %c0_i32 = arith.constant 0 : i32
    %c0_i32_0 = arith.constant 0 : i32
    return %arg0, %c0_i32 : i32, i32
  }
}

</mosaic_0001>

<bundles_post_ra>
// kernel: tile.18
= control target key start
LH: loop header
LB: loop body
LE: loop exit
PB: predicated region body
PF: predicated region fallthrough
CT: control target
= control target key end

     0   :  { %s466_s0 = inlined_call_operand.vmem [shape: f32[4], index: 0, kind: input, shape index: {}]   ;;  %s467_s1 = inlined_call_operand.vmem [shape: f32[512,4], index: 1, kind: output, shape index: {}]  }
   0x1   :  { %v208_v0 = vld [vmem:[%s466_s0] ss:$0 sm:$0xff] }
   0x2   :  { %5 = vst [vmem:[%s467_s1] sm:$0xff] %v208_v0 }
   0x3   :  { %132 = vst [vmem:[%s467_s1 + $0x8] sm:$0xff] %v208_v0 }
   0x4   :  { %133 = vst [vmem:[%s467_s1 + $0x10] sm:$0xff] %v208_v0 }
   0x5   :  { %134 = vst [vmem:[%s467_s1 + $0x18] sm:$0xff] %v208_v0 }
   0x6   :  { %135 = vst [vmem:[%s467_s1 + $0x20] sm:$0xff] %v208_v0 }
   0x7   :  { %136 = vst [vmem:[%s467_s1 + $0x28] sm:$0xff] %v208_v0 }
   0x8   :  { %137 = vst [vmem:[%s467_s1 + $0x30] sm:$0xff] %v208_v0 }
   0x9   :  { %138 = vst [vmem:[%s467_s1 + $0x38] sm:$0xff] %v208_v0 }
   0xa   :  { %139 = vst [vmem:[%s467_s1 + $0x40] sm:$0xff] %v208_v0 }
   0xb   :  { %140 = vst [vmem:[%s467_s1 + $0x48] sm:$0xff] %v208_v0 }
   0xc   :  { %141 = vst [vmem:[%s467_s1 + $0x50] sm:$0xff] %v208_v0 }
   0xd   :  { %142 = vst [vmem:[%s467_s1 + $0x58] sm:$0xff] %v208_v0 }
   0xe   :  { %143 = vst [vmem:[%s467_s1 + $0x60] sm:$0xff] %v208_v0 }
   0xf   :  { %144 = vst [vmem:[%s467_s1 + $0x68] sm:$0xff] %v208_v0 }
  0x10   :  { %145 = vst [vmem:[%s467_s1 + $0x70] sm:$0xff] %v208_v0 }
  0x11   :  { %146 = vst [vmem:[%s467_s1 + $0x78] sm:$0xff] %v208_v0 }
  0x12   :  { %147 = vst [vmem:[%s467_s1 + $0x80] sm:$0xff] %v208_v0 }
  0x13   :  { %148 = vst [vmem:[%s467_s1 + $0x88] sm:$0xff] %v208_v0 }
  0x14   :  { %149 = vst [vmem:[%s467_s1 + $0x90] sm:$0xff] %v208_v0 }
  0x15   :  { %150 = vst [vmem:[%s467_s1 + $0x98] sm:$0xff] %v208_v0 }
  0x16   :  { %151 = vst [vmem:[%s467_s1 + $0xa0] sm:$0xff] %v208_v0 }
  0x17   :  { %152 = vst [vmem:[%s467_s1 + $0xa8] sm:$0xff] %v208_v0 }
  0x18   :  { %153 = vst [vmem:[%s467_s1 + $0xb0] sm:$0xff] %v208_v0 }
  0x19   :  { %154 = vst [vmem:[%s467_s1 + $0xb8] sm:$0xff] %v208_v0 }
  0x1a   :  { %155 = vst [vmem:[%s467_s1 + $0xc0] sm:$0xff] %v208_v0 }
  0x1b   :  { %156 = vst [vmem:[%s467_s1 + $0xc8] sm:$0xff] %v208_v0 }
  0x1c   :  { %157 = vst [vmem:[%s467_s1 + $0xd0] sm:$0xff] %v208_v0 }
  0x1d   :  { %158 = vst [vmem:[%s467_s1 + $0xd8] sm:$0xff] %v208_v0 }
  0x1e   :  { %159 = vst [vmem:[%s467_s1 + $0xe0] sm:$0xff] %v208_v0 }
  0x1f   :  { %160 = vst [vmem:[%s467_s1 + $0xe8] sm:$0xff] %v208_v0 }
  0x20   :  { %161 = vst [vmem:[%s467_s1 + $0xf0] sm:$0xff] %v208_v0 }
  0x21   :  { %162 = vst [vmem:[%s467_s1 + $0xf8] sm:$0xff] %v208_v0 }
  0x22   :  { %163 = vst [vmem:[%s467_s1 + $0x100] sm:$0xff] %v208_v0 }
  0x23   :  { %164 = vst [vmem:[%s467_s1 + $0x108] sm:$0xff] %v208_v0 }
  0x24   :  { %165 = vst [vmem:[%s467_s1 + $0x110] sm:$0xff] %v208_v0 }
  0x25   :  { %166 = vst [vmem:[%s467_s1 + $0x118] sm:$0xff] %v208_v0 }
  0x26   :  { %167 = vst [vmem:[%s467_s1 + $0x120] sm:$0xff] %v208_v0 }
  0x27   :  { %168 = vst [vmem:[%s467_s1 + $0x128] sm:$0xff] %v208_v0 }
  0x28   :  { %169 = vst [vmem:[%s467_s1 + $0x130] sm:$0xff] %v208_v0 }
  0x29   :  { %170 = vst [vmem:[%s467_s1 + $0x138] sm:$0xff] %v208_v0 }
  0x2a   :  { %171 = vst [vmem:[%s467_s1 + $0x140] sm:$0xff] %v208_v0 }
  0x2b   :  { %172 = vst [vmem:[%s467_s1 + $0x148] sm:$0xff] %v208_v0 }
  0x2c   :  { %173 = vst [vmem:[%s467_s1 + $0x150] sm:$0xff] %v208_v0 }
  0x2d   :  { %174 = vst [vmem:[%s467_s1 + $0x158] sm:$0xff] %v208_v0 }
  0x2e   :  { %175 = vst [vmem:[%s467_s1 + $0x160] sm:$0xff] %v208_v0 }
  0x2f   :  { %176 = vst [vmem:[%s467_s1 + $0x168] sm:$0xff] %v208_v0 }
  0x30   :  { %177 = vst [vmem:[%s467_s1 + $0x170] sm:$0xff] %v208_v0 }
  0x31   :  { %178 = vst [vmem:[%s467_s1 + $0x178] sm:$0xff] %v208_v0 }
  0x32   :  { %179 = vst [vmem:[%s467_s1 + $0x180] sm:$0xff] %v208_v0 }
  0x33   :  { %180 = vst [vmem:[%s467_s1 + $0x188] sm:$0xff] %v208_v0 }
  0x34   :  { %181 = vst [vmem:[%s467_s1 + $0x190] sm:$0xff] %v208_v0 }
  0x35   :  { %182 = vst [vmem:[%s467_s1 + $0x198] sm:$0xff] %v208_v0 }
  0x36   :  { %183 = vst [vmem:[%s467_s1 + $0x1a0] sm:$0xff] %v208_v0 }
  0x37   :  { %184 = vst [vmem:[%s467_s1 + $0x1a8] sm:$0xff] %v208_v0 }
  0x38   :  { %185 = vst [vmem:[%s467_s1 + $0x1b0] sm:$0xff] %v208_v0 }
  0x39   :  { %186 = vst [vmem:[%s467_s1 + $0x1b8] sm:$0xff] %v208_v0 }
  0x3a   :  { %187 = vst [vmem:[%s467_s1 + $0x1c0] sm:$0xff] %v208_v0 }
  0x3b   :  { %188 = vst [vmem:[%s467_s1 + $0x1c8] sm:$0xff] %v208_v0 }
  0x3c   :  { %189 = vst [vmem:[%s467_s1 + $0x1d0] sm:$0xff] %v208_v0 }
  0x3d   :  { %190 = vst [vmem:[%s467_s1 + $0x1d8] sm:$0xff] %v208_v0 }
  0x3e   :  { %191 = vst [vmem:[%s467_s1 + $0x1e0] sm:$0xff] %v208_v0 }
  0x3f   :  { %192 = vst [vmem:[%s467_s1 + $0x1e8] sm:$0xff] %v208_v0 }
  0x40   :  { %193 = vst [vmem:[%s467_s1 + $0x1f0] sm:$0xff] %v208_v0 }
  0x41   :  { %194 = vst [vmem:[%s467_s1 + $0x1f8] sm:$0xff] %v208_v0 }

// kernel: tile.19
= control target key start
LH: loop header
LB: loop body
LE: loop exit
PB: predicated region body
PF: predicated region fallthrough
CT: control target
= control target key end

     0   :  { %vm5_vm0 = vcmask 1041409   ;;  %vm9_vm1 = vcmask 1042434   ;;  %vm13_vm2 = vcmask 1043459   ;;  %vm17_vm3 = vcmask 1044484   ;;  %s2954_s19 = smov 120   ;;  %s2955_s9 = smov 124   ;;  %s5217_s0 = inlined_call_operand.vmem [shape: f32[512,4], index: 0, kind: input, shape index: {}]   ;;  %s5218_s1 = inlined_call_operand.vmem [shape: f32[1,2048], index: 1, kind: output, shape index: {}]  }
   0x1   :  { %v2428_v0 = vld [vmem:[%s5217_s0 + $0x1e] sm:$0x1]   ;;  %vm21_vm4 = vcmask 1045509   ;;  %vm25_vm5 = vcmask 1046534   ;;  %vm29_vm6 = vcmask 1047559   ;;  %s2956_s27 = smov 112  }
   0x2   :  { %v2429_v1 = vld [vmem:[%s5217_s0 + $0x3d] sm:$0x2]   ;;  %v2412_v10 = vld [vmem:[%s5217_s0 + $0x1f] sm:$0x1]   ;;  %v2468_v52 = vld [vmem:[%s5217_s0 + $0x11c] sm:$0x1]  }
   0x3   :  { %v146_v2 = vsel %vm5_vm0, %v2429_v1, %v2428_v0  ;;  %v2430_v3 = vld [vmem:[%s5217_s0 + $0x5c] sm:$0x4]   ;;  %v2413_v11 = vld [vmem:[%s5217_s0 + $0x3e] sm:$0x2]   ;;  %v2469_v53 = vld [vmem:[%s5217_s0 + $0x13b] sm:$0x2]  }
   0x4   :  { %v2431_v4 = vld [vmem:[%s5217_s0 + $0x7b] sm:$0x8]   ;;  %v150_v6 = vsel %vm9_vm1, %v2430_v3, %v146_v2  ;;  %v2414_v12 = vld [vmem:[%s5217_s0 + $0x5d] sm:$0x4]   ;;  %v74_v15 = vsel %vm5_vm0, %v2413_v11, %v2412_v10  ;;  %v325_v56 = vsel %vm5_vm0, %v2469_v53, %v2468_v52  ;;  %v2470_v57 = vld [vmem:[%s5217_s0 + $0x15a] sm:$0x4]  }
   0x5   :  { %v2432_v5 = vld [vmem:[%s5217_s0 + $0x9a] sm:$0x10]   ;;  %v154_v9 = vsel %vm13_vm2, %v2431_v4, %v150_v6  ;;  %v2415_v16 = vld [vmem:[%s5217_s0 + $0x7c] sm:$0x8]   ;;  %v78_v19 = vsel %vm9_vm1, %v2414_v12, %v74_v15  ;;  %v2471_v58 = vld [vmem:[%s5217_s0 + $0x179] sm:$0x8]   ;;  %v329_v63 = vsel %vm9_vm1, %v2470_v57, %v325_v56 }
   0x6   :  { %v2433_v7 = vld [vmem:[%s5217_s0 + $0xb9] sm:$0x20]   ;;  %v158_v13 = vsel %vm17_vm3, %v2432_v5, %v154_v9  ;;  %v2416_v17 = vld [vmem:[%s5217_s0 + $0x9b] sm:$0x10]   ;;  %v82_v24 = vsel %vm13_vm2, %v2415_v16, %v78_v19  ;;  %v2472_v59 = vld [vmem:[%s5217_s0 + $0x198] sm:$0x10]   ;;  %v333_v2 = vsel %vm13_vm2, %v2471_v58, %v329_v63 }
   0x7   :  { %v2434_v8 = vld [vmem:[%s5217_s0 + $0xd8] sm:$0x40]   ;;  %v162_v18 = vsel %vm21_vm4, %v2433_v7, %v158_v13  ;;  %v2417_v20 = vld [vmem:[%s5217_s0 + $0xba] sm:$0x20]   ;;  %v86_v29 = vsel %vm17_vm3, %v2416_v17, %v82_v24  ;;  %v2473_v0 = vld [vmem:[%s5217_s0 + $0x1b7] sm:$0x20]   ;;  %v337_v7 = vsel %vm17_vm3, %v2472_v59, %v333_v2 }
   0x8   :  { %v2435_v14 = vld [vmem:[%s5217_s0 + $0xf7] sm:$0x80]   ;;  %v2418_v21 = vld [vmem:[%s5217_s0 + $0xd9] sm:$0x40]   ;;  %v166_v23 = vsel %vm25_vm5, %v2434_v8, %v162_v18  ;;  %v90_v33 = vsel %vm21_vm4, %v2417_v20, %v86_v29  ;;  %v2460_v3 = vld [vmem:[%s5217_s0 + $0x1c] sm:$0x1]   ;;  %v341_v13 = vsel %vm21_vm4, %v2473_v0, %v337_v7 }
   0x9   :  { %v2419_v22 = vld [vmem:[%s5217_s0 + $0xf8] sm:$0x80]   ;;  %v2436_v25 = vld [vmem:[%s5217_s0 + $0x11e] sm:$0x1]   ;;  %v170_v28 = vsel %vm29_vm6, %v2435_v14, %v166_v23  ;;  %v94_v38 = vsel %vm25_vm5, %v2418_v21, %v90_v33  ;;  %v2461_v4 = vld [vmem:[%s5217_s0 + $0x3b] sm:$0x2]  }
   0xa   :  { %v2437_v26 = vld [vmem:[%s5217_s0 + $0x13d] sm:$0x2]   ;;  %171 = vrot.lane.b32.xlu1 %v170_v28, %s2954_s19  ;;  %v2420_v37 = vld [vmem:[%s5217_s0 + $0x11f] sm:$0x1]   ;;  %v98_v43 = vsel %vm29_vm6, %v2419_v22, %v94_v38  ;;  %v2462_v5 = vld [vmem:[%s5217_s0 + $0x5a] sm:$0x4]   ;;  %v290_v9 = vsel %vm5_vm0, %v2461_v4, %v2460_v3 }
   0xb   :  { %v2438_v27 = vld [vmem:[%s5217_s0 + $0x15c] sm:$0x4]   ;;  %v181_v30 = vsel %vm5_vm0, %v2437_v26, %v2436_v25  ;;  %v2421_v40 = vld [vmem:[%s5217_s0 + $0x13e] sm:$0x2]   ;;  %99 = vrot.lane.b32.xlu0 %v98_v43, %s2955_s9  ;;  %v2474_v8 = vld [vmem:[%s5217_s0 + $0x1d6] sm:$0x40]   ;;  %v294_v14 = vsel %vm9_vm1, %v2462_v5, %v290_v9 }
   0xc   :  { %v2439_v31 = vld [vmem:[%s5217_s0 + $0x17b] sm:$0x8]   ;;  %v185_v34 = vsel %vm9_vm1, %v2438_v27, %v181_v30  ;;  %v2422_v41 = vld [vmem:[%s5217_s0 + $0x15d] sm:$0x4]   ;;  %v109_v46 = vsel %vm5_vm0, %v2421_v40, %v2420_v37  ;;  %v2463_v10 = vld [vmem:[%s5217_s0 + $0x79] sm:$0x8]   ;;  %v345_v21 = vsel %vm25_vm5, %v2474_v8, %v341_v13 }
   0xd   :  { %v2440_v32 = vld [vmem:[%s5217_s0 + $0x19a] sm:$0x10]   ;;  %v189_v39 = vsel %vm13_vm2, %v2439_v31, %v185_v34  ;;  %v2423_v42 = vld [vmem:[%s5217_s0 + $0x17c] sm:$0x8]   ;;  %v113_v50 = vsel %vm9_vm1, %v2422_v41, %v109_v46  ;;  %v2464_v11 = vld [vmem:[%s5217_s0 + $0x98] sm:$0x10]   ;;  %v298_v17 = vsel %vm13_vm2, %v2463_v10, %v294_v14 }
   0xe   :  { %v2441_v35 = vld [vmem:[%s5217_s0 + $0x1b9] sm:$0x20]   ;;  %v193_v44 = vsel %vm17_vm3, %v2440_v32, %v189_v39  ;;  %v2424_v47 = vld [vmem:[%s5217_s0 + $0x19b] sm:$0x10]   ;;  %v117_v55 = vsel %vm13_vm2, %v2423_v42, %v113_v50  ;;  %v2465_v15 = vld [vmem:[%s5217_s0 + $0xb7] sm:$0x20]   ;;  %v302_v23 = vsel %vm17_vm3, %v2464_v11, %v298_v17 }
   0xf   :  { %v2442_v36 = vld [vmem:[%s5217_s0 + $0x1d8] sm:$0x40]   ;;  %v2425_v48 = vld [vmem:[%s5217_s0 + $0x1ba] sm:$0x20]   ;;  %v197_v49 = vsel %vm21_vm4, %v2441_v35, %v193_v44  ;;  %v121_v61 = vsel %vm17_vm3, %v2424_v47, %v117_v55  ;;  %v2492_v16 = vld [vmem:[%s5217_s0 + $0x1a] sm:$0x1]   ;;  %v306_v27 = vsel %vm21_vm4, %v2465_v15, %v302_v23 }
  0x10   :  { %v2443_v45 = vld [vmem:[%s5217_s0 + $0x1f7] sm:$0x80]   ;;  %v2426_v51 = vld [vmem:[%s5217_s0 + $0x1d9] sm:$0x40]   ;;  %v201_v54 = vsel %vm25_vm5, %v2442_v36, %v197_v49  ;;  %v125_v1 = vsel %vm21_vm4, %v2425_v48, %v121_v61  ;;  %v2493_v18 = vld [vmem:[%s5217_s0 + $0x39] sm:$0x2]  }
  0x11   :  { %v205_v60 = vsel %vm29_vm6, %v2443_v45, %v201_v54  ;;  %v2427_v62 = vld [vmem:[%s5217_s0 + $0x1f8] sm:$0x80]   ;;  %v129_v6 = vsel %vm25_vm5, %v2426_v51, %v125_v1  ;;  %v2494_v19 = vld [vmem:[%s5217_s0 + $0x58] sm:$0x4]   ;;  %v2475_v22 = vld [vmem:[%s5217_s0 + $0x1f5] sm:$0x80]   ;;  %v434_v25 = vsel %vm5_vm0, %v2493_v18, %v2492_v16 }
  0x12   :  { %206 = vrot.lane.b32.xlu1 %v205_v60, %s2954_s19  ;;  %v133_v12 = vsel %vm29_vm6, %v2427_v62, %v129_v6  ;;  %v2495_v20 = vld [vmem:[%s5217_s0 + $0x77] sm:$0x8]   ;;  %v2466_v24 = vld [vmem:[%s5217_s0 + $0xd6] sm:$0x40]   ;;  %v438_v29 = vsel %vm9_vm1, %v2494_v19, %v434_v25  ;;  %v2484_v31 = vld [vmem:[%s5217_s0 + $0x11b] sm:$0x1]   ;;  %v349_v36 = vsel %vm29_vm6, %v2475_v22, %v345_v21 }
  0x13   :  { %v2496_v26 = vld [vmem:[%s5217_s0 + $0x96] sm:$0x10]   ;;  %134 = vrot.lane.b32.xlu0 %v133_v12, %s2955_s9  ;;  %v2467_v28 = vld [vmem:[%s5217_s0 + $0xf5] sm:$0x80]   ;;  %v442_v32 = vsel %vm13_vm2, %v2495_v20, %v438_v29  ;;  %v2485_v33 = vld [vmem:[%s5217_s0 + $0x13a] sm:$0x2]   ;;  %v310_v37 = vsel %vm25_vm5, %v2466_v24, %v306_v27 }
  0x14   :  { %v2497_v30 = vld [vmem:[%s5217_s0 + $0xb5] sm:$0x20]   ;;  %v2486_v34 = vld [vmem:[%s5217_s0 + $0x159] sm:$0x4]   ;;  %v446_v38 = vsel %vm17_vm3, %v2496_v26, %v442_v32  ;;  %v397_v40 = vsel %vm5_vm0, %v2485_v33, %v2484_v31  ;;  %v2444_v45 = vld [vmem:[%s5217_s0 + $0x1d] sm:$0x1]   ;;  %v314_v53 = vsel %vm29_vm6, %v2467_v28, %v310_v37 }
  0x15   :  { %v2487_v35 = vld [vmem:[%s5217_s0 + $0x178] sm:$0x8]   ;;  %v2498_v39 = vld [vmem:[%s5217_s0 + $0xd4] sm:$0x40]   ;;  %v450_v42 = vsel %vm21_vm4, %v2497_v30, %v446_v38  ;;  %v401_v43 = vsel %vm9_vm1, %v2486_v34, %v397_v40  ;;  %v2445_v46 = vld [vmem:[%s5217_s0 + $0x3c] sm:$0x2]  }
  0x16   :  { %v2488_v41 = vld [vmem:[%s5217_s0 + $0x197] sm:$0x10]   ;;  %v2499_v47 = vld [vmem:[%s5217_s0 + $0xf3] sm:$0x80]   ;;  %v405_v48 = vsel %vm13_vm2, %v2487_v35, %v401_v43  ;;  %v218_v49 = vsel %vm5_vm0, %v2445_v46, %v2444_v45  ;;  %v2446_v50 = vld [vmem:[%s5217_s0 + $0x5b] sm:$0x4]   ;;  %v454_v59 = vsel %vm25_vm5, %v2498_v39, %v450_v42 }
  0x17   :  { %v2489_v44 = vld [vmem:[%s5217_s0 + $0x1b6] sm:$0x20]   ;;  %v2447_v51 = vld [vmem:[%s5217_s0 + $0x7a] sm:$0x8]   ;;  %v409_v54 = vsel %vm17_vm3, %v2488_v41, %v405_v48  ;;  %v222_v56 = vsel %vm9_vm1, %v2446_v50, %v218_v49  ;;  %v2516_v62 = vld [vmem:[%s5217_s0 + $0x119] sm:$0x1]   ;;  %v458_v9 = vsel %vm29_vm6, %v2499_v47, %v454_v59 }
  0x18   :  { %v2448_v52 = vld [vmem:[%s5217_s0 + $0x99] sm:$0x10]   ;;  %v2490_v55 = vld [vmem:[%s5217_s0 + $0x1d5] sm:$0x40]   ;;  %v226_v60 = vsel %vm13_vm2, %v2447_v51, %v222_v56  ;;  %v2517_v63 = vld [vmem:[%s5217_s0 + $0x138] sm:$0x2]   ;;  %v413_v0 = vsel %vm21_vm4, %v2489_v44, %v409_v54 }
  0x19   :  { %v2449_v57 = vld [vmem:[%s5217_s0 + $0xb8] sm:$0x20]   ;;  %v230_v1 = vsel %vm17_vm3, %v2448_v52, %v226_v60  ;;  %v541_v2 = vsel %vm5_vm0, %v2517_v63, %v2516_v62  ;;  %v2518_v3 = vld [vmem:[%s5217_s0 + $0x157] sm:$0x4]   ;;  %v417_v15 = vsel %vm25_vm5, %v2490_v55, %v413_v0  ;;  %v2491_v16 = vld [vmem:[%s5217_s0 + $0x1f4] sm:$0x80]  }
  0x1a   :  { %350 = vrot.lane.b32.xlu1 %v349_v36, %s2956_s27  ;;  %v2450_v58 = vld [vmem:[%s5217_s0 + $0xd7] sm:$0x40]   ;;  %v2519_v4 = vld [vmem:[%s5217_s0 + $0x176] sm:$0x8]   ;;  %v234_v6 = vsel %vm21_vm4, %v2449_v57, %v230_v1  ;;  %v545_v7 = vsel %vm9_vm1, %v2518_v3, %v541_v2  ;;  %s2957_s2 = smov 116   ;;  %s2958_s17 = smov 104   ;;  %v421_v32 = vsel %vm29_vm6, %v2491_v16, %v417_v15 }
  0x1b   :  { %v2451_v61 = vld [vmem:[%s5217_s0 + $0xf6] sm:$0x80]   ;;  %v2520_v5 = vld [vmem:[%s5217_s0 + $0x195] sm:$0x10]   ;;  %315 = vrot.lane.b32.xlu0 %v314_v53, %s2956_s27  ;;  %v238_v10 = vsel %vm25_vm5, %v2450_v58, %v234_v6  ;;  %v549_v11 = vsel %vm13_vm2, %v2519_v4, %v545_v7  ;;  %v2540_v41 = vld [vmem:[%s5217_s0 + $0x17] sm:$0x1]  }
  0x1c   :  { %v2521_v8 = vld [vmem:[%s5217_s0 + $0x1b4] sm:$0x20]   ;;  %v242_v17 = vsel %vm29_vm6, %v2451_v61, %v238_v10  ;;  %v553_v18 = vsel %vm17_vm3, %v2520_v5, %v549_v11  ;;  %v2452_v26 = vld [vmem:[%s5217_s0 + $0x11d] sm:$0x1]   ;;  %v2541_v42 = vld [vmem:[%s5217_s0 + $0x36] sm:$0x2]  }
  0x1d   :  { %v2508_v12 = vld [vmem:[%s5217_s0 + $0x19] sm:$0x1]   ;;  %243 = vrot.lane.b32.xlu2 %v242_v17, %s2957_s2  ;;  %v557_v22 = vsel %vm21_vm4, %v2521_v8, %v553_v18  ;;  %v2453_v29 = vld [vmem:[%s5217_s0 + $0x13c] sm:$0x2]   ;;  %v650_v45 = vsel %vm5_vm0, %v2541_v42, %v2540_v41  ;;  %v2542_v46 = vld [vmem:[%s5217_s0 + $0x55] sm:$0x4]  }
  0x1e   :  { %v2509_v13 = vld [vmem:[%s5217_s0 + $0x38] sm:$0x2]   ;;  %v2454_v30 = vld [vmem:[%s5217_s0 + $0x15b] sm:$0x4]   ;;  %v253_v35 = vsel %vm5_vm0, %v2453_v29, %v2452_v26  ;;  %v2543_v47 = vld [vmem:[%s5217_s0 + $0x74] sm:$0x8]   ;;  %v654_v52 = vsel %vm9_vm1, %v2542_v46, %v650_v45 }
  0x1f   :  { %v2510_v14 = vld [vmem:[%s5217_s0 + $0x57] sm:$0x4]   ;;  %v506_v19 = vsel %vm5_vm0, %v2509_v13, %v2508_v12  ;;  %v2455_v31 = vld [vmem:[%s5217_s0 + $0x17a] sm:$0x8]   ;;  %v257_v39 = vsel %vm9_vm1, %v2454_v30, %v253_v35  ;;  %v2544_v48 = vld [vmem:[%s5217_s0 + $0x93] sm:$0x10]   ;;  %v658_v55 = vsel %vm13_vm2, %v2543_v47, %v654_v52 }
  0x20   :  { %v2511_v20 = vld [vmem:[%s5217_s0 + $0x76] sm:$0x8]   ;;  %v510_v24 = vsel %vm9_vm1, %v2510_v14, %v506_v19  ;;  %v2456_v36 = vld [vmem:[%s5217_s0 + $0x199] sm:$0x10]   ;;  %v261_v44 = vsel %vm13_vm2, %v2455_v31, %v257_v39  ;;  %s2959_s8 = smov 108   ;;  %v662_v61 = vsel %vm17_vm3, %v2544_v48, %v658_v55  ;;  %s2960_s7 = smov 100  }
  0x21   :  { %v2512_v21 = vld [vmem:[%s5217_s0 + $0x95] sm:$0x10]   ;;  %v514_v28 = vsel %vm13_vm2, %v2511_v20, %v510_v24  ;;  %v2457_v37 = vld [vmem:[%s5217_s0 + $0x1b8] sm:$0x20]   ;;  %v265_v50 = vsel %vm17_vm3, %v2456_v36, %v261_v44  ;;  %v2545_v56 = vld [vmem:[%s5217_s0 + $0xb2] sm:$0x20]  }
  0x22   :  { %v2522_v23 = vld [vmem:[%s5217_s0 + $0x1d3] sm:$0x40]   ;;  %459 = vrot.lane.b32.xlu1 %v458_v9, %s2958_s17  ;;  %v518_v33 = vsel %vm17_vm3, %v2512_v21, %v514_v28  ;;  %v2458_v40 = vld [vmem:[%s5217_s0 + $0x1d7] sm:$0x40]   ;;  %v269_v54 = vsel %vm21_vm4, %v2457_v37, %v265_v50  ;;  %v2532_v57 = vld [vmem:[%s5217_s0 + $0x118] sm:$0x1]   ;;  %v666_v6 = vsel %vm21_vm4, %v2545_v56, %v662_v61 }
  0x23   :  { %v2513_v25 = vld [vmem:[%s5217_s0 + $0xb4] sm:$0x20]   ;;  %v561_v38 = vsel %vm25_vm5, %v2522_v23, %v557_v22  ;;  %422 = vrot.lane.b32.xlu0 %v421_v32, %s2959_s8  ;;  %v2459_v51 = vld [vmem:[%s5217_s0 + $0x1f6] sm:$0x80]   ;;  %v2533_v58 = vld [vmem:[%s5217_s0 + $0x137] sm:$0x2]   ;;  %v273_v60 = vsel %vm25_vm5, %v2458_v40, %v269_v54 }
  0x24   :  { %v2523_v27 = vld [vmem:[%s5217_s0 + $0x1f2] sm:$0x80]   ;;  %v522_v43 = vsel %vm21_vm4, %v2513_v25, %v518_v33  ;;  %v613_v62 = vsel %vm5_vm0, %v2533_v58, %v2532_v57  ;;  %v2534_v63 = vld [vmem:[%s5217_s0 + $0x156] sm:$0x4]   ;;  %v277_v2 = vsel %vm29_vm6, %v2459_v51, %v273_v60  ;;  %v2546_v3 = vld [vmem:[%s5217_s0 + $0xd1] sm:$0x40]  }
  0x25   :  { %v2514_v34 = vld [vmem:[%s5217_s0 + $0xd3] sm:$0x40]   ;;  %v565_v53 = vsel %vm29_vm6, %v2523_v27, %v561_v38  ;;  %v2535_v0 = vld [vmem:[%s5217_s0 + $0x175] sm:$0x8]   ;;  %v617_v4 = vsel %vm9_vm1, %v2534_v63, %v613_v62  ;;  %278 = vrot.lane.b32.xlu2 %v277_v2, %s2957_s2  ;;  %v2476_v8 = vld [vmem:[%s5217_s0 + $0x1b] sm:$0x1]   ;;  %v670_v21 = vsel %vm25_vm5, %v2546_v3, %v666_v6 }
  0x26   :  { %v2515_v49 = vld [vmem:[%s5217_s0 + $0xf2] sm:$0x80]   ;;  %v526_v59 = vsel %vm25_vm5, %v2514_v34, %v522_v43  ;;  %v2536_v1 = vld [vmem:[%s5217_s0 + $0x194] sm:$0x10]   ;;  %v621_v7 = vsel %vm13_vm2, %v2535_v0, %v617_v4  ;;  %v2477_v9 = vld [vmem:[%s5217_s0 + $0x3a] sm:$0x2]  }
  0x27   :  { %v2537_v5 = vld [vmem:[%s5217_s0 + $0x1b3] sm:$0x20]   ;;  %v2478_v10 = vld [vmem:[%s5217_s0 + $0x59] sm:$0x4]   ;;  %v530_v11 = vsel %vm29_vm6, %v2515_v49, %v526_v59  ;;  %v2547_v12 = vld [vmem:[%s5217_s0 + $0xf0] sm:$0x80]   ;;  %v625_v13 = vsel %vm17_vm3, %v2536_v1, %v621_v7  ;;  %v362_v14 = vsel %vm5_vm0, %v2477_v9, %v2476_v8 }
  0x28   :  { %v2479_v15 = vld [vmem:[%s5217_s0 + $0x78] sm:$0x8]   ;;  %v2538_v17 = vld [vmem:[%s5217_s0 + $0x1d2] sm:$0x40]   ;;  %v366_v18 = vsel %vm9_vm1, %v2478_v10, %v362_v14  ;;  %v629_v22 = vsel %vm21_vm4, %v2537_v5, %v625_v13  ;;  %v2564_v24 = vld [vmem:[%s5217_s0 + $0x116] sm:$0x1]   ;;  %v674_v37 = vsel %vm29_vm6, %v2547_v12, %v670_v21 }
  0x29   :  { %v2480_v16 = vld [vmem:[%s5217_s0 + $0x97] sm:$0x10]   ;;  %v370_v23 = vsel %vm13_vm2, %v2479_v15, %v366_v18  ;;  %v2565_v25 = vld [vmem:[%s5217_s0 + $0x135] sm:$0x2]   ;;  %v2539_v32 = vld [vmem:[%s5217_s0 + $0x1f1] sm:$0x80]   ;;  %v633_v38 = vsel %vm25_vm5, %v2538_v17, %v629_v22 }
  0x2a   :  { %566 = vrot.lane.b32.xlu1 %v565_v53, %s2960_s7  ;;  %v2481_v19 = vld [vmem:[%s5217_s0 + $0xb6] sm:$0x20]   ;;  %v2566_v26 = vld [vmem:[%s5217_s0 + $0x154] sm:$0x4]   ;;  %v374_v27 = vsel %vm17_vm3, %v2480_v16, %v370_v23  ;;  %v757_v29 = vsel %vm5_vm0, %v2565_v25, %v2564_v24  ;;  %v2500_v52 = vld [vmem:[%s5217_s0 + $0x11a] sm:$0x1]   ;;  %v637_v54 = vsel %vm29_vm6, %v2539_v32, %v633_v38 }
  0x2b   :  { %v2482_v20 = vld [vmem:[%s5217_s0 + $0xd5] sm:$0x40]   ;;  %531 = vrot.lane.b32.xlu0 %v530_v11, %s2960_s7  ;;  %v2567_v30 = vld [vmem:[%s5217_s0 + $0x173] sm:$0x8]   ;;  %v378_v33 = vsel %vm21_vm4, %v2481_v19, %v374_v27  ;;  %v761_v34 = vsel %vm9_vm1, %v2566_v26, %v757_v29  ;;  %v2501_v53 = vld [vmem:[%s5217_s0 + $0x139] sm:$0x2]  }
  0x2c   :  { %v2483_v28 = vld [vmem:[%s5217_s0 + $0xf4] sm:$0x80]   ;;  %v2568_v31 = vld [vmem:[%s5217_s0 + $0x192] sm:$0x10]   ;;  %v382_v39 = vsel %vm25_vm5, %v2482_v20, %v378_v33  ;;  %v765_v40 = vsel %vm13_vm2, %v2567_v30, %v761_v34  ;;  %s2961_s28 = smov 92   ;;  %v469_v57 = vsel %vm5_vm0, %v2501_v53, %v2500_v52  ;;  %s2962_s23 = smov 96  }
  0x2d   :  { %v2569_v35 = vld [vmem:[%s5217_s0 + $0x1b1] sm:$0x20]   ;;  %v386_v44 = vsel %vm29_vm6, %v2483_v28, %v382_v39  ;;  %v769_v45 = vsel %vm17_vm3, %v2568_v31, %v765_v40  ;;  %v2502_v58 = vld [vmem:[%s5217_s0 + $0x158] sm:$0x4]   ;;  %v2588_v5 = vld [vmem:[%s5217_s0 + $0x14] sm:$0x1]  }
  0x2e   :  { %v2556_v36 = vld [vmem:[%s5217_s0 + $0x16] sm:$0x1]   ;;  %387 = vrot.lane.b32.xlu2 %v386_v44, %s2959_s8  ;;  %v773_v49 = vsel %vm21_vm4, %v2569_v35, %v769_v45  ;;  %v2503_v59 = vld [vmem:[%s5217_s0 + $0x177] sm:$0x8]   ;;  %v473_v63 = vsel %vm9_vm1, %v2502_v58, %v469_v57  ;;  %v2589_v6 = vld [vmem:[%s5217_s0 + $0x33] sm:$0x2]  }
  0x2f   :  { %v2557_v41 = vld [vmem:[%s5217_s0 + $0x35] sm:$0x2]   ;;  %v2504_v60 = vld [vmem:[%s5217_s0 + $0x196] sm:$0x10]   ;;  %v477_v4 = vsel %vm13_vm2, %v2503_v59, %v473_v63  ;;  %v2590_v7 = vld [vmem:[%s5217_s0 + $0x52] sm:$0x4]   ;;  %v866_v10 = vsel %vm5_vm0, %v2589_v6, %v2588_v5 }
  0x30   :  { %v2558_v42 = vld [vmem:[%s5217_s0 + $0x54] sm:$0x4]   ;;  %v722_v47 = vsel %vm5_vm0, %v2557_v41, %v2556_v36  ;;  %v2505_v0 = vld [vmem:[%s5217_s0 + $0x1b5] sm:$0x20]   ;;  %v481_v8 = vsel %vm17_vm3, %v2504_v60, %v477_v4  ;;  %v2591_v11 = vld [vmem:[%s5217_s0 + $0x71] sm:$0x8]   ;;  %v870_v15 = vsel %vm9_vm1, %v2590_v7, %v866_v10 }
  0x31   :  { %v2559_v43 = vld [vmem:[%s5217_s0 + $0x73] sm:$0x8]   ;;  %v726_v50 = vsel %vm9_vm1, %v2558_v42, %v722_v47  ;;  %v2506_v1 = vld [vmem:[%s5217_s0 + $0x1d4] sm:$0x40]   ;;  %v2592_v12 = vld [vmem:[%s5217_s0 + $0x90] sm:$0x10]   ;;  %v485_v14 = vsel %vm21_vm4, %v2505_v0, %v481_v8  ;;  %v874_v20 = vsel %vm13_vm2, %v2591_v11, %v870_v15 }
  0x32   :  { %v2570_v46 = vld [vmem:[%s5217_s0 + $0x1d0] sm:$0x40]   ;;  %675 = vrot.lane.b32.xlu1 %v674_v37, %s2961_s28  ;;  %v730_v56 = vsel %vm13_vm2, %v2559_v43, %v726_v50  ;;  %v2507_v9 = vld [vmem:[%s5217_s0 + $0x1f3] sm:$0x80]   ;;  %v2593_v16 = vld [vmem:[%s5217_s0 + $0xaf] sm:$0x20]   ;;  %v489_v19 = vsel %vm25_vm5, %v2506_v1, %v485_v14  ;;  %v878_v25 = vsel %vm17_vm3, %v2592_v12, %v874_v20 }
  0x33   :  { %v2560_v48 = vld [vmem:[%s5217_s0 + $0x92] sm:$0x10]   ;;  %v777_v2 = vsel %vm25_vm5, %v2570_v46, %v773_v49  ;;  %638 = vrot.lane.b32.xlu0 %v637_v54, %s2962_s23  ;;  %v2580_v21 = vld [vmem:[%s5217_s0 + $0x115] sm:$0x1]   ;;  %v493_v24 = vsel %vm29_vm6, %v2507_v9, %v489_v19  ;;  %v882_v29 = vsel %vm21_vm4, %v2593_v16, %v878_v25  ;;  %v2594_v30 = vld [vmem:[%s5217_s0 + $0xce] sm:$0x40]  }
  0x34   :  { %v2561_v51 = vld [vmem:[%s5217_s0 + $0xb1] sm:$0x20]   ;;  %v734_v61 = vsel %vm17_vm3, %v2560_v48, %v730_v56  ;;  %v2581_v22 = vld [vmem:[%s5217_s0 + $0x134] sm:$0x2]   ;;  %v2524_v33 = vld [vmem:[%s5217_s0 + $0x18] sm:$0x1]   ;;  %v886_v45 = vsel %vm25_vm5, %v2594_v30, %v882_v29 }
  0x35   :  { %v2571_v55 = vld [vmem:[%s5217_s0 + $0x1ef] sm:$0x80]   ;;  %v738_v3 = vsel %vm21_vm4, %v2561_v51, %v734_v61  ;;  %v2582_v23 = vld [vmem:[%s5217_s0 + $0x153] sm:$0x4]   ;;  %v829_v26 = vsel %vm5_vm0, %v2581_v22, %v2580_v21  ;;  %s2963_s22 = smov 88   ;;  %s2964_s15 = smov 80  }
  0x36   :  { %v2562_v62 = vld [vmem:[%s5217_s0 + $0xd0] sm:$0x40]   ;;  %v781_v17 = vsel %vm29_vm6, %v2571_v55, %v777_v2  ;;  %v2583_v27 = vld [vmem:[%s5217_s0 + $0x172] sm:$0x8]   ;;  %494 = vrot.lane.b32.xlu2 %v493_v24, %s2958_s17  ;;  %v833_v31 = vsel %vm9_vm1, %v2582_v23, %v829_v26  ;;  %v2595_v35 = vld [vmem:[%s5217_s0 + $0xed] sm:$0x80]  }
  0x37   :  { %v2563_v13 = vld [vmem:[%s5217_s0 + $0xef] sm:$0x80]   ;;  %v742_v18 = vsel %vm25_vm5, %v2562_v62, %v738_v3  ;;  %v2584_v28 = vld [vmem:[%s5217_s0 + $0x191] sm:$0x10]   ;;  %v837_v36 = vsel %vm13_vm2, %v2583_v27, %v833_v31  ;;  %v2525_v37 = vld [vmem:[%s5217_s0 + $0x37] sm:$0x2]   ;;  %v890_v61 = vsel %vm29_vm6, %v2595_v35, %v886_v45 }
  0x38   :  { %v2585_v32 = vld [vmem:[%s5217_s0 + $0x1b0] sm:$0x20]   ;;  %v746_v34 = vsel %vm29_vm6, %v2563_v13, %v742_v18  ;;  %v2526_v38 = vld [vmem:[%s5217_s0 + $0x56] sm:$0x4]   ;;  %v841_v40 = vsel %vm17_vm3, %v2584_v28, %v837_v36  ;;  %v578_v42 = vsel %vm5_vm0, %v2525_v37, %v2524_v33  ;;  %v2612_v49 = vld [vmem:[%s5217_s0 + $0x113] sm:$0x1]  }
  0x39   :  { %v2527_v39 = vld [vmem:[%s5217_s0 + $0x75] sm:$0x8]   ;;  %v2586_v41 = vld [vmem:[%s5217_s0 + $0x1cf] sm:$0x40]   ;;  %v845_v46 = vsel %vm21_vm4, %v2585_v32, %v841_v40  ;;  %v582_v47 = vsel %vm9_vm1, %v2526_v38, %v578_v42  ;;  %v2613_v50 = vld [vmem:[%s5217_s0 + $0x132] sm:$0x2]  }
  0x3a   :  { %782 = vrot.lane.b32.xlu1 %v781_v17, %s2963_s22  ;;  %v2528_v43 = vld [vmem:[%s5217_s0 + $0x94] sm:$0x10]   ;;  %v586_v51 = vsel %vm13_vm2, %v2527_v39, %v582_v47  ;;  %v973_v52 = vsel %vm5_vm0, %v2613_v50, %v2612_v49  ;;  %v2614_v53 = vld [vmem:[%s5217_s0 + $0x151] sm:$0x4]   ;;  %v2587_v56 = vld [vmem:[%s5217_s0 + $0x1ee] sm:$0x80]   ;;  %v849_v62 = vsel %vm25_vm5, %v2586_v41, %v845_v46 }
  0x3b   :  { %v2529_v44 = vld [vmem:[%s5217_s0 + $0xb3] sm:$0x20]   ;;  %747 = vrot.lane.b32.xlu0 %v746_v34, %s2963_s22  ;;  %v2615_v54 = vld [vmem:[%s5217_s0 + $0x170] sm:$0x8]   ;;  %v590_v57 = vsel %vm17_vm3, %v2528_v43, %v586_v51  ;;  %v977_v59 = vsel %vm9_vm1, %v2614_v53, %v973_v52  ;;  %v2548_v14 = vld [vmem:[%s5217_s0 + $0x117] sm:$0x1]   ;;  %v853_v15 = vsel %vm29_vm6, %v2587_v56, %v849_v62 }
  0x3c   :  { %v2530_v48 = vld [vmem:[%s5217_s0 + $0xd2] sm:$0x40]   ;;  %v2616_v55 = vld [vmem:[%s5217_s0 + $0x18f] sm:$0x10]   ;;  %v594_v63 = vsel %vm21_vm4, %v2529_v44, %v590_v57  ;;  %v981_v0 = vsel %vm13_vm2, %v2615_v54, %v977_v59  ;;  %v2549_v18 = vld [vmem:[%s5217_s0 + $0x136] sm:$0x2]  }
  0x3d   :  { %v2531_v58 = vld [vmem:[%s5217_s0 + $0xf1] sm:$0x80]   ;;  %v2617_v60 = vld [vmem:[%s5217_s0 + $0x1ae] sm:$0x20]   ;;  %v598_v4 = vsel %vm25_vm5, %v2530_v48, %v594_v63  ;;  %v985_v5 = vsel %vm17_vm3, %v2616_v55, %v981_v0  ;;  %v2550_v19 = vld [vmem:[%s5217_s0 + $0x155] sm:$0x4]   ;;  %v685_v22 = vsel %vm5_vm0, %v2549_v18, %v2548_v14 }
  0x3e   :  { %v2604_v1 = vld [vmem:[%s5217_s0 + $0x13] sm:$0x1]   ;;  %v602_v9 = vsel %vm29_vm6, %v2531_v58, %v598_v4  ;;  %v989_v10 = vsel %vm21_vm4, %v2617_v60, %v985_v5  ;;  %v2551_v23 = vld [vmem:[%s5217_s0 + $0x174] sm:$0x8]   ;;  %v689_v27 = vsel %vm9_vm1, %v2550_v19, %v685_v22  ;;  %v2636_v30 = vld [vmem:[%s5217_s0 + $0x11] sm:$0x1]  }
  0x3f   :  { %v2605_v2 = vld [vmem:[%s5217_s0 + $0x32] sm:$0x2]   ;;  %603 = vrot.lane.b32.xlu2 %v602_v9, %s2962_s23  ;;  %v2552_v24 = vld [vmem:[%s5217_s0 + $0x193] sm:$0x10]   ;;  %s2965_s6 = smov 84   ;;  %v693_v31 = vsel %vm13_vm2, %v2551_v23, %v689_v27  ;;  %s2966_s19 = smov 76  }
  0x40   :  { %v2606_v3 = vld [vmem:[%s5217_s0 + $0x51] sm:$0x4]   ;;  %v938_v6 = vsel %vm5_vm0, %v2605_v2, %v2604_v1  ;;  %v2553_v28 = vld [vmem:[%s5217_s0 + $0x1b2] sm:$0x20]   ;;  %v2637_v32 = vld [vmem:[%s5217_s0 + $0x30] sm:$0x2]   ;;  %v697_v36 = vsel %vm17_vm3, %v2552_v24, %v693_v31 }
  0x41   :  { %v2607_v7 = vld [vmem:[%s5217_s0 + $0x70] sm:$0x8]   ;;  %v942_v12 = vsel %vm9_vm1, %v2606_v3, %v938_v6  ;;  %v2554_v29 = vld [vmem:[%s5217_s0 + $0x1d1] sm:$0x40]   ;;  %v2638_v33 = vld [vmem:[%s5217_s0 + $0x4f] sm:$0x4]   ;;  %v1082_v38 = vsel %vm5_vm0, %v2637_v32, %v2636_v30  ;;  %v701_v42 = vsel %vm21_vm4, %v2553_v28, %v697_v36 }
  0x42   :  { %v2608_v8 = vld [vmem:[%s5217_s0 + $0x8f] sm:$0x10]   ;;  %891 = vrot.lane.b32.xlu1 %v890_v61, %s2964_s15  ;;  %v946_v17 = vsel %vm13_vm2, %v2607_v7, %v942_v12  ;;  %v2639_v34 = vld [vmem:[%s5217_s0 + $0x6e] sm:$0x8]   ;;  %v2555_v37 = vld [vmem:[%s5217_s0 + $0x1f0] sm:$0x80]   ;;  %v1086_v43 = vsel %vm9_vm1, %v2638_v33, %v1082_v38  ;;  %v705_v47 = vsel %vm25_vm5, %v2554_v29, %v701_v42 }
  0x43   :  { %v2618_v11 = vld [vmem:[%s5217_s0 + $0x1cd] sm:$0x40]   ;;  %v950_v20 = vsel %vm17_vm3, %v2608_v8, %v946_v17  ;;  %854 = vrot.lane.b32.xlu0 %v853_v15, %s2965_s6  ;;  %v2640_v39 = vld [vmem:[%s5217_s0 + $0x8d] sm:$0x10]   ;;  %v2628_v45 = vld [vmem:[%s5217_s0 + $0x112] sm:$0x1]   ;;  %v1090_v48 = vsel %vm13_vm2, %v2639_v34, %v1086_v43  ;;  %v709_v53 = vsel %vm29_vm6, %v2555_v37, %v705_v47 }
  0x44   :  { %v2609_v13 = vld [vmem:[%s5217_s0 + $0xae] sm:$0x20]   ;;  %v993_v25 = vsel %vm25_vm5, %v2618_v11, %v989_v10  ;;  %v2641_v44 = vld [vmem:[%s5217_s0 + $0xac] sm:$0x20]   ;;  %v2629_v46 = vld [vmem:[%s5217_s0 + $0x131] sm:$0x2]   ;;  %v1094_v54 = vsel %vm17_vm3, %v2640_v39, %v1090_v48 }
  0x45   :  { %v2619_v16 = vld [vmem:[%s5217_s0 + $0x1ec] sm:$0x80]   ;;  %v954_v26 = vsel %vm21_vm4, %v2609_v13, %v950_v20  ;;  %v1045_v49 = vsel %vm5_vm0, %v2629_v46, %v2628_v45  ;;  %v2630_v50 = vld [vmem:[%s5217_s0 + $0x150] sm:$0x4]   ;;  %v2642_v55 = vld [vmem:[%s5217_s0 + $0xcb] sm:$0x40]   ;;  %v1098_v59 = vsel %vm21_vm4, %v2641_v44, %v1094_v54 }
  0x46   :  { %v2610_v21 = vld [vmem:[%s5217_s0 + $0xcd] sm:$0x40]   ;;  %v997_v40 = vsel %vm29_vm6, %v2619_v16, %v993_v25  ;;  %v2631_v51 = vld [vmem:[%s5217_s0 + $0x16f] sm:$0x8]   ;;  %v1049_v56 = vsel %vm9_vm1, %v2630_v50, %v1045_v49  ;;  %v2643_v60 = vld [vmem:[%s5217_s0 + $0xea] sm:$0x80]   ;;  %v1102_v5 = vsel %vm25_vm5, %v2642_v55, %v1098_v59 }
  0x47   :  { %v2611_v35 = vld [vmem:[%s5217_s0 + $0xec] sm:$0x80]   ;;  %v958_v41 = vsel %vm25_vm5, %v2610_v21, %v954_v26  ;;  %v2632_v52 = vld [vmem:[%s5217_s0 + $0x18e] sm:$0x10]   ;;  %710 = vrot.lane.b32.xlu2 %v709_v53, %s2961_s28  ;;  %v1053_v61 = vsel %vm13_vm2, %v2631_v51, %v1049_v56  ;;  %v2572_v62 = vld [vmem:[%s5217_s0 + $0x15] sm:$0x1]   ;;  %v1106_v20 = vsel %vm29_vm6, %v2643_v60, %v1102_v5 }
  0x48   :  { %v2633_v57 = vld [vmem:[%s5217_s0 + $0x1ad] sm:$0x20]   ;;  %v962_v58 = vsel %vm29_vm6, %v2611_v35, %v958_v41  ;;  %v2573_v63 = vld [vmem:[%s5217_s0 + $0x34] sm:$0x2]   ;;  %v1057_v0 = vsel %vm17_vm3, %v2632_v52, %v1053_v61  ;;  %v2660_v12 = vld [vmem:[%s5217_s0 + $0x110] sm:$0x1]  }
  0x49   :  { %v794_v1 = vsel %vm5_vm0, %v2573_v63, %v2572_v62  ;;  %v2574_v2 = vld [vmem:[%s5217_s0 + $0x53] sm:$0x4]   ;;  %v1061_v6 = vsel %vm21_vm4, %v2633_v57, %v1057_v0  ;;  %v2634_v7 = vld [vmem:[%s5217_s0 + $0x1cc] sm:$0x40]   ;;  %v2661_v13 = vld [vmem:[%s5217_s0 + $0x12f] sm:$0x2]  }
  0x4a   :  { %998 = vrot.lane.b32.xlu1 %v997_v40, %s2966_s19  ;;  %v2575_v3 = vld [vmem:[%s5217_s0 + $0x72] sm:$0x8]   ;;  %v798_v8 = vsel %vm9_vm1, %v2574_v2, %v794_v1  ;;  %v2662_v14 = vld [vmem:[%s5217_s0 + $0x14e] sm:$0x4]   ;;  %v1189_v17 = vsel %vm5_vm0, %v2661_v13, %v2660_v12  ;;  %v1065_v21 = vsel %vm25_vm5, %v2634_v7, %v1061_v6  ;;  %v2635_v22 = vld [vmem:[%s5217_s0 + $0x1eb] sm:$0x80]  }
  0x4b   :  { %v2576_v4 = vld [vmem:[%s5217_s0 + $0x91] sm:$0x10]   ;;  %963 = vrot.lane.b32.xlu0 %v962_v58, %s2966_s19  ;;  %v802_v11 = vsel %vm13_vm2, %v2575_v3, %v798_v8  ;;  %v2663_v18 = vld [vmem:[%s5217_s0 + $0x16d] sm:$0x8]   ;;  %v1193_v24 = vsel %vm9_vm1, %v2662_v14, %v1189_v17  ;;  %s2967_s2 = smov 68   ;;  %v1069_v37 = vsel %vm29_vm6, %v2635_v22, %v1065_v21  ;;  %s2968_s21 = smov 72  }
  0x4c   :  { %v2577_v9 = vld [vmem:[%s5217_s0 + $0xb0] sm:$0x20]   ;;  %v806_v15 = vsel %vm17_vm3, %v2576_v4, %v802_v11  ;;  %v2664_v19 = vld [vmem:[%s5217_s0 + $0x18c] sm:$0x10]   ;;  %v1197_v28 = vsel %vm13_vm2, %v2663_v18, %v1193_v24  ;;  %v2596_v42 = vld [vmem:[%s5217_s0 + $0x114] sm:$0x1]  }
  0x4d   :  { %v2578_v10 = vld [vmem:[%s5217_s0 + $0xcf] sm:$0x40]   ;;  %v810_v23 = vsel %vm21_vm4, %v2577_v9, %v806_v15  ;;  %v2665_v25 = vld [vmem:[%s5217_s0 + $0x1ab] sm:$0x20]   ;;  %v1201_v33 = vsel %vm17_vm3, %v2664_v19, %v1197_v28  ;;  %v2597_v44 = vld [vmem:[%s5217_s0 + $0x133] sm:$0x2]  }
  0x4e   :  { %v2579_v16 = vld [vmem:[%s5217_s0 + $0xee] sm:$0x80]   ;;  %v2652_v26 = vld [vmem:[%s5217_s0 + $0x10] sm:$0x1]   ;;  %v814_v27 = vsel %vm25_vm5, %v2578_v10, %v810_v23  ;;  %v1205_v38 = vsel %vm21_vm4, %v2665_v25, %v1201_v33  ;;  %v2598_v45 = vld [vmem:[%s5217_s0 + $0x152] sm:$0x4]   ;;  %v901_v50 = vsel %vm5_vm0, %v2597_v44, %v2596_v42 }
  0x4f   :  { %v2653_v29 = vld [vmem:[%s5217_s0 + $0x2f] sm:$0x2]   ;;  %v818_v32 = vsel %vm29_vm6, %v2579_v16, %v814_v27  ;;  %v2599_v46 = vld [vmem:[%s5217_s0 + $0x171] sm:$0x8]   ;;  %v905_v55 = vsel %vm9_vm1, %v2598_v45, %v901_v50  ;;  %v2684_v57 = vld [vmem:[%s5217_s0 + $0xe] sm:$0x1]  }
  0x50   :  { %v2654_v30 = vld [vmem:[%s5217_s0 + $0x4e] sm:$0x4]   ;;  %v1154_v35 = vsel %vm5_vm0, %v2653_v29, %v2652_v26  ;;  %819 = vrot.lane.b32.xlu2 %v818_v32, %s2965_s6  ;;  %v2600_v51 = vld [vmem:[%s5217_s0 + $0x190] sm:$0x10]   ;;  %v2685_v58 = vld [vmem:[%s5217_s0 + $0x2d] sm:$0x2]   ;;  %v909_v59 = vsel %vm13_vm2, %v2599_v46, %v905_v55 }
  0x51   :  { %v2655_v31 = vld [vmem:[%s5217_s0 + $0x6d] sm:$0x8]   ;;  %v1158_v40 = vsel %vm9_vm1, %v2654_v30, %v1154_v35  ;;  %v2601_v52 = vld [vmem:[%s5217_s0 + $0x1af] sm:$0x20]   ;;  %v1298_v60 = vsel %vm5_vm0, %v2685_v58, %v2684_v57  ;;  %v2686_v61 = vld [vmem:[%s5217_s0 + $0x4c] sm:$0x4]   ;;  %v913_v2 = vsel %vm17_vm3, %v2600_v51, %v909_v59 }
  0x52   :  { %v2666_v34 = vld [vmem:[%s5217_s0 + $0x1ca] sm:$0x40]   ;;  %1107 = vrot.lane.b32.xlu1 %v1106_v20, %s2967_s2  ;;  %v1162_v43 = vsel %vm13_vm2, %v2655_v31, %v1158_v40  ;;  %v2602_v56 = vld [vmem:[%s5217_s0 + $0x1ce] sm:$0x40]   ;;  %v2687_v62 = vld [vmem:[%s5217_s0 + $0x6b] sm:$0x8]   ;;  %v1302_v4 = vsel %vm9_vm1, %v2686_v61, %v1298_v60  ;;  %v917_v6 = vsel %vm21_vm4, %v2601_v52, %v913_v2 }
  0x53   :  { %v2656_v36 = vld [vmem:[%s5217_s0 + $0x8c] sm:$0x10]   ;;  %v1209_v47 = vsel %vm25_vm5, %v2666_v34, %v1205_v38  ;;  %1070 = vrot.lane.b32.xlu0 %v1069_v37, %s2968_s21  ;;  %v2688_v63 = vld [vmem:[%s5217_s0 + $0x8a] sm:$0x10]   ;;  %v2603_v3 = vld [vmem:[%s5217_s0 + $0x1ed] sm:$0x80]   ;;  %v1306_v7 = vsel %vm13_vm2, %v2687_v62, %v1302_v4  ;;  %v921_v11 = vsel %vm25_vm5, %v2602_v56, %v917_v6 }
  0x54   :  { %v2667_v39 = vld [vmem:[%s5217_s0 + $0x1e9] sm:$0x80]   ;;  %v1166_v48 = vsel %vm17_vm3, %v2656_v36, %v1162_v43  ;;  %v2689_v5 = vld [vmem:[%s5217_s0 + $0xa9] sm:$0x20]   ;;  %v2676_v8 = vld [vmem:[%s5217_s0 + $0x10f] sm:$0x1]   ;;  %v1310_v12 = vsel %vm17_vm3, %v2688_v63, %v1306_v7  ;;  %v925_v18 = vsel %vm29_vm6, %v2603_v3, %v921_v11 }
  0x55   :  { %v2657_v41 = vld [vmem:[%s5217_s0 + $0xab] sm:$0x20]   ;;  %v1213_v0 = vsel %vm29_vm6, %v2667_v39, %v1209_v47  ;;  %v2677_v9 = vld [vmem:[%s5217_s0 + $0x12e] sm:$0x2]   ;;  %v2690_v13 = vld [vmem:[%s5217_s0 + $0xc8] sm:$0x40]   ;;  %v1314_v19 = vsel %vm21_vm4, %v2689_v5, %v1310_v12 }
  0x56   :  { %v2658_v49 = vld [vmem:[%s5217_s0 + $0xca] sm:$0x40]   ;;  %v1170_v53 = vsel %vm21_vm4, %v2657_v41, %v1166_v48  ;;  %v2678_v10 = vld [vmem:[%s5217_s0 + $0x14d] sm:$0x4]   ;;  %v1261_v14 = vsel %vm5_vm0, %v2677_v9, %v2676_v8  ;;  %s2969_s26 = smov 64   ;;  %v1318_v28 = vsel %vm25_vm5, %v2690_v13, %v1314_v19  ;;  %s2970_s20 = smov 56  }
  0x57   :  { %v2659_v54 = vld [vmem:[%s5217_s0 + $0xe9] sm:$0x80]   ;;  %v1174_v1 = vsel %vm25_vm5, %v2658_v49, %v1170_v53  ;;  %v2679_v15 = vld [vmem:[%s5217_s0 + $0x16c] sm:$0x8]   ;;  %v2691_v20 = vld [vmem:[%s5217_s0 + $0xe7] sm:$0x80]   ;;  %v1265_v21 = vsel %vm9_vm1, %v2678_v10, %v1261_v14 }
  0x58   :  { %v2680_v16 = vld [vmem:[%s5217_s0 + $0x18b] sm:$0x10]   ;;  %v1178_v17 = vsel %vm29_vm6, %v2659_v54, %v1174_v1  ;;  %v2620_v23 = vld [vmem:[%s5217_s0 + $0x12] sm:$0x1]   ;;  %926 = vrot.lane.b32.xlu2 %v925_v18, %s2964_s15  ;;  %v1269_v24 = vsel %vm13_vm2, %v2679_v15, %v1265_v21  ;;  %v2708_v37 = vld [vmem:[%s5217_s0 + $0x10d] sm:$0x1]   ;;  %v1322_v44 = vsel %vm29_vm6, %v2691_v20, %v1318_v28 }
  0x59   :  { %v2681_v22 = vld [vmem:[%s5217_s0 + $0x1aa] sm:$0x20]   ;;  %v2621_v25 = vld [vmem:[%s5217_s0 + $0x31] sm:$0x2]   ;;  %v1273_v29 = vsel %vm17_vm3, %v2680_v16, %v1269_v24  ;;  %v2709_v38 = vld [vmem:[%s5217_s0 + $0x12c] sm:$0x2]  }
  0x5a   :  { %1214 = vrot.lane.b32.xlu1 %v1213_v0, %s2969_s26  ;;  %v2622_v26 = vld [vmem:[%s5217_s0 + $0x50] sm:$0x4]   ;;  %v2682_v30 = vld [vmem:[%s5217_s0 + $0x1c9] sm:$0x40]   ;;  %v1010_v31 = vsel %vm5_vm0, %v2621_v25, %v2620_v23  ;;  %v1277_v34 = vsel %vm21_vm4, %v2681_v22, %v1273_v29  ;;  %v1405_v40 = vsel %vm5_vm0, %v2709_v38, %v2708_v37  ;;  %v2710_v41 = vld [vmem:[%s5217_s0 + $0x14b] sm:$0x4]  }
  0x5b   :  { %v2623_v27 = vld [vmem:[%s5217_s0 + $0x6f] sm:$0x8]   ;;  %1179 = vrot.lane.b32.xlu0 %v1178_v17, %s2969_s26  ;;  %v1014_v35 = vsel %vm9_vm1, %v2622_v26, %v1010_v31  ;;  %v2711_v42 = vld [vmem:[%s5217_s0 + $0x16a] sm:$0x8]   ;;  %v1281_v45 = vsel %vm25_vm5, %v2682_v30, %v1277_v34  ;;  %v2683_v46 = vld [vmem:[%s5217_s0 + $0x1e8] sm:$0x80]   ;;  %v1409_v49 = vsel %vm9_vm1, %v2710_v41, %v1405_v40 }
  0x5c   :  { %v2624_v32 = vld [vmem:[%s5217_s0 + $0x8e] sm:$0x10]   ;;  %v1018_v39 = vsel %vm13_vm2, %v2623_v27, %v1014_v35  ;;  %v2712_v43 = vld [vmem:[%s5217_s0 + $0x189] sm:$0x10]   ;;  %v1413_v52 = vsel %vm13_vm2, %v2711_v42, %v1409_v49  ;;  %v1285_v62 = vsel %vm29_vm6, %v2683_v46, %v1281_v45  ;;  %v2644_v4 = vld [vmem:[%s5217_s0 + $0x111] sm:$0x1]  }
  0x5d   :  { %v2625_v33 = vld [vmem:[%s5217_s0 + $0xad] sm:$0x20]   ;;  %v1022_v47 = vsel %vm17_vm3, %v2624_v32, %v1018_v39  ;;  %v2713_v50 = vld [vmem:[%s5217_s0 + $0x1a8] sm:$0x20]   ;;  %v1417_v57 = vsel %vm17_vm3, %v2712_v43, %v1413_v52  ;;  %v2645_v6 = vld [vmem:[%s5217_s0 + $0x130] sm:$0x2]  }
  0x5e   :  { %v2626_v36 = vld [vmem:[%s5217_s0 + $0xcc] sm:$0x40]   ;;  %v1026_v51 = vsel %vm21_vm4, %v2625_v33, %v1022_v47  ;;  %v2700_v53 = vld [vmem:[%s5217_s0 + $0xd] sm:$0x1]   ;;  %v1421_v0 = vsel %vm21_vm4, %v2713_v50, %v1417_v57  ;;  %v2646_v7 = vld [vmem:[%s5217_s0 + $0x14f] sm:$0x4]   ;;  %v1117_v12 = vsel %vm5_vm0, %v2645_v6, %v2644_v4 }
  0x5f   :  { %v2627_v48 = vld [vmem:[%s5217_s0 + $0xeb] sm:$0x80]   ;;  %v2701_v54 = vld [vmem:[%s5217_s0 + $0x2c] sm:$0x2]   ;;  %v1030_v56 = vsel %vm25_vm5, %v2626_v36, %v1026_v51  ;;  %v2647_v8 = vld [vmem:[%s5217_s0 + $0x16e] sm:$0x8]   ;;  %v1121_v16 = vsel %vm9_vm1, %v2646_v7, %v1117_v12 }
  0x60   :  { %v2702_v55 = vld [vmem:[%s5217_s0 + $0x4b] sm:$0x4]   ;;  %v1370_v59 = vsel %vm5_vm0, %v2701_v54, %v2700_v53  ;;  %v1034_v63 = vsel %vm29_vm6, %v2627_v48, %v1030_v56  ;;  %v2648_v13 = vld [vmem:[%s5217_s0 + $0x18d] sm:$0x10]   ;;  %s2971_s28 = smov 60   ;;  %v1125_v20 = vsel %vm13_vm2, %v2647_v8, %v1121_v16  ;;  %s2972_s17 = smov 52  }
  0x61   :  { %v2714_v58 = vld [vmem:[%s5217_s0 + $0x1c7] sm:$0x40]   ;;  %v1374_v2 = vsel %vm9_vm1, %v2702_v55, %v1370_v59  ;;  %1035 = vrot.lane.b32.xlu2 %v1034_v63, %s2968_s21  ;;  %v2649_v14 = vld [vmem:[%s5217_s0 + $0x1ac] sm:$0x20]   ;;  %v2732_v18 = vld [vmem:[%s5217_s0 + $0xb] sm:$0x1]   ;;  %v1129_v28 = vsel %vm17_vm3, %v2648_v13, %v1125_v20 }
  0x62   :  { %v2703_v60 = vld [vmem:[%s5217_s0 + $0x6a] sm:$0x8]   ;;  %1323 = vrot.lane.b32.xlu1 %v1322_v44, %s2970_s20  ;;  %v1425_v9 = vsel %vm25_vm5, %v2714_v58, %v1421_v0  ;;  %v2650_v17 = vld [vmem:[%s5217_s0 + $0x1cb] sm:$0x40]   ;;  %v2733_v19 = vld [vmem:[%s5217_s0 + $0x2a] sm:$0x2]   ;;  %v1133_v32 = vsel %vm21_vm4, %v2649_v14, %v1129_v28 }
  0x63   :  { %v2704_v61 = vld [vmem:[%s5217_s0 + $0x89] sm:$0x10]   ;;  %v1378_v5 = vsel %vm13_vm2, %v2703_v60, %v1374_v2  ;;  %1286 = vrot.lane.b32.xlu0 %v1285_v62, %s2971_s28  ;;  %v1514_v21 = vsel %vm5_vm0, %v2733_v19, %v2732_v18  ;;  %v2734_v22 = vld [vmem:[%s5217_s0 + $0x49] sm:$0x4]   ;;  %v2651_v29 = vld [vmem:[%s5217_s0 + $0x1ea] sm:$0x80]   ;;  %v1137_v37 = vsel %vm25_vm5, %v2650_v17, %v1133_v32 }
  0x64   :  { %v2715_v1 = vld [vmem:[%s5217_s0 + $0x1e6] sm:$0x80]   ;;  %v1382_v10 = vsel %vm17_vm3, %v2704_v61, %v1378_v5  ;;  %v2735_v23 = vld [vmem:[%s5217_s0 + $0x68] sm:$0x8]   ;;  %v1518_v30 = vsel %vm9_vm1, %v2734_v22, %v1514_v21  ;;  %v2724_v35 = vld [vmem:[%s5217_s0 + $0x10c] sm:$0x1]   ;;  %v1141_v44 = vsel %vm29_vm6, %v2651_v29, %v1137_v37 }
  0x65   :  { %v2705_v3 = vld [vmem:[%s5217_s0 + $0xa8] sm:$0x20]   ;;  %v2736_v24 = vld [vmem:[%s5217_s0 + $0x87] sm:$0x10]   ;;  %v1429_v25 = vsel %vm29_vm6, %v2715_v1, %v1425_v9  ;;  %v1522_v33 = vsel %vm13_vm2, %v2735_v23, %v1518_v30  ;;  %v2725_v36 = vld [vmem:[%s5217_s0 + $0x12b] sm:$0x2]  }
  0x66   :  { %v2706_v11 = vld [vmem:[%s5217_s0 + $0xc7] sm:$0x40]   ;;  %v1386_v15 = vsel %vm21_vm4, %v2705_v3, %v1382_v10  ;;  %v2737_v31 = vld [vmem:[%s5217_s0 + $0xa6] sm:$0x20]   ;;  %v1526_v38 = vsel %vm17_vm3, %v2736_v24, %v1522_v33  ;;  %v1477_v39 = vsel %vm5_vm0, %v2725_v36, %v2724_v35  ;;  %v2726_v40 = vld [vmem:[%s5217_s0 + $0x14a] sm:$0x4]  }
  0x67   :  { %v1390_v26 = vsel %vm25_vm5, %v2706_v11, %v1386_v15  ;;  %v2707_v27 = vld [vmem:[%s5217_s0 + $0xe6] sm:$0x80]   ;;  %v2738_v34 = vld [vmem:[%s5217_s0 + $0xc5] sm:$0x40]   ;;  %v2727_v41 = vld [vmem:[%s5217_s0 + $0x169] sm:$0x8]   ;;  %v1530_v45 = vsel %vm21_vm4, %v2737_v31, %v1526_v38  ;;  %v1481_v47 = vsel %vm9_vm1, %v2726_v40, %v1477_v39 }
  0x68   :  { %v2728_v42 = vld [vmem:[%s5217_s0 + $0x188] sm:$0x10]   ;;  %v1394_v43 = vsel %vm29_vm6, %v2707_v27, %v1390_v26  ;;  %v2739_v46 = vld [vmem:[%s5217_s0 + $0xe4] sm:$0x80]   ;;  %v1485_v49 = vsel %vm13_vm2, %v2727_v41, %v1481_v47  ;;  %v2668_v50 = vld [vmem:[%s5217_s0 + $0xf] sm:$0x1]   ;;  %v1534_v53 = vsel %vm25_vm5, %v2738_v34, %v1530_v45 }
  0x69   :  { %v2729_v48 = vld [vmem:[%s5217_s0 + $0x1a7] sm:$0x20]   ;;  %1142 = vrot.lane.b32.xlu2 %v1141_v44, %s2967_s2  ;;  %v2669_v51 = vld [vmem:[%s5217_s0 + $0x2e] sm:$0x2]   ;;  %v1489_v54 = vsel %vm17_vm3, %v2728_v42, %v1485_v49  ;;  %v2756_v1 = vld [vmem:[%s5217_s0 + $0x10a] sm:$0x1]   ;;  %v1538_v4 = vsel %vm29_vm6, %v2739_v46, %v1534_v53 }
  0x6a   :  { %1430 = vrot.lane.b32.xlu1 %v1429_v25, %s2972_s17  ;;  %v2670_v52 = vld [vmem:[%s5217_s0 + $0x4d] sm:$0x4]   ;;  %v2730_v55 = vld [vmem:[%s5217_s0 + $0x1c6] sm:$0x40]   ;;  %v1226_v56 = vsel %vm5_vm0, %v2669_v51, %v2668_v50  ;;  %v1493_v59 = vsel %vm21_vm4, %v2729_v48, %v1489_v54  ;;  %v2757_v2 = vld [vmem:[%s5217_s0 + $0x129] sm:$0x2]  }
  0x6b   :  { %v2671_v57 = vld [vmem:[%s5217_s0 + $0x6c] sm:$0x8]   ;;  %1395 = vrot.lane.b32.xlu0 %v1394_v43, %s2972_s17  ;;  %v2731_v60 = vld [vmem:[%s5217_s0 + $0x1e5] sm:$0x80]   ;;  %v1230_v61 = vsel %vm9_vm1, %v2670_v52, %v1226_v56  ;;  %v2758_v3 = vld [vmem:[%s5217_s0 + $0x148] sm:$0x4]   ;;  %v1497_v5 = vsel %vm25_vm5, %v2730_v55, %v1493_v59  ;;  %v1621_v8 = vsel %vm5_vm0, %v2757_v2, %v2756_v1 }
  0x6c   :  { %v2672_v58 = vld [vmem:[%s5217_s0 + $0x8b] sm:$0x10]   ;;  %v1234_v0 = vsel %vm13_vm2, %v2671_v57, %v1230_v61  ;;  %v2759_v9 = vld [vmem:[%s5217_s0 + $0x167] sm:$0x8]   ;;  %v1625_v12 = vsel %vm9_vm1, %v2758_v3, %v1621_v8  ;;  %s2973_s7 = smov 44   ;;  %v1501_v21 = vsel %vm29_vm6, %v2731_v60, %v1497_v5  ;;  %s2974_s18 = smov 48  }
  0x6d   :  { %v2673_v62 = vld [vmem:[%s5217_s0 + $0xaa] sm:$0x20]   ;;  %v1238_v6 = vsel %vm17_vm3, %v2672_v58, %v1234_v0  ;;  %v2760_v10 = vld [vmem:[%s5217_s0 + $0x186] sm:$0x10]   ;;  %v1629_v17 = vsel %vm13_vm2, %v2759_v9, %v1625_v12  ;;  %v2398_v33 = vld [vmem:[%s5217_s0 + $0x3e] sm:$0x4]  }
  0x6e   :  { %v2674_v63 = vld [vmem:[%s5217_s0 + $0xc9] sm:$0x40]   ;;  %v1242_v11 = vsel %vm21_vm4, %v2673_v62, %v1238_v6  ;;  %v2761_v13 = vld [vmem:[%s5217_s0 + $0x1a5] sm:$0x20]   ;;  %v1633_v23 = vsel %vm17_vm3, %v2760_v10, %v1629_v17  ;;  %v2399_v36 = vld [vmem:[%s5217_s0 + $0x5d] sm:$0x8]  }
  0x6f   :  { %v2675_v7 = vld [vmem:[%s5217_s0 + $0xe8] sm:$0x80]   ;;  %v2762_v14 = vld [vmem:[%s5217_s0 + $0x1c4] sm:$0x40]   ;;  %v1246_v16 = vsel %vm25_vm5, %v2674_v63, %v1242_v11  ;;  %v1637_v26 = vsel %vm21_vm4, %v2761_v13, %v1633_v23  ;;  %v2400_v37 = vld [vmem:[%s5217_s0 + $0x7c] sm:$0x10]  }
  0x70   :  { %v2748_v15 = vld [vmem:[%s5217_s0 + $0xa] sm:$0x1]   ;;  %v1250_v22 = vsel %vm29_vm6, %v2675_v7, %v1246_v16  ;;  %v1641_v29 = vsel %vm25_vm5, %v2762_v14, %v1637_v26  ;;  %v2_v38 = vld [vmem:[%s5217_s0] sm:$0x1]   ;;  %v2692_v42 = vld [vmem:[%s5217_s0 + $0x10e] sm:$0x1]  }
  0x71   :  { %v2749_v18 = vld [vmem:[%s5217_s0 + $0x29] sm:$0x2]   ;;  %1251 = vrot.lane.b32.xlu2 %v1250_v22, %s2971_s28  ;;  %v2401_v40 = vld [vmem:[%s5217_s0 + $0x9b] sm:$0x20]   ;;  %v2693_v43 = vld [vmem:[%s5217_s0 + $0x12d] sm:$0x2]  }
  0x72   :  { %v2750_v19 = vld [vmem:[%s5217_s0 + $0x48] sm:$0x4]   ;;  %1539 = vrot.lane.b32.xlu1 %v1538_v4, %s2973_s7  ;;  %v1586_v24 = vsel %vm5_vm0, %v2749_v18, %v2748_v15  ;;  %v2397_v41 = vld [vmem:[%s5217_s0 + $0x1f] sm:$0x2]   ;;  %v1333_v48 = vsel %vm5_vm0, %v2693_v43, %v2692_v42  ;;  %v2694_v49 = vld [vmem:[%s5217_s0 + $0x14c] sm:$0x4]  }
  0x73   :  { %v2751_v20 = vld [vmem:[%s5217_s0 + $0x67] sm:$0x8]   ;;  %v1590_v27 = vsel %vm9_vm1, %v2750_v19, %v1586_v24  ;;  %1502 = vrot.lane.b32.xlu0 %v1501_v21, %s2974_s18  ;;  %v2402_v46 = vld [vmem:[%s5217_s0 + $0xba] sm:$0x40]   ;;  %v6_v47 = vsel %vm5_vm0, %v2397_v41, %v2_v38  ;;  %v2695_v50 = vld [vmem:[%s5217_s0 + $0x16b] sm:$0x8]   ;;  %v1337_v54 = vsel %vm9_vm1, %v2694_v49, %v1333_v48 }
  0x74   :  { %v2752_v25 = vld [vmem:[%s5217_s0 + $0x86] sm:$0x10]   ;;  %v1594_v31 = vsel %vm13_vm2, %v2751_v20, %v1590_v27  ;;  %v2696_v51 = vld [vmem:[%s5217_s0 + $0x18a] sm:$0x10]   ;;  %v2403_v52 = vld [vmem:[%s5217_s0 + $0xd9] sm:$0x80]   ;;  %v10_v53 = vsel %vm9_vm1, %v2398_v33, %v6_v47  ;;  %v1341_v58 = vsel %vm13_vm2, %v2695_v50, %v1337_v54 }
  0x75   :  { %v2753_v28 = vld [vmem:[%s5217_s0 + $0xa5] sm:$0x20]   ;;  %v1598_v34 = vsel %vm17_vm3, %v2752_v25, %v1594_v31  ;;  %vm31_vm7 = vcmask 31744   ;;  %vm101_vm8 = vcmask 1048544   ;;  %v2697_v55 = vld [vmem:[%s5217_s0 + $0x1a9] sm:$0x20]   ;;  %v14_v57 = vsel %vm13_vm2, %v2399_v36, %v10_v53 }
  0x76   :  { %v2763_v30 = vld [vmem:[%s5217_s0 + $0x1e3] sm:$0x80]   ;;  %v1602_v39 = vsel %vm21_vm4, %v2753_v28, %v1598_v34  ;;  %v2698_v56 = vld [vmem:[%s5217_s0 + $0x1c8] sm:$0x40]   ;;  %v2780_v59 = vld [vmem:[%s5217_s0 + $0x8] sm:$0x1]   ;;  %v18_v63 = vsel %vm17_vm3, %v2400_v37, %v14_v57  ;;  %v1345_v0 = vsel %vm17_vm3, %v2696_v51, %v1341_v58 }
  0x77   :  { %v2754_v32 = vld [vmem:[%s5217_s0 + $0xc4] sm:$0x40]   ;;  %v1645_v44 = vsel %vm29_vm6, %v2763_v30, %v1641_v29  ;;  %v2781_v60 = vld [vmem:[%s5217_s0 + $0x27] sm:$0x2]   ;;  %s2975_s6 = smov 40   ;;  %v244_v5 = vpop.permute.xlu2 %243   ;;  %v22_v6 = vsel %vm21_vm4, %v2401_v40, %v18_v63  ;;  %v1349_v7 = vsel %vm21_vm4, %v2697_v55, %v1345_v0  ;;  %vm173_vm9 = vcmask 1015744  }
  0x78   :  { %v2755_v35 = vld [vmem:[%s5217_s0 + $0xe3] sm:$0x80]   ;;  %v1606_v45 = vsel %vm25_vm5, %v2754_v32, %v1602_v39  ;;  %v2782_v61 = vld [vmem:[%s5217_s0 + $0x46] sm:$0x4]   ;;  %v2699_v1 = vld [vmem:[%s5217_s0 + $0x1e7] sm:$0x80]   ;;  %v1730_v2 = vsel %vm5_vm0, %v2781_v60, %v2780_v59  ;;  %v26_v13 = vsel %vm25_vm5, %v2402_v46, %v22_v6  ;;  %v1353_v14 = vsel %vm25_vm5, %v2698_v56, %v1349_v7 }
  0x79   :  { %v1610_v62 = vsel %vm29_vm6, %v2755_v35, %v1606_v45  ;;  %v2783_v3 = vld [vmem:[%s5217_s0 + $0x65] sm:$0x8]   ;;  %v1734_v8 = vsel %vm9_vm1, %v2782_v61, %v1730_v2  ;;  %v2772_v16 = vld [vmem:[%s5217_s0 + $0x109] sm:$0x1]   ;;  %v30_v19 = vsel %vm29_vm6, %v2403_v52, %v26_v13  ;;  %v1357_v20 = vsel %vm29_vm6, %v2699_v1, %v1353_v14  ;;  %v2404_v35 = vld [vmem:[%s5217_s0 + $0x100] sm:$0x1]  }
  0x7a   :  { %1646 = vrot.lane.b32.xlu1 %v1645_v44, %s2975_s6  ;;  %v2784_v4 = vld [vmem:[%s5217_s0 + $0x84] sm:$0x10]   ;;  %v1738_v15 = vsel %vm13_vm2, %v2783_v3, %v1734_v8  ;;  %v2773_v17 = vld [vmem:[%s5217_s0 + $0x128] sm:$0x2]   ;;  %1358 = vrot.lane.b32.xlu2 %v1357_v20, %s2970_s20  ;;  %vm245_vm10 = vcmask 982944   ;;  %s2976_s10 = smov 32  }
  0x7b   :  { %v2785_v9 = vld [vmem:[%s5217_s0 + $0xa3] sm:$0x20]   ;;  %v2774_v18 = vld [vmem:[%s5217_s0 + $0x147] sm:$0x4]   ;;  %1611 = vrot.lane.b32.xlu0 %v1610_v62, %s2975_s6  ;;  %v1742_v21 = vsel %vm17_vm3, %v2784_v4, %v1738_v15  ;;  %v1693_v22 = vsel %vm5_vm0, %v2773_v17, %v2772_v16  ;;  %v2405_v37 = vld [vmem:[%s5217_s0 + $0x11f] sm:$0x2]  }
  0x7c   :  { %v2786_v10 = vld [vmem:[%s5217_s0 + $0xc2] sm:$0x40]   ;;  %v172_v12 = vpop.permute.xlu1 %171   ;;  %v2775_v23 = vld [vmem:[%s5217_s0 + $0x166] sm:$0x8]   ;;  %v1746_v26 = vsel %vm21_vm4, %v2785_v9, %v1742_v21  ;;  %v1697_v27 = vsel %vm9_vm1, %v2774_v18, %v1693_v22  ;;  %v2406_v39 = vld [vmem:[%s5217_s0 + $0x13e] sm:$0x4]   ;;  %v39_v40 = vsel %vm5_vm0, %v2405_v37, %v2404_v35 }
  0x7d   :  { %v2787_v11 = vld [vmem:[%s5217_s0 + $0xe1] sm:$0x80]   ;;  %v2776_v24 = vld [vmem:[%s5217_s0 + $0x185] sm:$0x10]   ;;  %v100_v29 = vpop.permute.xlu0 %99   ;;  %v1750_v30 = vsel %vm25_vm5, %v2786_v10, %v1746_v26  ;;  %v1701_v31 = vsel %vm13_vm2, %v2775_v23, %v1697_v27  ;;  %v2407_v42 = vld [vmem:[%s5217_s0 + $0x15d] sm:$0x8]   ;;  %v43_v43 = vsel %vm9_vm1, %v2406_v39, %v39_v40 }
  0x7e   :  { %v2777_v25 = vld [vmem:[%s5217_s0 + $0x1a4] sm:$0x20]   ;;  %32 = vst.msk [vmem:[#allocation0] ss:$8 sm:$0xf] %vm31_vm7, %v30_v19   ;;  %v1754_v33 = vsel %vm29_vm6, %v2787_v11, %v1750_v30  ;;  %v1705_v34 = vsel %vm17_vm3, %v2776_v24, %v1701_v31  ;;  %v47_v47 = vsel %vm13_vm2, %v2407_v42, %v43_v43  ;;  %s2977_s17 = smov 36  }
  0x7f   :  { %v2778_v28 = vld [vmem:[%s5217_s0 + $0x1c3] sm:$0x40]   ;;  %33 = vst.msk [vmem:[#allocation0] ss:$8 sm:$0xf0] %vm31_vm7, %v30_v19   ;;  %v1709_v36 = vsel %vm21_vm4, %v2777_v25, %v1705_v34  ;;  %v4439_v44 = vpop.permute.xlu2 %278   ;;  %vm317_vm11 = vcmask 950144  }
  0x80   :  { %v2779_v32 = vld [vmem:[%s5217_s0 + $0x1e2] sm:$0x80]   ;;  %102 = vst.msk [vmem:[#allocation0] ss:$8 sm:$0xf] %vm101_vm8, %v100_v29   ;;  %v1713_v38 = vsel %vm25_vm5, %v2778_v28, %v1709_v36  ;;  %s2978_s24 = smov 28  }
  0x81   :  { %103 = vst.msk [vmem:[#allocation0] ss:$8 sm:$0xf0] %vm101_vm8, %v100_v29   ;;  %v1717_v41 = vsel %vm29_vm6, %v2779_v32, %v1713_v38  ;;  %v2408_v46 = vld [vmem:[%s5217_s0 + $0x17c] sm:$0x10]   ;;  %vm389_vm12 = vcmask 917344  }
  0x82   :  { %174 = vst.msk [vmem:[#allocation0] ss:$8 sm:$0xf] %vm173_vm9, %v172_v12   ;;  %1755 = vrot.lane.b32.xlu1 %v1754_v33, %s2976_s10  ;;  %v2409_v48 = vld [vmem:[%s5217_s0 + $0x19b] sm:$0x20]   ;;  %v51_v49 = vsel %vm17_vm3, %v2408_v46, %v47_v47  ;;  %vm461_vm13 = vcmask 884544  }
  0x83   :  { %175 = vst.msk [vmem:[#allocation0] ss:$8 sm:$0xf0] %vm173_vm9, %v172_v12   ;;  %1718 = vrot.lane.b32.xlu0 %v1717_v41, %s2977_s17  ;;  %v2410_v50 = vld [vmem:[%s5217_s0 + $0x1ba] sm:$0x40]   ;;  %v55_v52 = vsel %vm21_vm4, %v2409_v48, %v51_v49  ;;  %s2979_s8 = smov 20  }
  0x84   :  { %246 = vst.msk [vmem:[#allocation0] ss:$8 sm:$0xf] %vm245_vm10, %v244_v5   ;;  %v207_v45 = vpop.permute.xlu1 %206   ;;  %v2411_v51 = vld [vmem:[%s5217_s0 + $0x1d9] sm:$0x80]   ;;  %v59_v55 = vsel %vm25_vm5, %v2410_v50, %v55_v52  ;;  %s2980_s27 = smov 24  }
  0x85   :  { %247 = vst.msk [vmem:[#allocation0] ss:$8 sm:$0xf0] %vm245_vm10, %v244_v5   ;;  %v2716_v53 = vld [vmem:[%s5217_s0 + $0xc] sm:$0x1]   ;;  %v135_v54 = vpop.permute.xlu0 %134   ;;  %v63_v59 = vsel %vm29_vm6, %v2411_v51, %v59_v55  ;;  %vm533_vm14 = vcmask 851744  }
  0x86   :  { %v2717_v56 = vld [vmem:[%s5217_s0 + $0x2b] sm:$0x2]   ;;  %66 = vst.msk [vmem:[#allocation0 + $0x40] ss:$8 sm:$0xf] %vm31_vm7, %v63_v59   ;;  %s2981_s16 = smov 16  }
  0x87   :  { %v2718_v57 = vld [vmem:[%s5217_s0 + $0x4a] sm:$0x4]   ;;  %v1442_v60 = vsel %vm5_vm0, %v2717_v56, %v2716_v53  ;;  %68 = vst.msk [vmem:[#allocation0 + $0x40] ss:$8 sm:$0xf0] %vm31_vm7, %v63_v59   ;;  %vm605_vm15 = vcmask 818944  }
  0x88   :  { %v2719_v58 = vld [vmem:[%s5217_s0 + $0x69] sm:$0x8]   ;;  %v1446_v0 = vsel %vm9_vm1, %v2718_v57, %v1442_v60  ;;  %v2804_v3 = vld [vmem:[%s5217_s0 + $0x107] sm:$0x1]   ;;  %v4498_v6 = vpop.permute.xlu2 %387   ;;  %v2740_v35 = vld [vmem:[%s5217_s0 + $0x10b] sm:$0x1]  }
  0x89   :  { %v2720_v61 = vld [vmem:[%s5217_s0 + $0x88] sm:$0x10]   ;;  %v1450_v2 = vsel %vm13_vm2, %v2719_v58, %v1446_v0  ;;  %138 = vst.msk [vmem:[#allocation0 + $0x40] ss:$8 sm:$0xf] %vm101_vm8, %v135_v54   ;;  %vm677_vm7 = vcmask 786144  }
  0x8a   :  { %v2721_v62 = vld [vmem:[%s5217_s0 + $0xa7] sm:$0x20]   ;;  %v1454_v4 = vsel %vm17_vm3, %v2720_v61, %v1450_v2  ;;  %v2805_v5 = vld [vmem:[%s5217_s0 + $0x126] sm:$0x2]   ;;  %v2741_v37 = vld [vmem:[%s5217_s0 + $0x12a] sm:$0x2]  }
  0x8b   :  { %v2722_v63 = vld [vmem:[%s5217_s0 + $0xc6] sm:$0x40]   ;;  %140 = vst.msk [vmem:[#allocation0 + $0x40] ss:$8 sm:$0xf0] %vm101_vm8, %v135_v54   ;;  %v1458_v7 = vsel %vm21_vm4, %v2721_v62, %v1454_v4  ;;  %v1837_v8 = vsel %vm5_vm0, %v2805_v5, %v2804_v3  ;;  %v1549_v40 = vsel %vm5_vm0, %v2741_v37, %v2740_v35  ;;  %s2982_s12 = smov 8  }
  0x8c   :  { %v2723_v1 = vld [vmem:[%s5217_s0 + $0xe5] sm:$0x80]   ;;  %v2806_v9 = vld [vmem:[%s5217_s0 + $0x145] sm:$0x4]   ;;  %v351_v10 = vpop.permute.xlu1 %350   ;;  %v1462_v11 = vsel %vm25_vm5, %v2722_v63, %v1458_v7  ;;  %v2742_v41 = vld [vmem:[%s5217_s0 + $0x149] sm:$0x4]  }
  0x8d   :  { %210 = vst.msk [vmem:[#allocation0 + $0x40] ss:$8 sm:$0xf] %vm173_vm9, %v207_v45   ;;  %v1841_v12 = vsel %vm9_vm1, %v2806_v9, %v1837_v8  ;;  %v2807_v13 = vld [vmem:[%s5217_s0 + $0x164] sm:$0x8]   ;;  %v1466_v14 = vsel %vm29_vm6, %v2723_v1, %v1462_v11  ;;  %v316_v21 = vpop.permute.xlu0 %315   ;;  %s2983_s2 = smov 12  }
  0x8e   :  { %212 = vst.msk [vmem:[#allocation0 + $0x40] ss:$8 sm:$0xf0] %vm173_vm9, %v207_v45   ;;  %v1845_v15 = vsel %vm13_vm2, %v2807_v13, %v1841_v12  ;;  %v2808_v16 = vld [vmem:[%s5217_s0 + $0x183] sm:$0x10]   ;;  %1467 = vrot.lane.b32.xlu2 %v1466_v14, %s2974_s18  ;;  %vm749_vm8 = vcmask 753344  }
  0x8f   :  { %v1849_v17 = vsel %vm17_vm3, %v2808_v16, %v1845_v15  ;;  %v2809_v18 = vld [vmem:[%s5217_s0 + $0x1a2] sm:$0x20]   ;;  %282 = vst.msk [vmem:[#allocation0 + $0x40] ss:$8 sm:$0xf] %vm245_vm10, %v4439_v44   ;;  %s2984_s19 = smov 4  }
  0x90   :  { %v2810_v19 = vld [vmem:[%s5217_s0 + $0x1c1] sm:$0x40]   ;;  %v1853_v22 = vsel %vm21_vm4, %v2809_v18, %v1849_v17  ;;  %v4567_v38 = vpop.permute.xlu2 %494   ;;  %284 = vst.msk [vmem:[#allocation0 + $0x40] ss:$8 sm:$0xf0] %vm245_vm10, %v4439_v44   ;;  %v1553_v44 = vsel %vm9_vm1, %v2742_v41, %v1549_v40  ;;  %vm821_vm9 = vcmask 720544  }
  0x91   :  { %v2811_v20 = vld [vmem:[%s5217_s0 + $0x1e0] sm:$0x80]   ;;  %v1857_v26 = vsel %vm25_vm5, %v2810_v19, %v1853_v22  ;;  %354 = vst.msk [vmem:[#allocation0 + $0x40] ss:$8 sm:$0xf] %vm317_vm11, %v351_v10   ;;  %vm893_vm10 = vcmask 687744  }
  0x92   :  { %v2796_v23 = vld [vmem:[%s5217_s0 + $0x7] sm:$0x1]   ;;  %v1861_v31 = vsel %vm29_vm6, %v2811_v20, %v1857_v26  ;;  %v2743_v45 = vld [vmem:[%s5217_s0 + $0x168] sm:$0x8]   ;;  %v2828_v57 = vld [vmem:[%s5217_s0 + $0x5] sm:$0x1]  }
  0x93   :  { %v2797_v24 = vld [vmem:[%s5217_s0 + $0x26] sm:$0x2]   ;;  %1862 = vrot.lane.b32.xlu1 %v1861_v31, %s2978_s24  ;;  %356 = vst.msk [vmem:[#allocation0 + $0x40] ss:$8 sm:$0xf0] %vm317_vm11, %v351_v10   ;;  %v1557_v47 = vsel %vm13_vm2, %v2743_v45, %v1553_v44 }
  0x94   :  { %v2798_v25 = vld [vmem:[%s5217_s0 + $0x45] sm:$0x4]   ;;  %v1802_v27 = vsel %vm5_vm0, %v2797_v24, %v2796_v23  ;;  %v4576_v42 = vpop.permute.xlu1 %459   ;;  %v2744_v48 = vld [vmem:[%s5217_s0 + $0x187] sm:$0x10]   ;;  %v2829_v58 = vld [vmem:[%s5217_s0 + $0x24] sm:$0x2]  }
  0x95   :  { %v2799_v28 = vld [vmem:[%s5217_s0 + $0x64] sm:$0x8]   ;;  %v1806_v32 = vsel %vm9_vm1, %v2798_v25, %v1802_v27  ;;  %318 = vst.msk [vmem:[#allocation0] ss:$8 sm:$0xf] %vm317_vm11, %v316_v21   ;;  %v1561_v50 = vsel %vm17_vm3, %v2744_v48, %v1557_v47  ;;  %v423_v52 = vpop.permute.xlu0 %422   ;;  %v1946_v60 = vsel %vm5_vm0, %v2829_v58, %v2828_v57 }
  0x96   :  { %v2800_v29 = vld [vmem:[%s5217_s0 + $0x83] sm:$0x10]   ;;  %v1810_v36 = vsel %vm13_vm2, %v2799_v28, %v1806_v32  ;;  %v2745_v51 = vld [vmem:[%s5217_s0 + $0x1a6] sm:$0x20]   ;;  %v2830_v61 = vld [vmem:[%s5217_s0 + $0x43] sm:$0x4]  }
  0x97   :  { %v2801_v30 = vld [vmem:[%s5217_s0 + $0xa2] sm:$0x20]   ;;  %v1814_v39 = vsel %vm17_vm3, %v2800_v29, %v1810_v36  ;;  %319 = vst.msk [vmem:[#allocation0] ss:$8 sm:$0xf0] %vm317_vm11, %v316_v21   ;;  %v1565_v53 = vsel %vm21_vm4, %v2745_v51, %v1561_v50  ;;  %v1950_v0 = vsel %vm9_vm1, %v2830_v61, %v1946_v60  ;;  %vm965_vm11 = vcmask 654944  }
  0x98   :  { %v2802_v33 = vld [vmem:[%s5217_s0 + $0xc1] sm:$0x40]   ;;  %v1818_v43 = vsel %vm21_vm4, %v2801_v30, %v1814_v39  ;;  %v2746_v54 = vld [vmem:[%s5217_s0 + $0x1c5] sm:$0x40]   ;;  %v2831_v62 = vld [vmem:[%s5217_s0 + $0x62] sm:$0x8]  }
  0x99   :  { %v2803_v34 = vld [vmem:[%s5217_s0 + $0xe0] sm:$0x80]   ;;  %v1822_v46 = vsel %vm25_vm5, %v2802_v33, %v1818_v43  ;;  %v1569_v55 = vsel %vm25_vm5, %v2746_v54, %v1565_v53  ;;  %v2747_v56 = vld [vmem:[%s5217_s0 + $0x1e4] sm:$0x80]   ;;  %v2832_v63 = vld [vmem:[%s5217_s0 + $0x81] sm:$0x10]   ;;  %v1954_v4 = vsel %vm13_vm2, %v2831_v62, %v1950_v0  ;;  %v4645_v10 = vpop.permute.xlu2 %603  }
  0x9a   :  { %v1826_v49 = vsel %vm29_vm6, %v2803_v34, %v1822_v46  ;;  %v1573_v59 = vsel %vm29_vm6, %v2747_v56, %v1569_v55  ;;  %v2833_v1 = vld [vmem:[%s5217_s0 + $0xa0] sm:$0x20]   ;;  %v2820_v5 = vld [vmem:[%s5217_s0 + $0x106] sm:$0x1]   ;;  %v1958_v11 = vsel %vm17_vm3, %v2832_v63, %v1954_v4  ;;  %v2764_v20 = vld [vmem:[%s5217_s0 + $0x9] sm:$0x1]  }
  0x9b   :  { %1827 = vrot.lane.b32.xlu0 %v1826_v49, %s2978_s24  ;;  %1574 = vrot.lane.b32.xlu2 %v1573_v59, %s2973_s7  ;;  %v2834_v2 = vld [vmem:[%s5217_s0 + $0xbf] sm:$0x40]   ;;  %v2821_v7 = vld [vmem:[%s5217_s0 + $0x125] sm:$0x2]   ;;  %v1962_v16 = vsel %vm21_vm4, %v2833_v1, %v1958_v11 }
  0x9c   :  { %v2835_v3 = vld [vmem:[%s5217_s0 + $0xde] sm:$0x80]   ;;  %v2822_v8 = vld [vmem:[%s5217_s0 + $0x144] sm:$0x4]   ;;  %v4643_v9 = vpop.permute.xlu1 %566   ;;  %v1909_v12 = vsel %vm5_vm0, %v2821_v7, %v2820_v5  ;;  %v1966_v21 = vsel %vm25_vm5, %v2834_v2, %v1962_v16  ;;  %v2765_v23 = vld [vmem:[%s5217_s0 + $0x28] sm:$0x2]  }
  0x9d   :  { %v2823_v13 = vld [vmem:[%s5217_s0 + $0x163] sm:$0x8]   ;;  %v1913_v17 = vsel %vm9_vm1, %v2822_v8, %v1909_v12  ;;  %390 = vst.msk [vmem:[#allocation0] ss:$8 sm:$0xf] %vm389_vm12, %v4498_v6   ;;  %v4676_v24 = vpop.permute.xlu0 %531   ;;  %v1970_v25 = vsel %vm29_vm6, %v2835_v3, %v1966_v21 }
  0x9e   :  { %v2824_v14 = vld [vmem:[%s5217_s0 + $0x182] sm:$0x10]   ;;  %v1917_v22 = vsel %vm13_vm2, %v2823_v13, %v1913_v17  ;;  %391 = vst.msk [vmem:[#allocation0] ss:$8 sm:$0xf0] %vm389_vm12, %v4498_v6   ;;  %v1658_v6 = vsel %vm5_vm0, %v2765_v23, %v2764_v20  ;;  %1971 = vrot.lane.b32.xlu1 %v1970_v25, %s2979_s8 }
  0x9f   :  { %v2825_v15 = vld [vmem:[%s5217_s0 + $0x1a1] sm:$0x20]   ;;  %v1921_v26 = vsel %vm17_vm3, %v2824_v14, %v1917_v22  ;;  %v2766_v27 = vld [vmem:[%s5217_s0 + $0x47] sm:$0x4]   ;;  %v2852_v43 = vld [vmem:[%s5217_s0 + $0x104] sm:$0x1]  }
  0xa0   :  { %v2826_v18 = vld [vmem:[%s5217_s0 + $0x1c0] sm:$0x40]   ;;  %v1925_v28 = vsel %vm21_vm4, %v2825_v15, %v1921_v26  ;;  %462 = vst.msk [vmem:[#allocation0] ss:$8 sm:$0xf] %vm461_vm13, %v4576_v42   ;;  %v1662_v29 = vsel %vm9_vm1, %v2766_v27, %v1658_v6 }
  0xa1   :  { %v2827_v19 = vld [vmem:[%s5217_s0 + $0x1df] sm:$0x80]   ;;  %v2767_v30 = vld [vmem:[%s5217_s0 + $0x66] sm:$0x8]   ;;  %v1929_v31 = vsel %vm25_vm5, %v2826_v18, %v1925_v28  ;;  %v2853_v44 = vld [vmem:[%s5217_s0 + $0x123] sm:$0x2]   ;;  %v4759_v59 = vpop.permute.xlu2 %710  }
  0xa2   :  { %463 = vst.msk [vmem:[#allocation0] ss:$8 sm:$0xf0] %vm461_vm13, %v4576_v42   ;;  %v1666_v32 = vsel %vm13_vm2, %v2767_v30, %v1662_v29  ;;  %v2768_v33 = vld [vmem:[%s5217_s0 + $0x85] sm:$0x10]   ;;  %v1933_v34 = vsel %vm29_vm6, %v2827_v19, %v1929_v31  ;;  %v2053_v46 = vsel %vm5_vm0, %v2853_v44, %v2852_v43 }
  0xa3   :  { %426 = vst.msk [vmem:[#allocation0 + $0x40] ss:$8 sm:$0xf] %vm389_vm12, %v423_v52   ;;  %v1670_v35 = vsel %vm17_vm3, %v2768_v33, %v1666_v32  ;;  %v2769_v36 = vld [vmem:[%s5217_s0 + $0xa4] sm:$0x20]   ;;  %1934 = vrot.lane.b32.xlu0 %v1933_v34, %s2980_s27 }
  0xa4   :  { %428 = vst.msk [vmem:[#allocation0 + $0x40] ss:$8 sm:$0xf0] %vm389_vm12, %v423_v52   ;;  %v1674_v37 = vsel %vm21_vm4, %v2769_v36, %v1670_v35  ;;  %v2770_v39 = vld [vmem:[%s5217_s0 + $0xc3] sm:$0x40]   ;;  %v4713_v40 = vpop.permute.xlu1 %675   ;;  %vm1541_vm12 = vcmask 392544  }
  0xa5   :  { %v1678_v41 = vsel %vm25_vm5, %v2770_v39, %v1674_v37  ;;  %v2771_v42 = vld [vmem:[%s5217_s0 + $0xe2] sm:$0x80]   ;;  %v2854_v47 = vld [vmem:[%s5217_s0 + $0x142] sm:$0x4]   ;;  %v4747_v54 = vpop.permute.xlu0 %638   ;;  %v2788_v5 = vld [vmem:[%s5217_s0 + $0x108] sm:$0x1]  }
  0xa6   :  { %v1682_v45 = vsel %vm29_vm6, %v2771_v42, %v1678_v41  ;;  %v2855_v48 = vld [vmem:[%s5217_s0 + $0x161] sm:$0x8]   ;;  %v2057_v50 = vsel %vm9_vm1, %v2854_v47, %v2053_v46  ;;  %498 = vst.msk [vmem:[#allocation0 + $0x40] ss:$8 sm:$0xf] %vm461_vm13, %v4567_v38  }
  0xa7   :  { %v2856_v49 = vld [vmem:[%s5217_s0 + $0x180] sm:$0x10]   ;;  %1683 = vrot.lane.b32.xlu2 %v1682_v45, %s2977_s17  ;;  %v2061_v55 = vsel %vm13_vm2, %v2855_v48, %v2057_v50  ;;  %v2789_v11 = vld [vmem:[%s5217_s0 + $0x127] sm:$0x2]   ;;  %v2876_v29 = vld [vmem:[%s5217_s0 + $0x2] sm:$0x1]  }
  0xa8   :  { %v2857_v51 = vld [vmem:[%s5217_s0 + $0x19f] sm:$0x20]   ;;  %v2065_v60 = vsel %vm17_vm3, %v2856_v49, %v2061_v55  ;;  %500 = vst.msk [vmem:[#allocation0 + $0x40] ss:$8 sm:$0xf0] %vm461_vm13, %v4567_v38   ;;  %v1765_v38 = vsel %vm5_vm0, %v2789_v11, %v2788_v5  ;;  %vm1613_vm13 = vcmask 359744  }
  0xa9   :  { %v2858_v52 = vld [vmem:[%s5217_s0 + $0x1be] sm:$0x40]   ;;  %v2069_v1 = vsel %vm21_vm4, %v2857_v51, %v2065_v60  ;;  %v2790_v14 = vld [vmem:[%s5217_s0 + $0x146] sm:$0x4]   ;;  %v2877_v30 = vld [vmem:[%s5217_s0 + $0x21] sm:$0x2]  }
  0xaa   :  { %v2859_v53 = vld [vmem:[%s5217_s0 + $0x1dd] sm:$0x80]   ;;  %v2073_v7 = vsel %vm25_vm5, %v2858_v52, %v2069_v1  ;;  %570 = vst.msk [vmem:[#allocation0 + $0x40] ss:$8 sm:$0xf] %vm533_vm14, %v4643_v9   ;;  %v1769_v17 = vsel %vm9_vm1, %v2790_v14, %v1765_v38  ;;  %v4829_v6 = vpop.permute.xlu2 %819   ;;  %v2162_v32 = vsel %vm5_vm0, %v2877_v30, %v2876_v29 }
  0xab   :  { %v2844_v56 = vld [vmem:[%s5217_s0 + $0x4] sm:$0x1]   ;;  %v2077_v12 = vsel %vm29_vm6, %v2859_v53, %v2073_v7  ;;  %v2791_v18 = vld [vmem:[%s5217_s0 + $0x165] sm:$0x8]   ;;  %v2878_v33 = vld [vmem:[%s5217_s0 + $0x40] sm:$0x4]  }
  0xac   :  { %v2845_v57 = vld [vmem:[%s5217_s0 + $0x23] sm:$0x2]   ;;  %v4798_v15 = vpop.permute.xlu1 %782   ;;  %2078 = vrot.lane.b32.xlu1 %v2077_v12, %s2981_s16  ;;  %572 = vst.msk [vmem:[#allocation0 + $0x40] ss:$8 sm:$0xf0] %vm533_vm14, %v4643_v9   ;;  %v1773_v9 = vsel %vm13_vm2, %v2791_v18, %v1769_v17  ;;  %v2166_v36 = vsel %vm9_vm1, %v2878_v33, %v2162_v32 }
  0xad   :  { %v2846_v58 = vld [vmem:[%s5217_s0 + $0x42] sm:$0x4]   ;;  %v2018_v61 = vsel %vm5_vm0, %v2845_v57, %v2844_v56  ;;  %v2792_v20 = vld [vmem:[%s5217_s0 + $0x184] sm:$0x10]   ;;  %v4821_v25 = vpop.permute.xlu0 %747   ;;  %v2879_v34 = vld [vmem:[%s5217_s0 + $0x5f] sm:$0x8]  }
  0xae   :  { %v2847_v62 = vld [vmem:[%s5217_s0 + $0x61] sm:$0x8]   ;;  %v2022_v2 = vsel %vm9_vm1, %v2846_v58, %v2018_v61  ;;  %534 = vst.msk [vmem:[#allocation0] ss:$8 sm:$0xf] %vm533_vm14, %v4676_v24   ;;  %v1777_v22 = vsel %vm17_vm3, %v2792_v20, %v1773_v9  ;;  %v2170_v42 = vsel %vm13_vm2, %v2879_v34, %v2166_v36 }
  0xaf   :  { %v2848_v63 = vld [vmem:[%s5217_s0 + $0x80] sm:$0x10]   ;;  %v2026_v8 = vsel %vm13_vm2, %v2847_v62, %v2022_v2  ;;  %v2793_v23 = vld [vmem:[%s5217_s0 + $0x1a3] sm:$0x20]   ;;  %v2880_v35 = vld [vmem:[%s5217_s0 + $0x7e] sm:$0x10]  }
  0xb0   :  { %v2849_v0 = vld [vmem:[%s5217_s0 + $0x9f] sm:$0x20]   ;;  %v2030_v13 = vsel %vm17_vm3, %v2848_v63, %v2026_v8  ;;  %535 = vst.msk [vmem:[#allocation0] ss:$8 sm:$0xf0] %vm533_vm14, %v4676_v24   ;;  %v1781_v24 = vsel %vm21_vm4, %v2793_v23, %v1777_v22  ;;  %v2174_v47 = vsel %vm17_vm3, %v2880_v35, %v2170_v42  ;;  %vm1685_vm14 = vcmask 326944  }
  0xb1   :  { %v2850_v3 = vld [vmem:[%s5217_s0 + $0xbe] sm:$0x40]   ;;  %v2034_v16 = vsel %vm21_vm4, %v2849_v0, %v2030_v13  ;;  %v2794_v26 = vld [vmem:[%s5217_s0 + $0x1c2] sm:$0x40]   ;;  %v2881_v37 = vld [vmem:[%s5217_s0 + $0x9d] sm:$0x20]  }
  0xb2   :  { %v2851_v4 = vld [vmem:[%s5217_s0 + $0xdd] sm:$0x80]   ;;  %v2038_v19 = vsel %vm25_vm5, %v2850_v3, %v2034_v16  ;;  %v1785_v27 = vsel %vm25_vm5, %v2794_v26, %v1781_v24  ;;  %v2795_v28 = vld [vmem:[%s5217_s0 + $0x1e1] sm:$0x80]   ;;  %v2882_v39 = vld [vmem:[%s5217_s0 + $0xbc] sm:$0x40]   ;;  %v2178_v52 = vsel %vm21_vm4, %v2881_v37, %v2174_v47  ;;  %v4914_v2 = vpop.permute.xlu2 %926  }
  0xb3   :  { %v2042_v21 = vsel %vm29_vm6, %v2851_v4, %v2038_v19  ;;  %v1789_v31 = vsel %vm29_vm6, %v2795_v28, %v1785_v27  ;;  %v2883_v41 = vld [vmem:[%s5217_s0 + $0xdb] sm:$0x80]   ;;  %v2868_v43 = vld [vmem:[%s5217_s0 + $0x103] sm:$0x1]   ;;  %v2812_v57 = vld [vmem:[%s5217_s0 + $0x6] sm:$0x1]   ;;  %v2182_v58 = vsel %vm25_vm5, %v2882_v39, %v2178_v52 }
  0xb4   :  { %2043 = vrot.lane.b32.xlu0 %v2042_v21, %s2981_s16  ;;  %1790 = vrot.lane.b32.xlu2 %v1789_v31, %s2976_s10  ;;  %v2869_v44 = vld [vmem:[%s5217_s0 + $0x122] sm:$0x2]   ;;  %v4873_v46 = vpop.permute.xlu1 %891   ;;  %606 = vst.msk [vmem:[#allocation0] ss:$8 sm:$0xf] %vm605_vm15, %v4645_v10   ;;  %v2186_v63 = vsel %vm29_vm6, %v2883_v41, %v2182_v58 }
  0xb5   :  { %v2870_v45 = vld [vmem:[%s5217_s0 + $0x141] sm:$0x4]   ;;  %v2125_v48 = vsel %vm5_vm0, %v2869_v44, %v2868_v43  ;;  %v2813_v61 = vld [vmem:[%s5217_s0 + $0x25] sm:$0x2]   ;;  %v4904_v62 = vpop.permute.xlu0 %854   ;;  %2187 = vrot.lane.b32.xlu1 %v2186_v63, %s2982_s12  ;;  %v2900_v18 = vld [vmem:[%s5217_s0 + $0x101] sm:$0x1]  }
  0xb6   :  { %v2871_v49 = vld [vmem:[%s5217_s0 + $0x160] sm:$0x8]   ;;  %v2129_v53 = vsel %vm9_vm1, %v2870_v45, %v2125_v48  ;;  %607 = vst.msk [vmem:[#allocation0] ss:$8 sm:$0xf0] %vm605_vm15, %v4645_v10   ;;  %v1874_v10 = vsel %vm5_vm0, %v2813_v61, %v2812_v57 }
  0xb7   :  { %v2872_v50 = vld [vmem:[%s5217_s0 + $0x17f] sm:$0x10]   ;;  %v2133_v60 = vsel %vm13_vm2, %v2871_v49, %v2129_v53  ;;  %v2814_v1 = vld [vmem:[%s5217_s0 + $0x44] sm:$0x4]   ;;  %v2901_v19 = vld [vmem:[%s5217_s0 + $0x120] sm:$0x2]  }
  0xb8   :  { %v2873_v51 = vld [vmem:[%s5217_s0 + $0x19e] sm:$0x20]   ;;  %v2137_v0 = vsel %vm17_vm3, %v2872_v50, %v2133_v60  ;;  %678 = vst.msk [vmem:[#allocation0] ss:$8 sm:$0xf] %vm677_vm7, %v4713_v40   ;;  %v1878_v4 = vsel %vm9_vm1, %v2814_v1, %v1874_v10  ;;  %v2269_v20 = vsel %vm5_vm0, %v2901_v19, %v2900_v18 }
  0xb9   :  { %v2874_v55 = vld [vmem:[%s5217_s0 + $0x1bd] sm:$0x40]   ;;  %v2141_v3 = vsel %vm21_vm4, %v2873_v51, %v2137_v0  ;;  %v2815_v5 = vld [vmem:[%s5217_s0 + $0x63] sm:$0x8]   ;;  %v2902_v21 = vld [vmem:[%s5217_s0 + $0x13f] sm:$0x4]  }
  0xba   :  { %v2875_v56 = vld [vmem:[%s5217_s0 + $0x1dc] sm:$0x80]   ;;  %v2145_v7 = vsel %vm25_vm5, %v2874_v55, %v2141_v3  ;;  %679 = vst.msk [vmem:[#allocation0] ss:$8 sm:$0xf0] %vm677_vm7, %v4713_v40   ;;  %v1882_v40 = vsel %vm13_vm2, %v2815_v5, %v1878_v4  ;;  %v2273_v24 = vsel %vm9_vm1, %v2902_v21, %v2269_v20 }
  0xbb   :  { %v2816_v8 = vld [vmem:[%s5217_s0 + $0x82] sm:$0x10]   ;;  %v2149_v11 = vsel %vm29_vm6, %v2875_v56, %v2145_v7  ;;  %642 = vst.msk [vmem:[#allocation0 + $0x40] ss:$8 sm:$0xf] %vm605_vm15, %v4747_v54   ;;  %v4991_v34 = vpop.permute.xlu2 %1035  }
  0xbc   :  { %v1886_v12 = vsel %vm17_vm3, %v2816_v8, %v1882_v40  ;;  %v2817_v13 = vld [vmem:[%s5217_s0 + $0xa1] sm:$0x20]   ;;  %2150 = vrot.lane.b32.xlu0 %v2149_v11, %s2983_s2  ;;  %644 = vst.msk [vmem:[#allocation0 + $0x40] ss:$8 sm:$0xf0] %vm605_vm15, %v4747_v54   ;;  %v4945_v14 = vpop.permute.xlu1 %998   ;;  %vm1757_vm15 = vcmask 294144  }
  0xbd   :  { %v1890_v54 = vsel %vm21_vm4, %v2817_v13, %v1886_v12  ;;  %v2818_v38 = vld [vmem:[%s5217_s0 + $0xc0] sm:$0x40]   ;;  %v2903_v22 = vld [vmem:[%s5217_s0 + $0x15e] sm:$0x8]   ;;  %v4979_v29 = vpop.permute.xlu0 %963   ;;  %v2836_v47 = vld [vmem:[%s5217_s0 + $0x105] sm:$0x1]  }
  0xbe   :  { %v1894_v16 = vsel %vm25_vm5, %v2818_v38, %v1890_v54  ;;  %v2819_v17 = vld [vmem:[%s5217_s0 + $0xdf] sm:$0x80]   ;;  %v2904_v23 = vld [vmem:[%s5217_s0 + $0x17d] sm:$0x10]   ;;  %v2277_v30 = vsel %vm13_vm2, %v2903_v22, %v2273_v24  ;;  %v2837_v50 = vld [vmem:[%s5217_s0 + $0x124] sm:$0x2]  }
  0xbf   :  { %v1898_v9 = vsel %vm29_vm6, %v2819_v17, %v1894_v16  ;;  %v2905_v26 = vld [vmem:[%s5217_s0 + $0x19c] sm:$0x20]   ;;  %v2281_v35 = vsel %vm17_vm3, %v2904_v23, %v2277_v30  ;;  %714 = vst.msk [vmem:[#allocation0 + $0x40] ss:$8 sm:$0xf] %vm677_vm7, %v4759_v59  }
  0xc0   :  { %1899 = vrot.lane.b32.xlu2 %v1898_v9, %s2980_s27  ;;  %v2906_v27 = vld [vmem:[%s5217_s0 + $0x1bb] sm:$0x40]   ;;  %v2285_v42 = vsel %vm21_vm4, %v2905_v26, %v2281_v35  ;;  %716 = vst.msk [vmem:[#allocation0 + $0x40] ss:$8 sm:$0xf0] %vm677_vm7, %v4759_v59   ;;  %v1981_v59 = vsel %vm5_vm0, %v2837_v50, %v2836_v47  ;;  %vm1829_vm7 = vcmask 261344  }
  0xc1   :  { %v2907_v28 = vld [vmem:[%s5217_s0 + $0x1da] sm:$0x80]   ;;  %v2289_v48 = vsel %vm25_vm5, %v2906_v27, %v2285_v42  ;;  %v2838_v53 = vld [vmem:[%s5217_s0 + $0x143] sm:$0x4]   ;;  %v2861_v8 = vld [vmem:[%s5217_s0 + $0x22] sm:$0x2]  }
  0xc2   :  { %v2892_v31 = vld [vmem:[%s5217_s0 + $0x1] sm:$0x1]   ;;  %v2293_v51 = vsel %vm29_vm6, %v2907_v28, %v2289_v48  ;;  %786 = vst.msk [vmem:[#allocation0 + $0x40] ss:$8 sm:$0xf] %vm749_vm8, %v4798_v15   ;;  %v1985_v57 = vsel %vm9_vm1, %v2838_v53, %v1981_v59 }
  0xc3   :  { %v2893_v32 = vld [vmem:[%s5217_s0 + $0x20] sm:$0x2]   ;;  %2294 = vrot.lane.b32.xlu1 %v2293_v51, %s2984_s19  ;;  %v2839_v58 = vld [vmem:[%s5217_s0 + $0x162] sm:$0x8]   ;;  %v5061_v4 = vpop.permute.xlu2 %1142   ;;  %v2862_v11 = vld [vmem:[%s5217_s0 + $0x41] sm:$0x4]  }
  0xc4   :  { %v2894_v33 = vld [vmem:[%s5217_s0 + $0x3f] sm:$0x4]   ;;  %v2234_v36 = vsel %vm5_vm0, %v2893_v32, %v2892_v31  ;;  %v5030_v55 = vpop.permute.xlu1 %1107   ;;  %788 = vst.msk [vmem:[#allocation0 + $0x40] ss:$8 sm:$0xf0] %vm749_vm8, %v4798_v15   ;;  %v1989_v15 = vsel %vm13_vm2, %v2839_v58, %v1985_v57 }
  0xc5   :  { %v2895_v37 = vld [vmem:[%s5217_s0 + $0x5e] sm:$0x8]   ;;  %v2238_v43 = vsel %vm9_vm1, %v2894_v33, %v2234_v36  ;;  %v2840_v61 = vld [vmem:[%s5217_s0 + $0x181] sm:$0x10]   ;;  %v5053_v1 = vpop.permute.xlu0 %1070   ;;  %v2863_v54 = vld [vmem:[%s5217_s0 + $0x60] sm:$0x8]  }
  0xc6   :  { %v2896_v39 = vld [vmem:[%s5217_s0 + $0x7d] sm:$0x10]   ;;  %v2242_v49 = vsel %vm13_vm2, %v2895_v37, %v2238_v43  ;;  %750 = vst.msk [vmem:[#allocation0] ss:$8 sm:$0xf] %vm749_vm8, %v4821_v25   ;;  %v1993_v0 = vsel %vm17_vm3, %v2840_v61, %v1989_v15 }
  0xc7   :  { %v2897_v41 = vld [vmem:[%s5217_s0 + $0x9c] sm:$0x20]   ;;  %v2246_v52 = vsel %vm17_vm3, %v2896_v39, %v2242_v49  ;;  %v2841_v10 = vld [vmem:[%s5217_s0 + $0x1a0] sm:$0x20]   ;;  %v2864_v38 = vld [vmem:[%s5217_s0 + $0x7f] sm:$0x10]  }
  0xc8   :  { %v2898_v44 = vld [vmem:[%s5217_s0 + $0xbb] sm:$0x40]   ;;  %v2250_v56 = vsel %vm21_vm4, %v2897_v41, %v2246_v52  ;;  %751 = vst.msk [vmem:[#allocation0] ss:$8 sm:$0xf0] %vm749_vm8, %v4821_v25   ;;  %v1997_v25 = vsel %vm21_vm4, %v2841_v10, %v1993_v0  ;;  %vm1901_vm8 = vcmask 228544  }
  0xc9   :  { %v2899_v45 = vld [vmem:[%s5217_s0 + $0xda] sm:$0x80]   ;;  %v2254_v60 = vsel %vm25_vm5, %v2898_v44, %v2250_v56  ;;  %v2842_v3 = vld [vmem:[%s5217_s0 + $0x1bf] sm:$0x40]   ;;  %v2865_v17 = vld [vmem:[%s5217_s0 + $0x9e] sm:$0x20]  }
  0xca   :  { %v2258_v63 = vsel %vm29_vm6, %v2899_v45, %v2254_v60  ;;  %v2001_v5 = vsel %vm25_vm5, %v2842_v3, %v1997_v25  ;;  %v2843_v7 = vld [vmem:[%s5217_s0 + $0x1de] sm:$0x80]   ;;  %822 = vst.msk [vmem:[#allocation0] ss:$8 sm:$0xf] %vm821_vm9, %v4829_v6  }
  0xcb   :  { %2259 = vrot.lane.b32.xlu0 %v2258_v63, %s2984_s19  ;;  %v2005_v40 = vsel %vm29_vm6, %v2843_v7, %v2001_v5  ;;  %823 = vst.msk [vmem:[#allocation0] ss:$8 sm:$0xf0] %vm821_vm9, %v4829_v6   ;;  %v2860_v6 = vld [vmem:[%s5217_s0 + $0x3] sm:$0x1]   ;;  %v1252_v22 = vpop.permute.xlu2 %1251  }
  0xcc   :  { %2006 = vrot.lane.b32.xlu2 %v2005_v40, %s2979_s8  ;;  %894 = vst.msk [vmem:[#allocation0] ss:$8 sm:$0xf] %vm893_vm10, %v4873_v46   ;;  %v1215_v12 = vpop.permute.xlu1 %1214   ;;  %v2866_v18 = vld [vmem:[%s5217_s0 + $0xbd] sm:$0x40]  }
  0xcd   :  { %895 = vst.msk [vmem:[#allocation0] ss:$8 sm:$0xf0] %vm893_vm10, %v4873_v46   ;;  %v2090_v46 = vsel %vm5_vm0, %v2861_v8, %v2860_v6  ;;  %v2867_v19 = vld [vmem:[%s5217_s0 + $0xdc] sm:$0x80]   ;;  %v1180_v9 = vpop.permute.xlu0 %1179  }
  0xce   :  { %858 = vst.msk [vmem:[#allocation0 + $0x40] ss:$8 sm:$0xf] %vm821_vm9, %v4904_v62   ;;  %v2094_v13 = vsel %vm9_vm1, %v2862_v11, %v2090_v46  ;;  %v2884_v21 = vld [vmem:[%s5217_s0 + $0x102] sm:$0x1]  }
  0xcf   :  { %860 = vst.msk [vmem:[#allocation0 + $0x40] ss:$8 sm:$0xf0] %vm821_vm9, %v4904_v62   ;;  %v2098_v62 = vsel %vm13_vm2, %v2863_v54, %v2094_v13  ;;  %v2886_v27 = vld [vmem:[%s5217_s0 + $0x140] sm:$0x4]   ;;  %vm1973_vm9 = vcmask 195744  }
  0xd0   :  { %v2102_v16 = vsel %vm17_vm3, %v2864_v38, %v2098_v62  ;;  %930 = vst.msk [vmem:[#allocation0 + $0x40] ss:$8 sm:$0xf] %vm893_vm10, %v4914_v2   ;;  %v2887_v28 = vld [vmem:[%s5217_s0 + $0x15f] sm:$0x8]  }
  0xd1   :  { %v2106_v20 = vsel %vm21_vm4, %v2865_v17, %v2102_v16  ;;  %932 = vst.msk [vmem:[#allocation0 + $0x40] ss:$8 sm:$0xf0] %vm893_vm10, %v4914_v2   ;;  %v2885_v2 = vld [vmem:[%s5217_s0 + $0x121] sm:$0x2]   ;;  %vm2045_vm10 = vcmask 162944  }
  0xd2   :  { %v2110_v23 = vsel %vm25_vm5, %v2866_v18, %v2106_v20  ;;  %1002 = vst.msk [vmem:[#allocation0 + $0x40] ss:$8 sm:$0xf] %vm965_vm11, %v4945_v14   ;;  %v2197_v26 = vsel %vm5_vm0, %v2885_v2, %v2884_v21  ;;  %v2888_v31 = vld [vmem:[%s5217_s0 + $0x17e] sm:$0x10]   ;;  %vm1037_vm0 = vcmask 622144  }
  0xd3   :  { %v2114_v24 = vsel %vm29_vm6, %v2867_v19, %v2110_v23  ;;  %1004 = vst.msk [vmem:[#allocation0 + $0x40] ss:$8 sm:$0xf0] %vm965_vm11, %v4945_v14   ;;  %v2201_v14 = vsel %vm9_vm1, %v2886_v27, %v2197_v26  ;;  %v2889_v33 = vld [vmem:[%s5217_s0 + $0x19d] sm:$0x20]   ;;  %vm1109_vm1 = vcmask 589344  }
  0xd4   :  { %2115 = vrot.lane.b32.xlu2 %v2114_v24, %s2983_s2  ;;  %966 = vst.msk [vmem:[#allocation0] ss:$8 sm:$0xf] %vm965_vm11, %v4979_v29   ;;  %v2205_v30 = vsel %vm13_vm2, %v2887_v28, %v2201_v14  ;;  %v1324_v32 = vpop.permute.xlu1 %1323   ;;  %v2890_v36 = vld [vmem:[%s5217_s0 + $0x1bc] sm:$0x40]   ;;  %vm1181_vm2 = vcmask 556544  }
  0xd5   :  { %967 = vst.msk [vmem:[#allocation0] ss:$8 sm:$0xf0] %vm965_vm11, %v4979_v29   ;;  %v2209_v29 = vsel %vm17_vm3, %v2888_v31, %v2205_v30  ;;  %v2891_v37 = vld [vmem:[%s5217_s0 + $0x1db] sm:$0x80]   ;;  %v1287_v41 = vpop.permute.xlu0 %1286   ;;  %vm1253_vm3 = vcmask 523744  }
  0xd6   :  { %v2213_v35 = vsel %vm21_vm4, %v2889_v33, %v2209_v29  ;;  %1038 = vst.msk [vmem:[#allocation0] ss:$8 sm:$0xf] %vm1037_vm0, %v4991_v34   ;;  %vm1325_vm4 = vcmask 490944   ;;  %vm2117_vm11 = vcmask 130144  }
  0xd7   :  { %v2217_v39 = vsel %vm25_vm5, %v2890_v36, %v2213_v35  ;;  %1039 = vst.msk [vmem:[#allocation0] ss:$8 sm:$0xf0] %vm1037_vm0, %v4991_v34   ;;  %v1359_v34 = vpop.permute.xlu2 %1358   ;;  %vm1397_vm5 = vcmask 458144  }
  0xd8   :  { %v2221_v42 = vsel %vm29_vm6, %v2891_v37, %v2217_v39  ;;  %1110 = vst.msk [vmem:[#allocation0] ss:$8 sm:$0xf] %vm1109_vm1, %v5030_v55   ;;  %vm1469_vm6 = vcmask 425344  }
  0xd9   :  { %1111 = vst.msk [vmem:[#allocation0] ss:$8 sm:$0xf0] %vm1109_vm1, %v5030_v55  }
  0xda   :  { %1074 = vst.msk [vmem:[#allocation0 + $0x40] ss:$8 sm:$0xf] %vm1037_vm0, %v5053_v1  }
  0xdb   :  { %1076 = vst.msk [vmem:[#allocation0 + $0x40] ss:$8 sm:$0xf0] %vm1037_vm0, %v5053_v1   ;;  %vm2189_vm0 = vcmask 97344  }
  0xdc   :  { %2222 = vrot.lane.b32.xlu2 %v2221_v42, %s2982_s12  ;;  %v1431_v43 = vpop.permute.xlu1 %1430   ;;  %1146 = vst.msk [vmem:[#allocation0 + $0x40] ss:$8 sm:$0xf] %vm1109_vm1, %v5061_v4  }
  0xdd   :  { %1148 = vst.msk [vmem:[#allocation0 + $0x40] ss:$8 sm:$0xf0] %vm1109_vm1, %v5061_v4   ;;  %v1396_v44 = vpop.permute.xlu0 %1395   ;;  %vm2261_vm1 = vcmask 64544  }
  0xde   :  { %1218 = vst.msk [vmem:[#allocation0 + $0x40] ss:$8 sm:$0xf] %vm1181_vm2, %v1215_v12  }
  0xdf   :  { %1220 = vst.msk [vmem:[#allocation0 + $0x40] ss:$8 sm:$0xf0] %vm1181_vm2, %v1215_v12  }
  0xe0   :  { %1182 = vst.msk [vmem:[#allocation0] ss:$8 sm:$0xf] %vm1181_vm2, %v1180_v9  }
  0xe1   :  { %1183 = vst.msk [vmem:[#allocation0] ss:$8 sm:$0xf0] %vm1181_vm2, %v1180_v9  }
  0xe2   :  { %1254 = vst.msk [vmem:[#allocation0] ss:$8 sm:$0xf] %vm1253_vm3, %v1252_v22  }
  0xe3   :  { %1255 = vst.msk [vmem:[#allocation0] ss:$8 sm:$0xf0] %vm1253_vm3, %v1252_v22  }
  0xe4   :  { %v1540_v45 = vpop.permute.xlu1 %1539   ;;  %1326 = vst.msk [vmem:[#allocation0] ss:$8 sm:$0xf] %vm1325_vm4, %v1324_v32  }
  0xe5   :  { %1327 = vst.msk [vmem:[#allocation0] ss:$8 sm:$0xf0] %vm1325_vm4, %v1324_v32   ;;  %v1503_v47 = vpop.permute.xlu0 %1502  }
  0xe6   :  { %1290 = vst.msk [vmem:[#allocation0 + $0x40] ss:$8 sm:$0xf] %vm1253_vm3, %v1287_v41  }
  0xe7   :  { %1292 = vst.msk [vmem:[#allocation0 + $0x40] ss:$8 sm:$0xf0] %vm1253_vm3, %v1287_v41  }
  0xe8   :  { %1362 = vst.msk [vmem:[#allocation0 + $0x40] ss:$8 sm:$0xf] %vm1325_vm4, %v1359_v34   ;;  %v1468_v48 = vpop.permute.xlu2 %1467  }
  0xe9   :  { %1364 = vst.msk [vmem:[#allocation0 + $0x40] ss:$8 sm:$0xf0] %vm1325_vm4, %v1359_v34  }
  0xea   :  { %1434 = vst.msk [vmem:[#allocation0 + $0x40] ss:$8 sm:$0xf] %vm1397_vm5, %v1431_v43  }
  0xeb   :  { %1436 = vst.msk [vmem:[#allocation0 + $0x40] ss:$8 sm:$0xf0] %vm1397_vm5, %v1431_v43  }
  0xec   :  { %v1647_v49 = vpop.permute.xlu1 %1646   ;;  %1398 = vst.msk [vmem:[#allocation0] ss:$8 sm:$0xf] %vm1397_vm5, %v1396_v44  }
  0xed   :  { %1399 = vst.msk [vmem:[#allocation0] ss:$8 sm:$0xf0] %vm1397_vm5, %v1396_v44   ;;  %v1612_v50 = vpop.permute.xlu0 %1611  }
  0xee   :  { %1470 = vst.msk [vmem:[#allocation0] ss:$8 sm:$0xf] %vm1469_vm6, %v1468_v48  }
  0xef   :  { %1471 = vst.msk [vmem:[#allocation0] ss:$8 sm:$0xf0] %vm1469_vm6, %v1468_v48  }
  0xf0   :  { %1542 = vst.msk [vmem:[#allocation0] ss:$8 sm:$0xf] %vm1541_vm12, %v1540_v45  }
  0xf1   :  { %1543 = vst.msk [vmem:[#allocation0] ss:$8 sm:$0xf0] %vm1541_vm12, %v1540_v45  }
  0xf2   :  { %1506 = vst.msk [vmem:[#allocation0 + $0x40] ss:$8 sm:$0xf] %vm1469_vm6, %v1503_v47  }
  0xf3   :  { %1508 = vst.msk [vmem:[#allocation0 + $0x40] ss:$8 sm:$0xf0] %vm1469_vm6, %v1503_v47  }
  0xf4   :  { %v1756_v51 = vpop.permute.xlu1 %1755   ;;  %1614 = vst.msk [vmem:[#allocation0] ss:$8 sm:$0xf] %vm1613_vm13, %v1612_v50  }
  0xf5   :  { %v1575_v52 = vpop.permute.xlu2 %1574   ;;  %v1719_v59 = vpop.permute.xlu0 %1718   ;;  %1615 = vst.msk [vmem:[#allocation0] ss:$8 sm:$0xf0] %vm1613_vm13, %v1612_v50  }
  0xf6   :  { %1578 = vst.msk [vmem:[#allocation0 + $0x40] ss:$8 sm:$0xf] %vm1541_vm12, %v1575_v52  }
  0xf7   :  { %1580 = vst.msk [vmem:[#allocation0 + $0x40] ss:$8 sm:$0xf0] %vm1541_vm12, %v1575_v52  }
  0xf8   :  { %1650 = vst.msk [vmem:[#allocation0 + $0x40] ss:$8 sm:$0xf] %vm1613_vm13, %v1647_v49  }
  0xf9   :  { %1652 = vst.msk [vmem:[#allocation0 + $0x40] ss:$8 sm:$0xf0] %vm1613_vm13, %v1647_v49  }
  0xfa   :  { %1722 = vst.msk [vmem:[#allocation0 + $0x40] ss:$8 sm:$0xf] %vm1685_vm14, %v1719_v59  }
  0xfb   :  { %1724 = vst.msk [vmem:[#allocation0 + $0x40] ss:$8 sm:$0xf0] %vm1685_vm14, %v1719_v59  }
 0x101   :  { %v1684_v53 = vpop.permute.xlu2 %1683  }
 0x102   :  { %1686 = vst.msk [vmem:[#allocation0] ss:$8 sm:$0xf] %vm1685_vm14, %v1684_v53  }
 0x103   :  { %1687 = vst.msk [vmem:[#allocation0] ss:$8 sm:$0xf0] %vm1685_vm14, %v1684_v53  }
 0x104   :  { %1758 = vst.msk [vmem:[#allocation0] ss:$8 sm:$0xf] %vm1757_vm15, %v1756_v51  }
 0x105   :  { %1759 = vst.msk [vmem:[#allocation0] ss:$8 sm:$0xf0] %vm1757_vm15, %v1756_v51   ;;  %v1863_v55 = vpop.permute.xlu1 %1862  }
 0x10d   :  { %v1828_v56 = vpop.permute.xlu0 %1827  }
 0x10e   :  { %1830 = vst.msk [vmem:[#allocation0] ss:$8 sm:$0xf] %vm1829_vm7, %v1828_v56   ;;  %v1791_v57 = vpop.permute.xlu2 %1790  }
 0x10f   :  { %1831 = vst.msk [vmem:[#allocation0] ss:$8 sm:$0xf0] %vm1829_vm7, %v1828_v56  }
 0x110   :  { %1794 = vst.msk [vmem:[#allocation0 + $0x40] ss:$8 sm:$0xf] %vm1757_vm15, %v1791_v57   ;;  %v1972_v58 = vpop.permute.xlu1 %1971  }
 0x111   :  { %1796 = vst.msk [vmem:[#allocation0 + $0x40] ss:$8 sm:$0xf0] %vm1757_vm15, %v1791_v57  }
 0x112   :  { %1866 = vst.msk [vmem:[#allocation0 + $0x40] ss:$8 sm:$0xf] %vm1829_vm7, %v1863_v55  }
 0x113   :  { %1868 = vst.msk [vmem:[#allocation0 + $0x40] ss:$8 sm:$0xf0] %vm1829_vm7, %v1863_v55  }
 0x115   :  { %v1935_v60 = vpop.permute.xlu0 %1934  }
 0x116   :  { %1938 = vst.msk [vmem:[#allocation0 + $0x40] ss:$8 sm:$0xf] %vm1901_vm8, %v1935_v60  }
 0x117   :  { %1940 = vst.msk [vmem:[#allocation0 + $0x40] ss:$8 sm:$0xf0] %vm1901_vm8, %v1935_v60  }
 0x11a   :  { %v1900_v15 = vpop.permute.xlu2 %1899  }
 0x11b   :  { %1902 = vst.msk [vmem:[#allocation0] ss:$8 sm:$0xf] %vm1901_vm8, %v1900_v15  }
 0x11c   :  { %1903 = vst.msk [vmem:[#allocation0] ss:$8 sm:$0xf0] %vm1901_vm8, %v1900_v15  }
 0x11d   :  { %1974 = vst.msk [vmem:[#allocation0] ss:$8 sm:$0xf] %vm1973_vm9, %v1972_v58  }
 0x11e   :  { %1975 = vst.msk [vmem:[#allocation0] ss:$8 sm:$0xf0] %vm1973_vm9, %v1972_v58   ;;  %v2079_v61 = vpop.permute.xlu1 %2078  }
 0x126   :  { %v2044_v63 = vpop.permute.xlu0 %2043   ;;  %v2007_v0 = vpop.permute.xlu2 %2006  }
 0x127   :  { %2046 = vst.msk [vmem:[#allocation0] ss:$8 sm:$0xf] %vm2045_vm10, %v2044_v63   ;;  %v2188_v10 = vpop.permute.xlu1 %2187  }
 0x128   :  { %2047 = vst.msk [vmem:[#allocation0] ss:$8 sm:$0xf0] %vm2045_vm10, %v2044_v63  }
 0x129   :  { %2010 = vst.msk [vmem:[#allocation0 + $0x40] ss:$8 sm:$0xf] %vm1973_vm9, %v2007_v0  }
 0x12a   :  { %2012 = vst.msk [vmem:[#allocation0 + $0x40] ss:$8 sm:$0xf0] %vm1973_vm9, %v2007_v0  }
 0x12b   :  { %2082 = vst.msk [vmem:[#allocation0 + $0x40] ss:$8 sm:$0xf] %vm2045_vm10, %v2079_v61  }
 0x12c   :  { %2084 = vst.msk [vmem:[#allocation0 + $0x40] ss:$8 sm:$0xf0] %vm2045_vm10, %v2079_v61  }
 0x12e   :  { %v2116_v1 = vpop.permute.xlu2 %2115   ;;  %v2151_v25 = vpop.permute.xlu0 %2150  }
 0x12f   :  { %2118 = vst.msk [vmem:[#allocation0] ss:$8 sm:$0xf] %vm2117_vm11, %v2116_v1  }
 0x130   :  { %2119 = vst.msk [vmem:[#allocation0] ss:$8 sm:$0xf0] %vm2117_vm11, %v2116_v1  }
 0x131   :  { %2190 = vst.msk [vmem:[#allocation0] ss:$8 sm:$0xf] %vm2189_vm0, %v2188_v10  }
 0x132   :  { %2191 = vst.msk [vmem:[#allocation0] ss:$8 sm:$0xf0] %vm2189_vm0, %v2188_v10  }
 0x133   :  { %2154 = vst.msk [vmem:[#allocation0 + $0x40] ss:$8 sm:$0xf] %vm2117_vm11, %v2151_v25  }
 0x134   :  { %2156 = vst.msk [vmem:[#allocation0 + $0x40] ss:$8 sm:$0xf0] %vm2117_vm11, %v2151_v25  }
 0x135   :  { %v2295_v4 = vpop.permute.xlu1 %2294  }
 0x136   :  { %v2223_v3 = vpop.permute.xlu2 %2222  }
 0x137   :  { %2226 = vst.msk [vmem:[#allocation0 + $0x40] ss:$8 sm:$0xf] %vm2189_vm0, %v2223_v3  }
 0x138   :  { %2228 = vst.msk [vmem:[#allocation0 + $0x40] ss:$8 sm:$0xf0] %vm2189_vm0, %v2223_v3  }
 0x139   :  { %2298 = vst.msk [vmem:[#allocation0 + $0x40] ss:$8 sm:$0xf] %vm2261_vm1, %v2295_v4  }
 0x13a   :  { %2300 = vst.msk [vmem:[#allocation0 + $0x40] ss:$8 sm:$0xf0] %vm2261_vm1, %v2295_v4  }
 0x13d   :  { %v2260_v5 = vpop.permute.xlu0 %2259  }
 0x13e   :  { %2262 = vst.msk [vmem:[#allocation0] ss:$8 sm:$0xf] %vm2261_vm1, %v2260_v5  }
 0x13f   :  { %2263 = vst.msk [vmem:[#allocation0] ss:$8 sm:$0xf0] %vm2261_vm1, %v2260_v5  }
 0x140   :  { %v2350_v7 = vld [vmem:[#allocation0 + $0x40] sm:$0x1]  ;;  %v2356_v40 = vld [vmem:[#allocation0 + $0x48] sm:$0x1]  ;;  %v2362_v6 = vld [vmem:[#allocation0 + $0x50] sm:$0x1] }
 0x141   :  { %2915 = vst [vmem:[%s5218_s1 + $0x8] sm:$0x1] %v2350_v7  ;;  %v2368_v8 = vld [vmem:[#allocation0 + $0x58] sm:$0x1]  ;;  %v2374_v46 = vld [vmem:[#allocation0 + $0x60] sm:$0x1] }
 0x142   :  { %2916 = vst [vmem:[%s5218_s1 + $0x9] sm:$0x1] %v2356_v40  ;;  %v2380_v11 = vld [vmem:[#allocation0 + $0x68] sm:$0x1]  ;;  %v2386_v12 = vld [vmem:[#allocation0 + $0x70] sm:$0x1] }
 0x143   :  { %2917 = vst [vmem:[%s5218_s1 + $0xa] sm:$0x1] %v2362_v6  ;;  %v2392_v13 = vld [vmem:[#allocation0 + $0x78] sm:$0x1] }
 0x144   :  { %2918 = vst [vmem:[%s5218_s1 + $0xb] sm:$0x1] %v2368_v8 }
 0x145   :  { %2919 = vst [vmem:[%s5218_s1 + $0xc] sm:$0x1] %v2374_v46  ;;  %v2303_v54 = vld [vmem:[#allocation0] sm:$0x1]  ;;  %v2308_v62 = vld [vmem:[#allocation0 + $0x8] sm:$0x1] }
 0x146   :  { %2920 = vst [vmem:[%s5218_s1 + $0xd] sm:$0x1] %v2380_v11  ;;  %v2314_v38 = vld [vmem:[#allocation0 + $0x10] sm:$0x1]  ;;  %v2320_v16 = vld [vmem:[#allocation0 + $0x18] sm:$0x1] }
 0x147   :  { %2921 = vst [vmem:[%s5218_s1 + $0xe] sm:$0x1] %v2386_v12  ;;  %v2326_v17 = vld [vmem:[#allocation0 + $0x20] sm:$0x1]  ;;  %v2332_v18 = vld [vmem:[#allocation0 + $0x28] sm:$0x1] }
 0x148   :  { %2922 = vst [vmem:[%s5218_s1 + $0xf] sm:$0x1] %v2392_v13  ;;  %v2338_v19 = vld [vmem:[#allocation0 + $0x30] sm:$0x1]  ;;  %v2344_v9 = vld [vmem:[#allocation0 + $0x38] sm:$0x1] }
 0x149   :  { %2306 = vst [vmem:[%s5218_s1] sm:$0x1] %v2303_v54 }
 0x14a   :  { %2908 = vst [vmem:[%s5218_s1 + $0x1] sm:$0x1] %v2308_v62 }
 0x14b   :  { %2909 = vst [vmem:[%s5218_s1 + $0x2] sm:$0x1] %v2314_v38 }
 0x14c   :  { %2910 = vst [vmem:[%s5218_s1 + $0x3] sm:$0x1] %v2320_v16 }
 0x14d   :  { %2911 = vst [vmem:[%s5218_s1 + $0x4] sm:$0x1] %v2326_v17 }
 0x14e   :  { %2912 = vst [vmem:[%s5218_s1 + $0x5] sm:$0x1] %v2332_v18 }
 0x14f   :  { %2913 = vst [vmem:[%s5218_s1 + $0x6] sm:$0x1] %v2338_v19 }
 0x150   :  { %2914 = vst [vmem:[%s5218_s1 + $0x7] sm:$0x1] %v2344_v9 }

// kernel: resblock_nchw.5
= control target key start
LH: loop header
LB: loop body
LE: loop exit
PB: predicated region body
PF: predicated region fallthrough
CT: control target
= control target key end

     0   :  { %v160_v1 = vmov 857870592   ;;  %v161_v3 = vmov 2003195204   ;;  %vm129_vm0 = vcmask 1040384   ;;  %vm131_vm1 = vcmask 1042434   ;;  %s231_s0 = inlined_call_operand.vmem [shape: bf16[1,2048], index: 0, kind: input, shape index: {}]   ;;  %s232_s1 = inlined_call_operand.vmem [shape: f32[1,2048], index: 1, kind: input, shape index: {}, may-alias: {1,4}]   ;;  %s233_s2 = inlined_call_operand.vmem [shape: f32[1,2048], index: 2, kind: input, shape index: {}]   ;;  %s234_s3 = inlined_call_operand.vmem [shape: f32[1,2048], index: 3, kind: input, shape index: {}]   ;;  %s235_s4 = inlined_call_operand.vmem [shape: f32[1,2048], index: 4, kind: output, shape index: {}, may-alias: {1,4}]  }
   0x1   :  { %v17_v0 = vld [vmem:[%s231_s0] sm:$0xff]  ;;  %v28_v2 = vunpack.c.l.s4 %v160_v1  ;;  %v32_v4 = vunpack.c.l.s4 %v161_v3  ;;  %v18_v7 = vld [vmem:[%s231_s0 + $0x8] sm:$0xff]  ;;  %vm133_vm2 = vcmask 1041408   ;;  %vm135_vm3 = vcmask 1044484  }
   0x2   :  { %v23_v5 = vld [vmem:[%s233_s2] sm:$0xff]  ;;  %v19_v8 = vunpack.c.l.bf16 %v17_v0  ;;  %v20_v9 = vunpack.c.h.bf16 %v17_v0  ;;  %v24_v13 = vld [vmem:[%s233_s2 + $0x8] sm:$0xff]  ;;  %v21_v14 = vunpack.c.l.bf16 %v18_v7  ;;  %v22_v15 = vunpack.c.h.bf16 %v18_v7 }
   0x3   :  { %v51_v6 = vld [vmem:[%s234_s3] sm:$0xff]  ;;  %v29_v10 = vunpack.c.0.s8 %v28_v2  ;;  %v33_v11 = vunpack.c.0.s8 %v32_v4  ;;  %v52_v16 = vld [vmem:[%s234_s3 + $0x8] sm:$0xff]  ;;  %vm137_vm4 = vcmask 1046534   ;;  %vm139_vm5 = vcmask 1045508  }
   0x4   :  { %v79_v12 = vld [vmem:[%s232_s1] sm:$0xff]  ;;  %v80_v21 = vld [vmem:[%s232_s1 + $0x8] sm:$0xff]  ;;  %vm141_vm6 = vcmask 1043456  }
   0x5   :  { %v30_v17 = vperm.slane %v23_v5, %v29_v10  ;;  %v34_v18 = vperm.slane %v23_v5, %v33_v11  ;;  %v58_v19 = vperm.slane %v51_v6, %v29_v10  ;;  %v62_v20 = vperm.slane %v51_v6, %v33_v11 }
   0x6   :  { %v86_v22 = vperm.slane %v79_v12, %v29_v10  ;;  %v90_v23 = vperm.slane %v79_v12, %v33_v11  ;;  %v38_v24 = vperm.slane %v24_v13, %v29_v10  ;;  %v42_v25 = vperm.slane %v24_v13, %v33_v11 }
   0x7   :  { %v47_v26 = vmul.f32 %v30_v17, %v19_v8  ;;  %v48_v27 = vmul.f32 %v34_v18, %v20_v9  ;;  %v66_v28 = vperm.slane %v52_v16, %v29_v10  ;;  %v70_v29 = vperm.slane %v52_v16, %v33_v11 }
   0x8   :  { %v49_v30 = vmul.f32 %v38_v24, %v21_v14  ;;  %v50_v31 = vmul.f32 %v42_v25, %v22_v15  ;;  %v94_v32 = vperm.slane %v80_v21, %v29_v10  ;;  %v98_v33 = vperm.slane %v80_v21, %v33_v11 }
   0x9   :  { %v75_v34 = vadd.f32 %v58_v19, %v47_v26  ;;  %v76_v35 = vadd.f32 %v62_v20, %v48_v27 }
   0xa   :  { %v77_v36 = vadd.f32 %v66_v28, %v49_v30  ;;  %v78_v37 = vadd.f32 %v70_v29, %v50_v31 }
   0xb   :  { %v103_v38 = vadd.f32 %v86_v22, %v75_v34  ;;  %v104_v39 = vadd.f32 %v90_v23, %v76_v35 }
   0xc   :  { %v105_v40 = vadd.f32 %v94_v32, %v77_v36  ;;  %v106_v41 = vadd.f32 %v98_v33, %v78_v37 }
   0xd   :  { %v107_v42 = vmax.f32 %v103_v38, 0.0  ;;  %v108_v43 = vmax.f32 %v104_v39, 0.0 }
   0xe   :  { %v109_v44 = vmax.f32 %v105_v40, 0.0  ;;  %v110_v45 = vmax.f32 %v106_v41, 0.0 }
   0xf   :  { %v115_v46 = vrot.slane %v107_v42, 1  ;;  %v116_v47 = vrot.slane %v107_v42, 2  ;;  %v117_v48 = vrot.slane %v107_v42, 3  ;;  %v118_v49 = vrot.slane %v108_v43, 4 }
  0x10   :  { %v119_v50 = vrot.slane %v108_v43, 5  ;;  %v120_v51 = vrot.slane %v108_v43, 6  ;;  %v121_v52 = vrot.slane %v108_v43, 7  ;;  %v122_v53 = vrot.slane %v109_v44, 1 }
  0x11   :  { %v130_v54 = vsel %vm129_vm0, %v107_v42, %v115_v46  ;;  %v132_v55 = vsel %vm131_vm1, %v116_v47, %v117_v48  ;;  %v123_v56 = vrot.slane %v109_v44, 2  ;;  %v124_v57 = vrot.slane %v109_v44, 3 }
  0x12   :  { %v134_v58 = vsel %vm133_vm2, %v130_v54, %v132_v55  ;;  %v136_v59 = vsel %vm135_vm3, %v118_v49, %v119_v50  ;;  %v138_v60 = vsel %vm137_vm4, %v120_v51, %v121_v52  ;;  %v125_v61 = vrot.slane %v110_v45, 4 }
  0x13   :  { %v140_v62 = vsel %vm139_vm5, %v136_v59, %v138_v60  ;;  %v126_v63 = vrot.slane %v110_v45, 5  ;;  %v127_v0 = vrot.slane %v110_v45, 6  ;;  %v128_v1 = vrot.slane %v110_v45, 7 }
  0x14   :  { %v142_v2 = vsel %vm141_vm6, %v134_v58, %v140_v62  ;;  %v143_v3 = vsel %vm129_vm0, %v109_v44, %v122_v53  ;;  %v144_v4 = vsel %vm131_vm1, %v123_v56, %v124_v57 }
  0x15   :  { %152 = vst [vmem:[%s235_s4] sm:$0xff] %v142_v2  ;;  %v145_v5 = vsel %vm133_vm2, %v143_v3, %v144_v4  ;;  %v146_v6 = vsel %vm135_vm3, %v125_v61, %v126_v63  ;;  %v147_v7 = vsel %vm137_vm4, %v127_v0, %v128_v1 }
  0x16   :  { %v148_v8 = vsel %vm139_vm5, %v146_v6, %v147_v7 }
  0x17   :  { %v149_v9 = vsel %vm141_vm6, %v145_v5, %v148_v8 }
  0x18   :  { %153 = vst [vmem:[%s235_s4 + $0x8] sm:$0xff] %v149_v9 }

// kernel: resblock_nchw.4
= control target key start
LH: loop header
LB: loop body
LE: loop exit
PB: predicated region body
PF: predicated region fallthrough
CT: control target
= control target key end

     0   :  { %s2613_s18 = smov 0   ;;  %s4524_s0 = inlined_call_operand.vmem [shape: bf16[2,16,16,4], index: 0, kind: input, shape index: {}]   ;;  %s4525_s1 = inlined_call_operand.vmem [shape: f32[1,4], index: 1, kind: input, shape index: {}]   ;;  %s4526_s2 = inlined_call_operand.vmem [shape: f32[1,4], index: 2, kind: input, shape index: {}]   ;;  %s4527_s3 = inlined_call_operand.vmem [shape: bf16[36,4], index: 3, kind: input, shape index: {}]   ;;  %s4528_s4 = inlined_call_operand.vmem [shape: bf16[2,16,16,4], index: 4, kind: output, shape index: {0}]   ;;  %s4529_s5 = inlined_call_operand.vmem [shape: f32[2,2,4], index: 5, kind: output, shape index: {1}]  }
   0x1 LB: > { %s2415_s19 = sadd.s32 4294967295, %s2572_s18   ;;  %p2419_p0 = scmp.ge.s32.totalorder %s2572_s18, 1  ;;  %s2572_s18 = sphi %s2613_s18, %s16_s18  }
   0x2   : > { %p190_p1 = scmp.lt.s32.totalorder %s2572_s18, 3 }
   0x4   : > { %p191_p2 = pnand %p2419_p0, %p190_p1 }
   0x6   : > { %194 = sbr.rel (%p191_p2) target bundleno = 1126 (0x466), region = 36 }
   0xb   : > { %vm405_vm0 = vcmask 31744   ;;  %v2574_v0 = vmov 0.0   ;;  %vm633_vm1 = vcmask 1046528   ;;  %s2575_s20 = smov 4   ;;  %p222_p3 = scmp.lt.s32.totalorder %s2415_s19, 1  ;;  %vm408_vm2 = vcmask 25600  }
   0xc   : > { %406 = vst.msk [vmem:[#allocation2] sm:$0xff] %vm405_vm0, %v2574_v0  ;;  %v2732_v9 = vld [vmem:[%s4525_s1] ss:$0 sm:$0xff]  ;;  %vm810_vm3 = vcmask 64544   ;;  %vm843_vm4 = vcmask 1045504   ;;  %s2576_s29 = smov 8  }
   0xd   : > { %407 = vst.msk [vmem:[#allocation2 + $0x8] sm:$0xff] %vm405_vm0, %v2574_v0  ;;  %s4730_s19 = smov (!%p222_p3, %s2415_s19), 1  ;;  %v2748_v16 = vld [vmem:[%s4526_s2] ss:$0 sm:$0xff]  ;;  %s2577_s30 = smov 12   ;;  %vm1020_vm5 = vcmask 97344  }
   0xe   : > { %410 = vst.msk [vmem:[#allocation2 + $0x18] sm:$0xff] %vm405_vm0, %v2574_v0  ;;  %s2451_s21 = sshll.u32 %s4730_s19, 7  ;;  %s2578_s10 = smov 16   ;;  %vm1151_vm6 = vcmask 130144   ;;  %vm1286_vm7 = vcmask 162944   ;;  %vm1420_vm8 = vcmask 195744  }
   0xf   : > { %411 = vst.msk [vmem:[#allocation2 + $0x20] sm:$0xff] %vm405_vm0, %v2574_v0  ;;  %s2713_s24 = scalar_lea.vmem %s4524_s0, %s2451_s21  ;;  %s2579_s11 = smov 20   ;;  %vm1965_vm9 = vcmask 1041408   ;;  %vm1551_vm10 = vcmask 228544   ;;  %vm1686_vm11 = vcmask 261344   ;;  %vm1820_vm12 = vcmask 294144  }
  0x10   : > { %413 = vst.msk [vmem:[#allocation2 + $0x30] sm:$0xff] %vm405_vm0, %v2574_v0  ;;  %v2456_v6 = vld [vmem:[%s2713_s24] sm:$0xff]   ;;  %v2520_v7 = vld [vmem:[%s2713_s24 + $0x10] sm:$0xff]   ;;  %v2521_v11 = vld [vmem:[%s2713_s24 + $0x18] sm:$0xff]   ;;  %s2580_s12 = smov 24   ;;  %s2581_s13 = smov 32  }
  0x11   : > { %414 = vst.msk [vmem:[#allocation2 + $0x38] sm:$0xff] %vm405_vm0, %v2574_v0  ;;  %v2457_v8 = vunpack.c.l.bf16 %v2456_v6  ;;  %v2458_v10 = vunpack.c.h.bf16 %v2456_v6  ;;  %v2465_v12 = vunpack.c.l.bf16 %v2520_v7  ;;  %v2466_v13 = vunpack.c.h.bf16 %v2520_v7  ;;  %v2523_v14 = vld [vmem:[%s2713_s24 + $0x28] sm:$0xff]   ;;  %v2522_v43 = vld [vmem:[%s2713_s24 + $0x20] sm:$0xff]   ;;  %v2524_v49 = vld [vmem:[%s2713_s24 + $0x30] sm:$0xff]   ;;  %s2582_s14 = smov 28   ;;  %s4015_s26 = scalar_lea.vmem %s4528_s4, %s2451_s21 }
  0x12   : > { %416 = vst.msk [vmem:[#allocation2 + $0x48] sm:$0xff] %vm405_vm0, %v2574_v0  ;;  %v2469_v17 = vunpack.c.l.bf16 %v2521_v11  ;;  %v2470_v20 = vunpack.c.h.bf16 %v2521_v11  ;;  %v2477_v23 = vunpack.c.l.bf16 %v2523_v14  ;;  %v2478_v25 = vunpack.c.h.bf16 %v2523_v14  ;;  %v2519_v31 = vld [vmem:[%s2713_s24 + $0x8] sm:$0xff]   ;;  %v2526_v56 = vld [vmem:[%s2713_s24 + $0x40] sm:$0xff]   ;;  %s2424_s21 = sshll.u32 %s4730_s19, 1 }
  0x13   : > { %v2635_v1 = vld [vmem:[#allocation2] sm:$0xff]  ;;  %417 = vst.msk [vmem:[#allocation2 + $0x50] sm:$0xff] %vm405_vm0, %v2574_v0  ;;  %v306_v15 = vmul.f32 %v2732_v9, %v2457_v8  ;;  %v307_v19 = vmul.f32 %v2732_v9, %v2458_v10  ;;  %v310_v22 = vmul.f32 %v2732_v9, %v2465_v12  ;;  %v311_v24 = vmul.f32 %v2732_v9, %v2466_v13  ;;  %v2525_v13 = vld [vmem:[%s2713_s24 + $0x38] sm:$0xff]  }
  0x14   : > { %v2639_v2 = vld [vmem:[#allocation2 + $0x8] sm:$0xff]  ;;  %v634_v3 = vrot.slane %v2635_v1, 1  ;;  %419 = vst.msk [vmem:[#allocation2 + $0x60] sm:$0xff] %vm405_vm0, %v2574_v0  ;;  %v312_v28 = vmul.f32 %v2732_v9, %v2469_v17  ;;  %v313_v30 = vmul.f32 %v2732_v9, %v2470_v20  ;;  %v316_v33 = vmul.f32 %v2732_v9, %v2477_v23 }
  0x15   : > { %v635_v4 = vrot.slane %v2639_v2, 1  ;;  %420 = vst.msk [vmem:[#allocation2 + $0x68] sm:$0xff] %vm405_vm0, %v2574_v0  ;;  %v341_v27 = vadd.f32 %v2748_v16, %v306_v15  ;;  %v342_v29 = vadd.f32 %v2748_v16, %v307_v19  ;;  %v345_v32 = vadd.f32 %v2748_v16, %v310_v22 }
  0x16   : > { %422 = vst.msk [vmem:[#allocation2 + $0x78] sm:$0xff] %vm405_vm0, %v2574_v0  ;;  %v346_v34 = vadd.f32 %v2748_v16, %v311_v24  ;;  %v317_v35 = vmul.f32 %v2732_v9, %v2478_v25  ;;  %v347_v37 = vadd.f32 %v2748_v16, %v312_v28  ;;  %v2461_v38 = vunpack.c.l.bf16 %v2519_v31 }
  0x17   : > { %v636_v5 = vsel %vm633_vm1, %v634_v3, %v635_v4  ;;  %423 = vst.msk [vmem:[#allocation2 + $0x80] sm:$0xff] %vm405_vm0, %v2574_v0  ;;  %v373_v36 = vmax.f32 %v341_v27, 0.0  ;;  %v374_v39 = vmax.f32 %v342_v29, 0.0  ;;  %v348_v40 = vadd.f32 %v2748_v16, %v313_v30 }
  0x18   : > { %714 = vrot.lane.b32.xlu0 %v636_v5, %s2575_s20  ;;  %425 = vst.msk [vmem:[#allocation2 + $0x90] sm:$0xff] %vm405_vm0, %v2574_v0  ;;  %v377_v41 = vmax.f32 %v345_v32, 0.0  ;;  %v351_v42 = vadd.f32 %v2748_v16, %v316_v33  ;;  %v378_v44 = vmax.f32 %v346_v34, 0.0  ;;  %v352_v45 = vadd.f32 %v2748_v16, %v317_v35  ;;  %v2527_v34 = vld [vmem:[%s2713_s24 + $0x48] sm:$0xff]  }
  0x19   : > { %426 = vst.msk [vmem:[#allocation2 + $0x98] sm:$0xff] %vm405_vm0, %v2574_v0  ;;  %v379_v46 = vmax.f32 %v347_v37, 0.0  ;;  %v2462_v47 = vunpack.c.h.bf16 %v2519_v31  ;;  %v308_v48 = vmul.f32 %v2732_v9, %v2461_v38  ;;  %v380_v50 = vmax.f32 %v348_v40, 0.0 }
  0x1a   : > { %428 = vst.msk [vmem:[#allocation2 + $0xa8] sm:$0xff] %vm405_vm0, %v2574_v0  ;;  %v2473_v51 = vunpack.c.l.bf16 %v2522_v43  ;;  %v383_v52 = vmax.f32 %v351_v42, 0.0  ;;  %v2474_v53 = vunpack.c.h.bf16 %v2522_v43  ;;  %v384_v54 = vmax.f32 %v352_v45, 0.0  ;;  %v2529_v45 = vld [vmem:[%s2713_s24 + $0x58] sm:$0xff]  }
  0x1b   : > { %429 = vst.msk [vmem:[#allocation2 + $0xb0] sm:$0xff] %vm405_vm0, %v2574_v0  ;;  %v2481_v55 = vunpack.c.l.bf16 %v2524_v49  ;;  %v309_v57 = vmul.f32 %v2732_v9, %v2462_v47  ;;  %v343_v58 = vadd.f32 %v2748_v16, %v308_v48  ;;  %v2482_v60 = vunpack.c.h.bf16 %v2524_v49 }
  0x1c   : > { %431 = vst.msk [vmem:[#allocation2 + $0xc0] sm:$0xff] %vm405_vm0, %v2574_v0  ;;  %v314_v59 = vmul.f32 %v2732_v9, %v2473_v51  ;;  %v315_v61 = vmul.f32 %v2732_v9, %v2474_v53  ;;  %v2489_v62 = vunpack.c.l.bf16 %v2526_v56  ;;  %v2490_v3 = vunpack.c.h.bf16 %v2526_v56 }
  0x1d   : > { %432 = vst.msk [vmem:[#allocation2 + $0xc8] sm:$0xff] %vm405_vm0, %v2574_v0  ;;  %v344_v6 = vadd.f32 %v2748_v16, %v309_v57  ;;  %v375_v7 = vmax.f32 %v343_v58, 0.0  ;;  %v319_v12 = vmul.f32 %v2732_v9, %v2482_v60  ;;  %v2485_v28 = vunpack.c.l.bf16 %v2525_v13  ;;  %v2528_v58 = vld [vmem:[%s2713_s24 + $0x50] sm:$0xff]  }
  0x1e   : > { %434 = vst.msk [vmem:[#allocation2 + $0xd8] sm:$0xff] %vm405_vm0, %v2574_v0  ;;  %v349_v11 = vadd.f32 %v2748_v16, %v314_v59  ;;  %v350_v19 = vadd.f32 %v2748_v16, %v315_v61  ;;  %v322_v20 = vmul.f32 %v2732_v9, %v2489_v62  ;;  %v323_v24 = vmul.f32 %v2732_v9, %v2490_v3 }
  0x1f   : > { %435 = vst.msk [vmem:[#allocation2 + $0xe0] sm:$0xff] %vm405_vm0, %v2574_v0  ;;  %v376_v27 = vmax.f32 %v344_v6, 0.0  ;;  %v354_v33 = vadd.f32 %v2748_v16, %v319_v12  ;;  %v2486_v38 = vunpack.c.h.bf16 %v2525_v13  ;;  %v320_v43 = vmul.f32 %v2732_v9, %v2485_v28  ;;  %v2530_v28 = vld [vmem:[%s2713_s24 + $0x60] sm:$0xff]  }
  0x20   : > { %437 = vst.msk [vmem:[#allocation2 + $0xf0] sm:$0xff] %vm405_vm0, %v2574_v0  ;;  %v381_v32 = vmax.f32 %v349_v11, 0.0  ;;  %v357_v37 = vadd.f32 %v2748_v16, %v322_v20  ;;  %v358_v42 = vadd.f32 %v2748_v16, %v323_v24  ;;  %v2494_v51 = vunpack.c.h.bf16 %v2527_v34 }
  0x21   : > { %438 = vst.msk [vmem:[#allocation2 + $0xf8] sm:$0xff] %vm405_vm0, %v2574_v0  ;;  %v386_v47 = vmax.f32 %v354_v33, 0.0  ;;  %v355_v56 = vadd.f32 %v2748_v16, %v320_v43  ;;  %v2502_v60 = vunpack.c.h.bf16 %v2529_v45  ;;  %v2505_v43 = vunpack.c.l.bf16 %v2530_v28 }
  0x22   : > { %440 = vst.msk [vmem:[#allocation2 + $0x108] sm:$0xff] %vm405_vm0, %v2574_v0  ;;  %v389_v49 = vmax.f32 %v357_v37, 0.0  ;;  %vm1916_vm13 = vcmask 293888   ;;  %vm2090_vm14 = vcmask 27648   ;;  %vm2326_vm15 = vcmask 24576  }
  0x23   : > { %441 = vst.msk [vmem:[#allocation2 + $0x110] sm:$0xff] %vm405_vm0, %v2574_v0  ;;  %v387_v13 = vmax.f32 %v355_v56, 0.0  ;;  %v329_v24 = vmul.f32 %v2732_v9, %v2502_v60  ;;  %v2506_v56 = vunpack.c.h.bf16 %v2530_v28 }
  0x24   : > { %443 = vst.msk [vmem:[#allocation2 + $0x120] sm:$0xff] %vm405_vm0, %v2574_v0 }
  0x25   : > { %444 = vst.msk [vmem:[#allocation2 + $0x128] sm:$0xff] %vm405_vm0, %v2574_v0 }
  0x26   : > { %446 = vst.msk [vmem:[#allocation2 + $0x138] sm:$0xff] %vm405_vm0, %v2574_v0 }
  0x27   : > { %447 = vst.msk [vmem:[#allocation2 + $0x140] sm:$0xff] %vm405_vm0, %v2574_v0 }
  0x28   : > { %449 = vst.msk [vmem:[#allocation2 + $0x150] sm:$0xff] %vm405_vm0, %v2574_v0 }
  0x29   : > { %450 = vst.msk [vmem:[#allocation2 + $0x158] sm:$0xff] %vm405_vm0, %v2574_v0 }
  0x2a   : > { %452 = vst.msk [vmem:[#allocation2 + $0x168] sm:$0xff] %vm405_vm0, %v2574_v0 }
  0x2b   : > { %453 = vst.msk [vmem:[#allocation2 + $0x170] sm:$0xff] %vm405_vm0, %v2574_v0 }
  0x2c   : > { %455 = vst.msk [vmem:[#allocation2 + $0x180] sm:$0xff] %vm405_vm0, %v2574_v0 }
  0x2d   : > { %456 = vst.msk [vmem:[#allocation2 + $0x188] sm:$0xff] %vm405_vm0, %v2574_v0 }
  0x2e   : > { %458 = vst.msk [vmem:[#allocation2 + $0x198] sm:$0xff] %vm405_vm0, %v2574_v0 }
  0x2f   : > { %459 = vst.msk [vmem:[#allocation2 + $0x1a0] sm:$0xff] %vm405_vm0, %v2574_v0 }
  0x30   : > { %553 = vst.msk [vmem:[#allocation3] sm:$0xff] %vm405_vm0, %v2635_v1 }
  0x31   : > { %554 = vst.msk [vmem:[#allocation3 + $0x8] sm:$0xff] %vm405_vm0, %v2639_v2 }
  0x32   : > { %409 = vst.msk [vmem:[#allocation2 + $0x10] sm:$0x3] %vm408_vm2, %v2574_v0 }
  0x33   : > { %412 = vst.msk [vmem:[#allocation2 + $0x28] sm:$0x3] %vm408_vm2, %v2574_v0 }
  0x34   : > { %415 = vst.msk [vmem:[#allocation2 + $0x40] sm:$0x3] %vm408_vm2, %v2574_v0 }
  0x35   : > { %418 = vst.msk [vmem:[#allocation2 + $0x58] sm:$0x3] %vm408_vm2, %v2574_v0 }
  0x36   : > { %421 = vst.msk [vmem:[#allocation2 + $0x70] sm:$0x3] %vm408_vm2, %v2574_v0 }
  0x37   : > { %424 = vst.msk [vmem:[#allocation2 + $0x88] sm:$0x3] %vm408_vm2, %v2574_v0 }
  0x38   : > { %427 = vst.msk [vmem:[#allocation2 + $0xa0] sm:$0x3] %vm408_vm2, %v2574_v0 }
  0x39   : > { %v2750_v18 = vld [vmem:[#allocation2 + $0x10] sm:$0x3]  ;;  %430 = vst.msk [vmem:[#allocation2 + $0xb8] sm:$0x3] %vm408_vm2, %v2574_v0 }
  0x3a   : > { %v637_v21 = vrot.slane %v2750_v18, 1  ;;  %433 = vst.msk [vmem:[#allocation2 + $0xd0] sm:$0x3] %vm408_vm2, %v2574_v0 }
  0x3b   : > { %436 = vst.msk [vmem:[#allocation2 + $0xe8] sm:$0x3] %vm408_vm2, %v2574_v0 }
  0x3c   : > { %v638_v26 = vsel %vm633_vm1, %v635_v4, %v637_v21  ;;  %439 = vst.msk [vmem:[#allocation2 + $0x100] sm:$0x3] %vm408_vm2, %v2574_v0 }
  0x3d   : > { %716 = vrot.lane.b32.xlu0 %v638_v26, %s2575_s20  ;;  %442 = vst.msk [vmem:[#allocation2 + $0x118] sm:$0x3] %vm408_vm2, %v2574_v0 }
  0x3e   : > { %445 = vst.msk [vmem:[#allocation2 + $0x130] sm:$0x3] %vm408_vm2, %v2574_v0 }
  0x3f   : > { %448 = vst.msk [vmem:[#allocation2 + $0x148] sm:$0x3] %vm408_vm2, %v2574_v0 }
  0x40   : > { %451 = vst.msk [vmem:[#allocation2 + $0x160] sm:$0x3] %vm408_vm2, %v2574_v0 }
  0x41   : > { %454 = vst.msk [vmem:[#allocation2 + $0x178] sm:$0x3] %vm408_vm2, %v2574_v0 }
  0x42   : > { %457 = vst.msk [vmem:[#allocation2 + $0x190] sm:$0x3] %vm408_vm2, %v2574_v0 }
  0x43   : > { %460 = vst.msk [vmem:[#allocation2 + $0x1a8] sm:$0x3] %vm408_vm2, %v2574_v0  ;;  %v318_v0 = vmul.f32 %v2732_v9, %v2481_v55  ;;  %v2501_v55 = vunpack.c.l.bf16 %v2529_v45 }
  0x44   : > { %462 = vst.msk [vmem:[#allocation2 + $0x19] sm:$0xff] %vm405_vm0, %v373_v36  ;;  %v382_v36 = vmax.f32 %v350_v19, 0.0 }
  0x45   : > { %463 = vst.msk [vmem:[#allocation2 + $0x21] sm:$0xff] %vm405_vm0, %v374_v39  ;;  %v353_v23 = vadd.f32 %v2748_v16, %v318_v0  ;;  %v325_v0 = vmul.f32 %v2732_v9, %v2494_v51  ;;  %v2532_v51 = vld [vmem:[%s2713_s24 + $0x70] sm:$0xff]  }
  0x46   : > { %466 = vst.msk [vmem:[#allocation2 + $0x49] sm:$0xff] %vm405_vm0, %v377_v41 }
  0x47   : > { %467 = vst.msk [vmem:[#allocation2 + $0x51] sm:$0xff] %vm405_vm0, %v378_v44  ;;  %v385_v41 = vmax.f32 %v353_v23, 0.0  ;;  %v2493_v44 = vunpack.c.l.bf16 %v2527_v34 }
  0x48   : > { %468 = vst.msk [vmem:[#allocation2 + $0x61] sm:$0xff] %vm405_vm0, %v379_v46 }
  0x49   : > { %469 = vst.msk [vmem:[#allocation2 + $0x69] sm:$0xff] %vm405_vm0, %v380_v50  ;;  %v321_v50 = vmul.f32 %v2732_v9, %v2486_v38  ;;  %v324_v57 = vmul.f32 %v2732_v9, %v2493_v44 }
  0x4a   : > { %472 = vst.msk [vmem:[#allocation2 + $0x91] sm:$0xff] %vm405_vm0, %v383_v52 }
  0x4b   : > { %v2810_v63 = vld [vmem:[#allocation2 + $0x18] sm:$0xff]  ;;  %473 = vst.msk [vmem:[#allocation2 + $0x99] sm:$0xff] %vm405_vm0, %v384_v54  ;;  %v390_v54 = vmax.f32 %v358_v42, 0.0  ;;  %v356_v62 = vadd.f32 %v2748_v16, %v321_v50 }
  0x4c   : > { %v2814_v4 = vld [vmem:[#allocation2 + $0x20] sm:$0xff]  ;;  %v639_v5 = vrot.slane %v2810_v63, 1  ;;  %555 = vst.msk [vmem:[#allocation3 + $0x10] sm:$0xff] %vm405_vm0, %v2810_v63  ;;  %v2833_v17 = vld [vmem:[#allocation2 + $0x28] sm:$0x3] }
  0x4d   : > { %v640_v8 = vrot.slane %v2814_v4, 1  ;;  %556 = vst.msk [vmem:[#allocation3 + $0x18] sm:$0xff] %vm405_vm0, %v2814_v4  ;;  %v2823_v10 = vld [vmem:[#allocation2 + $0x48] sm:$0xff]  ;;  %v642_v30 = vrot.slane %v2833_v17, 1  ;;  %v388_v34 = vmax.f32 %v356_v62, 0.0  ;;  %v330_v62 = vmul.f32 %v2732_v9, %v2505_v43 }
  0x4e   : > { %v2828_v14 = vld [vmem:[#allocation2 + $0x50] sm:$0xff]  ;;  %v649_v15 = vrot.slane %v2823_v10, 1  ;;  %559 = vst.msk [vmem:[#allocation3 + $0x30] sm:$0xff] %vm405_vm0, %v2823_v10  ;;  %v2883_v48 = vld [vmem:[#allocation2 + $0x58] sm:$0x3] }
  0x4f   : > { %v2838_v21 = vsel %vm633_vm1, %v639_v5, %v640_v8  ;;  %v650_v22 = vrot.slane %v2828_v14, 1  ;;  %560 = vst.msk [vmem:[#allocation3 + $0x38] sm:$0xff] %vm405_vm0, %v2828_v14  ;;  %v2880_v46 = vsel %vm633_vm1, %v640_v8, %v642_v30  ;;  %v652_v59 = vrot.slane %v2883_v48, 1 }
  0x50   : > { %718 = vrot.lane.b32.xlu1 %v2838_v21, %s2575_s20  ;;  %v2847_v25 = vld [vmem:[#allocation2 + $0x68] sm:$0xff]  ;;  %v2849_v26 = vld [vmem:[#allocation2 + $0x70] sm:$0x3]  ;;  %464 = vst.msk [vmem:[#allocation2 + $0x31] sm:$0xff] %vm405_vm0, %v375_v7  ;;  %v328_v7 = vmul.f32 %v2732_v9, %v2501_v55  ;;  %v2497_v8 = vunpack.c.l.bf16 %v2528_v58 }
  0x51   : > { %v2855_v29 = vsel %vm633_vm1, %v649_v15, %v650_v22  ;;  %562 = vst.msk [vmem:[#allocation3 + $0x48] sm:$0xff] %vm405_vm0, %v2847_v25  ;;  %v2860_v31 = vld [vmem:[#allocation2 + $0x90] sm:$0xff]  ;;  %v655_v39 = vrot.slane %v2847_v25, 1  ;;  %v657_v40 = vrot.slane %v2849_v26, 1  ;;  %v359_v15 = vadd.f32 %v2748_v16, %v324_v57 }
  0x52   : > { %4621 = vst [vmem:[#allocation4_spill] sm:$0xff] %v2855_v29  ;;  %726 = vrot.lane.b32.xlu0 %v2855_v29, %s2575_s20  ;;  %v2866_v35 = vld [vmem:[#allocation2 + $0x98] sm:$0xff]  ;;  %v664_v3 = vrot.slane %v2860_v31, 1  ;;  %v2925_v19 = vsel %vm633_vm1, %v650_v22, %v652_v59  ;;  %v360_v22 = vadd.f32 %v2748_v16, %v325_v0  ;;  %v326_v37 = vmul.f32 %v2732_v9, %v2497_v8 }
  0x53   : > { %565 = vst.msk [vmem:[#allocation3 + $0x60] sm:$0xff] %vm405_vm0, %v2860_v31  ;;  %v2890_v52 = vsel %vm633_vm1, %v655_v39, %v657_v40  ;;  %v665_v5 = vrot.slane %v2866_v35, 1  ;;  %v391_v42 = vmax.f32 %v359_v15, 0.0  ;;  %v2513_v0 = vunpack.c.l.bf16 %v2532_v51  ;;  %v2995_v15 = vld [vmem:[#allocation2 + $0xa0] sm:$0x3] }
  0x54   : > { %566 = vst.msk [vmem:[#allocation3 + $0x68] sm:$0xff] %vm405_vm0, %v2866_v35  ;;  %v392_v55 = vmax.f32 %v360_v22, 0.0  ;;  %v361_v60 = vadd.f32 %v2748_v16, %v326_v37 }
  0x55   : > { %465 = vst.msk [vmem:[#allocation2 + $0x39] sm:$0xff] %vm405_vm0, %v376_v27  ;;  %v2498_v27 = vunpack.c.h.bf16 %v2528_v58  ;;  %v2946_v33 = vsel %vm633_vm1, %v664_v3, %v665_v5  ;;  %v334_v37 = vmul.f32 %v2732_v9, %v2513_v0 }
  0x56   : > { %470 = vst.msk [vmem:[#allocation2 + $0x79] sm:$0xff] %vm405_vm0, %v381_v32  ;;  %v2940_v32 = vld [vmem:[#allocation2 + $0x60] sm:$0xff]  ;;  %v393_v22 = vmax.f32 %v361_v60, 0.0 }
  0x57   : > { %471 = vst.msk [vmem:[#allocation2 + $0x81] sm:$0xff] %vm405_vm0, %v382_v36  ;;  %v2892_v53 = vld [vmem:[#allocation2 + $0x30] sm:$0xff]  ;;  %v363_v36 = vadd.f32 %v2748_v16, %v328_v7  ;;  %v327_v50 = vmul.f32 %v2732_v9, %v2498_v27 }
  0x58   : > { %4622 = vst [vmem:[#allocation5_spill] sm:$0xff] %v2890_v52  ;;  %720 = vrot.lane.b32.xlu1 %v2880_v46, %s2575_s20  ;;  %v644_v61 = vrot.slane %v2892_v53, 1 }
  0x59   : > { %474 = vst.msk [vmem:[#allocation2 + $0xa9] sm:$0xff] %vm405_vm0, %v385_v41  ;;  %v395_v59 = vmax.f32 %v363_v36, 0.0  ;;  %v362_v8 = vadd.f32 %v2748_v16, %v327_v50  ;;  %v365_v36 = vadd.f32 %v2748_v16, %v330_v62  ;;  %v369_v62 = vadd.f32 %v2748_v16, %v334_v37 }
  0x5a   : > { %557 = vst.msk [vmem:[#allocation3 + $0x20] sm:$0xff] %vm405_vm0, %v2892_v53  ;;  %732 = vrot.lane.b32.xlu0 %v2890_v52, %s2575_s20 }
  0x5b   : > { %475 = vst.msk [vmem:[#allocation2 + $0xb1] sm:$0xff] %vm405_vm0, %v386_v47  ;;  %v397_v60 = vmax.f32 %v365_v36, 0.0  ;;  %v401_v37 = vmax.f32 %v369_v62, 0.0 }
  0x5c   : > { %478 = vst.msk [vmem:[#allocation2 + $0xd9] sm:$0xff] %vm405_vm0, %v389_v49  ;;  %v2912_v6 = vld [vmem:[#allocation2 + $0x38] sm:$0xff]  ;;  %v2931_v23 = vld [vmem:[#allocation2 + $0x40] sm:$0x3]  ;;  %v364_v49 = vadd.f32 %v2748_v16, %v329_v24  ;;  %v2514_v24 = vunpack.c.h.bf16 %v2532_v51 }
  0x5d   : > { %479 = vst.msk [vmem:[#allocation2 + $0xe1] sm:$0xff] %vm405_vm0, %v390_v54  ;;  %v645_v11 = vrot.slane %v2912_v6, 1  ;;  %v2919_v12 = vld [vmem:[#allocation2 + $0x78] sm:$0xff]  ;;  %v647_v41 = vrot.slane %v2931_v23, 1 }
  0x5e   : > { %558 = vst.msk [vmem:[#allocation3 + $0x28] sm:$0xff] %vm405_vm0, %v2912_v6  ;;  %v2927_v20 = vld [vmem:[#allocation2 + $0x80] sm:$0xff]  ;;  %v659_v44 = vrot.slane %v2919_v12, 1  ;;  %v396_v7 = vmax.f32 %v364_v49, 0.0  ;;  %v335_v51 = vmul.f32 %v2732_v9, %v2514_v24 }
  0x5f   : > { %4623 = vst [vmem:[#allocation6_spill] sm:$0xff] %v2925_v19  ;;  %v2936_v30 = vsel %vm633_vm1, %v644_v61, %v645_v11  ;;  %v660_v45 = vrot.slane %v2927_v20, 1  ;;  %v2983_v61 = vsel %vm633_vm1, %v645_v11, %v647_v41  ;;  %v331_v11 = vmul.f32 %v2732_v9, %v2506_v56 }
  0x60   : > { %563 = vst.msk [vmem:[#allocation3 + $0x50] sm:$0xff] %vm405_vm0, %v2919_v12  ;;  %722 = vrot.lane.b32.xlu2 %v2936_v30, %s2575_s20  ;;  %728 = vrot.lane.b32.xlu1 %v2925_v19, %s2575_s20  ;;  %v3018_v43 = vld [vmem:[#allocation2 + $0xa8] sm:$0xff] }
  0x61   : > { %4624 = vst [vmem:[#allocation7_spill] sm:$0xff] %v2936_v30  ;;  %v2990_v3 = vsel %vm633_vm1, %v659_v44, %v660_v45  ;;  %v394_v44 = vmax.f32 %v362_v8, 0.0  ;;  %v366_v50 = vadd.f32 %v2748_v16, %v331_v11 }
  0x62   : > { %564 = vst.msk [vmem:[#allocation3 + $0x58] sm:$0xff] %vm405_vm0, %v2927_v20  ;;  %v2956_v38 = vld [vmem:[#allocation2 + $0xb0] sm:$0xff]  ;;  %v2958_v40 = vld [vmem:[#allocation2 + $0xb8] sm:$0x3]  ;;  %738 = vrot.lane.b32.xlu0 %v2946_v33, %s2575_s20 }
  0x63   : > { %4625 = vst [vmem:[#allocation8_spill] sm:$0xff] %v2946_v33  ;;  %v2966_v47 = vld [vmem:[#allocation2 + $0xd8] sm:$0xff]  ;;  %v670_v57 = vrot.slane %v2956_v38, 1  ;;  %v672_v58 = vrot.slane %v2958_v40, 1  ;;  %v398_v24 = vmax.f32 %v366_v50, 0.0 }
  0x64   : > { %561 = vst.msk [vmem:[#allocation3 + $0x40] sm:$0xff] %vm405_vm0, %v2940_v32  ;;  %v2973_v54 = vld [vmem:[#allocation2 + $0xe0] sm:$0xff] }
  0x65   : > { %476 = vst.msk [vmem:[#allocation2 + $0xc1] sm:$0xff] %vm405_vm0, %v387_v13  ;;  %v2531_v13 = vld [vmem:[%s2713_s24 + $0x68] sm:$0xff]   ;;  %v3002_v27 = vsel %vm633_vm1, %v670_v57, %v672_v58  ;;  %v4530_v56 = vrot.slane %v2973_v54, 1 }
  0x66   : > { %568 = vst.msk [vmem:[#allocation3 + $0x78] sm:$0xff] %vm405_vm0, %v2956_v38  ;;  %v2509_v41 = vunpack.c.l.bf16 %v2531_v13  ;;  %v2510_v49 = vunpack.c.h.bf16 %v2531_v13  ;;  %v3047_v13 = vld [vmem:[#allocation2 + $0x88] sm:$0x3] }
  0x67   : > { %4626 = vst [vmem:[#allocation9_spill] sm:$0xff] %v2966_v47 }
  0x68   : > { %4627 = vst [vmem:[#allocation10_spill] sm:$0xff] %v2973_v54  ;;  %724 = vrot.lane.b32.xlu2 %v2983_v61, %s2575_s20  ;;  %734 = vrot.lane.b32.xlu1 %v2990_v3, %s2575_s20  ;;  %v332_v0 = vmul.f32 %v2732_v9, %v2509_v41 }
  0x69   : > { %571 = vst.msk [vmem:[#allocation3 + $0x90] sm:$0xff] %vm405_vm0, %v2966_v47 }
  0x6a   : > { %572 = vst.msk [vmem:[#allocation3 + $0x98] sm:$0xff] %vm405_vm0, %v2973_v54  ;;  %744 = vrot.lane.b32.xlu0 %v3002_v27, %s2575_s20  ;;  %v367_v41 = vadd.f32 %v2748_v16, %v332_v0 }
  0x6b   : > { %477 = vst.msk [vmem:[#allocation2 + $0xc9] sm:$0xff] %vm405_vm0, %v388_v34  ;;  %v654_v34 = vrot.slane %v2940_v32, 1 }
  0x6c   : > { %4628 = vst [vmem:[#allocation11_spill] sm:$0xff] %v2990_v3  ;;  %v3006_v28 = vld [vmem:[#allocation2 + $0xc0] sm:$0xff]  ;;  %v399_v0 = vmax.f32 %v367_v41, 0.0 }
  0x6d   : > { %480 = vst.msk [vmem:[#allocation2 + $0xf1] sm:$0xff] %vm405_vm0, %v391_v42  ;;  %v667_v42 = vrot.slane %v2995_v15, 1 }
  0x6e   : > { %481 = vst.msk [vmem:[#allocation2 + $0xf9] sm:$0xff] %vm405_vm0, %v392_v55  ;;  %v679_v55 = vrot.slane %v2966_v47, 1 }
  0x6f   : > { %4629 = vst [vmem:[#allocation12_spill] sm:$0xff] %v3002_v27 }
  0x70   : > { %484 = vst.msk [vmem:[#allocation2 + $0x121] sm:$0xff] %vm405_vm0, %v395_v59  ;;  %v3034_v59 = vsel %vm633_vm1, %v654_v34, %v655_v39  ;;  %v333_v39 = vmul.f32 %v2732_v9, %v2510_v49  ;;  %v662_v34 = vrot.slane %v3047_v13, 1 }
  0x71   : > { %569 = vst.msk [vmem:[#allocation3 + $0x80] sm:$0xff] %vm405_vm0, %v3006_v28  ;;  %730 = vrot.lane.b32.xlu2 %v3034_v59, %s2575_s20 }
  0x72   : > { %485 = vst.msk [vmem:[#allocation2 + $0x129] sm:$0xff] %vm405_vm0, %v396_v7  ;;  %v3028_v58 = vld [vmem:[#allocation2 + $0xc8] sm:$0xff]  ;;  %v3043_v7 = vsel %vm633_vm1, %v665_v5, %v667_v42  ;;  %v3059_v5 = vsel %vm633_vm1, %v679_v55, %v4530_v56  ;;  %v674_v42 = vrot.slane %v3006_v28, 1  ;;  %v368_v49 = vadd.f32 %v2748_v16, %v333_v39 }
  0x73   : > { %567 = vst.msk [vmem:[#allocation3 + $0x70] sm:$0xff] %vm405_vm0, %v3018_v43  ;;  %740 = vrot.lane.b32.xlu1 %v3043_v7, %s2575_s20  ;;  %750 = vrot.lane.b32.xlu0 %v3059_v5, %s2575_s20  ;;  %v3091_v62 = vsel %vm633_vm1, %v660_v45, %v662_v34  ;;  %v669_v34 = vrot.slane %v3018_v43, 1 }
  0x74   : > { %482 = vst.msk [vmem:[#allocation2 + $0x109] sm:$0xff] %vm405_vm0, %v393_v22  ;;  %v370_v22 = vadd.f32 %v2748_v16, %v335_v51  ;;  %v3104_v56 = vld [vmem:[#allocation2 + $0xf0] sm:$0xff] }
  0x75   : > { %570 = vst.msk [vmem:[#allocation3 + $0x88] sm:$0xff] %vm405_vm0, %v3028_v58  ;;  %v3045_v8 = vld [vmem:[#allocation2 + $0xf8] sm:$0xff]  ;;  %v3067_v9 = vld [vmem:[#allocation2 + $0x100] sm:$0x3] }
  0x76   : > { %4630 = vst [vmem:[#allocation13_spill] sm:$0xff] %v3043_v7  ;;  %v402_v51 = vmax.f32 %v370_v22, 0.0  ;;  %v685_v55 = vrot.slane %v3045_v8, 1  ;;  %v3101_v22 = vld [vmem:[#allocation2 + $0xe8] sm:$0x3] }
  0x77   : > { %483 = vst.msk [vmem:[#allocation2 + $0x111] sm:$0xff] %vm405_vm0, %v394_v44  ;;  %v3053_v11 = vld [vmem:[#allocation2 + $0x120] sm:$0xff]  ;;  %v675_v44 = vrot.slane %v3028_v58, 1 }
  0x78   : > { %574 = vst.msk [vmem:[#allocation3 + $0xa8] sm:$0xff] %vm405_vm0, %v3045_v8 }
  0x79   : > { %4631 = vst [vmem:[#allocation14_spill] sm:$0xff] %v3053_v11  ;;  %v3070_v36 = vld [vmem:[#allocation2 + $0x128] sm:$0xff]  ;;  %v3097_v39 = vsel %vm633_vm1, %v674_v42, %v675_v44  ;;  %736 = vrot.lane.b32.xlu2 %v3091_v62, %s2575_s20  ;;  %v694_v42 = vrot.slane %v3053_v11, 1 }
  0x7a   : > { %4632 = vst [vmem:[#allocation15_spill] sm:$0xff] %v3059_v5 }
  0x7b   : > { %577 = vst.msk [vmem:[#allocation3 + $0xc0] sm:$0xff] %vm405_vm0, %v3053_v11  ;;  %v3081_v50 = vld [vmem:[#allocation2 + $0x108] sm:$0xff]  ;;  %746 = vrot.lane.b32.xlu1 %v3097_v39, %s2575_s20 }
  0x7c   : > { %4633 = vst [vmem:[#allocation16_spill] sm:$0xff] %v3070_v36 }
  0x7d   : > { %486 = vst.msk [vmem:[#allocation2 + $0x139] sm:$0xff] %vm405_vm0, %v397_v60  ;;  %v687_v60 = vrot.slane %v3067_v9, 1 }
  0x7e   : > { %578 = vst.msk [vmem:[#allocation3 + $0xc8] sm:$0xff] %vm405_vm0, %v3070_v36  ;;  %v3093_v16 = vld [vmem:[#allocation2 + $0x110] sm:$0xff] }
  0x7f   : > { %487 = vst.msk [vmem:[#allocation2 + $0x141] sm:$0xff] %vm405_vm0, %v398_v24  ;;  %v400_v24 = vmax.f32 %v368_v49, 0.0  ;;  %v3107_v45 = vsel %vm633_vm1, %v685_v55, %v687_v60  ;;  %v695_v49 = vrot.slane %v3070_v36, 1  ;;  %v3132_v60 = vsel %vm633_vm1, %v669_v34, %v670_v57 }
  0x80   : > { %575 = vst.msk [vmem:[#allocation3 + $0xb0] sm:$0xff] %vm405_vm0, %v3081_v50  ;;  %756 = vrot.lane.b32.xlu0 %v3107_v45, %s2575_s20  ;;  %v690_v27 = vrot.slane %v3093_v16, 1 }
  0x81   : > { %4634 = vst [vmem:[#allocation17_spill] sm:$0xff] %v3091_v62  ;;  %v3150_v57 = vsel %vm633_vm1, %v694_v42, %v695_v49  ;;  %742 = vrot.lane.b32.xlu2 %v3132_v60, %s2575_s20  ;;  %v689_v42 = vrot.slane %v3081_v50, 1 }
  0x82   : > { %490 = vst.msk [vmem:[#allocation2 + $0x169] sm:$0xff] %vm405_vm0, %v401_v37  ;;  %v682_v37 = vrot.slane %v3101_v22, 1 }
  0x83   : > { %4635 = vst [vmem:[#allocation18_spill] sm:$0xff] %v3097_v39  ;;  %v3179_v19 = vsel %vm633_vm1, %v689_v42, %v690_v27 }
  0x84   : > { %576 = vst.msk [vmem:[#allocation3 + $0xb8] sm:$0xff] %vm405_vm0, %v3093_v16  ;;  %v3147_v5 = vld [vmem:[#allocation2 + $0x138] sm:$0xff] }
  0x85   : > { %491 = vst.msk [vmem:[#allocation2 + $0x171] sm:$0xff] %vm405_vm0, %v402_v51 }
  0x86   : > { %4636 = vst [vmem:[#allocation19_spill] sm:$0xff] %v3107_v45  ;;  %v3118_v41 = vld [vmem:[#allocation2 + $0x140] sm:$0xff]  ;;  %v3141_v45 = vld [vmem:[#allocation2 + $0xd0] sm:$0x3] }
  0x87   : > { %573 = vst.msk [vmem:[#allocation3 + $0xa0] sm:$0xff] %vm405_vm0, %v3104_v56 }
  0x88   : > { %488 = vst.msk [vmem:[#allocation2 + $0x151] sm:$0xff] %vm405_vm0, %v399_v0  ;;  %v4640_v0 = vrot.slane %v2973_v54, 1  ;;  %762 = vrot.lane.b32.xlu0 %v3150_v57, %s2575_s20 }
  0x89   : > { %4637 = vst [vmem:[#allocation20_spill] sm:$0xff] %v3118_v41  ;;  %v3127_v51 = vld [vmem:[#allocation2 + $0x168] sm:$0xff] }
  0x8a   : > { %489 = vst.msk [vmem:[#allocation2 + $0x159] sm:$0xff] %vm405_vm0, %v400_v24  ;;  %v3139_v24 = vsel %vm633_vm1, %v4640_v0, %v682_v37  ;;  %v3160_v37 = vld [vmem:[#allocation2 + $0x148] sm:$0x3]  ;;  %v677_v0 = vrot.slane %v3141_v45, 1 }
  0x8b   : > { %580 = vst.msk [vmem:[#allocation3 + $0xd8] sm:$0xff] %vm405_vm0, %v3118_v41  ;;  %752 = vrot.lane.b32.xlu1 %v3139_v24, %s2575_s20  ;;  %v702_v3 = vrot.slane %v3160_v37, 1 }
  0x8c   : > { %4638 = vst [vmem:[#allocation21_spill] sm:$0xff] %v3127_v51  ;;  %v3143_v39 = vld [vmem:[#allocation2 + $0x170] sm:$0xff]  ;;  %v3176_v33 = vsel %vm633_vm1, %v675_v44, %v677_v0  ;;  %v709_v44 = vrot.slane %v3127_v51, 1 }
  0x8d   : > { %4639 = vst [vmem:[#allocation22_spill] sm:$0xff] %v3132_v60  ;;  %v3181_v60 = vld [vmem:[#allocation2 + $0x130] sm:$0x3]  ;;  %748 = vrot.lane.b32.xlu2 %v3176_v33, %s2575_s20  ;;  %v710_v0 = vrot.slane %v3143_v39, 1 }
  0x8e   : > { %583 = vst.msk [vmem:[#allocation3 + $0xf0] sm:$0xff] %vm405_vm0, %v3127_v51  ;;  %v697_v30 = vrot.slane %v3181_v60, 1 }
  0x8f   : > { %4641 = vst [vmem:[#allocation23_spill] sm:$0xff] %v3139_v24  ;;  %v3154_v34 = vld [vmem:[#allocation2 + $0x150] sm:$0xff]  ;;  %v700_v24 = vrot.slane %v3118_v41, 1 }
  0x90   : > { %4642 = vst [vmem:[#allocation24_spill] sm:$0xff] %v3143_v39  ;;  %v3200_v42 = vsel %vm633_vm1, %v695_v49, %v697_v30  ;;  %v704_v62 = vrot.slane %v3154_v34, 1  ;;  %v715_v30 = vpop.permute.xlu0 %714  ;;  %v845_v49 = vrot.slane %v2639_v2, 2  ;;  %v699_v2 = vrot.slane %v3147_v5, 1 }
  0x91   : > { %584 = vst.msk [vmem:[#allocation3 + $0xf8] sm:$0xff] %vm405_vm0, %v3143_v39  ;;  %v3163_v7 = vld [vmem:[#allocation2 + $0x158] sm:$0xff]  ;;  %v3184_v52 = vsel %vm633_vm1, %v700_v24, %v702_v3 }
  0x92   : > { %4643 = vst [vmem:[#allocation25_spill] sm:$0xff] %v3147_v5  ;;  %768 = vrot.lane.b32.xlu0 %v3184_v52, %s2575_s20 }
  0x93   : > { %4644 = vst [vmem:[#allocation26_spill] sm:$0xff] %v3150_v57  ;;  %758 = vrot.lane.b32.xlu1 %v3179_v19, %s2575_s20  ;;  %v684_v57 = vrot.slane %v3104_v56, 1 }
  0x94   : > { %579 = vst.msk [vmem:[#allocation3 + $0xd0] sm:$0xff] %vm405_vm0, %v3147_v5 }
  0x95   : > { %581 = vst.msk [vmem:[#allocation3 + $0xe0] sm:$0xff] %vm405_vm0, %v3154_v34  ;;  %v3197_v3 = vsel %vm633_vm1, %v684_v57, %v685_v55  ;;  %v705_v55 = vrot.slane %v3163_v7, 1  ;;  %v847_v57 = vrot.slane %v2750_v18, 2 }
  0x96   : > { %582 = vst.msk [vmem:[#allocation3 + $0xe8] sm:$0xff] %vm405_vm0, %v3163_v7  ;;  %754 = vrot.lane.b32.xlu2 %v3197_v3, %s2575_s20 }
  0x97   : > { %4645 = vst [vmem:[#allocation27_spill] sm:$0xff] %v3176_v33  ;;  %v3202_v33 = vld [vmem:[#allocation2 + $0x118] sm:$0x3]  ;;  %v848_v29 = vsel %vm843_vm4, %v845_v49, %v847_v57  ;;  %v3243_v57 = vld [vmem:[#allocation2 + $0x160] sm:$0x3] }
  0x98   : > { %4646 = vst [vmem:[#allocation28_spill] sm:$0xff] %v3179_v19  ;;  %v3205_v19 = vsel %vm633_vm1, %v709_v44, %v710_v0 }
  0x99   : > { %4647 = vst [vmem:[#allocation29_spill] sm:$0xff] %v3184_v52  ;;  %v692_v52 = vrot.slane %v3202_v33, 1 }
  0x9a   : > { %4648 = vst [vmem:[#allocation30_spill] sm:$0xff] %v3197_v3  ;;  %774 = vrot.lane.b32.xlu0 %v3205_v19, %s2575_s20  ;;  %v3225_v3 = vld [vmem:[#allocation2 + $0x178] sm:$0x3] }
  0x9b   : > { %4649 = vst [vmem:[#allocation31_spill] sm:$0xff] %v3200_v42  ;;  %764 = vrot.lane.b32.xlu1 %v3200_v42, %s2575_s20  ;;  %v3220_v44 = vsel %vm633_vm1, %v690_v27, %v692_v52  ;;  %v3223_v42 = vsel %vm633_vm1, %v704_v62, %v705_v55  ;;  %v712_v18 = vrot.slane %v3225_v3, 1  ;;  %v854_v52 = vrot.slane %v2892_v53, 2 }
  0x9c   : > { %4650 = vst [vmem:[#allocation32_spill] sm:$0xff] %v3205_v19  ;;  %v855_v27 = vrot.slane %v2912_v6, 2  ;;  %v3238_v62 = vsel %vm633_vm1, %v699_v2, %v700_v24  ;;  %v849_v19 = vrot.slane %v2810_v63, 2  ;;  %v850_v24 = vrot.slane %v2814_v4, 2 }
  0x9d   : > { %811 = vst.msk [vmem:[#allocation3] sm:$0xff] %vm810_vm3, %v715_v30  ;;  %v3241_v30 = vsel %vm633_vm1, %v710_v0, %v712_v18  ;;  %v860_v0 = vrot.slane %v2828_v14, 2  ;;  %v862_v2 = vrot.slane %v2883_v48, 2  ;;  %v869_v48 = vrot.slane %v2919_v12, 2 }
  0x9e   : > { %4651 = vst [vmem:[#allocation33_spill] sm:$0xff] %v3223_v42  ;;  %760 = vrot.lane.b32.xlu2 %v3220_v44, %s2575_s20 }
  0x9f   : > { %4652 = vst [vmem:[#allocation34_spill] sm:$0xff] %v3238_v62 }
  0xa0   : > { %4653 = vst [vmem:[#allocation35_spill] sm:$0xff] %v3241_v30 }
  0xa2   : > { %926 = vrot.lane.b32.xlu0 %v848_v29, %s2576_s29  ;;  %v707_v29 = vrot.slane %v3243_v57, 1 }
  0xa3   : > { %770 = vrot.lane.b32.xlu1 %v3223_v42, %s2575_s20  ;;  %v3246_v42 = vsel %vm843_vm4, %v854_v52, %v855_v27  ;;  %v3263_v52 = vsel %vm843_vm4, %v849_v19, %v850_v24  ;;  %v870_v19 = vrot.slane %v2927_v20, 2 }
  0xa4   : > { %4654 = vst [vmem:[#allocation36_spill] sm:$0xff] %v3246_v42  ;;  %v3260_v18 = vsel %vm633_vm1, %v705_v55, %v707_v29 }
  0xa6   : > { %766 = vrot.lane.b32.xlu2 %v3238_v62, %s2575_s20  ;;  %v857_v62 = vrot.slane %v2931_v23, 2  ;;  %v852_v23 = vrot.slane %v2833_v17, 2 }
  0xa8   : > { %v3280_v29 = vsel %vm843_vm4, %v855_v27, %v857_v62  ;;  %v877_v27 = vrot.slane %v2995_v15, 2  ;;  %v3297_v62 = vsel %vm843_vm4, %v850_v24, %v852_v23  ;;  %v872_v15 = vrot.slane %v3047_v13, 2 }
  0xa9   : > { %v885_v24 = vrot.slane %v3028_v58, 2  ;;  %v867_v13 = vrot.slane %v2849_v26, 2 }
  0xaa   : > { %932 = vrot.lane.b32.xlu0 %v3246_v42, %s2576_s29  ;;  %v844_v42 = vrot.slane %v2635_v1, 2 }
  0xab   : > { %776 = vrot.lane.b32.xlu1 %v3241_v30, %s2575_s20  ;;  %v3266_v30 = vsel %vm843_vm4, %v860_v0, %v862_v2  ;;  %v3283_v2 = vsel %vm843_vm4, %v869_v48, %v870_v19 }
  0xac   : > { %4655 = vst [vmem:[#allocation37_spill] sm:$0xff] %v3266_v30  ;;  %v846_v55 = vsel %vm843_vm4, %v844_v42, %v845_v49  ;;  %v865_v42 = vrot.slane %v2847_v25, 2  ;;  %v875_v49 = vrot.slane %v2866_v35, 2 }
  0xae   : > { %772 = vrot.lane.b32.xlu2 %v3260_v18, %s2575_s20  ;;  %v3303_v17 = vsel %vm843_vm4, %v875_v49, %v877_v27  ;;  %v3320_v27 = vsel %vm843_vm4, %v870_v19, %v872_v15  ;;  %v892_v15 = vrot.slane %v3101_v22, 2  ;;  %v3339_v26 = vsel %vm843_vm4, %v865_v42, %v867_v13 }
  0xaf   : > { %v717_v1 = vpop.permute.xlu0 %716  ;;  %4657 = vst [vmem:[#allocation39_spill] sm:$0xff] %v3303_v17  ;;  %v874_v22 = vrot.slane %v2860_v31, 2 }
  0xb0   : > { %812 = vst.msk [vmem:[#allocation3 + $0x8] sm:$0xff] %vm810_vm3, %v717_v1 }
  0xb1   : > { %4660 = vst [vmem:[#allocation42_spill] sm:$0xff] %v3339_v26 }
  0xb2   : > { %938 = vrot.lane.b32.xlu0 %v3266_v30, %s2576_s29  ;;  %v864_v30 = vrot.slane %v2940_v32, 2 }
  0xb3   : > { %928 = vrot.lane.b32.xlu1 %v3263_v52, %s2576_s29 }
  0xb4   : > { %v3300_v48 = vsel %vm843_vm4, %v864_v30, %v865_v42  ;;  %v884_v30 = vrot.slane %v3006_v28, 2  ;;  %v887_v42 = vrot.slane %v3141_v45, 2 }
  0xb5   : > { %4656 = vst [vmem:[#allocation38_spill] sm:$0xff] %v3300_v48 }
  0xb6   : > { %924 = vrot.lane.b32.xlu2 %v846_v55, %s2576_s29  ;;  %v859_v55 = vrot.slane %v2823_v10, 2  ;;  %v3365_v45 = vsel %vm843_vm4, %v885_v24, %v887_v42  ;;  %v905_v42 = vrot.slane %v3070_v36, 2 }
  0xb7   : > { %4661 = vst [vmem:[#allocation43_spill] sm:$0xff] %v3365_v45 }
  0xb8   : > { %v3317_v23 = vsel %vm843_vm4, %v859_v55, %v860_v0  ;;  %v880_v0 = vrot.slane %v2956_v38, 2  ;;  %v890_v55 = vrot.slane %v2973_v54, 2 }
  0xb9   : > { %4658 = vst [vmem:[#allocation40_spill] sm:$0xff] %v3317_v23 }
  0xba   : > { %944 = vrot.lane.b32.xlu0 %v3283_v2, %s2576_s29  ;;  %v723_v1 = vpop.permute.xlu2 %722 }
  0xbb   : > { %934 = vrot.lane.b32.xlu1 %v3280_v29, %s2576_s29  ;;  %815 = vst.msk [vmem:[#allocation3 + $0x20] sm:$0xff] %vm810_vm3, %v723_v1 }
  0xbe   : > { %930 = vrot.lane.b32.xlu2 %v3297_v62, %s2576_s29 }
  0xc2   : > { %950 = vrot.lane.b32.xlu0 %v3303_v17, %s2576_s29  ;;  %v725_v1 = vpop.permute.xlu2 %724  ;;  %v879_v17 = vrot.slane %v3018_v43, 2  ;;  %v719_v19 = vpop.permute.xlu1 %718 }
  0xc3   : > { %940 = vrot.lane.b32.xlu1 %v3300_v48, %s2576_s29  ;;  %v3323_v48 = vsel %vm843_vm4, %v884_v30, %v885_v24  ;;  %816 = vst.msk [vmem:[#allocation3 + $0x28] sm:$0xff] %vm810_vm3, %v725_v1 }
  0xc4   : > { %4659 = vst [vmem:[#allocation41_spill] sm:$0xff] %v3323_v48  ;;  %v727_v30 = vpop.permute.xlu0 %726 }
  0xc5   : > { %813 = vst.msk [vmem:[#allocation3 + $0x10] sm:$0xff] %vm810_vm3, %v719_v19  ;;  %v900_v19 = vrot.slane %v3093_v16, 2 }
  0xc6   : > { %936 = vrot.lane.b32.xlu2 %v3317_v23, %s2576_s29  ;;  %817 = vst.msk [vmem:[#allocation3 + $0x30] sm:$0xff] %vm810_vm3, %v727_v30  ;;  %v3343_v23 = vsel %vm843_vm4, %v879_v17, %v880_v0  ;;  %v899_v17 = vrot.slane %v3081_v50, 2  ;;  %v3361_v30 = vsel %vm843_vm4, %v874_v22, %v875_v49  ;;  %v894_v49 = vrot.slane %v3104_v56, 2 }
  0xc7   : > { %v895_v22 = vrot.slane %v3045_v8, 2 }
  0xca   : > { %956 = vrot.lane.b32.xlu0 %v3323_v48, %s2576_s29  ;;  %v3346_v48 = vsel %vm843_vm4, %v890_v55, %v892_v15  ;;  %v721_v13 = vpop.permute.xlu1 %720 }
  0xcb   : > { %946 = vrot.lane.b32.xlu1 %v3320_v27, %s2576_s29  ;;  %v731_v1 = vpop.permute.xlu2 %730  ;;  %814 = vst.msk [vmem:[#allocation3 + $0x18] sm:$0xff] %vm810_vm3, %v721_v13 }
  0xcc   : > { %819 = vst.msk [vmem:[#allocation3 + $0x40] sm:$0xff] %vm810_vm3, %v731_v1  ;;  %v733_v15 = vpop.permute.xlu0 %732  ;;  %v882_v1 = vrot.slane %v2958_v40, 2 }
  0xcd   : > { %820 = vst.msk [vmem:[#allocation3 + $0x48] sm:$0xff] %vm810_vm3, %v733_v15 }
  0xce   : > { %942 = vrot.lane.b32.xlu2 %v3339_v26, %s2576_s29  ;;  %v3368_v26 = vsel %vm843_vm4, %v899_v17, %v900_v19  ;;  %v907_v17 = vrot.slane %v3181_v60, 2  ;;  %v3384_v40 = vsel %vm843_vm4, %v880_v0, %v882_v1  ;;  %v889_v60 = vrot.slane %v2966_v47, 2 }
  0xcf   : > { %4662 = vst [vmem:[#allocation44_spill] sm:$0xff] %v3368_v26  ;;  %v902_v0 = vrot.slane %v3202_v33, 2 }
  0xd1   : > { %v3410_v33 = vsel %vm843_vm4, %v900_v19, %v902_v0  ;;  %v920_v0 = vrot.slane %v3143_v39, 2 }
  0xd2   : > { %962 = vrot.lane.b32.xlu0 %v3346_v48, %s2576_s29  ;;  %v729_v24 = vpop.permute.xlu1 %728  ;;  %4664 = vst [vmem:[#allocation46_spill] sm:$0xff] %v3410_v33 }
  0xd3   : > { %952 = vrot.lane.b32.xlu1 %v3343_v23, %s2576_s29  ;;  %v737_v13 = vpop.permute.xlu2 %736  ;;  %818 = vst.msk [vmem:[#allocation3 + $0x38] sm:$0xff] %vm810_vm3, %v729_v24  ;;  %v915_v24 = vrot.slane %v3163_v7, 2 }
  0xd4   : > { %822 = vst.msk [vmem:[#allocation3 + $0x58] sm:$0xff] %vm810_vm3, %v737_v13  ;;  %v739_v15 = vpop.permute.xlu0 %738 }
  0xd5   : > { %823 = vst.msk [vmem:[#allocation3 + $0x60] sm:$0xff] %vm810_vm3, %v739_v15  ;;  %v3406_v15 = vsel %vm843_vm4, %v889_v60, %v890_v55  ;;  %v909_v55 = vrot.slane %v3147_v5, 2  ;;  %v910_v60 = vrot.slane %v3118_v41, 2 }
  0xd6   : > { %948 = vrot.lane.b32.xlu2 %v3361_v30, %s2576_s29 }
  0xda   : > { %968 = vrot.lane.b32.xlu0 %v3368_v26, %s2576_s29  ;;  %v3391_v26 = vsel %vm843_vm4, %v905_v42, %v907_v17  ;;  %v735_v1 = vpop.permute.xlu1 %734 }
  0xdb   : > { %958 = vrot.lane.b32.xlu1 %v3365_v45, %s2576_s29  ;;  %v3388_v45 = vsel %vm843_vm4, %v894_v49, %v895_v22  ;;  %4663 = vst [vmem:[#allocation45_spill] sm:$0xff] %v3391_v26  ;;  %v743_v13 = vpop.permute.xlu2 %742  ;;  %v914_v49 = vrot.slane %v3154_v34, 2 }
  0xdc   : > { %825 = vst.msk [vmem:[#allocation3 + $0x70] sm:$0xff] %vm810_vm3, %v743_v13  ;;  %v745_v17 = vpop.permute.xlu0 %744  ;;  %v897_v13 = vrot.slane %v3067_v9, 2 }
  0xdd   : > { %821 = vst.msk [vmem:[#allocation3 + $0x50] sm:$0xff] %vm810_vm3, %v735_v1 }
  0xde   : > { %954 = vrot.lane.b32.xlu2 %v3384_v40, %s2576_s29  ;;  %826 = vst.msk [vmem:[#allocation3 + $0x78] sm:$0xff] %vm810_vm3, %v745_v17  ;;  %v3429_v9 = vsel %vm843_vm4, %v895_v22, %v897_v13  ;;  %v917_v22 = vrot.slane %v3243_v57, 2  ;;  %v912_v57 = vrot.slane %v3160_v37, 2  ;;  %v919_v37 = vrot.slane %v3127_v51, 2 }
  0xe2   : > { %974 = vrot.lane.b32.xlu0 %v3391_v26, %s2576_s29  ;;  %v3413_v26 = vsel %vm843_vm4, %v914_v49, %v915_v24  ;;  %v922_v49 = vrot.slane %v3225_v3, 2  ;;  %v904_v3 = vrot.slane %v3053_v11, 2 }
  0xe3   : > { %964 = vrot.lane.b32.xlu1 %v3388_v45, %s2576_s29  ;;  %4665 = vst [vmem:[#allocation47_spill] sm:$0xff] %v3413_v26 }
  0xe5   : > { %v741_v19 = vpop.permute.xlu1 %740  ;;  %v751_v17 = vpop.permute.xlu0 %750 }
  0xe6   : > { %960 = vrot.lane.b32.xlu2 %v3406_v15, %s2576_s29  ;;  %824 = vst.msk [vmem:[#allocation3 + $0x68] sm:$0xff] %vm810_vm3, %v741_v19  ;;  %v3449_v19 = vsel %vm843_vm4, %v904_v3, %v905_v42  ;;  %v3465_v3 = vsel %vm843_vm4, %v910_v60, %v912_v57 }
  0xe7   : > { %v749_v1 = vpop.permute.xlu2 %748  ;;  %829 = vst.msk [vmem:[#allocation3 + $0x90] sm:$0xff] %vm810_vm3, %v751_v17 }
  0xe8   : > { %828 = vst.msk [vmem:[#allocation3 + $0x88] sm:$0xff] %vm810_vm3, %v749_v1 }
  0xe9   : > { %4667 = vst [vmem:[#allocation49_spill] sm:$0xff] %v3449_v19 }
  0xea   : > { %980 = vrot.lane.b32.xlu0 %v3413_v26, %s2576_s29  ;;  %v3436_v26 = vsel %vm843_vm4, %v920_v0, %v922_v49  ;;  %v3453_v49 = vsel %vm843_vm4, %v915_v24, %v917_v22 }
  0xeb   : > { %970 = vrot.lane.b32.xlu1 %v3410_v33, %s2576_s29  ;;  %v3433_v33 = vsel %vm843_vm4, %v909_v55, %v910_v60  ;;  %4666 = vst [vmem:[#allocation48_spill] sm:$0xff] %v3436_v26 }
  0xed   : > { %v747_v13 = vpop.permute.xlu1 %746 }
  0xee   : > { %966 = vrot.lane.b32.xlu2 %v3429_v9, %s2576_s29  ;;  %827 = vst.msk [vmem:[#allocation3 + $0x80] sm:$0xff] %vm810_vm3, %v747_v13  ;;  %v3478_v13 = vsel %vm843_vm4, %v919_v37, %v920_v0 }
  0xef   : > { %4668 = vst [vmem:[#allocation50_spill] sm:$0xff] %v3478_v13 }
  0xf0   : > { %v755_v1 = vpop.permute.xlu2 %754 }
  0xf1   : > { %831 = vst.msk [vmem:[#allocation3 + $0xa0] sm:$0xff] %vm810_vm3, %v755_v1 }
  0xf2   : > { %986 = vrot.lane.b32.xlu0 %v3436_v26, %s2576_s29  ;;  %v757_v55 = vpop.permute.xlu0 %756 }
  0xf3   : > { %976 = vrot.lane.b32.xlu1 %v3433_v33, %s2576_s29  ;;  %832 = vst.msk [vmem:[#allocation3 + $0xa8] sm:$0xff] %vm810_vm3, %v757_v55 }
  0xf6   : > { %972 = vrot.lane.b32.xlu2 %v3449_v19, %s2576_s29 }
  0xf8   : > { %v761_v17 = vpop.permute.xlu2 %760 }
  0xf9   : > { %834 = vst.msk [vmem:[#allocation3 + $0xb8] sm:$0xff] %vm810_vm3, %v761_v17 }
  0xfa   : > { %1059 = vrot.lane.b32.xlu0 %v2892_v53, %s2577_s30  ;;  %v763_v24 = vpop.permute.xlu0 %762 }
  0xfb   : > { %982 = vrot.lane.b32.xlu1 %v3453_v49, %s2576_s29  ;;  %835 = vst.msk [vmem:[#allocation3 + $0xc0] sm:$0xff] %vm810_vm3, %v763_v24 }
  0xfd   : > { %v753_v42 = vpop.permute.xlu1 %752 }
  0xfe   : > { %830 = vst.msk [vmem:[#allocation3 + $0x98] sm:$0xff] %vm810_vm3, %v753_v42  ;;  %978 = vrot.lane.b32.xlu2 %v3465_v3, %s2576_s29 }
 0x100   : > { %v767_v1 = vpop.permute.xlu2 %766 }
 0x101   : > { %837 = vst.msk [vmem:[#allocation3 + $0xd0] sm:$0xff] %vm810_vm3, %v767_v1  ;;  %v2533_v1 = vld [vmem:[%s2713_s24 + $0x78] sm:$0xff]  }
 0x102   : > { %1065 = vrot.lane.b32.xlu0 %v2828_v14, %s2577_s30 }
 0x103   : > { %1055 = vrot.lane.b32.xlu1 %v2810_v63, %s2577_s30 }
 0x104   : > { %v769_v60 = vpop.permute.xlu0 %768 }
 0x105   : > { %v759_v22 = vpop.permute.xlu1 %758  ;;  %838 = vst.msk [vmem:[#allocation3 + $0xd8] sm:$0xff] %vm810_vm3, %v769_v60 }
 0x106   : > { %833 = vst.msk [vmem:[#allocation3 + $0xb0] sm:$0xff] %vm810_vm3, %v759_v22  ;;  %984 = vrot.lane.b32.xlu2 %v3478_v13, %s2576_s29  ;;  %v2517_v22 = vunpack.c.l.bf16 %v2533_v1  ;;  %s4417_s29 = scalar_lea.vmem %s4529_s5, %s2424_s21 }
 0x108   : > { %v773_v63 = vpop.permute.xlu2 %772 }
 0x109   : > { %840 = vst.msk [vmem:[#allocation3 + $0xe8] sm:$0xff] %vm810_vm3, %v773_v63 }
 0x10a   : > { %1071 = vrot.lane.b32.xlu0 %v2919_v12, %s2577_s30 }
 0x10b   : > { %1061 = vrot.lane.b32.xlu1 %v2912_v6, %s2577_s30 }
 0x10c   : > { %v775_v57 = vpop.permute.xlu0 %774 }
 0x10d   : > { %v765_v55 = vpop.permute.xlu1 %764  ;;  %841 = vst.msk [vmem:[#allocation3 + $0xf0] sm:$0xff] %vm810_vm3, %v775_v57 }
 0x10e   : > { %836 = vst.msk [vmem:[#allocation3 + $0xc8] sm:$0xff] %vm810_vm3, %v765_v55  ;;  %1057 = vrot.lane.b32.xlu2 %v2814_v4, %s2577_s30  ;;  %v2562_v55 = vld [vmem:[%s4525_s1] ss:$0 sm:$0xff] }
 0x10f   : > { %v336_v57 = vmul.f32 %v2562_v55, %v2517_v22 }
 0x110   : > { %v925_v0 = vpop.permute.xlu2 %924 }
 0x111   : > { %1021 = vst.msk [vmem:[#allocation3] sm:$0xff] %vm1020_vm5, %v925_v0 }
 0x112   : > { %1077 = vrot.lane.b32.xlu0 %v2866_v35, %s2577_s30 }
 0x113   : > { %1067 = vrot.lane.b32.xlu1 %v2940_v32, %s2577_s30 }
 0x114   : > { %v927_v42 = vpop.permute.xlu0 %926 }
 0x115   : > { %v771_v17 = vpop.permute.xlu1 %770  ;;  %1022 = vst.msk [vmem:[#allocation3 + $0x8] sm:$0xff] %vm1020_vm5, %v927_v42 }
 0x116   : > { %839 = vst.msk [vmem:[#allocation3 + $0xe0] sm:$0xff] %vm810_vm3, %v771_v17  ;;  %1063 = vrot.lane.b32.xlu2 %v2823_v10, %s2577_s30  ;;  %v2563_v17 = vld [vmem:[%s4526_s2] ss:$0 sm:$0xff] }
 0x117   : > { %v371_v42 = vadd.f32 %v2563_v17, %v336_v57  ;;  %v2518_v57 = vunpack.c.h.bf16 %v2533_v1 }
 0x118   : > { %v931_v4 = vpop.permute.xlu2 %930 }
 0x119   : > { %1024 = vst.msk [vmem:[#allocation3 + $0x18] sm:$0xff] %vm1020_vm5, %v931_v4  ;;  %v403_v4 = vmax.f32 %v371_v42, 0.0  ;;  %v337_v42 = vmul.f32 %v2562_v55, %v2518_v57 }
 0x11a   : > { %1083 = vrot.lane.b32.xlu0 %v3006_v28, %s2577_s30 }
 0x11b   : > { %1073 = vrot.lane.b32.xlu1 %v2927_v20, %s2577_s30  ;;  %492 = vst.msk [vmem:[#allocation2 + $0x181] sm:$0xff] %vm405_vm0, %v403_v4  ;;  %v372_v4 = vadd.f32 %v2563_v17, %v337_v42 }
 0x11c   : > { %v933_v37 = vpop.permute.xlu0 %932 }
 0x11d   : > { %v777_v24 = vpop.permute.xlu1 %776  ;;  %1025 = vst.msk [vmem:[#allocation3 + $0x20] sm:$0xff] %vm1020_vm5, %v933_v37 }
 0x11e   : > { %842 = vst.msk [vmem:[#allocation3 + $0xf8] sm:$0xff] %vm810_vm3, %v777_v24  ;;  %1069 = vrot.lane.b32.xlu2 %v2847_v25, %s2577_s30 }
 0x120   : > { %v937_v60 = vpop.permute.xlu2 %936 }
 0x121   : > { %1027 = vst.msk [vmem:[#allocation3 + $0x30] sm:$0xff] %vm1020_vm5, %v937_v60 }
 0x122   : > { %1089 = vrot.lane.b32.xlu0 %v2973_v54, %s2577_s30  ;;  %v3571_v42 = vld [vmem:[#allocation2 + $0x180] sm:$0xff] }
 0x123   : > { %1079 = vrot.lane.b32.xlu1 %v3018_v43, %s2577_s30  ;;  %4669 = vst [vmem:[#allocation51_spill] sm:$0xff] %v3571_v42  ;;  %v4681_v54 = vld [vmem:[#allocation30_spill] sm:$0xff] }
 0x124   : > { %v939_v0 = vpop.permute.xlu0 %938 }
 0x125   : > { %v929_v63 = vpop.permute.xlu1 %928  ;;  %1028 = vst.msk [vmem:[#allocation3 + $0x38] sm:$0xff] %vm1020_vm5, %v939_v0 }
 0x126   : > { %1023 = vst.msk [vmem:[#allocation3 + $0x10] sm:$0xff] %vm1020_vm5, %v929_v63  ;;  %1075 = vrot.lane.b32.xlu2 %v2860_v31, %s2577_s30 }
 0x128   : > { %v943_v24 = vpop.permute.xlu2 %942 }
 0x129   : > { %1030 = vst.msk [vmem:[#allocation3 + $0x48] sm:$0xff] %vm1020_vm5, %v943_v24  ;;  %v404_v24 = vmax.f32 %v372_v4, 0.0 }
 0x12a   : > { %1095 = vrot.lane.b32.xlu0 %v3081_v50, %s2577_s30 }
 0x12b   : > { %1085 = vrot.lane.b32.xlu1 %v3028_v58, %s2577_s30  ;;  %493 = vst.msk [vmem:[#allocation2 + $0x189] sm:$0xff] %vm405_vm0, %v404_v24 }
 0x12c   : > { %v945_v22 = vpop.permute.xlu0 %944 }
 0x12d   : > { %v935_v37 = vpop.permute.xlu1 %934  ;;  %1031 = vst.msk [vmem:[#allocation3 + $0x50] sm:$0xff] %vm1020_vm5, %v945_v22 }
 0x12e   : > { %1026 = vst.msk [vmem:[#allocation3 + $0x28] sm:$0xff] %vm1020_vm5, %v935_v37  ;;  %1081 = vrot.lane.b32.xlu2 %v2956_v38, %s2577_s30 }
 0x130   : > { %v949_v60 = vpop.permute.xlu2 %948 }
 0x131   : > { %1033 = vst.msk [vmem:[#allocation3 + $0x60] sm:$0xff] %vm1020_vm5, %v949_v60 }
 0x132   : > { %1101 = vrot.lane.b32.xlu0 %v3070_v36, %s2577_s30 }
 0x133   : > { %1091 = vrot.lane.b32.xlu1 %v3104_v56, %s2577_s30 }
 0x134   : > { %v951_v0 = vpop.permute.xlu0 %950 }
 0x135   : > { %v941_v63 = vpop.permute.xlu1 %940  ;;  %1034 = vst.msk [vmem:[#allocation3 + $0x68] sm:$0xff] %vm1020_vm5, %v951_v0 }
 0x136   : > { %1029 = vst.msk [vmem:[#allocation3 + $0x40] sm:$0xff] %vm1020_vm5, %v941_v63  ;;  %1087 = vrot.lane.b32.xlu2 %v2966_v47, %s2577_s30 }
 0x138   : > { %v955_v37 = vpop.permute.xlu2 %954 }
 0x139   : > { %1036 = vst.msk [vmem:[#allocation3 + $0x78] sm:$0xff] %vm1020_vm5, %v955_v37 }
 0x13a   : > { %1107 = vrot.lane.b32.xlu0 %v3154_v34, %s2577_s30 }
 0x13b   : > { %1097 = vrot.lane.b32.xlu1 %v3093_v16, %s2577_s30 }
 0x13c   : > { %v957_v1 = vpop.permute.xlu0 %956 }
 0x13d   : > { %v947_v22 = vpop.permute.xlu1 %946  ;;  %1037 = vst.msk [vmem:[#allocation3 + $0x80] sm:$0xff] %vm1020_vm5, %v957_v1 }
 0x13e   : > { %1032 = vst.msk [vmem:[#allocation3 + $0x58] sm:$0xff] %vm1020_vm5, %v947_v22  ;;  %1093 = vrot.lane.b32.xlu2 %v3045_v8, %s2577_s30 }
 0x140   : > { %v961_v55 = vpop.permute.xlu2 %960 }
 0x141   : > { %1039 = vst.msk [vmem:[#allocation3 + $0x90] sm:$0xff] %vm1020_vm5, %v961_v55  ;;  %v3590_v55 = vld [vmem:[#allocation2 + $0x188] sm:$0xff] }
 0x142   : > { %1113 = vrot.lane.b32.xlu0 %v3143_v39, %s2577_s30  ;;  %4670 = vst [vmem:[#allocation52_spill] sm:$0xff] %v3590_v55 }
 0x143   : > { %1103 = vrot.lane.b32.xlu1 %v3147_v5, %s2577_s30 }
 0x144   : > { %v963_v60 = vpop.permute.xlu0 %962 }
 0x145   : > { %v953_v17 = vpop.permute.xlu1 %952  ;;  %1040 = vst.msk [vmem:[#allocation3 + $0x98] sm:$0xff] %vm1020_vm5, %v963_v60  ;;  %v4672_v60 = vld [vmem:[#allocation17_spill] sm:$0xff] }
 0x146   : > { %1035 = vst.msk [vmem:[#allocation3 + $0x70] sm:$0xff] %vm1020_vm5, %v953_v17  ;;  %1099 = vrot.lane.b32.xlu2 %v3053_v11, %s2577_s30  ;;  %v4671_v17 = vld [vmem:[#allocation4_spill] sm:$0xff] }
 0x148   : > { %v967_v63 = vpop.permute.xlu2 %966 }
 0x149   : > { %1042 = vst.msk [vmem:[#allocation3 + $0xa8] sm:$0xff] %vm1020_vm5, %v967_v63 }
 0x14a   : > { %1190 = vrot.lane.b32.xlu0 %v2838_v21, %s2578_s10 }
 0x14b   : > { %1109 = vrot.lane.b32.xlu1 %v3163_v7, %s2577_s30 }
 0x14c   : > { %v969_v0 = vpop.permute.xlu0 %968 }
 0x14d   : > { %v959_v57 = vpop.permute.xlu1 %958  ;;  %1043 = vst.msk [vmem:[#allocation3 + $0xb0] sm:$0xff] %vm1020_vm5, %v969_v0  ;;  %v4673_v0 = vld [vmem:[#allocation7_spill] sm:$0xff] }
 0x14e   : > { %1038 = vst.msk [vmem:[#allocation3 + $0x88] sm:$0xff] %vm1020_vm5, %v959_v57  ;;  %1105 = vrot.lane.b32.xlu2 %v3118_v41, %s2577_s30 }
 0x150   : > { %v973_v4 = vpop.permute.xlu2 %972 }
 0x151   : > { %1045 = vst.msk [vmem:[#allocation3 + $0xc0] sm:$0xff] %vm1020_vm5, %v973_v4  ;;  %v4674_v4 = vld [vmem:[#allocation5_spill] sm:$0xff] }
 0x152   : > { %1196 = vrot.lane.b32.xlu0 %v2983_v61, %s2578_s10 }
 0x153   : > { %1115 = vrot.lane.b32.xlu1 %v3571_v42, %s2577_s30 }
 0x154   : > { %v975_v24 = vpop.permute.xlu0 %974 }
 0x155   : > { %v965_v21 = vpop.permute.xlu1 %964  ;;  %1046 = vst.msk [vmem:[#allocation3 + $0xc8] sm:$0xff] %vm1020_vm5, %v975_v24  ;;  %v4675_v24 = vld [vmem:[#allocation22_spill] sm:$0xff] }
 0x156   : > { %1041 = vst.msk [vmem:[#allocation3 + $0xa0] sm:$0xff] %vm1020_vm5, %v965_v21  ;;  %1111 = vrot.lane.b32.xlu2 %v3127_v51, %s2577_s30 }
 0x158   : > { %v979_v37 = vpop.permute.xlu2 %978 }
 0x159   : > { %1048 = vst.msk [vmem:[#allocation3 + $0xd8] sm:$0xff] %vm1020_vm5, %v979_v37 }
 0x15a   : > { %1202 = vrot.lane.b32.xlu0 %v3034_v59, %s2578_s10 }
 0x15b   : > { %1192 = vrot.lane.b32.xlu1 %v2880_v46, %s2578_s10 }
 0x15c   : > { %v981_v1 = vpop.permute.xlu0 %980 }
 0x15d   : > { %v971_v22 = vpop.permute.xlu1 %970  ;;  %1049 = vst.msk [vmem:[#allocation3 + $0xe0] sm:$0xff] %vm1020_vm5, %v981_v1  ;;  %v4676_v1 = vld [vmem:[#allocation6_spill] sm:$0xff] }
 0x15e   : > { %1044 = vst.msk [vmem:[#allocation3 + $0xb8] sm:$0xff] %vm1020_vm5, %v971_v22  ;;  %1117 = vrot.lane.b32.xlu2 %v3590_v55, %s2577_s30 }
 0x160   : > { %v985_v46 = vpop.permute.xlu2 %984 }
 0x161   : > { %1051 = vst.msk [vmem:[#allocation3 + $0xf0] sm:$0xff] %vm1020_vm5, %v985_v46  ;;  %v4677_v46 = vld [vmem:[#allocation8_spill] sm:$0xff] }
 0x162   : > { %1208 = vrot.lane.b32.xlu0 %v4672_v60, %s2578_s10 }
 0x163   : > { %1198 = vrot.lane.b32.xlu1 %v4671_v17, %s2578_s10 }
 0x164   : > { %v987_v57 = vpop.permute.xlu0 %986 }
 0x165   : > { %v977_v63 = vpop.permute.xlu1 %976  ;;  %1052 = vst.msk [vmem:[#allocation3 + $0xf8] sm:$0xff] %vm1020_vm5, %v987_v57  ;;  %v4678_v57 = vld [vmem:[#allocation27_spill] sm:$0xff] }
 0x166   : > { %1047 = vst.msk [vmem:[#allocation3 + $0xd0] sm:$0xff] %vm1020_vm5, %v977_v63  ;;  %1194 = vrot.lane.b32.xlu2 %v4673_v0, %s2578_s10 }
 0x168   : > { %v1058_v21 = vpop.permute.xlu2 %1057 }
 0x169   : > { %1153 = vst.msk [vmem:[#allocation3 + $0x8] sm:$0xff] %vm1151_vm6, %v1058_v21 }
 0x16a   : > { %1214 = vrot.lane.b32.xlu0 %v4675_v24, %s2578_s10 }
 0x16b   : > { %1204 = vrot.lane.b32.xlu1 %v4674_v4, %s2578_s10 }
 0x16c   : > { %v1060_v22 = vpop.permute.xlu0 %1059 }
 0x16d   : > { %v983_v37 = vpop.permute.xlu1 %982  ;;  %1154 = vst.msk [vmem:[#allocation3 + $0x10] sm:$0xff] %vm1151_vm6, %v1060_v22  ;;  %v4680_v22 = vld [vmem:[#allocation12_spill] sm:$0xff] }
 0x16e   : > { %1050 = vst.msk [vmem:[#allocation3 + $0xe8] sm:$0xff] %vm1020_vm5, %v983_v37  ;;  %1200 = vrot.lane.b32.xlu2 %v4676_v1, %s2578_s10  ;;  %v4679_v37 = vld [vmem:[#allocation11_spill] sm:$0xff] }
 0x170   : > { %v1064_v63 = vpop.permute.xlu2 %1063 }
 0x171   : > { %1156 = vst.msk [vmem:[#allocation3 + $0x20] sm:$0xff] %vm1151_vm6, %v1064_v63 }
 0x172   : > { %1220 = vrot.lane.b32.xlu0 %v4678_v57, %s2578_s10 }
 0x173   : > { %1210 = vrot.lane.b32.xlu1 %v4677_v46, %s2578_s10 }
 0x174   : > { %v1066_v21 = vpop.permute.xlu0 %1065 }
 0x175   : > { %v1056_v5 = vpop.permute.xlu1 %1055  ;;  %1157 = vst.msk [vmem:[#allocation3 + $0x28] sm:$0xff] %vm1151_vm6, %v1066_v21  ;;  %v4683_v21 = vld [vmem:[#allocation15_spill] sm:$0xff] }
 0x176   : > { %1152 = vst.msk [vmem:[#allocation3] sm:$0xff] %vm1151_vm6, %v1056_v5  ;;  %1206 = vrot.lane.b32.xlu2 %v4679_v37, %s2578_s10  ;;  %v4682_v5 = vld [vmem:[#allocation13_spill] sm:$0xff] }
 0x178   : > { %v1070_v41 = vpop.permute.xlu2 %1069 }
 0x179   : > { %1159 = vst.msk [vmem:[#allocation3 + $0x38] sm:$0xff] %vm1151_vm6, %v1070_v41 }
 0x17a   : > { %1226 = vrot.lane.b32.xlu0 %v4681_v54, %s2578_s10 }
 0x17b   : > { %1216 = vrot.lane.b32.xlu1 %v4680_v22, %s2578_s10 }
 0x17c   : > { %v1072_v63 = vpop.permute.xlu0 %1071 }
 0x17d   : > { %v1062_v47 = vpop.permute.xlu1 %1061  ;;  %1160 = vst.msk [vmem:[#allocation3 + $0x40] sm:$0xff] %vm1151_vm6, %v1072_v63  ;;  %v4685_v63 = vld [vmem:[#allocation19_spill] sm:$0xff] }
 0x17e   : > { %1155 = vst.msk [vmem:[#allocation3 + $0x18] sm:$0xff] %vm1151_vm6, %v1062_v47  ;;  %1212 = vrot.lane.b32.xlu2 %v4682_v5, %s2578_s10  ;;  %v4684_v47 = vld [vmem:[#allocation18_spill] sm:$0xff] }
 0x180   : > { %v1076_v26 = vpop.permute.xlu2 %1075 }
 0x181   : > { %1162 = vst.msk [vmem:[#allocation3 + $0x50] sm:$0xff] %vm1151_vm6, %v1076_v26 }
 0x182   : > { %1232 = vrot.lane.b32.xlu0 %v3220_v44, %s2578_s10 }
 0x183   : > { %1222 = vrot.lane.b32.xlu1 %v4683_v21, %s2578_s10  ;;  %v4686_v21 = vld [vmem:[#allocation34_spill] sm:$0xff] }
 0x184   : > { %v1078_v41 = vpop.permute.xlu0 %1077 }
 0x185   : > { %v1068_v19 = vpop.permute.xlu1 %1067  ;;  %1163 = vst.msk [vmem:[#allocation3 + $0x58] sm:$0xff] %vm1151_vm6, %v1078_v41  ;;  %v4688_v41 = vld [vmem:[#allocation26_spill] sm:$0xff] }
 0x186   : > { %1158 = vst.msk [vmem:[#allocation3 + $0x30] sm:$0xff] %vm1151_vm6, %v1068_v19  ;;  %1218 = vrot.lane.b32.xlu2 %v4684_v47, %s2578_s10  ;;  %v4687_v19 = vld [vmem:[#allocation23_spill] sm:$0xff] }
 0x188   : > { %v1082_v39 = vpop.permute.xlu2 %1081 }
 0x189   : > { %1165 = vst.msk [vmem:[#allocation3 + $0x68] sm:$0xff] %vm1151_vm6, %v1082_v39  ;;  %v1185_v39 = vrot.slane %v3571_v42, 1 }
 0x18a   : > { %1238 = vrot.lane.b32.xlu0 %v4686_v21, %s2578_s10  ;;  %v4689_v21 = vld [vmem:[#allocation28_spill] sm:$0xff] }
 0x18b   : > { %1228 = vrot.lane.b32.xlu1 %v4685_v63, %s2578_s10 }
 0x18c   : > { %v1084_v26 = vpop.permute.xlu0 %1083 }
 0x18d   : > { %v1074_v13 = vpop.permute.xlu1 %1073  ;;  %1166 = vst.msk [vmem:[#allocation3 + $0x70] sm:$0xff] %vm1151_vm6, %v1084_v26 }
 0x18e   : > { %1161 = vst.msk [vmem:[#allocation3 + $0x48] sm:$0xff] %vm1151_vm6, %v1074_v13  ;;  %1224 = vrot.lane.b32.xlu2 %v4687_v19, %s2578_s10  ;;  %v1186_v13 = vrot.slane %v3590_v55, 1  ;;  %v4694_v55 = vld [vmem:[#allocation32_spill] sm:$0xff] }
 0x190   : > { %v1088_v11 = vpop.permute.xlu2 %1087  ;;  %v3661_v19 = vsel %vm633_vm1, %v1185_v39, %v1186_v13  ;;  %v4693_v39 = vld [vmem:[#allocation31_spill] sm:$0xff] }
 0x191   : > { %1168 = vst.msk [vmem:[#allocation3 + $0x80] sm:$0xff] %vm1151_vm6, %v1088_v11 }
 0x192   : > { %1244 = vrot.lane.b32.xlu0 %v3260_v18, %s2578_s10  ;;  %4690 = vst [vmem:[#allocation4_spill] sm:$0xff] %v3661_v19 }
 0x193   : > { %1234 = vrot.lane.b32.xlu1 %v4688_v41, %s2578_s10  ;;  %v4691_v41 = vld [vmem:[#allocation29_spill] sm:$0xff] }
 0x194   : > { %v1090_v26 = vpop.permute.xlu0 %1089 }
 0x195   : > { %v1080_v51 = vpop.permute.xlu1 %1079  ;;  %1169 = vst.msk [vmem:[#allocation3 + $0x88] sm:$0xff] %vm1151_vm6, %v1090_v26  ;;  %v3670_v26 = vld [vmem:[#allocation2 + $0x190] sm:$0x3] }
 0x196   : > { %1164 = vst.msk [vmem:[#allocation3 + $0x60] sm:$0xff] %vm1151_vm6, %v1080_v51  ;;  %1230 = vrot.lane.b32.xlu2 %v4689_v21, %s2578_s10  ;;  %v1188_v42 = vrot.slane %v3670_v26, 1 }
 0x197   : > { %4692 = vst [vmem:[#allocation17_spill] sm:$0xff] %v3670_v26 }
 0x198   : > { %v1094_v36 = vpop.permute.xlu2 %1093 }
 0x199   : > { %1171 = vst.msk [vmem:[#allocation3 + $0x98] sm:$0xff] %vm1151_vm6, %v1094_v36 }
 0x19a   : > { %1250 = vrot.lane.b32.xlu0 %v3661_v19, %s2578_s10  ;;  %v4695_v19 = vld [vmem:[#allocation33_spill] sm:$0xff] }
 0x19b   : > { %1240 = vrot.lane.b32.xlu1 %v4691_v41, %s2578_s10 }
 0x19c   : > { %v1096_v51 = vpop.permute.xlu0 %1095 }
 0x19d   : > { %v1086_v11 = vpop.permute.xlu1 %1085  ;;  %1172 = vst.msk [vmem:[#allocation3 + $0xa0] sm:$0xff] %vm1151_vm6, %v1096_v51  ;;  %v3683_v51 = vsel %vm633_vm1, %v1186_v13, %v1188_v42  ;;  %v4696_v42 = vld [vmem:[#allocation35_spill] sm:$0xff]  ;;  %v4697_v13 = vld [vmem:[#allocation36_spill] sm:$0xff] }
 0x19e   : > { %1167 = vst.msk [vmem:[#allocation3 + $0x78] sm:$0xff] %vm1151_vm6, %v1086_v11  ;;  %1236 = vrot.lane.b32.xlu2 %v4693_v39, %s2578_s10 }
 0x1a0   : > { %v1100_v41 = vpop.permute.xlu2 %1099 }
 0x1a1   : > { %1174 = vst.msk [vmem:[#allocation3 + $0xb0] sm:$0xff] %vm1151_vm6, %v1100_v41 }
 0x1a2   : > { %1326 = vrot.lane.b32.xlu0 %v3297_v62, %s2579_s11 }
 0x1a3   : > { %1246 = vrot.lane.b32.xlu1 %v4694_v55, %s2578_s10 }
 0x1a4   : > { %v1102_v11 = vpop.permute.xlu0 %1101 }
 0x1a5   : > { %v1092_v36 = vpop.permute.xlu1 %1091  ;;  %1175 = vst.msk [vmem:[#allocation3 + $0xb8] sm:$0xff] %vm1151_vm6, %v1102_v11 }
 0x1a6   : > { %1170 = vst.msk [vmem:[#allocation3 + $0x90] sm:$0xff] %vm1151_vm6, %v1092_v36  ;;  %1242 = vrot.lane.b32.xlu2 %v4695_v19, %s2578_s10 }
 0x1a8   : > { %v1106_v26 = vpop.permute.xlu2 %1105 }
 0x1a9   : > { %1177 = vst.msk [vmem:[#allocation3 + $0xc8] sm:$0xff] %vm1151_vm6, %v1106_v26 }
 0x1aa   : > { %1457 = vrot.lane.b32.xlu0 %v2912_v6, %s2580_s12 }
 0x1ab   : > { %1252 = vrot.lane.b32.xlu1 %v3683_v51, %s2578_s10 }
 0x1ac   : > { %v1108_v41 = vpop.permute.xlu0 %1107 }
 0x1ad   : > { %v1098_v62 = vpop.permute.xlu1 %1097  ;;  %1178 = vst.msk [vmem:[#allocation3 + $0xd0] sm:$0xff] %vm1151_vm6, %v1108_v41 }
 0x1ae   : > { %1173 = vst.msk [vmem:[#allocation3 + $0xa8] sm:$0xff] %vm1151_vm6, %v1098_v62  ;;  %1248 = vrot.lane.b32.xlu2 %v4696_v42, %s2578_s10 }
 0x1b0   : > { %v1112_v36 = vpop.permute.xlu2 %1111 }
 0x1b1   : > { %1180 = vst.msk [vmem:[#allocation3 + $0xe0] sm:$0xff] %vm1151_vm6, %v1112_v36 }
 0x1b2   : > { %1724 = vrot.lane.b32.xlu0 %v4697_v13, %s2581_s13 }
 0x1b3   : > { %1328 = vrot.lane.b32.xlu1 %v4697_v13, %s2579_s11 }
 0x1b4   : > { %v1114_v26 = vpop.permute.xlu0 %1113 }
 0x1b5   : > { %v1104_v6 = vpop.permute.xlu1 %1103  ;;  %1181 = vst.msk [vmem:[#allocation3 + $0xe8] sm:$0xff] %vm1151_vm6, %v1114_v26 }
 0x1b6   : > { %1176 = vst.msk [vmem:[#allocation3 + $0xc0] sm:$0xff] %vm1151_vm6, %v1104_v6  ;;  %1324 = vrot.lane.b32.xlu2 %v3263_v52, %s2579_s11 }
 0x1b8   : > { %v1118_v11 = vpop.permute.xlu2 %1117 }
 0x1b9   : > { %1183 = vst.msk [vmem:[#allocation3 + $0xf8] sm:$0xff] %vm1151_vm6, %v1118_v11 }
 0x1ba   : > { %1340 = vrot.lane.b32.xlu0 %v3283_v2, %s2579_s11 }
 0x1bb   : > { %1590 = vrot.lane.b32.xlu1 %v4673_v0, %s2582_s14 }
 0x1bc   : > { %v1191_v41 = vpop.permute.xlu0 %1190 }
 0x1bd   : > { %v1110_v62 = vpop.permute.xlu1 %1109  ;;  %1287 = vst.msk [vmem:[#allocation3] sm:$0xff] %vm1286_vm7, %v1191_v41 }
 0x1be   : > { %1179 = vst.msk [vmem:[#allocation3 + $0xd8] sm:$0xff] %vm1151_vm6, %v1110_v62  ;;  %1455 = vrot.lane.b32.xlu2 %v2892_v53, %s2580_s12 }
 0x1c0   : > { %v1195_v52 = vpop.permute.xlu2 %1194 }
 0x1c1   : > { %1289 = vst.msk [vmem:[#allocation3 + $0x10] sm:$0xff] %vm1286_vm7, %v1195_v52 }
 0x1c2   : > { %1461 = vrot.lane.b32.xlu0 %v2828_v14, %s2580_s12 }
 0x1c3   : > { %1726 = vrot.lane.b32.xlu1 %v3280_v29, %s2581_s13 }
 0x1c4   : > { %v1197_v13 = vpop.permute.xlu0 %1196 }
 0x1c5   : > { %v1116_v0 = vpop.permute.xlu1 %1115  ;;  %1290 = vst.msk [vmem:[#allocation3 + $0x18] sm:$0xff] %vm1286_vm7, %v1197_v13 }
 0x1c6   : > { %1182 = vst.msk [vmem:[#allocation3 + $0xf0] sm:$0xff] %vm1151_vm6, %v1116_v0  ;;  %1592 = vrot.lane.b32.xlu2 %v2983_v61, %s2582_s14  ;;  %v4700_v0 = vld [vmem:[#allocation37_spill] sm:$0xff] }
 0x1c8   : > { %v1201_v53 = vpop.permute.xlu2 %1200 }
 0x1c9   : > { %1292 = vst.msk [vmem:[#allocation3 + $0x28] sm:$0xff] %vm1286_vm7, %v1201_v53 }
 0x1ca   : > { %1594 = vrot.lane.b32.xlu0 %v4671_v17, %s2582_s14 }
 0x1cb   : > { %1342 = vrot.lane.b32.xlu1 %v3320_v27, %s2579_s11 }
 0x1cc   : > { %v1203_v14 = vpop.permute.xlu0 %1202 }
 0x1cd   : > { %v1193_v36 = vpop.permute.xlu1 %1192  ;;  %1293 = vst.msk [vmem:[#allocation3 + $0x30] sm:$0xff] %vm1286_vm7, %v1203_v14 }
 0x1ce   : > { %1288 = vst.msk [vmem:[#allocation3 + $0x8] sm:$0xff] %vm1286_vm7, %v1193_v36  ;;  %1330 = vrot.lane.b32.xlu2 %v3280_v29, %s2579_s11 }
 0x1d0   : > { %v1207_v61 = vpop.permute.xlu2 %1206 }
 0x1d1   : > { %1295 = vst.msk [vmem:[#allocation3 + $0x40] sm:$0xff] %vm1286_vm7, %v1207_v61 }
 0x1d2   : > { %1608 = vrot.lane.b32.xlu0 %v4682_v5, %s2582_s14 }
 0x1d3   : > { %1471 = vrot.lane.b32.xlu1 %v2860_v31, %s2580_s12 }
 0x1d4   : > { %v1209_v17 = vpop.permute.xlu0 %1208 }
 0x1d5   : > { %v1199_v6 = vpop.permute.xlu1 %1198  ;;  %1296 = vst.msk [vmem:[#allocation3 + $0x48] sm:$0xff] %vm1286_vm7, %v1209_v17 }
 0x1d6   : > { %1291 = vst.msk [vmem:[#allocation3 + $0x20] sm:$0xff] %vm1286_vm7, %v1199_v6  ;;  %1459 = vrot.lane.b32.xlu2 %v2823_v10, %s2580_s12  ;;  %v4698_v10 = vld [vmem:[#allocation40_spill] sm:$0xff] }
 0x1d7   : > { %v552_v6 = vld [vmem:[%s4527_s3 + $0x10] sm:$0x3] }
 0x1d8   : > { %v1213_v29 = vpop.permute.xlu2 %1212  ;;  %v1910_v17 = vunpack.c.l.b16 %v552_v6 }
 0x1d9   : > { %1298 = vst.msk [vmem:[#allocation3 + $0x58] sm:$0xff] %vm1286_vm7, %v1213_v29 }
 0x1da   : > { %1740 = vrot.lane.b32.xlu0 %v3361_v30, %s2581_s13  ;;  %v1913_v29 = vpack.c.b16 %v1910_v17, %v1910_v17 }
 0x1db   : > { %1596 = vrot.lane.b32.xlu1 %v4676_v1, %s2582_s14 }
 0x1dc   : > { %v1215_v5 = vpop.permute.xlu0 %1214 }
 0x1dd   : > { %v1205_v31 = vpop.permute.xlu1 %1204  ;;  %1299 = vst.msk [vmem:[#allocation3 + $0x60] sm:$0xff] %vm1286_vm7, %v1215_v5 }
 0x1de   : > { %1294 = vst.msk [vmem:[#allocation3 + $0x38] sm:$0xff] %vm1286_vm7, %v1205_v31  ;;  %1473 = vrot.lane.b32.xlu2 %v2866_v35, %s2580_s12  ;;  %v4699_v35 = vld [vmem:[#allocation39_spill] sm:$0xff]  ;;  %v1967_v31 = vsel %vm1965_vm9, %v1913_v29, 0 }
 0x1df   : > { %1974 = vmatpush.bf16.msra.mxu0 %v1967_v31  ;;  %2534 = vmatpush.bf16.msra.mxu1 %v1967_v31 }
 0x1e0   : > { %v1219_v26 = vpop.permute.xlu2 %1218  ;;  %2535 = vmatpush.bf16.msra.mxu2 %v1967_v31  ;;  %2536 = vmatpush.bf16.msra.mxu3 %v1967_v31 }
 0x1e1   : > { %1301 = vst.msk [vmem:[#allocation3 + $0x70] sm:$0xff] %vm1286_vm7, %v1219_v26  ;;  %v2454_v26 = vld [vmem:[%s4527_s3 + $0x8] sm:$0xff] }
 0x1e2   : > { %1358 = vrot.lane.b32.xlu0 %v3346_v48, %s2579_s11 }
 0x1e3   : > { %1728 = vrot.lane.b32.xlu1 %v4698_v10, %s2581_s13  ;;  %1975 = vmatpush.bf16.msra.mxu0 %v2454_v26 }
 0x1e4   : > { %v1221_v11 = vpop.permute.xlu0 %1220  ;;  %2537 = vmatpush.bf16.msra.mxu1 %v2454_v26  ;;  %2538 = vmatpush.bf16.msra.mxu2 %v2454_v26 }
 0x1e5   : > { %v1211_v1 = vpop.permute.xlu1 %1210  ;;  %1302 = vst.msk [vmem:[#allocation3 + $0x78] sm:$0xff] %vm1286_vm7, %v1221_v11  ;;  %2539 = vmatpush.bf16.msra.mxu3 %v2454_v26 }
 0x1e6   : > { %1297 = vst.msk [vmem:[#allocation3 + $0x50] sm:$0xff] %vm1286_vm7, %v1211_v1  ;;  %1606 = vrot.lane.b32.xlu2 %v4677_v46, %s2582_s14 }
 0x1e8   : > { %v1225_v62 = vpop.permute.xlu2 %1224 }
 0x1e9   : > { %1304 = vst.msk [vmem:[#allocation3 + $0x88] sm:$0xff] %vm1286_vm7, %v1225_v62 }
 0x1ea   : > { %1622 = vrot.lane.b32.xlu0 %v4681_v54, %s2582_s14 }
 0x1eb   : > { %1742 = vrot.lane.b32.xlu1 %v4699_v35, %s2581_s13 }
 0x1ec   : > { %v1227_v52 = vpop.permute.xlu0 %1226 }
 0x1ed   : > { %v1217_v41 = vpop.permute.xlu1 %1216  ;;  %1305 = vst.msk [vmem:[#allocation3 + $0x90] sm:$0xff] %vm1286_vm7, %v1227_v52 }
 0x1ee   : > { %1300 = vst.msk [vmem:[#allocation3 + $0x68] sm:$0xff] %vm1286_vm7, %v1217_v41  ;;  %1730 = vrot.lane.b32.xlu2 %v4700_v0, %s2581_s13 }
 0x1f0   : > { %v1231_v46 = vpop.permute.xlu2 %1230 }
 0x1f1   : > { %1307 = vst.msk [vmem:[#allocation3 + $0xa0] sm:$0xff] %vm1286_vm7, %v1231_v46 }
 0x1f2   : > { %1758 = vrot.lane.b32.xlu0 %v3429_v9, %s2581_s13 }
 0x1f3   : > { %1487 = vrot.lane.b32.xlu1 %v3104_v56, %s2580_s12 }
 0x1f4   : > { %v1233_v54 = vpop.permute.xlu0 %1232 }
 0x1f5   : > { %v1223_v13 = vpop.permute.xlu1 %1222  ;;  %1308 = vst.msk [vmem:[#allocation3 + $0xa8] sm:$0xff] %vm1286_vm7, %v1233_v54 }
 0x1f6   : > { %1303 = vst.msk [vmem:[#allocation3 + $0x80] sm:$0xff] %vm1286_vm7, %v1223_v13  ;;  %1356 = vrot.lane.b32.xlu2 %v3406_v15, %s2579_s11 }
 0x1f8   : > { %v1237_v53 = vpop.permute.xlu2 %1236 }
 0x1f9   : > { %1310 = vst.msk [vmem:[#allocation3 + $0xb8] sm:$0xff] %vm1286_vm7, %v1237_v53 }
 0x1fa   : > { %1344 = vrot.lane.b32.xlu0 %v3361_v30, %s2579_s11 }
 0x1fb   : > { %1624 = vrot.lane.b32.xlu1 %v4685_v63, %s2582_s14 }
 0x1fc   : > { %v1239_v36 = vpop.permute.xlu0 %1238 }
 0x1fd   : > { %v1229_v56 = vpop.permute.xlu1 %1228  ;;  %1311 = vst.msk [vmem:[#allocation3 + $0xc0] sm:$0xff] %vm1286_vm7, %v1239_v36 }
 0x1fe   : > { %1306 = vst.msk [vmem:[#allocation3 + $0x98] sm:$0xff] %vm1286_vm7, %v1229_v56  ;;  %1489 = vrot.lane.b32.xlu2 %v3045_v8, %s2580_s12 }
 0x200   : > { %v1243_v14 = vpop.permute.xlu2 %1242 }
 0x201   : > { %1313 = vst.msk [vmem:[#allocation3 + $0xd0] sm:$0xff] %vm1286_vm7, %v1243_v14 }
 0x202   : > { %1465 = vrot.lane.b32.xlu0 %v2847_v25, %s2580_s12 }
 0x203   : > { %1332 = vrot.lane.b32.xlu1 %v4698_v10, %s2579_s11 }
 0x204   : > { %v1245_v30 = vpop.permute.xlu0 %1244 }
 0x205   : > { %v1235_v63 = vpop.permute.xlu1 %1234  ;;  %1314 = vst.msk [vmem:[#allocation3 + $0xd8] sm:$0xff] %vm1286_vm7, %v1245_v30 }
 0x206   : > { %1309 = vst.msk [vmem:[#allocation3 + $0xb0] sm:$0xff] %vm1286_vm7, %v1235_v63  ;;  %1756 = vrot.lane.b32.xlu2 %v3388_v45, %s2581_s13 }
 0x208   : > { %v1249_v8 = vpop.permute.xlu2 %1248 }
 0x209   : > { %1316 = vst.msk [vmem:[#allocation3 + $0xe8] sm:$0xff] %vm1286_vm7, %v1249_v8 }
 0x20a   : > { %1598 = vrot.lane.b32.xlu0 %v3034_v59, %s2582_s14 }
 0x20b   : > { %1346 = vrot.lane.b32.xlu1 %v4699_v35, %s2579_s11 }
 0x20c   : > { %v1251_v25 = vpop.permute.xlu0 %1250 }
 0x20d   : > { %v1241_v61 = vpop.permute.xlu1 %1240  ;;  %1317 = vst.msk [vmem:[#allocation3 + $0xf0] sm:$0xff] %vm1286_vm7, %v1251_v25 }
 0x20e   : > { %1312 = vst.msk [vmem:[#allocation3 + $0xc8] sm:$0xff] %vm1286_vm7, %v1241_v61  ;;  %1334 = vrot.lane.b32.xlu2 %v4700_v0, %s2579_s11  ;;  %v4705_v61 = vld [vmem:[#allocation44_spill] sm:$0xff] }
 0x210   : > { %v1325_v59 = vpop.permute.xlu2 %1324 }
 0x211   : > { %1421 = vst.msk [vmem:[#allocation3] sm:$0xff] %vm1420_vm8, %v1325_v59 }
 0x212   : > { %1612 = vrot.lane.b32.xlu0 %v4680_v22, %s2582_s14 }
 0x213   : > { %1475 = vrot.lane.b32.xlu1 %v3018_v43, %s2580_s12  ;;  %v2453_v43 = vld [vmem:[%s4527_s3] sm:$0xff] }
 0x214   : > { %v1327_v10 = vpop.permute.xlu0 %1326  ;;  %1976 = vmatpush.bf16.msra.mxu0 %v2453_v43  ;;  %2540 = vmatpush.bf16.msra.mxu1 %v2453_v43 }
 0x215   : > { %v1247_v5 = vpop.permute.xlu1 %1246  ;;  %1422 = vst.msk [vmem:[#allocation3 + $0x8] sm:$0xff] %vm1420_vm8, %v1327_v10  ;;  %2541 = vmatpush.bf16.msra.mxu2 %v2453_v43  ;;  %2542 = vmatpush.bf16.msra.mxu3 %v2453_v43 }
 0x216   : > { %1315 = vst.msk [vmem:[#allocation3 + $0xe0] sm:$0xff] %vm1286_vm7, %v1247_v5  ;;  %1463 = vrot.lane.b32.xlu2 %v2940_v32, %s2580_s12 }
 0x218   : > { %v1456_v22 = vpop.permute.xlu2 %1455 }
 0x219   : > { %1552 = vst.msk [vmem:[#allocation3] sm:$0xff] %vm1551_vm10, %v1456_v22 }
 0x21a   : > { %1744 = vrot.lane.b32.xlu0 %v3343_v23, %s2581_s13 }
 0x21b   : > { %1600 = vrot.lane.b32.xlu1 %v4674_v4, %s2582_s14  ;;  %v4701_v4 = vld [vmem:[#allocation38_spill] sm:$0xff] }
 0x21c   : > { %v1458_v32 = vpop.permute.xlu0 %1457 }
 0x21d   : > { %v1253_v1 = vpop.permute.xlu1 %1252  ;;  %1553 = vst.msk [vmem:[#allocation3 + $0x8] sm:$0xff] %vm1551_vm10, %v1458_v32 }
 0x21e   : > { %1318 = vst.msk [vmem:[#allocation3 + $0xf8] sm:$0xff] %vm1286_vm7, %v1253_v1  ;;  %1477 = vrot.lane.b32.xlu2 %v2956_v38, %s2580_s12 }
 0x220   : > { %v1593_v11 = vpop.permute.xlu2 %1592 }
 0x221   : > { %1688 = vst.msk [vmem:[#allocation3 + $0x8] sm:$0xff] %vm1686_vm11, %v1593_v11 }
 0x222   : > { %1362 = vrot.lane.b32.xlu0 %v3429_v9, %s2579_s11 }
 0x223   : > { %1732 = vrot.lane.b32.xlu1 %v4701_v4, %s2581_s13 }
 0x224   : > { %v1725_v62 = vpop.permute.xlu0 %1724 }
 0x225   : > { %v1329_v35 = vpop.permute.xlu1 %1328 }
 0x226   : > { %1423 = vst.msk [vmem:[#allocation3 + $0x10] sm:$0xff] %vm1420_vm8, %v1329_v35  ;;  %1610 = vrot.lane.b32.xlu2 %v4675_v24, %s2582_s14  ;;  %v4702_v24 = vld [vmem:[#allocation42_spill] sm:$0xff]  ;;  %v4707_v35 = vld [vmem:[#allocation16_spill] sm:$0xff] }
 0x228   : > { %v1331_v38 = vpop.permute.xlu2 %1330 }
 0x229   : > { %1424 = vst.msk [vmem:[#allocation3 + $0x18] sm:$0xff] %vm1420_vm8, %v1331_v38  ;;  %v4708_v38 = vld [vmem:[#allocation41_spill] sm:$0xff] }
 0x22a   : > { %1491 = vrot.lane.b32.xlu0 %v3081_v50, %s2580_s12 }
 0x22b   : > { %1746 = vrot.lane.b32.xlu1 %v3384_v40, %s2581_s13 }
 0x22c   : > { %v1341_v9 = vpop.permute.xlu0 %1340 }
 0x22d   : > { %v1591_v41 = vpop.permute.xlu1 %1590  ;;  %1429 = vst.msk [vmem:[#allocation3 + $0x40] sm:$0xff] %vm1420_vm8, %v1341_v9  ;;  %v4709_v9 = vld [vmem:[#allocation26_spill] sm:$0xff] }
 0x22e   : > { %1687 = vst.msk [vmem:[#allocation3] sm:$0xff] %vm1686_vm11, %v1591_v41  ;;  %1734 = vrot.lane.b32.xlu2 %v4702_v24, %s2581_s13 }
 0x22f   : > { %1821 = vst.msk [vmem:[#allocation3] sm:$0xff] %vm1820_vm12, %v1725_v62 }
 0x230   : > { %v1460_v52 = vpop.permute.xlu2 %1459 }
 0x231   : > { %1554 = vst.msk [vmem:[#allocation3 + $0x10] sm:$0xff] %vm1551_vm10, %v1460_v52  ;;  %v4710_v52 = vld [vmem:[#allocation21_spill] sm:$0xff] }
 0x232   : > { %1505 = vrot.lane.b32.xlu0 %v3163_v7, %s2580_s12 }
 0x233   : > { %1372 = vrot.lane.b32.xlu1 %v3433_v33, %s2579_s11 }
 0x234   : > { %v1462_v0 = vpop.permute.xlu0 %1461 }
 0x235   : > { %v1727_v50 = vpop.permute.xlu1 %1726  ;;  %1555 = vst.msk [vmem:[#allocation3 + $0x18] sm:$0xff] %vm1551_vm10, %v1462_v0 }
 0x236   : > { %1822 = vst.msk [vmem:[#allocation3 + $0x8] sm:$0xff] %vm1820_vm12, %v1727_v50  ;;  %1360 = vrot.lane.b32.xlu2 %v3388_v45, %s2579_s11  ;;  %v1853_v7 = vld [vmem:[#allocation3] sm:$0xff]  ;;  %v4703_v45 = vld [vmem:[#allocation46_spill] sm:$0xff] }
 0x238   : > { %v1474_v46 = vpop.permute.xlu2 %1473 }
 0x23a   : > { %1638 = vrot.lane.b32.xlu0 %v4695_v19, %s2582_s14 }
 0x23b   : > { %1493 = vrot.lane.b32.xlu1 %v3093_v16, %s2580_s12 }
 0x23c   : > { %v1595_v56 = vpop.permute.xlu0 %1594 }
 0x23d   : > { %v1343_v13 = vpop.permute.xlu1 %1342  ;;  %v1854_v54 = vld [vmem:[#allocation3 + $0x8] sm:$0xff]  ;;  %1689 = vst.msk [vmem:[#allocation3 + $0x10] sm:$0xff] %vm1686_vm11, %v1595_v56  ;;  %v4712_v56 = vld [vmem:[#allocation50_spill] sm:$0xff] }
 0x23e   : > { %1430 = vst.msk [vmem:[#allocation3 + $0x48] sm:$0xff] %vm1420_vm8, %v1343_v13  ;;  %v1885_v53 = vpack.c.bf16 %v1854_v54, %v1853_v7  ;;  %1374 = vrot.lane.b32.xlu2 %v3465_v3, %s2579_s11 }
 0x23f   : > { %1561 = vst.msk [vmem:[#allocation3 + $0x48] sm:$0xff] %vm1551_vm10, %v1474_v46  ;;  %v4711_v46 = vld [vmem:[#allocation14_spill] sm:$0xff] }
 0x240   : > { %2433 = vmatmul.msk.bf16.vlgmr.msra.gmra.mxu0 %vm1916_vm13, %v1885_v53  ;;  %v1607_v16 = vpop.permute.xlu2 %1606 }
 0x242   : > { %1762 = vrot.lane.b32.xlu0 %v4703_v45, %s2581_s13 }
 0x243   : > { %1626 = vrot.lane.b32.xlu1 %v4689_v21, %s2582_s14 }
 0x244   : > { %v1609_v36 = vpop.permute.xlu0 %1608 }
 0x245   : > { %v1472_v19 = vpop.permute.xlu1 %1471  ;;  %1696 = vst.msk [vmem:[#allocation3 + $0x48] sm:$0xff] %vm1686_vm11, %v1609_v36 }
 0x246   : > { %1560 = vst.msk [vmem:[#allocation3 + $0x40] sm:$0xff] %vm1551_vm10, %v1472_v19  ;;  %1503 = vrot.lane.b32.xlu2 %v3154_v34, %s2580_s12  ;;  %v4704_v34 = vld [vmem:[#allocation47_spill] sm:$0xff] }
 0x247   : > { %1695 = vst.msk [vmem:[#allocation3 + $0x40] sm:$0xff] %vm1686_vm11, %v1607_v16 }
 0x248   : > { %v1731_v14 = vpop.permute.xlu2 %1730 }
 0x24a   : > { %1336 = vrot.lane.b32.xlu0 %v4701_v4, %s2579_s11 }
 0x24b   : > { %1640 = vrot.lane.b32.xlu1 %v3260_v18, %s2582_s14 }
 0x24c   : > { %v1741_v63 = vpop.permute.xlu0 %1740 }
 0x24d   : > { %v1597_v21 = vpop.permute.xlu1 %1596  ;;  %1829 = vst.msk [vmem:[#allocation3 + $0x40] sm:$0xff] %vm1820_vm12, %v1741_v63 }
 0x24e   : > { %1690 = vst.msk [vmem:[#allocation3 + $0x18] sm:$0xff] %vm1686_vm11, %v1597_v21  ;;  %1628 = vrot.lane.b32.xlu2 %v3220_v44, %s2582_s14 }
 0x24f   : > { %1824 = vst.msk [vmem:[#allocation3 + $0x18] sm:$0xff] %vm1820_vm12, %v1731_v14 }
 0x250   : > { %v1357_v30 = vpop.permute.xlu2 %1356 }
 0x251   : > { %1437 = vst.msk [vmem:[#allocation3 + $0x80] sm:$0xff] %vm1420_vm8, %v1357_v30  ;;  %v4715_v30 = vld [vmem:[#allocation48_spill] sm:$0xff] }
 0x252   : > { %1350 = vrot.lane.b32.xlu0 %v3384_v40, %s2579_s11 }
 0x253   : > { %1772 = vrot.lane.b32.xlu1 %v4704_v34, %s2581_s13 }
 0x254   : > { %v1359_v8 = vpop.permute.xlu0 %1358  ;;  %v1861_v31 = vld [vmem:[#allocation3 + $0x40] sm:$0xff] }
 0x255   : > { %v1729_v18 = vpop.permute.xlu1 %1728  ;;  %1438 = vst.msk [vmem:[#allocation3 + $0x88] sm:$0xff] %vm1420_vm8, %v1359_v8 }
 0x256   : > { %1823 = vst.msk [vmem:[#allocation3 + $0x10] sm:$0xff] %vm1820_vm12, %v1729_v18  ;;  %1760 = vrot.lane.b32.xlu2 %v4705_v61, %s2581_s13  ;;  %v1856_v44 = vld [vmem:[#allocation3 + $0x18] sm:$0xff] }
 0x258   : > { %v1490_v25 = vpop.permute.xlu2 %1489 }
 0x259   : > { %1569 = vst.msk [vmem:[#allocation3 + $0x88] sm:$0xff] %vm1551_vm10, %v1490_v25  ;;  %v4717_v25 = vld [vmem:[#allocation45_spill] sm:$0xff] }
 0x25a   : > { %1479 = vrot.lane.b32.xlu0 %v3006_v28, %s2580_s12 }
 0x25b   : > { %1338 = vrot.lane.b32.xlu1 %v4702_v24, %s2579_s11 }
 0x25c   : > { %v1623_v29 = vpop.permute.xlu0 %1622 }
 0x25d   : > { %v1743_v40 = vpop.permute.xlu1 %1742  ;;  %v1855_v6 = vld [vmem:[#allocation3 + $0x10] sm:$0xff] }
 0x25e   : > { %1830 = vst.msk [vmem:[#allocation3 + $0x48] sm:$0xff] %vm1820_vm12, %v1743_v40  ;;  %v1886_v17 = vpack.c.bf16 %v1856_v44, %v1855_v6  ;;  %1774 = vrot.lane.b32.xlu2 %v3453_v49, %s2581_s13 }
 0x260   : > { %2434 = vmatmul.msk.bf16.gmra.mxu0 %vm1916_vm13, %v1886_v17  ;;  %v1757_v59 = vpop.permute.xlu2 %1756 }
 0x262   : > { %1604 = vrot.lane.b32.xlu0 %v4672_v60, %s2582_s14 }
 0x263   : > { %1467 = vrot.lane.b32.xlu1 %v2919_v12, %s2580_s12 }
 0x264   : > { %v1759_v26 = vpop.permute.xlu0 %1758 }
 0x265   : > { %v1488_v28 = vpop.permute.xlu1 %1487  ;;  %v1862_v5 = vld [vmem:[#allocation3 + $0x48] sm:$0xff] }
 0x266   : > { %1568 = vst.msk [vmem:[#allocation3 + $0x80] sm:$0xff] %vm1551_vm10, %v1488_v28  ;;  %v1889_v10 = vpack.c.bf16 %v1862_v5, %v1861_v31  ;;  %1348 = vrot.lane.b32.xlu2 %v3343_v23, %s2579_s11 }
 0x267   : > { %1703 = vst.msk [vmem:[#allocation3 + $0x80] sm:$0xff] %vm1686_vm11, %v1623_v29  ;;  %v4719_v29 = vld [vmem:[#allocation23_spill] sm:$0xff] }
 0x268   : > { %1837 = vst.msk [vmem:[#allocation3 + $0x80] sm:$0xff] %vm1820_vm12, %v1757_v59  ;;  %2437 = vmatmul.msk.bf16.vlgmr.msra.gmra.mxu1 %vm1916_vm13, %v1889_v10  ;;  %v1335_v12 = vpop.permute.xlu2 %1334 }
 0x269   : > { %1426 = vst.msk [vmem:[#allocation3 + $0x28] sm:$0xff] %vm1420_vm8, %v1335_v12 }
 0x26a   : > { %1736 = vrot.lane.b32.xlu0 %v3283_v2, %s2581_s13  ;;  %v4706_v2 = vld [vmem:[#allocation43_spill] sm:$0xff] }
 0x26b   : > { %1481 = vrot.lane.b32.xlu1 %v3028_v58, %s2580_s12 }
 0x26c   : > { %v1345_v43 = vpop.permute.xlu0 %1344 }
 0x26d   : > { %v1625_v60 = vpop.permute.xlu1 %1624  ;;  %1431 = vst.msk [vmem:[#allocation3 + $0x50] sm:$0xff] %vm1420_vm8, %v1345_v43 }
 0x26e   : > { %1704 = vst.msk [vmem:[#allocation3 + $0x88] sm:$0xff] %vm1686_vm11, %v1625_v60  ;;  %1469 = vrot.lane.b32.xlu2 %v2927_v20, %s2580_s12  ;;  %v4720_v60 = vld [vmem:[#allocation10_spill] sm:$0xff] }
 0x26f   : > { %1838 = vst.msk [vmem:[#allocation3 + $0x88] sm:$0xff] %vm1820_vm12, %v1759_v26  ;;  %v1869_v23 = vld [vmem:[#allocation3 + $0x80] sm:$0xff] }
 0x270   : > { %v1464_v58 = vpop.permute.xlu2 %1463 }
 0x272   : > { %1750 = vrot.lane.b32.xlu0 %v4706_v2, %s2581_s13 }
 0x273   : > { %1614 = vrot.lane.b32.xlu1 %v4684_v47, %s2582_s14 }
 0x274   : > { %v1466_v32 = vpop.permute.xlu0 %1465 }
 0x275   : > { %v1333_v22 = vpop.permute.xlu1 %1332  ;;  %1557 = vst.msk [vmem:[#allocation3 + $0x28] sm:$0xff] %vm1551_vm10, %v1466_v32 }
 0x276   : > { %1425 = vst.msk [vmem:[#allocation3 + $0x20] sm:$0xff] %vm1420_vm8, %v1333_v22  ;;  %v1870_v1 = vld [vmem:[#allocation3 + $0x88] sm:$0xff]  ;;  %1602 = vrot.lane.b32.xlu2 %v4679_v37, %s2582_s14 }
 0x277   : > { %1556 = vst.msk [vmem:[#allocation3 + $0x20] sm:$0xff] %vm1551_vm10, %v1464_v58  ;;  %v1893_v4 = vpack.c.bf16 %v1870_v1, %v1869_v23 }
 0x278   : > { %v1478_v20 = vpop.permute.xlu2 %1477 }
 0x279   : > { %2441 = vmatmul.msk.bf16.vlgmr.msra.gmra.mxu2 %vm1916_vm13, %v1893_v4 }
 0x27a   : > { %1376 = vrot.lane.b32.xlu0 %v4704_v34, %s2579_s11 }
 0x27b   : > { %1738 = vrot.lane.b32.xlu1 %v3320_v27, %s2581_s13 }
 0x27c   : > { %v1599_v11 = vpop.permute.xlu0 %1598 }
 0x27d   : > { %v1347_v47 = vpop.permute.xlu1 %1346  ;;  %1691 = vst.msk [vmem:[#allocation3 + $0x20] sm:$0xff] %vm1686_vm11, %v1599_v11  ;;  %v4722_v11 = vld [vmem:[#allocation34_spill] sm:$0xff] }
 0x27e   : > { %1432 = vst.msk [vmem:[#allocation3 + $0x58] sm:$0xff] %vm1420_vm8, %v1347_v47  ;;  %1616 = vrot.lane.b32.xlu2 %v4678_v57, %s2582_s14 }
 0x27f   : > { %1563 = vst.msk [vmem:[#allocation3 + $0x58] sm:$0xff] %vm1551_vm10, %v1478_v20 }
 0x280   : > { %v1611_v37 = vpop.permute.xlu2 %1610 }
 0x282   : > { %1497 = vrot.lane.b32.xlu0 %v4707_v35, %s2580_s12 }
 0x283   : > { %1364 = vrot.lane.b32.xlu1 %v4705_v61, %s2579_s11  ;;  %v4716_v61 = vld [vmem:[#allocation15_spill] sm:$0xff] }
 0x284   : > { %v1613_v62 = vpop.permute.xlu0 %1612 }
 0x285   : > { %v1476_v27 = vpop.permute.xlu1 %1475  ;;  %1698 = vst.msk [vmem:[#allocation3 + $0x58] sm:$0xff] %vm1686_vm11, %v1613_v62 }
 0x286   : > { %1562 = vst.msk [vmem:[#allocation3 + $0x50] sm:$0xff] %vm1551_vm10, %v1476_v27  ;;  %1748 = vrot.lane.b32.xlu2 %v4708_v38, %s2581_s13 }
 0x287   : > { %1697 = vst.msk [vmem:[#allocation3 + $0x50] sm:$0xff] %vm1686_vm11, %v1611_v37 }
 0x288   : > { %v1735_v57 = vpop.permute.xlu2 %1734 }
 0x28a   : > { %1630 = vrot.lane.b32.xlu0 %v4709_v9, %s2582_s14 }
 0x28b   : > { %1378 = vrot.lane.b32.xlu1 %v3453_v49, %s2579_s11 }
 0x28c   : > { %v1745_v24 = vpop.permute.xlu0 %1744 }
 0x28d   : > { %v1601_v41 = vpop.permute.xlu1 %1600  ;;  %1831 = vst.msk [vmem:[#allocation3 + $0x50] sm:$0xff] %vm1820_vm12, %v1745_v24 }
 0x28e   : > { %1692 = vst.msk [vmem:[#allocation3 + $0x28] sm:$0xff] %vm1686_vm11, %v1601_v41  ;;  %1366 = vrot.lane.b32.xlu2 %v4703_v45, %s2579_s11  ;;  %v4713_v45 = vld [vmem:[#allocation24_spill] sm:$0xff] }
 0x28f   : > { %1826 = vst.msk [vmem:[#allocation3 + $0x28] sm:$0xff] %vm1820_vm12, %v1735_v57  ;;  %v4724_v41 = vld [vmem:[#allocation52_spill] sm:$0xff] }
 0x290   : > { %v1361_v50 = vpop.permute.xlu2 %1360  ;;  %v1320_v9 = vrot.slane %v4724_v41, 2 }
 0x291   : > { %1439 = vst.msk [vmem:[#allocation3 + $0x90] sm:$0xff] %vm1420_vm8, %v1361_v50 }
 0x292   : > { %1644 = vrot.lane.b32.xlu0 %v4696_v42, %s2582_s14 }
 0x293   : > { %1507 = vrot.lane.b32.xlu1 %v4710_v52, %s2580_s12  ;;  %v4725_v52 = vld [vmem:[#allocation25_spill] sm:$0xff] }
 0x294   : > { %v1363_v0 = vpop.permute.xlu0 %1362  ;;  %v1863_v14 = vld [vmem:[#allocation3 + $0x50] sm:$0xff] }
 0x295   : > { %v1733_v49 = vpop.permute.xlu1 %1732  ;;  %1440 = vst.msk [vmem:[#allocation3 + $0x98] sm:$0xff] %vm1420_vm8, %v1363_v0 }
 0x296   : > { %1825 = vst.msk [vmem:[#allocation3 + $0x20] sm:$0xff] %vm1820_vm12, %v1733_v49  ;;  %1495 = vrot.lane.b32.xlu2 %v4711_v46, %s2580_s12  ;;  %v1858_v13 = vld [vmem:[#allocation3 + $0x28] sm:$0xff] }
 0x298   : > { %v1375_v7 = vpop.permute.xlu2 %1374 }
 0x299   : > { %1446 = vst.msk [vmem:[#allocation3 + $0xc8] sm:$0xff] %vm1420_vm8, %v1375_v7  ;;  %v4727_v7 = vld [vmem:[#allocation17_spill] sm:$0xff] }
 0x29a   : > { %1776 = vrot.lane.b32.xlu0 %v4712_v56, %s2581_s13 }
 0x29b   : > { %1632 = vrot.lane.b32.xlu1 %v4693_v39, %s2582_s14  ;;  %v4714_v39 = vld [vmem:[#allocation49_spill] sm:$0xff] }
 0x29c   : > { %v1492_v16 = vpop.permute.xlu0 %1491 }
 0x29d   : > { %v1747_v54 = vpop.permute.xlu1 %1746  ;;  %v1857_v53 = vld [vmem:[#allocation3 + $0x20] sm:$0xff]  ;;  %1570 = vst.msk [vmem:[#allocation3 + $0x90] sm:$0xff] %vm1551_vm10, %v1492_v16  ;;  %v4087_v16 = vld [vmem:[#allocation2 + $0x198] sm:$0xff] }
 0x29e   : > { %1832 = vst.msk [vmem:[#allocation3 + $0x58] sm:$0xff] %vm1820_vm12, %v1747_v54  ;;  %v1887_v42 = vpack.c.bf16 %v1858_v13, %v1857_v53  ;;  %1509 = vrot.lane.b32.xlu2 %v4713_v45, %s2580_s12  ;;  %v1322_v54 = vrot.slane %v4727_v7, 2  ;;  %v4089_v45 = vld [vmem:[#allocation2 + $0x1a0] sm:$0xff] }
 0x2a0   : > { %2435 = vmatmul.msk.bf16.gmra.mxu0 %vm1916_vm13, %v1887_v42  ;;  %v1504_v19 = vpop.permute.xlu2 %1503  ;;  %v1323_v42 = vsel %vm843_vm4, %v1320_v9, %v1322_v54 }
 0x2a2   : > { %1354 = vrot.lane.b32.xlu0 %v4706_v2, %s2579_s11  ;;  %v4721_v2 = vld [vmem:[#allocation20_spill] sm:$0xff] }
 0x2a3   : > { %1764 = vrot.lane.b32.xlu1 %v4714_v39, %s2581_s13 }
 0x2a4   : > { %v1506_v34 = vpop.permute.xlu0 %1505 }
 0x2a5   : > { %v1373_v36 = vpop.permute.xlu1 %1372  ;;  %v1864_v21 = vld [vmem:[#allocation3 + $0x58] sm:$0xff]  ;;  %1577 = vst.msk [vmem:[#allocation3 + $0xc8] sm:$0xff] %vm1551_vm10, %v1506_v34 }
 0x2a6   : > { %1445 = vst.msk [vmem:[#allocation3 + $0xc0] sm:$0xff] %vm1420_vm8, %v1373_v36  ;;  %v1890_v63 = vpack.c.bf16 %v1864_v21, %v1863_v14  ;;  %1642 = vrot.lane.b32.xlu2 %v4694_v55, %s2582_s14  ;;  %v4718_v55 = vld [vmem:[#allocation9_spill] sm:$0xff] }
 0x2a7   : > { %1576 = vst.msk [vmem:[#allocation3 + $0xc0] sm:$0xff] %vm1551_vm10, %v1504_v19 }
 0x2a8   : > { %2438 = vmatmul.msk.bf16.gmra.mxu1 %vm1916_vm13, %v1890_v63  ;;  %v1629_v18 = vpop.permute.xlu2 %1628  ;;  %v1586_v63 = vrot.slane %v4089_v45, 1 }
 0x2aa   : > { %1618 = vrot.lane.b32.xlu0 %v4716_v61, %s2582_s14  ;;  %v547_v61 = vld [vmem:[#allocation2 + $0x1a8] sm:$0x3] }
 0x2ab   : > { %1778 = vrot.lane.b32.xlu1 %v4715_v30, %s2581_s13 }
 0x2ac   : > { %v1639_v44 = vpop.permute.xlu0 %1638 }
 0x2ad   : > { %v1494_v8 = vpop.permute.xlu1 %1493  ;;  %1711 = vst.msk [vmem:[#allocation3 + $0xc0] sm:$0xff] %vm1686_vm11, %v1639_v44 }
 0x2ae   : > { %1571 = vst.msk [vmem:[#allocation3 + $0x98] sm:$0xff] %vm1551_vm10, %v1494_v8  ;;  %1766 = vrot.lane.b32.xlu2 %v4717_v25, %s2581_s13 }
 0x2af   : > { %1706 = vst.msk [vmem:[#allocation3 + $0x98] sm:$0xff] %vm1686_vm11, %v1629_v18  ;;  %v4728_v18 = vld [vmem:[#allocation4_spill] sm:$0xff] }
 0x2b0   : > { %v1761_v40 = vpop.permute.xlu2 %1760 }
 0x2b2   : > { %1754 = vrot.lane.b32.xlu0 %v3346_v48, %s2581_s13 }
 0x2b3   : > { %1483 = vrot.lane.b32.xlu1 %v4718_v55, %s2580_s12 }
 0x2b4   : > { %v1763_v17 = vpop.permute.xlu0 %1762 }
 0x2b5   : > { %v1627_v6 = vpop.permute.xlu1 %1626  ;;  %1840 = vst.msk [vmem:[#allocation3 + $0x98] sm:$0xff] %vm1820_vm12, %v1763_v17  ;;  %v1722_v17 = vrot.slane %v547_v61, 2 }
 0x2b6   : > { %1705 = vst.msk [vmem:[#allocation3 + $0x90] sm:$0xff] %vm1686_vm11, %v1627_v6  ;;  %1352 = vrot.lane.b32.xlu2 %v4708_v38, %s2579_s11  ;;  %v2564_v38 = vld [vmem:[#allocation2 + $0x180] sm:$0xff]  ;;  %v1720_v6 = vrot.slane %v4089_v45, 2 }
 0x2b7   : > { %1839 = vst.msk [vmem:[#allocation3 + $0x90] sm:$0xff] %vm1820_vm12, %v1761_v40  ;;  %v1319_v57 = vrot.slane %v2564_v38, 2 }
 0x2b8   : > { %v1775_v59 = vpop.permute.xlu2 %1774 }
 0x2b9   : > { %v4067_v50 = vsel %vm843_vm4, %v1319_v57, %v1320_v9 }
 0x2ba   : > { %1380 = vrot.lane.b32.xlu0 %v4712_v56, %s2579_s11  ;;  %v2565_v56 = vld [vmem:[#allocation2 + $0x188] sm:$0xff] }
 0x2bb   : > { %1620 = vrot.lane.b32.xlu1 %v4719_v29, %s2582_s14 }
 0x2bc   : > { %v1337_v10 = vpop.permute.xlu0 %1336  ;;  %v1872_v26 = vld [vmem:[#allocation3 + $0x98] sm:$0xff] }
 0x2bd   : > { %v4017_v48 = vpop.f32.mrf.mxu0  ;;  %v1641_v28 = vpop.permute.xlu1 %1640  ;;  %1427 = vst.msk [vmem:[#allocation3 + $0x30] sm:$0xff] %vm1420_vm8, %v1337_v10  ;;  %v1588_v10 = vrot.slane %v547_v61, 1 }
 0x2be   : > { %v2058_v31 = vpack.c.bf16 %v4017_v48, %v4017_v48  ;;  %1712 = vst.msk [vmem:[#allocation3 + $0xc8] sm:$0xff] %vm1686_vm11, %v1641_v28  ;;  %v1871_v5 = vld [vmem:[#allocation3 + $0x90] sm:$0xff]  ;;  %1485 = vrot.lane.b32.xlu2 %v4720_v60, %s2580_s12 }
 0x2bf   : > { %1846 = vst.msk [vmem:[#allocation3 + $0xc8] sm:$0xff] %vm1820_vm12, %v1775_v59  ;;  %v1894_v12 = vpack.c.bf16 %v1872_v26, %v1871_v5  ;;  %v1723_v5 = vsel %vm843_vm4, %v1720_v6, %v1722_v17 }
 0x2c0   : > { %2091 = vst.msk [vmem:[%s4015_s26] sm:$0xf] %vm2090_vm14, %v2058_v31  ;;  %v1349_v43 = vpop.permute.xlu2 %1348 }
 0x2c1   : > { %2442 = vmatmul.msk.bf16.gmra.mxu2 %vm1916_vm13, %v1894_v12  ;;  %1433 = vst.msk [vmem:[#allocation3 + $0x60] sm:$0xff] %vm1420_vm8, %v1349_v43 }
 0x2c2   : > { %1501 = vrot.lane.b32.xlu0 %v4721_v2, %s2580_s12  ;;  %v1589_v2 = vsel %vm633_vm1, %v1586_v63, %v1588_v10 }
 0x2c3   : > { %1368 = vrot.lane.b32.xlu1 %v4714_v39, %s2579_s11 }
 0x2c4   : > { %v1351_v1 = vpop.permute.xlu0 %1350 }
 0x2c5   : > { %v4033_v58 = vpop.f32.mrf.mxu0  ;;  %v1773_v23 = vpop.permute.xlu1 %1772  ;;  %1434 = vst.msk [vmem:[#allocation3 + $0x68] sm:$0xff] %vm1420_vm8, %v1351_v1 }
 0x2c6   : > { %v2059_v22 = vpack.c.bf16 %v4033_v58, %v4033_v58  ;;  %1845 = vst.msk [vmem:[#allocation3 + $0xc0] sm:$0xff] %vm1820_vm12, %v1773_v23  ;;  %1752 = vrot.lane.b32.xlu2 %v3406_v15, %s2581_s13  ;;  %v1878_v32 = vld [vmem:[#allocation3 + $0xc8] sm:$0xff]  ;;  %v4723_v15 = vld [vmem:[#allocation51_spill] sm:$0xff] }
 0x2c8   : > { %2092 = vst.msk [vmem:[%s4015_s26 + $0x4] sm:$0xf] %vm2090_vm14, %v2059_v22  ;;  %v1470_v4 = vpop.permute.xlu2 %1469 }
 0x2ca   : > { %1634 = vrot.lane.b32.xlu0 %v4722_v11, %s2582_s14 }
 0x2cb   : > { %1382 = vrot.lane.b32.xlu1 %v4715_v30, %s2579_s11 }
 0x2cc   : > { %v1480_v27 = vpop.permute.xlu0 %1479 }
 0x2cd   : > { %v1339_v20 = vpop.permute.xlu1 %1338  ;;  %v1877_v47 = vld [vmem:[#allocation3 + $0xc0] sm:$0xff]  ;;  %1564 = vst.msk [vmem:[#allocation3 + $0x60] sm:$0xff] %vm1551_vm10, %v1480_v27 }
 0x2ce   : > { %1428 = vst.msk [vmem:[#allocation3 + $0x38] sm:$0xff] %vm1420_vm8, %v1339_v20  ;;  %v1897_v37 = vpack.c.bf16 %v1878_v32, %v1877_v47  ;;  %1370 = vrot.lane.b32.xlu2 %v4717_v25, %s2579_s11  ;;  %v1719_v47 = vrot.slane %v4087_v16, 2 }
 0x2cf   : > { %1559 = vst.msk [vmem:[#allocation3 + $0x38] sm:$0xff] %vm1551_vm10, %v1470_v4 }
 0x2d0   : > { %2445 = vmatmul.msk.bf16.vlgmr.msra.gmra.mxu3 %vm1916_vm13, %v1897_v37  ;;  %v1603_v35 = vpop.permute.xlu2 %1602 }
 0x2d2   : > { %1648 = vrot.lane.b32.xlu0 %v3683_v51, %s2582_s14  ;;  %v4726_v51 = vld [vmem:[#allocation29_spill] sm:$0xff] }
 0x2d3   : > { %1511 = vrot.lane.b32.xlu1 %v4723_v15, %s2580_s12 }
 0x2d4   : > { %v1605_v24 = vpop.permute.xlu0 %1604 }
 0x2d5   : > { %v1468_v62 = vpop.permute.xlu1 %1467  ;;  %1694 = vst.msk [vmem:[#allocation3 + $0x38] sm:$0xff] %vm1686_vm11, %v1605_v24 }
 0x2d6   : > { %1558 = vst.msk [vmem:[#allocation3 + $0x30] sm:$0xff] %vm1551_vm10, %v1468_v62  ;;  %1499 = vrot.lane.b32.xlu2 %v4725_v52, %s2580_s12  ;;  %v1721_v62 = vsel %vm843_vm4, %v1719_v47, %v1720_v6 }
 0x2d7   : > { %1693 = vst.msk [vmem:[#allocation3 + $0x30] sm:$0xff] %vm1686_vm11, %v1603_v35 }
 0x2d8   : > { %v1617_v49 = vpop.permute.xlu2 %1616 }
 0x2da   : > { %1780 = vrot.lane.b32.xlu0 %v4067_v50, %s2581_s13 }
 0x2db   : > { %1636 = vrot.lane.b32.xlu1 %v4726_v51, %s2582_s14 }
 0x2dc   : > { %v1737_v53 = vpop.permute.xlu0 %1736 }
 0x2dd   : > { %v1482_v0 = vpop.permute.xlu1 %1481  ;;  %v4071_v46 = vpop.f32.mrf.mxu0  ;;  %1827 = vst.msk [vmem:[#allocation3 + $0x30] sm:$0xff] %vm1820_vm12, %v1737_v53 }
 0x2de   : > { %1565 = vst.msk [vmem:[#allocation3 + $0x68] sm:$0xff] %vm1551_vm10, %v1482_v0  ;;  %v2060_v13 = vpack.c.bf16 %v4071_v46, %v4071_v46  ;;  %1513 = vrot.lane.b32.xlu2 %v2565_v56, %s2580_s12 }
 0x2df   : > { %1700 = vst.msk [vmem:[#allocation3 + $0x68] sm:$0xff] %vm1686_vm11, %v1617_v49 }
 0x2e0   : > { %2093 = vst.msk [vmem:[%s4015_s26 + $0x8] sm:$0xf] %vm2090_vm14, %v2060_v13  ;;  %v1749_v39 = vpop.permute.xlu2 %1748 }
 0x2e2   : > { %1386 = vrot.lane.b32.xlu0 %v1323_v42, %s2579_s11 }
 0x2e3   : > { %1768 = vrot.lane.b32.xlu1 %v3433_v33, %s2581_s13  ;;  %v1585_v33 = vrot.slane %v4087_v16, 1 }
 0x2e4   : > { %v1751_v30 = vpop.permute.xlu0 %1750  ;;  %v1859_v60 = vld [vmem:[#allocation3 + $0x30] sm:$0xff] }
 0x2e5   : > { %v4091_v19 = vpop.f32.mrf.mxu1  ;;  %v1615_v36 = vpop.permute.xlu1 %1614  ;;  %1834 = vst.msk [vmem:[#allocation3 + $0x68] sm:$0xff] %vm1820_vm12, %v1751_v30  ;;  %v1587_v8 = vsel %vm633_vm1, %v1585_v33, %v1586_v63 }
 0x2e6   : > { %v2066_v14 = vpack.c.bf16 %v4091_v19, %v4091_v19  ;;  %1699 = vst.msk [vmem:[#allocation3 + $0x60] sm:$0xff] %vm1686_vm11, %v1615_v36  ;;  %v4097_v21 = vpop.f32.mrf.mxu0  ;;  %1646 = vrot.lane.b32.xlu2 %v4728_v18, %s2582_s14 }
 0x2e7   : > { %v2061_v34 = vpack.c.bf16 %v4097_v21, %v4097_v21  ;;  %1833 = vst.msk [vmem:[#allocation3 + $0x60] sm:$0xff] %vm1820_vm12, %v1749_v39 }
 0x2e8   : > { %2099 = vst.msk [vmem:[%s4015_s26 + $0x20] sm:$0xf] %vm2090_vm14, %v2066_v14  ;;  %v1367_v44 = vpop.permute.xlu2 %1366 }
 0x2e9   : > { %2094 = vst.msk [vmem:[%s4015_s26 + $0xc] sm:$0xf] %vm2090_vm14, %v2061_v34 }
 0x2ea   : > { %1650 = vrot.lane.b32.xlu0 %v1587_v8, %s2582_s14  ;;  %1442 = vst.msk [vmem:[#allocation3 + $0xa8] sm:$0xff] %vm1420_vm8, %v1367_v44 }
 0x2eb   : > { %1782 = vrot.lane.b32.xlu1 %v1323_v42, %s2581_s13 }
 0x2ec   : > { %v1377_v59 = vpop.permute.xlu0 %1376  ;;  %v1866_v28 = vld [vmem:[#allocation3 + $0x68] sm:$0xff] }
 0x2ed   : > { %v4113_v25 = vpop.f32.mrf.mxu1  ;;  %v1739_v55 = vpop.permute.xlu1 %1738  ;;  %1447 = vst.msk [vmem:[#allocation3 + $0xd0] sm:$0xff] %vm1420_vm8, %v1377_v59 }
 0x2ee   : > { %v2067_v40 = vpack.c.bf16 %v4113_v25, %v4113_v25  ;;  %1828 = vst.msk [vmem:[#allocation3 + $0x38] sm:$0xff] %vm1820_vm12, %v1739_v55  ;;  %v1865_v29 = vld [vmem:[#allocation3 + $0x60] sm:$0xff]  ;;  %1770 = vrot.lane.b32.xlu2 %v3465_v3, %s2581_s13 }
 0x2ef   : > { %v1891_v31 = vpack.c.bf16 %v1866_v28, %v1865_v29 }
 0x2f0   : > { %2100 = vst.msk [vmem:[%s4015_s26 + $0x24] sm:$0xf] %vm2090_vm14, %v2067_v40  ;;  %v1496_v26 = vpop.permute.xlu2 %1495 }
 0x2f1   : > { %2439 = vmatmul.msk.bf16.gmra.mxu1 %vm1916_vm13, %v1891_v31 }
 0x2f2   : > { %1786 = vrot.lane.b32.xlu0 %v1723_v5, %s2581_s13 }
 0x2f3   : > { %1515 = vrot.lane.b32.xlu1 %v4087_v16, %s2580_s12 }
 0x2f4   : > { %v1498_v3 = vpop.permute.xlu0 %1497 }
 0x2f5   : > { %v1365_v12 = vpop.permute.xlu1 %1364  ;;  %v1860_v43 = vld [vmem:[#allocation3 + $0x38] sm:$0xff]  ;;  %1573 = vst.msk [vmem:[#allocation3 + $0xa8] sm:$0xff] %vm1551_vm10, %v1498_v3 }
 0x2f6   : > { %1441 = vst.msk [vmem:[#allocation3 + $0xa0] sm:$0xff] %vm1420_vm8, %v1365_v12  ;;  %v1888_v23 = vpack.c.bf16 %v1860_v43, %v1859_v60  ;;  %1384 = vrot.lane.b32.xlu2 %v4067_v50, %s2579_s11 }
 0x2f7   : > { %1572 = vst.msk [vmem:[#allocation3 + $0xa0] sm:$0xff] %vm1551_vm10, %v1496_v26 }
 0x2f8   : > { %2436 = vmatmul.msk.bf16.gmra.mxu0 %vm1916_vm13, %v1888_v23  ;;  %v1510_v1 = vpop.permute.xlu2 %1509 }
 0x2fb   : > { %1652 = vrot.lane.b32.xlu1 %v1589_v2, %s2582_s14 }
 0x2fc   : > { %v4139_v22 = vpop.f32.mrf.mxu2  ;;  %v1631_v20 = vpop.permute.xlu0 %1630 }
 0x2fd   : > { %v2074_v32 = vpack.c.bf16 %v4139_v22, %v4139_v22  ;;  %v1379_v4 = vpop.permute.xlu1 %1378  ;;  %1707 = vst.msk [vmem:[#allocation3 + $0xa0] sm:$0xff] %vm1686_vm11, %v1631_v20 }
 0x2fe   : > { %1448 = vst.msk [vmem:[#allocation3 + $0xd8] sm:$0xff] %vm1420_vm8, %v1379_v4  ;;  %1517 = vrot.lane.b32.xlu2 %v4089_v45, %s2580_s12 }
 0x2ff   : > { %2107 = vst.msk [vmem:[%s4015_s26 + $0x40] sm:$0xf] %vm2090_vm14, %v2074_v32 }
 0x300   : > { %1579 = vst.msk [vmem:[#allocation3 + $0xd8] sm:$0xff] %vm1551_vm10, %v1510_v1  ;;  %v1643_v37 = vpop.permute.xlu2 %1642 }
 0x304   : > { %v4151_v11 = vpop.f32.mrf.mxu2  ;;  %v1645_v35 = vpop.permute.xlu0 %1644 }
 0x305   : > { %v2075_v27 = vpack.c.bf16 %v4151_v11, %v4151_v11  ;;  %v1508_v15 = vpop.permute.xlu1 %1507  ;;  %1714 = vst.msk [vmem:[#allocation3 + $0xd8] sm:$0xff] %vm1686_vm11, %v1645_v35 }
 0x306   : > { %1578 = vst.msk [vmem:[#allocation3 + $0xd0] sm:$0xff] %vm1551_vm10, %v1508_v15  ;;  %1784 = vrot.lane.b32.xlu2 %v1721_v62, %s2581_s13 }
 0x307   : > { %2108 = vst.msk [vmem:[%s4015_s26 + $0x44] sm:$0xf] %vm2090_vm14, %v2075_v27 }
 0x308   : > { %1713 = vst.msk [vmem:[#allocation3 + $0xd0] sm:$0xff] %vm1686_vm11, %v1643_v37  ;;  %v1767_v38 = vpop.permute.xlu2 %1766 }
 0x30c   : > { %v1777_v41 = vpop.permute.xlu0 %1776 }
 0x30d   : > { %v1633_v57 = vpop.permute.xlu1 %1632  ;;  %1847 = vst.msk [vmem:[#allocation3 + $0xd0] sm:$0xff] %vm1820_vm12, %v1777_v41 }
 0x30e   : > { %1708 = vst.msk [vmem:[#allocation3 + $0xa8] sm:$0xff] %vm1686_vm11, %v1633_v57 }
 0x30f   : > { %1842 = vst.msk [vmem:[#allocation3 + $0xa8] sm:$0xff] %vm1820_vm12, %v1767_v38 }
 0x310   : > { %v1353_v9 = vpop.permute.xlu2 %1352 }
 0x311   : > { %1435 = vst.msk [vmem:[#allocation3 + $0x70] sm:$0xff] %vm1420_vm8, %v1353_v9 }
 0x314   : > { %v1355_v52 = vpop.permute.xlu0 %1354  ;;  %v1879_v45 = vld [vmem:[#allocation3 + $0xd0] sm:$0xff] }
 0x315   : > { %v1765_v24 = vpop.permute.xlu1 %1764  ;;  %1436 = vst.msk [vmem:[#allocation3 + $0x78] sm:$0xff] %vm1420_vm8, %v1355_v52 }
 0x316   : > { %1841 = vst.msk [vmem:[#allocation3 + $0xa0] sm:$0xff] %vm1820_vm12, %v1765_v24  ;;  %v1874_v50 = vld [vmem:[#allocation3 + $0xa8] sm:$0xff] }
 0x318   : > { %v1486_v51 = vpop.permute.xlu2 %1485 }
 0x319   : > { %1567 = vst.msk [vmem:[#allocation3 + $0x78] sm:$0xff] %vm1551_vm10, %v1486_v51 }
 0x31c   : > { %v1619_v53 = vpop.permute.xlu0 %1618 }
 0x31d   : > { %v1779_v49 = vpop.permute.xlu1 %1778  ;;  %v4168_v0 = vpop.f32.mrf.mxu0  ;;  %v1873_v13 = vld [vmem:[#allocation3 + $0xa0] sm:$0xff] }
 0x31e   : > { %1848 = vst.msk [vmem:[#allocation3 + $0xd8] sm:$0xff] %vm1820_vm12, %v1779_v49  ;;  %v2062_v7 = vpack.c.bf16 %v4168_v0, %v4168_v0  ;;  %v1895_v54 = vpack.c.bf16 %v1874_v50, %v1873_v13 }
 0x320   : > { %2095 = vst.msk [vmem:[%s4015_s26 + $0x10] sm:$0xf] %vm2090_vm14, %v2062_v7  ;;  %2443 = vmatmul.msk.bf16.gmra.mxu2 %vm1916_vm13, %v1895_v54  ;;  %v1753_v56 = vpop.permute.xlu2 %1752 }
 0x324   : > { %v1755_v34 = vpop.permute.xlu0 %1754 }
 0x325   : > { %v4177_v42 = vpop.f32.mrf.mxu1  ;;  %v1484_v16 = vpop.permute.xlu1 %1483  ;;  %v1880_v39 = vld [vmem:[#allocation3 + $0xd8] sm:$0xff] }
 0x326   : > { %v2068_v36 = vpack.c.bf16 %v4177_v42, %v4177_v42  ;;  %1566 = vst.msk [vmem:[#allocation3 + $0x70] sm:$0xff] %vm1551_vm10, %v1484_v16  ;;  %v4182_v14 = vpop.f32.mrf.mxu0  ;;  %v1898_v33 = vpack.c.bf16 %v1880_v39, %v1879_v45 }
 0x327   : > { %v2063_v63 = vpack.c.bf16 %v4182_v14, %v4182_v14  ;;  %1701 = vst.msk [vmem:[#allocation3 + $0x70] sm:$0xff] %vm1686_vm11, %v1619_v53 }
 0x328   : > { %2101 = vst.msk [vmem:[%s4015_s26 + $0x28] sm:$0xf] %vm2090_vm14, %v2068_v36  ;;  %2446 = vmatmul.msk.bf16.gmra.mxu3 %vm1916_vm13, %v1898_v33  ;;  %v1371_v30 = vpop.permute.xlu2 %1370 }
 0x329   : > { %2096 = vst.msk [vmem:[%s4015_s26 + $0x14] sm:$0xf] %vm2090_vm14, %v2063_v63 }
 0x32a   : > { %1835 = vst.msk [vmem:[#allocation3 + $0x70] sm:$0xff] %vm1820_vm12, %v1753_v56 }
 0x32b   : > { %1444 = vst.msk [vmem:[#allocation3 + $0xb8] sm:$0xff] %vm1420_vm8, %v1371_v30 }
 0x32c   : > { %v1381_v44 = vpop.permute.xlu0 %1380 }
 0x32d   : > { %v4193_v18 = vpop.f32.mrf.mxu1  ;;  %v1621_v8 = vpop.permute.xlu1 %1620  ;;  %1449 = vst.msk [vmem:[#allocation3 + $0xe0] sm:$0xff] %vm1420_vm8, %v1381_v44 }
 0x32e   : > { %v2069_v61 = vpack.c.bf16 %v4193_v18, %v4193_v18  ;;  %1702 = vst.msk [vmem:[#allocation3 + $0x78] sm:$0xff] %vm1686_vm11, %v1621_v8 }
 0x32f   : > { %1836 = vst.msk [vmem:[#allocation3 + $0x78] sm:$0xff] %vm1820_vm12, %v1755_v34 }
 0x330   : > { %2102 = vst.msk [vmem:[%s4015_s26 + $0x2c] sm:$0xf] %vm2090_vm14, %v2069_v61  ;;  %v1500_v40 = vpop.permute.xlu2 %1499 }
 0x331   : > { %v1867_v55 = vld [vmem:[#allocation3 + $0x70] sm:$0xff] }
 0x334   : > { %v1502_v59 = vpop.permute.xlu0 %1501 }
 0x335   : > { %v1369_v6 = vpop.permute.xlu1 %1368  ;;  %1575 = vst.msk [vmem:[#allocation3 + $0xb8] sm:$0xff] %vm1551_vm10, %v1502_v59 }
 0x336   : > { %1443 = vst.msk [vmem:[#allocation3 + $0xb0] sm:$0xff] %vm1420_vm8, %v1369_v6  ;;  %v1868_v17 = vld [vmem:[#allocation3 + $0x78] sm:$0xff]  ;;  %v2126_v6 = vsel %vm405_vm0, %v4071_v46, 0.0 }
 0x337   : > { %v1892_v29 = vpack.c.bf16 %v1868_v17, %v1867_v55  ;;  %1574 = vst.msk [vmem:[#allocation3 + $0xb0] sm:$0xff] %vm1551_vm10, %v1500_v40  ;;  %v2124_v55 = vsel %vm405_vm0, %v4033_v58, 0.0  ;;  %v2123_v40 = vsel %vm405_vm0, %v4017_v48, 0.0 }
 0x338   : > { %v1514_v28 = vpop.permute.xlu2 %1513  ;;  %v2125_v17 = vadd.f32 %v2124_v55, %v2123_v40  ;;  %v2156_v55 = vsel %vm405_vm0, %v4151_v11, 0.0 }
 0x339   : > { %2440 = vmatmul.msk.bf16.gmra.mxu1 %vm1916_vm13, %v1892_v29  ;;  %v2128_v29 = vsel %vm405_vm0, %v4097_v21, 0.0 }
 0x33c   : > { %v1635_v5 = vpop.permute.xlu0 %1634 }
 0x33d   : > { %v1383_v31 = vpop.permute.xlu1 %1382  ;;  %1709 = vst.msk [vmem:[#allocation3 + $0xb0] sm:$0xff] %vm1686_vm11, %v1635_v5 }
 0x33e   : > { %1450 = vst.msk [vmem:[#allocation3 + $0xe8] sm:$0xff] %vm1420_vm8, %v1383_v31  ;;  %v2127_v31 = vadd.f32 %v2126_v6, %v2125_v17 }
 0x33f   : > { %1581 = vst.msk [vmem:[#allocation3 + $0xe8] sm:$0xff] %vm1551_vm10, %v1514_v28 }
 0x340   : > { %v1647_v10 = vpop.permute.xlu2 %1646 }
 0x344   : > { %v4210_v26 = vpop.f32.mrf.mxu2  ;;  %v1649_v43 = vpop.permute.xlu0 %1648 }
 0x345   : > { %v1512_v12 = vpop.permute.xlu1 %1511  ;;  %v2076_v60 = vpack.c.bf16 %v4210_v26, %v4210_v26  ;;  %1716 = vst.msk [vmem:[#allocation3 + $0xe8] sm:$0xff] %vm1686_vm11, %v1649_v43  ;;  %v2132_v43 = vsel %vm405_vm0, %v4182_v14, 0.0  ;;  %v2158_v6 = vsel %vm405_vm0, %v4210_v26, 0.0 }
 0x346   : > { %1580 = vst.msk [vmem:[#allocation3 + $0xe0] sm:$0xff] %vm1551_vm10, %v1512_v12  ;;  %v2130_v12 = vsel %vm405_vm0, %v4168_v0, 0.0 }
 0x347   : > { %1715 = vst.msk [vmem:[#allocation3 + $0xe0] sm:$0xff] %vm1686_vm11, %v1647_v10 }
 0x348   : > { %2109 = vst.msk [vmem:[%s4015_s26 + $0x48] sm:$0xf] %vm2090_vm14, %v2076_v60  ;;  %v1771_v23 = vpop.permute.xlu2 %1770  ;;  %v2129_v60 = vadd.f32 %v2128_v29, %v2127_v31 }
 0x34c   : > { %v4219_v3 = vpop.f32.mrf.mxu2  ;;  %v1781_v32 = vpop.permute.xlu0 %1780 }
 0x34d   : > { %v1637_v2 = vpop.permute.xlu1 %1636  ;;  %v2077_v1 = vpack.c.bf16 %v4219_v3, %v4219_v3  ;;  %1849 = vst.msk [vmem:[#allocation3 + $0xe0] sm:$0xff] %vm1820_vm12, %v1781_v32  ;;  %v2160_v29 = vsel %vm405_vm0, %v4219_v3, 0.0 }
 0x34e   : > { %1710 = vst.msk [vmem:[#allocation3 + $0xb8] sm:$0xff] %vm1686_vm11, %v1637_v2 }
 0x34f   : > { %1844 = vst.msk [vmem:[#allocation3 + $0xb8] sm:$0xff] %vm1820_vm12, %v1771_v23  ;;  %v2131_v23 = vadd.f32 %v2130_v12, %v2129_v60 }
 0x350   : > { %2110 = vst.msk [vmem:[%s4015_s26 + $0x4c] sm:$0xf] %vm2090_vm14, %v2077_v1  ;;  %v1385_v47 = vpop.permute.xlu2 %1384 }
 0x351   : > { %1451 = vst.msk [vmem:[#allocation3 + $0xf0] sm:$0xff] %vm1420_vm8, %v1385_v47  ;;  %v2133_v1 = vadd.f32 %v2132_v43, %v2131_v23 }
 0x353   : > { %v4228_v4 = vpop.f32.mrf.mxu3 }
 0x354   : > { %v2082_v20 = vpack.c.bf16 %v4228_v4, %v4228_v4  ;;  %v1387_v27 = vpop.permute.xlu0 %1386  ;;  %v1881_v51 = vld [vmem:[#allocation3 + $0xe0] sm:$0xff] }
 0x355   : > { %v1769_v37 = vpop.permute.xlu1 %1768  ;;  %1452 = vst.msk [vmem:[#allocation3 + $0xf8] sm:$0xff] %vm1420_vm8, %v1387_v27 }
 0x356   : > { %2115 = vst.msk [vmem:[%s4015_s26 + $0x60] sm:$0xf] %vm2090_vm14, %v2082_v20  ;;  %v1876_v62 = vld [vmem:[#allocation3 + $0xb8] sm:$0xff] }
 0x357   : > { %1843 = vst.msk [vmem:[#allocation3 + $0xb0] sm:$0xff] %vm1820_vm12, %v1769_v37 }
 0x358   : > { %v1518_v38 = vpop.permute.xlu2 %1517 }
 0x359   : > { %1583 = vst.msk [vmem:[#allocation3 + $0xf8] sm:$0xff] %vm1551_vm10, %v1518_v38  ;;  %v2138_v38 = vsel %vm405_vm0, %v4091_v19, 0.0 }
 0x35b   : > { %v4237_v15 = vpop.f32.mrf.mxu3 }
 0x35c   : > { %v2083_v35 = vpack.c.bf16 %v4237_v15, %v4237_v15  ;;  %v1651_v24 = vpop.permute.xlu0 %1650 }
 0x35d   : > { %v1783_v57 = vpop.permute.xlu1 %1782 }
 0x35e   : > { %2116 = vst.msk [vmem:[%s4015_s26 + $0x64] sm:$0xf] %vm2090_vm14, %v2083_v35  ;;  %v1875_v41 = vld [vmem:[#allocation3 + $0xb0] sm:$0xff] }
 0x35f   : > { %1850 = vst.msk [vmem:[#allocation3 + $0xe8] sm:$0xff] %vm1820_vm12, %v1783_v57  ;;  %v1896_v9 = vpack.c.bf16 %v1876_v62, %v1875_v41  ;;  %v2140_v41 = vsel %vm405_vm0, %v4113_v25, 0.0 }
 0x360   : > { %v1785_v50 = vpop.permute.xlu2 %1784 }
 0x361   : > { %2444 = vmatmul.msk.bf16.gmra.mxu2 %vm1916_vm13, %v1896_v9 }
 0x364   : > { %v1787_v7 = vpop.permute.xlu0 %1786 }
 0x365   : > { %v1516_v52 = vpop.permute.xlu1 %1515 }
 0x366   : > { %1582 = vst.msk [vmem:[#allocation3 + $0xf0] sm:$0xff] %vm1551_vm10, %v1516_v52  ;;  %v1882_v49 = vld [vmem:[#allocation3 + $0xe8] sm:$0xff] }
 0x367   : > { %1717 = vst.msk [vmem:[#allocation3 + $0xf0] sm:$0xff] %vm1686_vm11, %v1651_v24  ;;  %v1899_v13 = vpack.c.bf16 %v1882_v49, %v1881_v51  ;;  %v2144_v49 = vsel %vm405_vm0, %v4193_v18, 0.0 }
 0x368   : > { %1851 = vst.msk [vmem:[#allocation3 + $0xf0] sm:$0xff] %vm1820_vm12, %v1785_v50  ;;  %v2142_v50 = vsel %vm405_vm0, %v4177_v42, 0.0 }
 0x369   : > { %2447 = vmatmul.msk.bf16.gmra.mxu3 %vm1916_vm13, %v1899_v13 }
 0x36d   : > { %v1653_v54 = vpop.permute.xlu1 %1652 }
 0x36e   : > { %1718 = vst.msk [vmem:[#allocation3 + $0xf8] sm:$0xff] %vm1686_vm11, %v1653_v54  ;;  %v4252_v53 = vpop.f32.mrf.mxu1 }
 0x36f   : > { %1852 = vst.msk [vmem:[#allocation3 + $0xf8] sm:$0xff] %vm1820_vm12, %v1787_v7  ;;  %v2070_v56 = vpack.c.bf16 %v4252_v53, %v4252_v53  ;;  %v1883_v16 = vld [vmem:[#allocation3 + $0xf0] sm:$0xff]  ;;  %v2146_v7 = vsel %vm405_vm0, %v4252_v53, 0.0 }
 0x371   : > { %2103 = vst.msk [vmem:[%s4015_s26 + $0x30] sm:$0xf] %vm2090_vm14, %v2070_v56 }
 0x375   : > { %v4258_v45 = vpop.f32.mrf.mxu0 }
 0x376   : > { %v2064_v39 = vpack.c.bf16 %v4258_v45, %v4258_v45  ;;  %v1884_v36 = vld [vmem:[#allocation3 + $0xf8] sm:$0xff]  ;;  %v4264_v63 = vpop.f32.mrf.mxu1  ;;  %v2134_v2 = vsel %vm405_vm0, %v4258_v45, 0.0 }
 0x377   : > { %v1900_v33 = vpack.c.bf16 %v1884_v36, %v1883_v16  ;;  %v2071_v34 = vpack.c.bf16 %v4264_v63, %v4264_v63  ;;  %v2135_v47 = vadd.f32 %v2134_v2, %v2133_v1  ;;  %v2148_v56 = vsel %vm405_vm0, %v4264_v63, 0.0 }
 0x378   : > { %2097 = vst.msk [vmem:[%s4015_s26 + $0x18] sm:$0xf] %vm2090_vm14, %v2064_v39 }
 0x379   : > { %2448 = vmatmul.msk.bf16.gmra.mxu3 %vm1916_vm13, %v1900_v33  ;;  %2104 = vst.msk [vmem:[%s4015_s26 + $0x34] sm:$0xf] %vm2090_vm14, %v2071_v34 }
 0x37d   : > { %v4271_v30 = vpop.f32.mrf.mxu0 }
 0x37e   : > { %v2065_v8 = vpack.c.bf16 %v4271_v30, %v4271_v30  ;;  %v2136_v32 = vsel %vm405_vm0, %v4271_v30, 0.0 }
 0x37f   : > { %v2137_v27 = vadd.f32 %v2136_v32, %v2135_v47 }
 0x380   : > { %2098 = vst.msk [vmem:[%s4015_s26 + $0x1c] sm:$0xf] %vm2090_vm14, %v2065_v8  ;;  %v2154_v8 = vsel %vm405_vm0, %v4139_v22, 0.0 }
 0x381   : > { %v2139_v57 = vadd.f32 %v2138_v38, %v2137_v27 }
 0x383   : > { %v2141_v9 = vadd.f32 %v2140_v41, %v2139_v57  ;;  %v2170_v57 = vsel %vm405_vm0, %v4228_v4, 0.0 }
 0x385   : > { %v2143_v51 = vadd.f32 %v2142_v50, %v2141_v9  ;;  %v2172_v9 = vsel %vm405_vm0, %v4237_v15, 0.0 }
 0x387   : > { %v2145_v13 = vadd.f32 %v2144_v49, %v2143_v51 }
 0x389   : > { %v2147_v54 = vadd.f32 %v2146_v7, %v2145_v13 }
 0x38b   : > { %v2149_v39 = vadd.f32 %v2148_v56, %v2147_v54 }
 0x3a3   : > { %v4277_v61 = vpop.f32.mrf.mxu2 }
 0x3a4   : > { %v2078_v44 = vpack.c.bf16 %v4277_v61, %v4277_v61 }
 0x3a6   : > { %2111 = vst.msk [vmem:[%s4015_s26 + $0x50] sm:$0xf] %vm2090_vm14, %v2078_v44 }
 0x3ab   : > { %v4291_v59 = vpop.f32.mrf.mxu2  ;;  %v4293_v28 = vpop.f32.mrf.mxu3 }
 0x3ac   : > { %v2079_v5 = vpack.c.bf16 %v4291_v59, %v4291_v59  ;;  %v2084_v10 = vpack.c.bf16 %v4293_v28, %v4293_v28  ;;  %v2164_v43 = vsel %vm405_vm0, %v4291_v59, 0.0  ;;  %v2174_v51 = vsel %vm405_vm0, %v4293_v28, 0.0 }
 0x3ae   : > { %2112 = vst.msk [vmem:[%s4015_s26 + $0x54] sm:$0xf] %vm2090_vm14, %v2079_v5 }
 0x3af   : > { %2117 = vst.msk [vmem:[%s4015_s26 + $0x68] sm:$0xf] %vm2090_vm14, %v2084_v10  ;;  %v2162_v10 = vsel %vm405_vm0, %v4277_v61, 0.0 }
 0x3b3   : > { %v4311_v20 = vpop.f32.mrf.mxu3 }
 0x3b4   : > { %v2085_v37 = vpack.c.bf16 %v4311_v20, %v4311_v20  ;;  %v2176_v7 = vsel %vm405_vm0, %v4311_v20, 0.0 }
 0x3b6   : > { %2118 = vst.msk [vmem:[%s4015_s26 + $0x6c] sm:$0xf] %vm2090_vm14, %v2085_v37  ;;  %v4317_v35 = vpop.f32.mrf.mxu1 }
 0x3b7   : > { %v2072_v62 = vpack.c.bf16 %v4317_v35, %v4317_v35  ;;  %v2150_v16 = vsel %vm405_vm0, %v4317_v35, 0.0 }
 0x3b8   : > { %v2151_v33 = vadd.f32 %v2150_v16, %v2149_v39 }
 0x3b9   : > { %2105 = vst.msk [vmem:[%s4015_s26 + $0x38] sm:$0xf] %vm2090_vm14, %v2072_v62 }
 0x3be   : > { %v4327_v24 = vpop.f32.mrf.mxu1 }
 0x3bf   : > { %v2073_v52 = vpack.c.bf16 %v4327_v24, %v4327_v24  ;;  %v2152_v36 = vsel %vm405_vm0, %v4327_v24, 0.0 }
 0x3c0   : > { %v2153_v34 = vadd.f32 %v2152_v36, %v2151_v33 }
 0x3c1   : > { %2106 = vst.msk [vmem:[%s4015_s26 + $0x3c] sm:$0xf] %vm2090_vm14, %v2073_v52 }
 0x3c2   : > { %v2155_v44 = vadd.f32 %v2154_v8, %v2153_v34 }
 0x3c4   : > { %v2157_v40 = vadd.f32 %v2156_v55, %v2155_v44 }
 0x3c6   : > { %v2159_v17 = vadd.f32 %v2158_v6, %v2157_v40 }
 0x3c8   : > { %v2161_v31 = vadd.f32 %v2160_v29, %v2159_v17 }
 0x3ca   : > { %v2163_v60 = vadd.f32 %v2162_v10, %v2161_v31 }
 0x3cc   : > { %v2165_v2 = vadd.f32 %v2164_v43, %v2163_v60 }
 0x3e4   : > { %v4353_v5 = vpop.f32.mrf.mxu2 }
 0x3e5   : > { %v2080_v12 = vpack.c.bf16 %v4353_v5, %v4353_v5  ;;  %v2166_v23 = vsel %vm405_vm0, %v4353_v5, 0.0 }
 0x3e6   : > { %v2167_v1 = vadd.f32 %v2166_v23, %v2165_v2 }
 0x3e7   : > { %2113 = vst.msk [vmem:[%s4015_s26 + $0x58] sm:$0xf] %vm2090_vm14, %v2080_v12 }
 0x3ec   : > { %v4365_v32 = vpop.f32.mrf.mxu2  ;;  %v4367_v47 = vpop.f32.mrf.mxu3 }
 0x3ed   : > { %v2081_v37 = vpack.c.bf16 %v4365_v32, %v4365_v32  ;;  %v2168_v27 = vsel %vm405_vm0, %v4365_v32, 0.0  ;;  %v2086_v62 = vpack.c.bf16 %v4367_v47, %v4367_v47  ;;  %v2178_v16 = vsel %vm405_vm0, %v4367_v47, 0.0 }
 0x3ee   : > { %v2169_v38 = vadd.f32 %v2168_v27, %v2167_v1 }
 0x3ef   : > { %2114 = vst.msk [vmem:[%s4015_s26 + $0x5c] sm:$0xf] %vm2090_vm14, %v2081_v37 }
 0x3f0   : > { %v2171_v41 = vadd.f32 %v2170_v57, %v2169_v38  ;;  %2119 = vst.msk [vmem:[%s4015_s26 + $0x70] sm:$0xf] %vm2090_vm14, %v2086_v62 }
 0x3f2   : > { %v2173_v52 = vadd.f32 %v2172_v9, %v2171_v41 }
 0x3f4   : > { %v4383_v50 = vpop.f32.mrf.mxu3  ;;  %v2175_v13 = vadd.f32 %v2174_v51, %v2173_v52 }
 0x3f5   : > { %v2087_v49 = vpack.c.bf16 %v4383_v50, %v4383_v50  ;;  %v2180_v33 = vsel %vm405_vm0, %v4383_v50, 0.0 }
 0x3f6   : > { %v2177_v54 = vadd.f32 %v2176_v7, %v2175_v13 }
 0x3f7   : > { %2120 = vst.msk [vmem:[%s4015_s26 + $0x74] sm:$0xf] %vm2090_vm14, %v2087_v49 }
 0x3f8   : > { %v2179_v36 = vadd.f32 %v2178_v16, %v2177_v54 }
 0x3fa   : > { %v2181_v8 = vadd.f32 %v2180_v33, %v2179_v36 }
 0x3fc   : > { %v4393_v56 = vpop.f32.mrf.mxu3 }
 0x3fd   : > { %v2088_v39 = vpack.c.bf16 %v4393_v56, %v4393_v56  ;;  %v2182_v34 = vsel %vm405_vm0, %v4393_v56, 0.0 }
 0x3fe   : > { %v2183_v44 = vadd.f32 %v2182_v34, %v2181_v8 }
 0x3ff   : > { %2121 = vst.msk [vmem:[%s4015_s26 + $0x78] sm:$0xf] %vm2090_vm14, %v2088_v39 }
 0x404   : > { %v4405_v55 = vpop.f32.mrf.mxu3 }
 0x405   : > { %v2089_v40 = vpack.c.bf16 %v4405_v55, %v4405_v55  ;;  %v2184_v6 = vsel %vm405_vm0, %v4405_v55, 0.0 }
 0x406   : > { %v2185_v17 = vadd.f32 %v2184_v6, %v2183_v44 }
 0x407   : > { %2122 = vst.msk [vmem:[%s4015_s26 + $0x7c] sm:$0xf] %vm2090_vm14, %v2089_v40 }
 0x408   : > { %v2186_v29 = vrot.slane %v2185_v17, 4 }
 0x40a   : > { %v2187_v31 = vadd.f32 %v2186_v29, %v2185_v17 }
 0x40c   : > { %v2188_v10 = vrot.slane %v2187_v31, 2 }
 0x40e   : > { %v2189_v12 = vadd.f32 %v2188_v10, %v2187_v31 }
 0x410   : > { %v2190_v60 = vrot.slane %v2189_v12, 1 }
 0x412   : > { %v2191_v43 = vadd.f32 %v2190_v60, %v2189_v12 }
 0x414   : > { %2327 = vst.msk [vmem:[%s4417_s29] sm:$0x1] %vm2326_vm15, %v2191_v43  ;;  %v4421_v23 = vmul.f32 0.00390625, %v2191_v43 }
 0x416   : > { %v2193_v2 = vsub.f32 %v4017_v48, %v4421_v23  ;;  %v2194_v1 = vsub.f32 %v4033_v58, %v4421_v23  ;;  %v2195_v37 = vsub.f32 %v4071_v46, %v4421_v23  ;;  %v2196_v27 = vsub.f32 %v4097_v21, %v4421_v23 }
 0x417   : > { %v2197_v57 = vsub.f32 %v4168_v0, %v4421_v23  ;;  %v2198_v9 = vsub.f32 %v4182_v14, %v4421_v23  ;;  %v2199_v46 = vsub.f32 %v4258_v45, %v4421_v23  ;;  %v2200_v0 = vsub.f32 %v4271_v30, %v4421_v23 }
 0x418   : > { %v2225_v62 = vmul.f32 %v2193_v2, %v2193_v2  ;;  %v2226_v38 = vmul.f32 %v2194_v1, %v2194_v1  ;;  %v2227_v41 = vmul.f32 %v2195_v37, %v2195_v37  ;;  %v2228_v52 = vmul.f32 %v2196_v27, %v2196_v27 }
 0x419   : > { %v2229_v49 = vmul.f32 %v2197_v57, %v2197_v57  ;;  %v2230_v7 = vmul.f32 %v2198_v9, %v2198_v9  ;;  %v2201_v16 = vsub.f32 %v4091_v19, %v4421_v23  ;;  %v2231_v39 = vmul.f32 %v2199_v46, %v2199_v46 }
 0x41a   : > { %v2257_v48 = vsel %vm405_vm0, %v2225_v62, 0.0  ;;  %v2258_v58 = vsel %vm405_vm0, %v2226_v38, 0.0  ;;  %v2260_v21 = vsel %vm405_vm0, %v2227_v41, 0.0  ;;  %v2262_v54 = vsel %vm405_vm0, %v2228_v52, 0.0 }
 0x41b   : > { %v2259_v51 = vadd.f32 %v2258_v58, %v2257_v48  ;;  %v2264_v36 = vsel %vm405_vm0, %v2229_v49, 0.0  ;;  %v2202_v45 = vsub.f32 %v4113_v25, %v4421_v23  ;;  %v2232_v34 = vmul.f32 %v2200_v0, %v2200_v0 }
 0x41c   : > { %v2266_v8 = vsel %vm405_vm0, %v2230_v7, 0.0  ;;  %v2203_v30 = vsub.f32 %v4177_v42, %v4421_v23  ;;  %v2233_v40 = vmul.f32 %v2201_v16, %v2201_v16  ;;  %v2268_v6 = vsel %vm405_vm0, %v2231_v39, 0.0 }
 0x41d   : > { %v2261_v13 = vadd.f32 %v2260_v21, %v2259_v51  ;;  %v2204_v19 = vsub.f32 %v4193_v18, %v4421_v23  ;;  %v2234_v29 = vmul.f32 %v2202_v45, %v2202_v45  ;;  %v2270_v31 = vsel %vm405_vm0, %v2232_v34, 0.0 }
 0x41e   : > { %v2205_v25 = vsub.f32 %v4252_v53, %v4421_v23  ;;  %v2235_v12 = vmul.f32 %v2203_v30, %v2203_v30  ;;  %v2272_v60 = vsel %vm405_vm0, %v2233_v40, 0.0  ;;  %v2206_v42 = vsub.f32 %v4264_v63, %v4421_v23 }
 0x41f   : > { %v2263_v14 = vadd.f32 %v2262_v54, %v2261_v13  ;;  %v2236_v2 = vmul.f32 %v2204_v19, %v2204_v19  ;;  %v2274_v1 = vsel %vm405_vm0, %v2234_v29, 0.0  ;;  %v2207_v18 = vsub.f32 %v4317_v35, %v4421_v23 }
 0x420   : > { %v2237_v27 = vmul.f32 %v2205_v25, %v2205_v25  ;;  %v2276_v62 = vsel %vm405_vm0, %v2235_v12, 0.0  ;;  %v2208_v53 = vsub.f32 %v4327_v24, %v4421_v23  ;;  %v2238_v57 = vmul.f32 %v2206_v42, %v2206_v42 }
 0x421   : > { %v2265_v33 = vadd.f32 %v2264_v36, %v2263_v14  ;;  %v2278_v41 = vsel %vm405_vm0, %v2236_v2, 0.0  ;;  %v2209_v63 = vsub.f32 %v4139_v22, %v4421_v23  ;;  %v2239_v52 = vmul.f32 %v2207_v18, %v2207_v18 }
 0x422   : > { %v2280_v48 = vsel %vm405_vm0, %v2237_v27, 0.0  ;;  %v2210_v35 = vsub.f32 %v4151_v11, %v4421_v23  ;;  %v2240_v51 = vmul.f32 %v2208_v53, %v2208_v53  ;;  %v2282_v46 = vsel %vm405_vm0, %v2238_v57, 0.0 }
 0x423   : > { %v2267_v44 = vadd.f32 %v2266_v8, %v2265_v33  ;;  %v2211_v24 = vsub.f32 %v4210_v26, %v4421_v23  ;;  %v2241_v21 = vmul.f32 %v2209_v63, %v2209_v63  ;;  %v2284_v13 = vsel %vm405_vm0, %v2239_v52, 0.0 }
 0x424   : > { %v2212_v22 = vsub.f32 %v4219_v3, %v4421_v23  ;;  %v2242_v7 = vmul.f32 %v2210_v35, %v2210_v35  ;;  %v2286_v54 = vsel %vm405_vm0, %v2240_v51, 0.0  ;;  %v2213_v11 = vsub.f32 %v4277_v61, %v4421_v23 }
 0x425   : > { %v2269_v17 = vadd.f32 %v2268_v6, %v2267_v44  ;;  %v2243_v16 = vmul.f32 %v2211_v24, %v2211_v24  ;;  %v2288_v39 = vsel %vm405_vm0, %v2241_v21, 0.0  ;;  %v2214_v26 = vsub.f32 %v4291_v59, %v4421_v23 }
 0x426   : > { %v2244_v33 = vmul.f32 %v2212_v22, %v2212_v22  ;;  %v2290_v45 = vsel %vm405_vm0, %v2242_v7, 0.0  ;;  %v2215_v3 = vsub.f32 %v4353_v5, %v4421_v23  ;;  %v2245_v8 = vmul.f32 %v2213_v11, %v2213_v11 }
 0x427   : > { %v2271_v10 = vadd.f32 %v2270_v31, %v2269_v17  ;;  %v2292_v44 = vsel %vm405_vm0, %v2243_v16, 0.0  ;;  %v2216_v61 = vsub.f32 %v4365_v32, %v4421_v23  ;;  %v2246_v40 = vmul.f32 %v2214_v26, %v2214_v26 }
 0x428   : > { %v2294_v6 = vsel %vm405_vm0, %v2244_v33, 0.0  ;;  %v2217_v59 = vsub.f32 %v4228_v4, %v4421_v23  ;;  %v2247_v19 = vmul.f32 %v2215_v3, %v2215_v3  ;;  %v2296_v29 = vsel %vm405_vm0, %v2245_v8, 0.0 }
 0x429   : > { %v2273_v43 = vadd.f32 %v2272_v60, %v2271_v10  ;;  %v2218_v5 = vsub.f32 %v4237_v15, %v4421_v23  ;;  %v2248_v10 = vmul.f32 %v2216_v61, %v2216_v61  ;;  %v2298_v25 = vsel %vm405_vm0, %v2246_v40, 0.0 }
 0x42a   : > { %v2219_v32 = vsub.f32 %v4293_v28, %v4421_v23  ;;  %v2249_v60 = vmul.f32 %v2217_v59, %v2217_v59  ;;  %v2220_v4 = vsub.f32 %v4311_v20, %v4421_v23  ;;  %v2221_v15 = vsub.f32 %v4367_v47, %v4421_v23 }
 0x42b   : > { %v2275_v37 = vadd.f32 %v2274_v1, %v2273_v43  ;;  %v2300_v43 = vsel %vm405_vm0, %v2247_v19, 0.0  ;;  %v2250_v2 = vmul.f32 %v2218_v5, %v2218_v5  ;;  %v2302_v1 = vsel %vm405_vm0, %v2248_v10, 0.0 }
 0x42c   : > { %v2251_v18 = vmul.f32 %v2219_v32, %v2219_v32  ;;  %v2304_v27 = vsel %vm405_vm0, %v2249_v60, 0.0  ;;  %v2222_v28 = vsub.f32 %v4383_v50, %v4421_v23  ;;  %v2223_v20 = vsub.f32 %v4393_v56, %v4421_v23 }
 0x42d   : > { %v2277_v38 = vadd.f32 %v2276_v62, %v2275_v37  ;;  %v2306_v53 = vsel %vm405_vm0, %v2250_v2, 0.0  ;;  %v2224_v47 = vsub.f32 %v4405_v55, %v4421_v23 }
 0x42e   : > { %v2254_v52 = vmul.f32 %v2222_v28, %v2222_v28  ;;  %v2255_v35 = vmul.f32 %v2223_v20, %v2223_v20 }
 0x42f   : > { %v2279_v9 = vadd.f32 %v2278_v41, %v2277_v38  ;;  %v2252_v38 = vmul.f32 %v2220_v4, %v2220_v4  ;;  %v2253_v41 = vmul.f32 %v2221_v15, %v2221_v15 }
 0x430   : > { %v2316_v24 = vsel %vm405_vm0, %v2255_v35, 0.0 }
 0x431   : > { %v2281_v58 = vadd.f32 %v2280_v48, %v2279_v9  ;;  %v2308_v9 = vsel %vm405_vm0, %v2251_v18, 0.0  ;;  %v2310_v48 = vsel %vm405_vm0, %v2252_v38, 0.0  ;;  %v2312_v50 = vsel %vm405_vm0, %v2253_v41, 0.0 }
 0x433   : > { %v2283_v49 = vadd.f32 %v2282_v46, %v2281_v58  ;;  %v2256_v46 = vmul.f32 %v2224_v47, %v2224_v47 }
 0x435   : > { %v2285_v0 = vadd.f32 %v2284_v13, %v2283_v49  ;;  %v2314_v49 = vsel %vm405_vm0, %v2254_v52, 0.0  ;;  %v2318_v13 = vsel %vm405_vm0, %v2256_v46, 0.0 }
 0x437   : > { %v2287_v14 = vadd.f32 %v2286_v54, %v2285_v0 }
 0x439   : > { %v2289_v36 = vadd.f32 %v2288_v39, %v2287_v14 }
 0x43b   : > { %v2291_v34 = vadd.f32 %v2290_v45, %v2289_v36 }
 0x43d   : > { %v2293_v30 = vadd.f32 %v2292_v44, %v2291_v34 }
 0x43f   : > { %v2295_v17 = vadd.f32 %v2294_v6, %v2293_v30 }
 0x441   : > { %v2297_v31 = vadd.f32 %v2296_v29, %v2295_v17 }
 0x443   : > { %v2299_v12 = vadd.f32 %v2298_v25, %v2297_v31 }
 0x445   : > { %v2301_v42 = vadd.f32 %v2300_v43, %v2299_v12 }
 0x447   : > { %v2303_v37 = vadd.f32 %v2302_v1, %v2301_v42 }
 0x449   : > { %v2305_v62 = vadd.f32 %v2304_v27, %v2303_v37 }
 0x44b   : > { %v2307_v57 = vadd.f32 %v2306_v53, %v2305_v62 }
 0x44d   : > { %v2309_v63 = vadd.f32 %v2308_v9, %v2307_v57 }
 0x44f   : > { %v2311_v58 = vadd.f32 %v2310_v48, %v2309_v63 }
 0x451   : > { %v2313_v51 = vadd.f32 %v2312_v50, %v2311_v58 }
 0x453   : > { %v2315_v56 = vadd.f32 %v2314_v49, %v2313_v51 }
 0x455   : > { %v2317_v21 = vadd.f32 %v2316_v24, %v2315_v56 }
 0x457   : > { %v2319_v0 = vadd.f32 %v2318_v13, %v2317_v21 }
 0x459   : > { %v2320_v55 = vrot.slane %v2319_v0, 4 }
 0x45b   : > { %v2321_v23 = vadd.f32 %v2320_v55, %v2319_v0 }
 0x45d   : > { %v2322_v22 = vrot.slane %v2321_v23, 2 }
 0x45f   : > { %v2323_v7 = vadd.f32 %v2322_v22, %v2321_v23 }
 0x461   : > { %v2324_v54 = vrot.slane %v2323_v7, 1 }
 0x463   : > { %v2325_v14 = vadd.f32 %v2324_v54, %v2323_v7 }
 0x465   : > { %2328 = vst.msk [vmem:[%s4417_s29 + $0x1] sm:$0x1] %vm2326_vm15, %v2325_v14 }
 0x466 PF: > { %s16_s18 = sadd.s32 1, %s2572_s18  }
 0x467   : > { %p13_p4 = scmp.ge.s32.totalorder %s16_s18, 4  }
 0x469   :  { %15 = sbr.rel (!%p13_p4) target bundleno = 1 (0x1), region = 79 }

// kernel: resblock_nchw.3
= control target key start
LH: loop header
LB: loop body
LE: loop exit
PB: predicated region body
PF: predicated region fallthrough
CT: control target
= control target key end

     0   :  { %s3537_s12 = smov 0   ;;  %s5084_s0 = inlined_call_operand.vmem [shape: bf16[2,18,18,4], index: 0, kind: input, shape index: {}]   ;;  %s5085_s1 = inlined_call_operand.vmem [shape: bf16[36,4], index: 1, kind: input, shape index: {}]   ;;  %s5086_s2 = inlined_call_operand.vmem [shape: bf16[2,16,16,4], index: 2, kind: output, shape index: {0}]   ;;  %s5087_s3 = inlined_call_operand.vmem [shape: f32[2,2,4], index: 3, kind: output, shape index: {1}]  }
   0x1 LB: > { %s2773_s13 = sadd.s32 4294967295, %s3507_s12   ;;  %p2777_p0 = scmp.ge.s32.totalorder %s3507_s12, 1  ;;  %s3507_s12 = sphi %s3537_s12, %s14_s12  }
   0x2   : > { %p140_p1 = scmp.lt.s32.totalorder %s3507_s12, 3 }
   0x4   : > { %p141_p2 = pnand %p2777_p0, %p140_p1 }
   0x6   : > { %144 = sbr.rel (%p141_p2) target bundleno = 762 (0x2fa), region = 28 }
   0xb   : > { %p168_p3 = scmp.lt.s32.totalorder %s2773_s13, 1  ;;  %vm307_vm0 = vsmask.f32 3328  ;;  %vm308_vm1 = vsmask.f32 7440  ;;  %s3509_s18 = smov 4  }
   0xc   : > { %vm3589_vm2 = vmor %vm307_vm0, %vm308_vm1  ;;  %vm967_vm3 = vcmask 1042432   ;;  %vm968_vm4 = vcmask 1046532   ;;  %s3510_s19 = smov 8   ;;  %vm274_vm6 = vcmask 31744   ;;  %s3511_s20 = smov 12   ;;  %vm886_vm7 = vcmask 64544  }
   0xd   : > { %s5159_s13 = smov (!%p168_p3, %s2773_s13), 1  ;;  %vm3816_vm5 = vmor %vm967_vm3, %vm968_vm4  ;;  %s3512_s21 = smov 16   ;;  %vm1274_vm8 = vcmask 97344   ;;  %vm1437_vm9 = vcmask 130144   ;;  %vm1596_vm10 = vcmask 162944   ;;  %vm2323_vm11 = vcmask 1041408  }
   0xe   : > { %s2838_s14 = smul.u32 216, %s5159_s13  ;;  %s3513_s22 = smov 20   ;;  %vm1741_vm12 = vcmask 195744   ;;  %vm1874_vm13 = vcmask 228544   ;;  %vm2033_vm14 = vcmask 261344   ;;  %vm2178_vm15 = vcmask 294144  }
   0xf   : > { %s3514_s23 = smov 28   ;;  %s3515_s24 = smov 24   ;;  %vm2274_vm0 = vcmask 293888   ;;  %vm2448_vm1 = vcmask 27648  }
  0x10   : > { %s3551_s17 = scalar_lea.vmem %s5084_s0, %s2838_s14  ;;  %s3516_s25 = smov 32  }
  0x11   : > { %v3554_v0 = vld [vmem:[%s3551_s17 + $0x18] sm:$0xf]  ;;  %v3557_v1 = vld [vmem:[%s3551_s17 + $0x1c] sm:$0xf]  ;;  %v3560_v2 = vld [vmem:[%s3551_s17 + $0x20] sm:$0x1] }
  0x12   : > { %v359_v3 = vshrl.u32 %v3554_v0, 16  ;;  %v362_v4 = vshll.u32 %v3554_v0, 16  ;;  %v368_v5 = vshll.u32 %v3557_v1, 16  ;;  %v372_v6 = vshrl.u32 %v3557_v1, 16  ;;  %v3567_v7 = vld [vmem:[%s3551_s17] sm:$0xf] }
  0x13   : > { %v378_v8 = vshll.u32 %v3560_v2, 16  ;;  %v3571_v9 = vld [vmem:[%s3551_s17 + $0x4] sm:$0xf]  ;;  %v3574_v10 = vld [vmem:[%s3551_s17 + $0x8] sm:$0x1]  ;;  %v311_v11 = vshrl.u32 %v3567_v7, 16 }
  0x14   : > { %v361_v12 = vrot.slane %v359_v3, 4  ;;  %v364_v13 = vrot.slane %v362_v4, 5  ;;  %v370_v14 = vrot.slane %v368_v5, 5  ;;  %v374_v15 = vrot.slane %v372_v6, 4  ;;  %v3578_v16 = vld [vmem:[%s3551_s17 + $0x24] sm:$0xf] }
  0x15   : > { %v380_v17 = vrot.slane %v378_v8, 5  ;;  %v313_v18 = vrot.slane %v311_v11, 4  ;;  %v314_v19 = vshll.u32 %v3567_v7, 16  ;;  %v320_v20 = vshll.u32 %v3571_v9, 16  ;;  %v3585_v25 = vld [vmem:[%s3551_s17 + $0x28] sm:$0xf] }
  0x16   : > { %v365_v21 = vor.u32 %v364_v13, %v361_v12  ;;  %v375_v22 = vor.u32 %v374_v15, %v370_v14  ;;  %v324_v23 = vshrl.u32 %v3571_v9, 16  ;;  %v330_v24 = vshll.u32 %v3574_v10, 16  ;;  %v3596_v36 = vld [vmem:[%s3551_s17 + $0x2c] sm:$0x1]  ;;  %v3613_v56 = vld [vmem:[%s3551_s17 + $0x10] sm:$0xf] }
  0x17   : > { %v316_v27 = vrot.slane %v314_v19, 5  ;;  %v322_v28 = vrot.slane %v320_v20, 5  ;;  %v383_v29 = vshrl.u32 %v3578_v16, 16  ;;  %v386_v30 = vshll.u32 %v3578_v16, 16  ;;  %v3605_v44 = vld [vmem:[%s3551_s17 + $0xc] sm:$0xf] }
  0x18   : > { %v366_v31 = vrot.slane %v365_v21, 4  ;;  %v376_v32 = vrot.slane %v375_v22, 4  ;;  %v326_v33 = vrot.slane %v324_v23, 4  ;;  %v332_v34 = vrot.slane %v330_v24, 5  ;;  %v3619_v62 = vld [vmem:[%s3551_s17 + $0x14] sm:$0x1] }
  0x19   : > { %v317_v35 = vor.u32 %v316_v27, %v313_v18  ;;  %v385_v37 = vrot.slane %v383_v29, 4  ;;  %v388_v38 = vrot.slane %v386_v30, 5  ;;  %v392_v39 = vshll.u32 %v3585_v25, 16  ;;  %v3622_v63 = vld [vmem:[%s3551_s17 + $0x54] sm:$0xf]  ;;  %s2826_s5 = sshll.u32 %s5159_s13, 7 }
  0x1a   : > { %v371_v40 = vsel %vm3589_vm2, %v366_v31, %v370_v14  ;;  %v381_v41 = vsel %vm3589_vm2, %v376_v32, %v380_v17  ;;  %v327_v42 = vor.u32 %v326_v33, %v322_v28  ;;  %v396_v43 = vshrl.u32 %v3585_v25, 16  ;;  %v3632_v14 = vld [vmem:[%s3551_s17 + $0x58] sm:$0xf]  ;;  %v3636_v19 = vld [vmem:[%s3551_s17 + $0x5c] sm:$0x1]  ;;  %s4695_s8 = scalar_lea.vmem %s5086_s2, %s2826_s5  ;;  %s2781_s9 = sshll.u32 %s5159_s13, 1 }
  0x1b   : > { %v730_v45 = vunpack.c.l.bf16 %v371_v40  ;;  %v731_v46 = vunpack.c.l.bf16 %v381_v41  ;;  %v318_v47 = vrot.slane %v317_v35, 4  ;;  %v389_v48 = vor.u32 %v388_v38, %v385_v37  ;;  %v3643_v27 = vld [vmem:[%s3551_s17 + $0x48] sm:$0xf]  ;;  %v3652_v40 = vld [vmem:[%s3551_s17 + $0x4c] sm:$0xf]  ;;  %s4977_s14 = scalar_lea.vmem %s5087_s3, %s2781_s9 }
  0x1c   : > { %v328_v49 = vrot.slane %v327_v42, 4  ;;  %v394_v50 = vrot.slane %v392_v39, 5  ;;  %v398_v51 = vrot.slane %v396_v43, 4  ;;  %v402_v52 = vshll.u32 %v3596_v36, 16 }
  0x1d   : > { %v3608_v53 = vpack.i.bf16 %v731_v46, %v730_v45  ;;  %v323_v54 = vsel %vm3589_vm2, %v318_v47, %v322_v28  ;;  %v390_v55 = vrot.slane %v389_v48, 4  ;;  %v335_v57 = vshrl.u32 %v3605_v44, 16  ;;  %v3656_v47 = vld [vmem:[%s3551_s17 + $0x50] sm:$0x1] }
  0x1e   : > { %v333_v58 = vsel %vm3589_vm2, %v328_v49, %v332_v34  ;;  %v726_v59 = vunpack.c.l.bf16 %v323_v54  ;;  %v399_v60 = vor.u32 %v398_v51, %v394_v50  ;;  %v404_v61 = vrot.slane %v402_v52, 5  ;;  %v3664_v52 = vld [vmem:[%s3551_s17 + $0x78] sm:$0xf] }
  0x1f   : > { %5122 = vst [vmem:[#allocation3_spill] sm:$0xff] %v3608_v53  ;;  %2866 = vrot.lane.b32.xlu1 %v3608_v53, %s3509_s18  ;;  %v727_v3 = vunpack.c.l.bf16 %v333_v58  ;;  %v395_v4 = vsel %vm3589_vm2, %v390_v55, %v394_v50  ;;  %v337_v5 = vrot.slane %v335_v57, 4  ;;  %v338_v6 = vshll.u32 %v3605_v44, 16  ;;  %v3889_v53 = vld [vmem:[%s3551_s17 + $0x8c] sm:$0x1] }
  0x20   : > { %v400_v8 = vrot.slane %v399_v60, 4  ;;  %v732_v11 = vunpack.c.l.bf16 %v395_v4  ;;  %v344_v12 = vshll.u32 %v3613_v56, 16  ;;  %v348_v13 = vshrl.u32 %v3613_v56, 16 }
  0x21   : > { %v2855_v15 = vpack.i.bf16 %v727_v3, %v726_v59  ;;  %v340_v17 = vrot.slane %v338_v6, 5  ;;  %v354_v18 = vshll.u32 %v3619_v62, 16  ;;  %v479_v20 = vshrl.u32 %v3622_v63, 16 }
  0x22   : > { %v405_v21 = vsel %vm3589_vm2, %v400_v8, %v404_v61  ;;  %v346_v22 = vrot.slane %v344_v12, 5  ;;  %v350_v23 = vrot.slane %v348_v13, 4  ;;  %v482_v24 = vshll.u32 %v3622_v63, 16  ;;  %v3674_v8 = vld [vmem:[%s3551_s17 + $0x7c] sm:$0xf] }
  0x23   : > { %2856 = vrot.lane.b32.xlu0 %v2855_v15, %s3509_s18  ;;  %v733_v28 = vunpack.c.l.bf16 %v405_v21  ;;  %v341_v29 = vor.u32 %v340_v17, %v337_v5  ;;  %v356_v30 = vrot.slane %v354_v18, 5  ;;  %v481_v31 = vrot.slane %v479_v20, 4  ;;  %v3680_v18 = vld [vmem:[%s3551_s17 + $0x80] sm:$0x1]  ;;  %v3683_v20 = vld [vmem:[%s3551_s17 + $0x6c] sm:$0xf] }
  0x24   : > { %v351_v32 = vor.u32 %v350_v23, %v346_v22  ;;  %v484_v33 = vrot.slane %v482_v24, 5  ;;  %v488_v34 = vshll.u32 %v3632_v14, 16  ;;  %v492_v35 = vshrl.u32 %v3632_v14, 16 }
  0x25   : > { %v3648_v37 = vpack.i.bf16 %v733_v28, %v732_v11  ;;  %v342_v38 = vrot.slane %v341_v29, 4  ;;  %v498_v39 = vshll.u32 %v3636_v19, 16  ;;  %v455_v41 = vshrl.u32 %v3643_v27, 16 }
  0x26   : > { %v352_v42 = vrot.slane %v351_v32, 4  ;;  %v485_v43 = vor.u32 %v484_v33, %v481_v31  ;;  %v490_v45 = vrot.slane %v488_v34, 5  ;;  %v494_v46 = vrot.slane %v492_v35, 4  ;;  %v3694_v35 = vld [vmem:[%s3551_s17 + $0x70] sm:$0xf] }
  0x27   : > { %5123 = vst [vmem:[#allocation4_spill] sm:$0xff] %v3648_v37  ;;  %2871 = vrot.lane.b32.xlu1 %v3648_v37, %s3509_s18  ;;  %v347_v48 = vsel %vm3589_vm2, %v342_v38, %v346_v22  ;;  %v500_v49 = vrot.slane %v498_v39, 5  ;;  %v457_v50 = vrot.slane %v455_v41, 4  ;;  %v458_v51 = vshll.u32 %v3643_v27, 16 }
  0x28   : > { %v357_v54 = vsel %vm3589_vm2, %v352_v42, %v356_v30  ;;  %v728_v55 = vunpack.c.l.bf16 %v347_v48  ;;  %v486_v57 = vrot.slane %v485_v43, 4  ;;  %v495_v58 = vor.u32 %v494_v46, %v490_v45 }
  0x29   : > { %v729_v59 = vunpack.c.l.bf16 %v357_v54  ;;  %v460_v60 = vrot.slane %v458_v51, 5  ;;  %v464_v61 = vshll.u32 %v3652_v40, 16  ;;  %v468_v3 = vshrl.u32 %v3652_v40, 16 }
  0x2a   : > { %v491_v4 = vsel %vm3589_vm2, %v486_v57, %v490_v45  ;;  %v496_v5 = vrot.slane %v495_v58, 4  ;;  %v474_v6 = vshll.u32 %v3656_v47, 16  ;;  %v551_v11 = vshrl.u32 %v3664_v52, 16  ;;  %v3702_v45 = vld [vmem:[%s3551_s17 + $0x74] sm:$0x1] }
  0x2b   : > { %v3677_v12 = vpack.i.bf16 %v729_v59, %v728_v55  ;;  %v740_v13 = vunpack.c.l.bf16 %v491_v4  ;;  %v461_v15 = vor.u32 %v460_v60, %v457_v50  ;;  %v466_v17 = vrot.slane %v464_v61, 5  ;;  %v3709_v58 = vld [vmem:[%s3551_s17 + $0x30] sm:$0xf] }
  0x2c   : > { %v501_v21 = vsel %vm3589_vm2, %v496_v5, %v500_v49  ;;  %v470_v22 = vrot.slane %v468_v3, 4  ;;  %v476_v23 = vrot.slane %v474_v6, 5  ;;  %v553_v24 = vrot.slane %v551_v11, 4 }
  0x2d   : > { %5124 = vst [vmem:[#allocation5_spill] sm:$0xff] %v3677_v12  ;;  %2861 = vrot.lane.b32.xlu0 %v3677_v12, %s3509_s18  ;;  %v741_v28 = vunpack.c.l.bf16 %v501_v21  ;;  %v462_v29 = vrot.slane %v461_v15, 4  ;;  %v554_v30 = vshll.u32 %v3664_v52, 16  ;;  %v560_v31 = vshll.u32 %v3674_v8, 16  ;;  %v3716_v21 = vld [vmem:[%s3551_s17 + $0x34] sm:$0xf] }
  0x2e   : > { %v471_v32 = vor.u32 %v470_v22, %v466_v17  ;;  %v564_v33 = vshrl.u32 %v3674_v8, 16  ;;  %v570_v34 = vshll.u32 %v3680_v18, 16  ;;  %v527_v38 = vshrl.u32 %v3683_v20, 16 }
  0x2f   : > { %v3697_v39 = vpack.i.bf16 %v741_v28, %v740_v13  ;;  %v467_v41 = vsel %vm3589_vm2, %v462_v29, %v466_v17  ;;  %v556_v42 = vrot.slane %v554_v30, 5  ;;  %v562_v43 = vrot.slane %v560_v31, 5  ;;  %v3724_v29 = vld [vmem:[%s3551_s17 + $0x38] sm:$0x1]  ;;  %v3728_v31 = vld [vmem:[%s3551_s17 + $0x9c] sm:$0xf] }
  0x30   : > { %v472_v46 = vrot.slane %v471_v32, 4  ;;  %v738_v48 = vunpack.c.l.bf16 %v467_v41  ;;  %v566_v49 = vrot.slane %v564_v33, 4  ;;  %v572_v50 = vrot.slane %v570_v34, 5  ;;  %5127 = vst [vmem:[#allocation8_spill] sm:$0xff] %v3728_v31 }
  0x31   : > { %5125 = vst [vmem:[#allocation6_spill] sm:$0xff] %v3697_v39  ;;  %2891 = vrot.lane.b32.xlu1 %v3697_v39, %s3509_s18  ;;  %v557_v51 = vor.u32 %v556_v42, %v553_v24  ;;  %v529_v54 = vrot.slane %v527_v38, 4  ;;  %v530_v55 = vshll.u32 %v3683_v20, 16  ;;  %v536_v57 = vshll.u32 %v3694_v35, 16 }
  0x32   : > { %v477_v59 = vsel %vm3589_vm2, %v472_v46, %v476_v23  ;;  %v567_v60 = vor.u32 %v566_v49, %v562_v43  ;;  %v540_v61 = vshrl.u32 %v3694_v35, 16  ;;  %v546_v3 = vshll.u32 %v3702_v45, 16 }
  0x33   : > { %v739_v4 = vunpack.c.l.bf16 %v477_v59  ;;  %v558_v5 = vrot.slane %v557_v51, 4  ;;  %v532_v6 = vrot.slane %v530_v55, 5  ;;  %v538_v11 = vrot.slane %v536_v57, 5 }
  0x34   : > { %v568_v13 = vrot.slane %v567_v60, 4  ;;  %v542_v15 = vrot.slane %v540_v61, 4  ;;  %v548_v17 = vrot.slane %v546_v3, 5  ;;  %v407_v22 = vshrl.u32 %v3709_v58, 16  ;;  %v3743_v60 = vld [vmem:[%s3551_s17 + $0xa0] sm:$0xf] }
  0x35   : > { %v3719_v24 = vpack.i.bf16 %v739_v4, %v738_v48  ;;  %v563_v23 = vsel %vm3589_vm2, %v558_v5, %v562_v43  ;;  %v533_v28 = vor.u32 %v532_v6, %v529_v54  ;;  %v410_v30 = vshll.u32 %v3709_v58, 16  ;;  %v3746_v61 = vld [vmem:[%s3551_s17 + $0xa4] sm:$0x1] }
  0x36   : > { %v573_v32 = vsel %vm3589_vm2, %v568_v13, %v572_v50  ;;  %v746_v33 = vunpack.c.l.bf16 %v563_v23  ;;  %v543_v34 = vor.u32 %v542_v15, %v538_v11  ;;  %v409_v38 = vrot.slane %v407_v22, 4  ;;  %5129 = vst [vmem:[#allocation10_spill] sm:$0xff] %v3746_v61  ;;  %v3751_v13 = vld [vmem:[%s3551_s17 + $0x90] sm:$0xf] }
  0x37   : > { %5126 = vst [vmem:[#allocation7_spill] sm:$0xff] %v3719_v24  ;;  %2886 = vrot.lane.b32.xlu0 %v3719_v24, %s3509_s18  ;;  %v747_v41 = vunpack.c.l.bf16 %v573_v32  ;;  %v534_v42 = vrot.slane %v533_v28, 4  ;;  %v412_v43 = vrot.slane %v410_v30, 5  ;;  %v416_v46 = vshll.u32 %v3716_v21, 16  ;;  %v3790_v24 = vld [vmem:[%s3551_s17 + $0x44] sm:$0x1] }
  0x38   : > { %v544_v48 = vrot.slane %v543_v34, 4  ;;  %v420_v49 = vshrl.u32 %v3716_v21, 16  ;;  %v426_v51 = vshll.u32 %v3724_v29, 16  ;;  %v623_v50 = vshrl.u32 %v3728_v31, 16 }
  0x39   : > { %v3738_v54 = vpack.i.bf16 %v747_v41, %v746_v33  ;;  %v539_v55 = vsel %vm3589_vm2, %v534_v42, %v538_v11  ;;  %v413_v57 = vor.u32 %v412_v43, %v409_v38  ;;  %v418_v59 = vrot.slane %v416_v46, 5  ;;  %v3764_v41 = vld [vmem:[%s3551_s17 + $0x94] sm:$0xf] }
  0x3a   : > { %v549_v3 = vsel %vm3589_vm2, %v544_v48, %v548_v17  ;;  %v744_v4 = vunpack.c.l.bf16 %v539_v55  ;;  %v422_v5 = vrot.slane %v420_v49, 4  ;;  %v428_v6 = vrot.slane %v426_v51, 5  ;;  %v3768_v51 = vld [vmem:[%s3551_s17 + $0x98] sm:$0x1] }
  0x3b   : > { %5128 = vst [vmem:[#allocation9_spill] sm:$0xff] %v3738_v54  ;;  %2906 = vrot.lane.b32.xlu1 %v3738_v54, %s3509_s18  ;;  %v745_v15 = vunpack.c.l.bf16 %v549_v3  ;;  %v414_v11 = vrot.slane %v413_v57, 4  ;;  %v625_v22 = vrot.slane %v623_v50, 4  ;;  %v626_v23 = vshll.u32 %v3728_v31, 16  ;;  %v3774_v3 = vld [vmem:[%s3551_s17 + $0x3c] sm:$0xf] }
  0x3c   : > { %v423_v28 = vor.u32 %v422_v5, %v418_v59  ;;  %v632_v30 = vshll.u32 %v3743_v60, 16  ;;  %v636_v17 = vshrl.u32 %v3743_v60, 16  ;;  %v642_v32 = vshll.u32 %v3746_v61, 16 }
  0x3d   : > { %v3759_v33 = vpack.i.bf16 %v745_v15, %v744_v4  ;;  %v419_v34 = vsel %vm3589_vm2, %v414_v11, %v418_v59  ;;  %v628_v38 = vrot.slane %v626_v23, 5  ;;  %v599_v42 = vshrl.u32 %v3751_v13, 16 }
  0x3e   : > { %v424_v43 = vrot.slane %v423_v28, 4  ;;  %v734_v46 = vunpack.c.l.bf16 %v419_v34  ;;  %v634_v48 = vrot.slane %v632_v30, 5  ;;  %v638_v49 = vrot.slane %v636_v17, 4 }
  0x3f   : > { %5130 = vst [vmem:[#allocation11_spill] sm:$0xff] %v3759_v33  ;;  %2901 = vrot.lane.b32.xlu0 %v3759_v33, %s3509_s18  ;;  %v629_v50 = vor.u32 %v628_v38, %v625_v22  ;;  %v644_v55 = vrot.slane %v642_v32, 5  ;;  %v601_v57 = vrot.slane %v599_v42, 4  ;;  %v602_v59 = vshll.u32 %v3751_v13, 16  ;;  %v3782_v38 = vld [vmem:[%s3551_s17 + $0x40] sm:$0xf] }
  0x40   : > { %v429_v4 = vsel %vm3589_vm2, %v424_v43, %v428_v6  ;;  %v639_v5 = vor.u32 %v638_v49, %v634_v48  ;;  %v608_v15 = vshll.u32 %v3764_v41, 16  ;;  %v612_v11 = vshrl.u32 %v3764_v41, 16 }
  0x41   : > { %v735_v23 = vunpack.c.l.bf16 %v429_v4  ;;  %v630_v28 = vrot.slane %v629_v50, 4  ;;  %v604_v30 = vrot.slane %v602_v59, 5  ;;  %v618_v22 = vshll.u32 %v3768_v51, 16 }
  0x42   : > { %v640_v17 = vrot.slane %v639_v5, 4  ;;  %v610_v32 = vrot.slane %v608_v15, 5  ;;  %v614_v34 = vrot.slane %v612_v11, 4  ;;  %v431_v42 = vshrl.u32 %v3774_v3, 16 }
  0x43   : > { %v3785_v33 = vpack.i.bf16 %v735_v23, %v734_v46  ;;  %v635_v6 = vsel %vm3589_vm2, %v630_v28, %v634_v48  ;;  %v605_v43 = vor.u32 %v604_v30, %v601_v57  ;;  %v620_v49 = vrot.slane %v618_v22, 5 }
  0x44   : > { %v645_v50 = vsel %vm3589_vm2, %v640_v17, %v644_v55  ;;  %v752_v59 = vunpack.c.l.bf16 %v635_v6  ;;  %v615_v4 = vor.u32 %v614_v34, %v610_v32  ;;  %v433_v5 = vrot.slane %v431_v42, 4  ;;  %v3805_v34 = vld [vmem:[%s3551_s17 + $0xb4] sm:$0xf] }
  0x45   : > { %5131 = vst [vmem:[#allocation12_spill] sm:$0xff] %v3785_v33  ;;  %2876 = vrot.lane.b32.xlu2 %v3785_v33, %s3509_s18  ;;  %v753_v15 = vunpack.c.l.bf16 %v645_v50  ;;  %v606_v46 = vrot.slane %v605_v43, 4  ;;  %v434_v11 = vshll.u32 %v3774_v3, 16  ;;  %v440_v48 = vshll.u32 %v3782_v38, 16 }
  0x46   : > { %v616_v57 = vrot.slane %v615_v4, 4  ;;  %v444_v23 = vshrl.u32 %v3782_v38, 16  ;;  %v450_v28 = vshll.u32 %v3790_v24, 16  ;;  %v3810_v4 = vld [vmem:[%s3551_s17 + $0xb8] sm:$0xf]  ;;  %v989_v12 = vrot.slane %v3560_v2, 5 }
  0x47   : > { %v3800_v55 = vpack.i.bf16 %v753_v15, %v752_v59  ;;  %v611_v30 = vsel %vm3589_vm2, %v606_v46, %v610_v32  ;;  %v436_v22 = vrot.slane %v434_v11, 5  ;;  %v442_v17 = vrot.slane %v440_v48, 5 }
  0x48   : > { %v621_v42 = vsel %vm3589_vm2, %v616_v57, %v620_v49  ;;  %v750_v6 = vunpack.c.l.bf16 %v611_v30  ;;  %v446_v43 = vrot.slane %v444_v23, 4  ;;  %v452_v50 = vrot.slane %v450_v28, 5 }
  0x49   : > { %5132 = vst [vmem:[#allocation13_spill] sm:$0xff] %v3800_v55  ;;  %2921 = vrot.lane.b32.xlu1 %v3800_v55, %s3509_s18  ;;  %v751_v59 = vunpack.c.l.bf16 %v621_v42  ;;  %v437_v15 = vor.u32 %v436_v22, %v433_v5  ;;  %v2782_v32 = vrot.slane %v3567_v7, 9  ;;  %v972_v49 = vrot.slane %v3571_v9, 5  ;;  %v3837_v55 = vld [vmem:[%s3551_s17 + $0x60] sm:$0xf] }
  0x4a   : > { %v447_v46 = vor.u32 %v446_v43, %v442_v17  ;;  %v975_v48 = vrot.slane %v3574_v10, 5  ;;  %v671_v57 = vshrl.u32 %v3805_v34, 16  ;;  %v674_v28 = vshll.u32 %v3805_v34, 16  ;;  %v3830_v43 = vld [vmem:[%s3551_s17 + $0xbc] sm:$0x1] }
  0x4b   : > { %v3823_v23 = vpack.i.bf16 %v751_v59, %v750_v6  ;;  %v438_v5 = vrot.slane %v437_v15, 4  ;;  %v680_v7 = vshll.u32 %v3810_v4, 16  ;;  %v973_v22 = vsel %vm3816_vm5, %v2782_v32, %v972_v49 }
  0x4c   : > { %v448_v30 = vrot.slane %v447_v46, 4  ;;  %v974_v42 = vrot.slane %v972_v49, 4  ;;  %v673_v9 = vrot.slane %v671_v57, 4  ;;  %v1114_v6 = vunpack.c.l.bf16 %v973_v22  ;;  %v3840_v46 = vld [vmem:[%s3551_s17 + $0x64] sm:$0xf] }
  0x4d   : > { %5135 = vst [vmem:[#allocation14_spill] sm:$0xff] %v3823_v23  ;;  %2916 = vrot.lane.b32.xlu0 %v3823_v23, %s3509_s18  ;;  %v443_v10 = vsel %vm3589_vm2, %v438_v5, %v442_v17  ;;  %v676_v59 = vrot.slane %v674_v28, 5  ;;  %v682_v15 = vrot.slane %v680_v7, 5  ;;  %v684_v23 = vshrl.u32 %v3810_v4, 16  ;;  %v3849_v28 = vld [vmem:[%s3551_s17 + $0x68] sm:$0x1] }
  0x4e   : > { %v453_v32 = vsel %vm3589_vm2, %v448_v30, %v452_v50  ;;  %v736_v49 = vunpack.c.l.bf16 %v443_v10  ;;  %v976_v57 = vsel %vm3816_vm5, %v974_v42, %v975_v48  ;;  %v690_v17 = vshll.u32 %v3830_v43, 16 }
  0x4f   : > { %v737_v37 = vunpack.c.l.bf16 %v453_v32  ;;  %v1115_v54 = vunpack.c.l.bf16 %v976_v57  ;;  %v677_v39 = vor.u32 %v676_v59, %v673_v9  ;;  %v686_v5 = vrot.slane %v684_v23, 4 }
  0x50   : > { %v503_v7 = vshrl.u32 %v3837_v55, 16  ;;  %v506_v22 = vshll.u32 %v3837_v55, 16  ;;  %v512_v50 = vshll.u32 %v3840_v46, 16  ;;  %v692_v42 = vrot.slane %v690_v17, 5 }
  0x51   : > { %v3854_v30 = vpack.i.bf16 %v737_v37, %v736_v49  ;;  %v2935_v10 = vpack.i.bf16 %v1115_v54, %v1114_v6  ;;  %v678_v48 = vrot.slane %v677_v39, 4  ;;  %v687_v33 = vor.u32 %v686_v5, %v682_v15 }
  0x52   : > { %v505_v32 = vrot.slane %v503_v7, 4  ;;  %v508_v57 = vrot.slane %v506_v22, 5  ;;  %v514_v9 = vrot.slane %v512_v50, 5  ;;  %v516_v37 = vshrl.u32 %v3840_v46, 16 }
  0x53   : > { %5136 = vst [vmem:[#allocation15_spill] sm:$0xff] %v3854_v30  ;;  %2881 = vrot.lane.b32.xlu2 %v3854_v30, %s3509_s18  ;;  %2936 = vrot.lane.b32.xlu1 %v2935_v10, %s3510_s19  ;;  %v683_v23 = vsel %vm3589_vm2, %v678_v48, %v682_v15  ;;  %v522_v54 = vshll.u32 %v3849_v28, 16  ;;  %v2785_v39 = vrot.slane %v3578_v16, 9  ;;  %v688_v6 = vrot.slane %v687_v33, 4  ;;  %v3868_v10 = vld [vmem:[%s3551_s17 + $0x84] sm:$0xf] }
  0x54   : > { %v756_v59 = vunpack.c.l.bf16 %v683_v23  ;;  %v509_v49 = vor.u32 %v508_v57, %v505_v32  ;;  %v993_v17 = vrot.slane %v3585_v25, 5  ;;  %v518_v5 = vrot.slane %v516_v37, 4 }
  0x55   : > { %v524_v7 = vrot.slane %v522_v54, 5  ;;  %v996_v22 = vrot.slane %v3596_v36, 5  ;;  %v2784_v50 = vrot.slane %v3554_v0, 9  ;;  %v693_v15 = vsel %vm3589_vm2, %v688_v6, %v692_v42  ;;  %v3881_v42 = vld [vmem:[%s3551_s17 + $0x88] sm:$0xf] }
  0x56   : > { %v510_v48 = vrot.slane %v509_v49, 4  ;;  %v994_v33 = vsel %vm3816_vm5, %v2785_v39, %v993_v17  ;;  %v995_v23 = vrot.slane %v993_v17, 4  ;;  %v757_v32 = vunpack.c.l.bf16 %v693_v15 }
  0x57   : > { %v519_v57 = vor.u32 %v518_v5, %v514_v9  ;;  %v1120_v37 = vunpack.c.l.bf16 %v994_v33  ;;  %v986_v54 = vrot.slane %v3557_v1, 5  ;;  %v575_v6 = vshrl.u32 %v3868_v10, 16 }
  0x58   : > { %v515_v36 = vsel %vm3589_vm2, %v510_v48, %v514_v9  ;;  %v997_v30 = vsel %vm3816_vm5, %v995_v23, %v996_v22  ;;  %v3884_v39 = vpack.i.bf16 %v757_v32, %v756_v59  ;;  %v578_v22 = vshll.u32 %v3868_v10, 16 }
  0x59   : > { %v520_v49 = vrot.slane %v519_v57, 4  ;;  %v742_v17 = vunpack.c.l.bf16 %v515_v36  ;;  %v1121_v5 = vunpack.c.l.bf16 %v997_v30  ;;  %v987_v15 = vsel %vm3816_vm5, %v2784_v50, %v986_v54 }
  0x5a   : > { %5137 = vst [vmem:[#allocation16_spill] sm:$0xff] %v3884_v39  ;;  %v988_v33 = vrot.slane %v986_v54, 4  ;;  %v577_v9 = vrot.slane %v575_v6, 4  ;;  %2931 = vrot.lane.b32.xlu0 %v3884_v39, %s3509_s18  ;;  %v1118_v48 = vunpack.c.l.bf16 %v987_v15  ;;  %v584_v30 = vshll.u32 %v3881_v42, 16  ;;  %v3936_v39 = vld [vmem:[%s3551_s17 + $0xb0] sm:$0x1] }
  0x5b   : > { %v525_v2 = vsel %vm3589_vm2, %v520_v49, %v524_v7  ;;  %v3896_v59 = vpack.i.bf16 %v1121_v5, %v1120_v37  ;;  %v580_v32 = vrot.slane %v578_v22, 5  ;;  %v588_v57 = vshrl.u32 %v3881_v42, 16 }
  0x5c   : > { %v743_v23 = vunpack.c.l.bf16 %v525_v2  ;;  %v990_v50 = vsel %vm3816_vm5, %v988_v33, %v989_v12  ;;  %v586_v36 = vrot.slane %v584_v30, 5  ;;  %v594_v7 = vshll.u32 %v3889_v53, 16  ;;  %v3910_v2 = vld [vmem:[%s3551_s17 + $0xa8] sm:$0xf] }
  0x5d   : > { %5138 = vst [vmem:[#allocation17_spill] sm:$0xff] %v3896_v59  ;;  %2951 = vrot.lane.b32.xlu1 %v3896_v59, %s3510_s19  ;;  %v1119_v54 = vunpack.c.l.bf16 %v990_v50  ;;  %v2788_v37 = vrot.slane %v3643_v27, 9  ;;  %v581_v49 = vor.u32 %v580_v32, %v577_v9  ;;  %v590_v5 = vrot.slane %v588_v57, 4 }
  0x5e   : > { %v3906_v6 = vpack.i.bf16 %v743_v23, %v742_v17  ;;  %v1014_v15 = vrot.slane %v3652_v40, 5  ;;  %v596_v33 = vrot.slane %v594_v7, 5  ;;  %v1017_v22 = vrot.slane %v3656_v47, 5 }
  0x5f   : > { %v3912_v12 = vpack.i.bf16 %v1119_v54, %v1118_v48  ;;  %v2787_v30 = vrot.slane %v3774_v3, 9  ;;  %v582_v50 = vrot.slane %v581_v49, 4  ;;  %v591_v17 = vor.u32 %v590_v5, %v586_v36  ;;  %v3928_v5 = vld [vmem:[%s3551_s17 + $0xac] sm:$0xf] }
  0x60   : > { %5139 = vst [vmem:[#allocation18_spill] sm:$0xff] %v3906_v6  ;;  %2896 = vrot.lane.b32.xlu2 %v3906_v6, %s3509_s18  ;;  %v1015_v9 = vsel %vm3816_vm5, %v2788_v37, %v1014_v15  ;;  %v1016_v23 = vrot.slane %v1014_v15, 4  ;;  %v1007_v48 = vrot.slane %v3782_v38, 5  ;;  %v1010_v57 = vrot.slane %v3790_v24, 5 }
  0x61   : > { %5140 = vst [vmem:[#allocation19_spill] sm:$0xff] %v3912_v12  ;;  %v1126_v32 = vunpack.c.l.bf16 %v1015_v9  ;;  %v647_v54 = vshrl.u32 %v3910_v2, 16  ;;  %v587_v47 = vsel %vm3589_vm2, %v582_v50, %v586_v36  ;;  %v592_v7 = vrot.slane %v591_v17, 4 }
  0x62   : > { %v1018_v49 = vsel %vm3816_vm5, %v1016_v23, %v1017_v22  ;;  %v650_v37 = vshll.u32 %v3910_v2, 16  ;;  %2946 = vrot.lane.b32.xlu0 %v3912_v12, %s3510_s19  ;;  %v748_v15 = vunpack.c.l.bf16 %v587_v47  ;;  %v1008_v24 = vsel %vm3816_vm5, %v2787_v30, %v1007_v48 }
  0x63   : > { %v1127_v9 = vunpack.c.l.bf16 %v1018_v49  ;;  %v1009_v59 = vrot.slane %v1007_v48, 4  ;;  %v597_v36 = vsel %vm3589_vm2, %v592_v7, %v596_v33  ;;  %v1124_v50 = vunpack.c.l.bf16 %v1008_v24 }
  0x64   : > { %v649_v22 = vrot.slane %v647_v54, 4  ;;  %v652_v17 = vrot.slane %v650_v37, 5  ;;  %v749_v23 = vunpack.c.l.bf16 %v597_v36  ;;  %v656_v47 = vshll.u32 %v3928_v5, 16 }
  0x65   : > { %v3940_v6 = vpack.i.bf16 %v1127_v9, %v1126_v32  ;;  %v1011_v12 = vsel %vm3816_vm5, %v1009_v59, %v1010_v57  ;;  %v660_v30 = vshrl.u32 %v3928_v5, 16  ;;  %v666_v48 = vshll.u32 %v3936_v39, 16 }
  0x66   : > { %v1125_v49 = vunpack.c.l.bf16 %v1011_v12  ;;  %v653_v61 = vor.u32 %v652_v17, %v649_v22  ;;  %v3947_v31 = vpack.i.bf16 %v749_v23, %v748_v15  ;;  %v658_v33 = vrot.slane %v656_v47, 5 }
  0x67   : > { %2966 = vrot.lane.b32.xlu1 %v3940_v6, %s3510_s19  ;;  %v2791_v32 = vrot.slane %v3683_v20, 9  ;;  %v1035_v54 = vrot.slane %v3694_v35, 5  ;;  %v662_v57 = vrot.slane %v660_v30, 4  ;;  %v668_v12 = vrot.slane %v666_v48, 5 }
  0x68   : > { %v3953_v7 = vpack.i.bf16 %v1125_v49, %v1124_v50  ;;  %v654_v59 = vrot.slane %v653_v61, 4  ;;  %2911 = vrot.lane.b32.xlu2 %v3947_v31, %s3509_s18  ;;  %v1038_v9 = vrot.slane %v3702_v45, 5  ;;  %v2790_v24 = vrot.slane %v3837_v55, 9 }
  0x69   : > { %v1036_v37 = vsel %vm3816_vm5, %v2791_v32, %v1035_v54  ;;  %v1037_v15 = vrot.slane %v1035_v54, 4  ;;  %v663_v22 = vor.u32 %v662_v57, %v658_v33  ;;  %v1028_v61 = vrot.slane %v3840_v46, 5 }
  0x6a   : > { %v659_v36 = vsel %vm3589_vm2, %v654_v59, %v658_v33  ;;  %v1132_v50 = vunpack.c.l.bf16 %v1036_v37  ;;  %2961 = vrot.lane.b32.xlu0 %v3953_v7, %s3510_s19  ;;  %v1031_v47 = vrot.slane %v3849_v28, 5  ;;  %v2783_v45 = vrot.slane %v3605_v44, 9 }
  0x6b   : > { %v754_v17 = vunpack.c.l.bf16 %v659_v36  ;;  %v1039_v23 = vsel %vm3816_vm5, %v1037_v15, %v1038_v9  ;;  %v664_v49 = vrot.slane %v663_v22, 4  ;;  %v1029_v48 = vsel %vm3816_vm5, %v2790_v24, %v1028_v61 }
  0x6c   : > { %v1133_v30 = vunpack.c.l.bf16 %v1039_v23  ;;  %v1030_v33 = vrot.slane %v1028_v61, 4  ;;  %v1130_v32 = vunpack.c.l.bf16 %v1029_v48  ;;  %v979_v54 = vrot.slane %v3613_v56, 5 }
  0x6d   : > { %v982_v59 = vrot.slane %v3619_v62, 5  ;;  %v2794_v57 = vrot.slane %v3751_v13, 9  ;;  %v669_v37 = vsel %vm3589_vm2, %v664_v49, %v668_v12  ;;  %v1056_v9 = vrot.slane %v3764_v41, 5 }
  0x6e   : > { %v3977_v15 = vpack.i.bf16 %v1133_v30, %v1132_v50  ;;  %v1032_v28 = vsel %vm3816_vm5, %v1030_v33, %v1031_v47  ;;  %v755_v36 = vunpack.c.l.bf16 %v669_v37  ;;  %v980_v22 = vsel %vm3816_vm5, %v2783_v45, %v979_v54 }
  0x6f   : > { %v1131_v24 = vunpack.c.l.bf16 %v1032_v28  ;;  %v981_v61 = vrot.slane %v979_v54, 4  ;;  %v1116_v62 = vunpack.c.l.bf16 %v980_v22  ;;  %v1057_v12 = vsel %vm3816_vm5, %v2794_v57, %v1056_v9 }
  0x70   : > { %2981 = vrot.lane.b32.xlu1 %v3977_v15, %s3510_s19  ;;  %v1058_v50 = vrot.slane %v1056_v9, 4  ;;  %v1059_v23 = vrot.slane %v3768_v51, 5  ;;  %v3989_v49 = vpack.i.bf16 %v755_v36, %v754_v17  ;;  %v1138_v48 = vunpack.c.l.bf16 %v1057_v12 }
  0x71   : > { %v3991_v47 = vpack.i.bf16 %v1131_v24, %v1130_v32  ;;  %v983_v30 = vsel %vm3816_vm5, %v981_v61, %v982_v59  ;;  %v2793_v54 = vrot.slane %v3868_v10, 9  ;;  %v1049_v37 = vrot.slane %v3881_v42, 5 }
  0x72   : > { %v1117_v45 = vunpack.c.l.bf16 %v983_v30  ;;  %v1060_v33 = vsel %vm3816_vm5, %v1058_v50, %v1059_v23  ;;  %2926 = vrot.lane.b32.xlu2 %v3989_v49, %s3509_s18  ;;  %v1052_v17 = vrot.slane %v3889_v53, 5  ;;  %v2786_v32 = vrot.slane %v3709_v58, 9 }
  0x73   : > { %2976 = vrot.lane.b32.xlu0 %v3991_v47, %s3510_s19  ;;  %v1139_v51 = vunpack.c.l.bf16 %v1060_v33  ;;  %v1000_v59 = vrot.slane %v3716_v21, 5  ;;  %v1050_v57 = vsel %vm3816_vm5, %v2793_v54, %v1049_v37  ;;  %v1051_v28 = vrot.slane %v1049_v37, 4 }
  0x74   : > { %v1003_v9 = vrot.slane %v3724_v29, 5  ;;  %v1136_v24 = vunpack.c.l.bf16 %v1050_v57  ;;  %v4011_v61 = vpack.i.bf16 %v1117_v45, %v1116_v62  ;;  %v2797_v53 = vrot.slane %v3805_v34, 9 }
  0x75   : > { %v4009_v36 = vpack.i.bf16 %v1139_v51, %v1138_v48  ;;  %v1002_v22 = vrot.slane %v1000_v59, 4  ;;  %v1053_v12 = vsel %vm3816_vm5, %v1051_v28, %v1052_v17  ;;  %v1077_v50 = vrot.slane %v3810_v4, 5 }
  0x76   : > { %v1137_v23 = vunpack.c.l.bf16 %v1053_v12  ;;  %v1001_v30 = vsel %vm3816_vm5, %v2786_v32, %v1000_v59  ;;  %v1080_v33 = vrot.slane %v3830_v43, 5  ;;  %v2796_v29 = vrot.slane %v3910_v2, 9 }
  0x77   : > { %v1004_v62 = vsel %vm3816_vm5, %v1002_v22, %v1003_v9  ;;  %v1078_v48 = vsel %vm3816_vm5, %v2797_v53, %v1077_v50  ;;  %v1079_v45 = vrot.slane %v1077_v50, 4  ;;  %v1070_v54 = vrot.slane %v3928_v5, 5 }
  0x78   : > { %2996 = vrot.lane.b32.xlu1 %v4009_v36, %s3510_s19  ;;  %v4028_v37 = vpack.i.bf16 %v1137_v23, %v1136_v24  ;;  %v1144_v51 = vunpack.c.l.bf16 %v1078_v48  ;;  %v1073_v17 = vrot.slane %v3936_v39, 5  ;;  %v1122_v43 = vunpack.c.l.bf16 %v1001_v30 }
  0x79   : > { %v1081_v32 = vsel %vm3816_vm5, %v1079_v45, %v1080_v33  ;;  %v1071_v59 = vsel %vm3816_vm5, %v2796_v29, %v1070_v54  ;;  %v1072_v57 = vrot.slane %v1070_v54, 4  ;;  %v1123_v28 = vunpack.c.l.bf16 %v1004_v62 }
  0x7a   : > { %2941 = vrot.lane.b32.xlu2 %v4011_v61, %s3510_s19  ;;  %v1145_v9 = vunpack.c.l.bf16 %v1081_v32  ;;  %v1142_v24 = vunpack.c.l.bf16 %v1071_v59  ;;  %v1021_v22 = vrot.slane %v3632_v14, 5  ;;  %v2789_v12 = vrot.slane %v3622_v63, 9 }
  0x7b   : > { %2991 = vrot.lane.b32.xlu0 %v4028_v37, %s3510_s19  ;;  %v1074_v39 = vsel %vm3816_vm5, %v1072_v57, %v1073_v17  ;;  %v1024_v53 = vrot.slane %v3636_v19, 5  ;;  %v4046_v33 = vpack.i.bf16 %v1123_v28, %v1122_v43  ;;  %v248_v62 = vunpack.c.l.bf16 %v3578_v16 }
  0x7c   : > { %v4044_v50 = vpack.i.bf16 %v1145_v9, %v1144_v51  ;;  %v1143_v23 = vunpack.c.l.bf16 %v1074_v39  ;;  %v1023_v30 = vrot.slane %v1021_v22, 4  ;;  %v1022_v14 = vsel %vm3816_vm5, %v2789_v12, %v1021_v22  ;;  %v5141_v12 = vld [vmem:[#allocation8_spill] sm:$0xff] }
  0x7d   : > { %v249_v19 = vunpack.c.l.bf16 %v3585_v25  ;;  %v1042_v48 = vrot.slane %v3674_v8, 5  ;;  %v246_v45 = vunpack.c.l.bf16 %v3554_v0  ;;  %v247_v54 = vunpack.c.l.bf16 %v3557_v1  ;;  %281 = vst.msk [vmem:[#allocation2 + $0x30] sm:$0xff] %vm274_vm6, %v248_v62 }
  0x7e   : > { %v4048_v29 = vpack.i.bf16 %v1143_v23, %v1142_v24  ;;  %v1025_v63 = vsel %vm3816_vm5, %v1023_v30, %v1024_v53  ;;  %v1128_v16 = vunpack.c.l.bf16 %v1022_v14  ;;  %v2792_v43 = vrot.slane %v3664_v52, 9  ;;  %v5142_v30 = vld [vmem:[#allocation10_spill] sm:$0xff] }
  0x7f   : > { %v1129_v51 = vunpack.c.l.bf16 %v1025_v63  ;;  %v4065_v17 = vpack.i.bf16 %v249_v19, %v248_v62  ;;  %v1044_v32 = vrot.slane %v1042_v48, 4  ;;  %v1045_v25 = vrot.slane %v3680_v18, 5  ;;  %279 = vst.msk [vmem:[#allocation2 + $0x20] sm:$0xff] %vm274_vm6, %v246_v45 }
  0x80   : > { %3011 = vrot.lane.b32.xlu1 %v4044_v50, %s3510_s19  ;;  %v4069_v8 = vpack.i.bf16 %v247_v54, %v246_v45  ;;  %v245_v0 = vunpack.c.l.bf16 %v3613_v56  ;;  %v254_v59 = vunpack.c.l.bf16 %v3643_v27  ;;  %v244_v57 = vunpack.c.l.bf16 %v3605_v44  ;;  %280 = vst.msk [vmem:[#allocation2 + $0x28] sm:$0xff] %vm274_vm6, %v247_v54 }
  0x81   : > { %v4072_v1 = vpack.i.bf16 %v1129_v51, %v1128_v16  ;;  %v1043_v52 = vsel %vm3816_vm5, %v2792_v43, %v1042_v48  ;;  %v1046_v18 = vsel %vm3816_vm5, %v1044_v32, %v1045_v25  ;;  %v255_v28 = vunpack.c.l.bf16 %v3652_v40  ;;  %282 = vst.msk [vmem:[#allocation2 + $0x38] sm:$0xff] %vm274_vm6, %v249_v19 }
  0x82   : > { %2956 = vrot.lane.b32.xlu2 %v4046_v33, %s3510_s19  ;;  %v1063_v9 = vrot.slane %v3743_v60, 5  ;;  %278 = vst.msk [vmem:[#allocation2 + $0x18] sm:$0xff] %vm274_vm6, %v245_v0  ;;  %v1134_v27 = vunpack.c.l.bf16 %v1043_v52  ;;  %v1135_v40 = vunpack.c.l.bf16 %v1046_v18  ;;  %v252_v24 = vunpack.c.l.bf16 %v3774_v3 }
  0x83   : > { %3006 = vrot.lane.b32.xlu0 %v4048_v29, %s3510_s19  ;;  %277 = vst.msk [vmem:[#allocation2 + $0x10] sm:$0xff] %vm274_vm6, %v244_v57  ;;  %v253_v22 = vunpack.c.l.bf16 %v3782_v38  ;;  %v4098_v39 = vpack.i.bf16 %v255_v28, %v254_v59  ;;  %v2795_v53 = vrot.slane %v5141_v12, 9  ;;  %v1066_v14 = vrot.slane %v5142_v30, 5 }
  0x84   : > { %v1065_v23 = vrot.slane %v1063_v9, 4  ;;  %285 = vst.msk [vmem:[#allocation2 + $0x50] sm:$0xff] %vm274_vm6, %v252_v24  ;;  %v4105_v63 = vpack.i.bf16 %v1135_v40, %v1134_v27  ;;  %v260_v38 = vunpack.c.l.bf16 %v3683_v20  ;;  %v261_v19 = vunpack.c.l.bf16 %v3694_v35 }
  0x85   : > { %v4107_v3 = vpack.i.bf16 %v253_v22, %v252_v24  ;;  %286 = vst.msk [vmem:[#allocation2 + $0x58] sm:$0xff] %vm274_vm6, %v253_v22  ;;  %v1064_v48 = vsel %vm3816_vm5, %v2795_v53, %v1063_v9  ;;  %v258_v45 = vunpack.c.l.bf16 %v3837_v55  ;;  %v259_v54 = vunpack.c.l.bf16 %v3840_v46 }
  0x86   : > { %v1067_v62 = vsel %vm3816_vm5, %v1065_v23, %v1066_v14  ;;  %287 = vst.msk [vmem:[#allocation2 + $0x60] sm:$0xff] %vm274_vm6, %v254_v59  ;;  %v1140_v20 = vunpack.c.l.bf16 %v1064_v48  ;;  %v4128_v55 = vpack.i.bf16 %v261_v19, %v260_v38  ;;  %v266_v46 = vunpack.c.l.bf16 %v3751_v13 }
  0x87   : > { %288 = vst.msk [vmem:[#allocation2 + $0x68] sm:$0xff] %vm274_vm6, %v255_v28  ;;  %v1141_v16 = vunpack.c.l.bf16 %v1067_v62  ;;  %v267_v51 = vunpack.c.l.bf16 %v3764_v41  ;;  %v264_v32 = vunpack.c.l.bf16 %v3868_v10  ;;  %v4138_v59 = vpack.i.bf16 %v259_v54, %v258_v45  ;;  %v3495_v28 = vld [vmem:[%s3551_s17 + $0x4] sm:$0xf] }
  0x88   : > { %3026 = vrot.lane.b32.xlu1 %v4065_v17, %s3511_s20  ;;  %291 = vst.msk [vmem:[#allocation2 + $0x80] sm:$0xff] %vm274_vm6, %v258_v45  ;;  %v265_v52 = vunpack.c.l.bf16 %v3881_v42  ;;  %v250_v13 = vunpack.c.l.bf16 %v3709_v58  ;;  %v251_v10 = vunpack.c.l.bf16 %v3716_v21  ;;  %v243_v9 = vunpack.c.l.bf16 %v3495_v28  ;;  %v3496_v21 = vld [vmem:[%s3551_s17] sm:$0xf] }
  0x89   : > { %292 = vst.msk [vmem:[#allocation2 + $0x88] sm:$0xff] %vm274_vm6, %v259_v54  ;;  %v4136_v25 = vpack.i.bf16 %v1141_v16, %v1140_v20  ;;  %v4155_v42 = vpack.i.bf16 %v267_v51, %v266_v46  ;;  %v242_v27 = vunpack.c.l.bf16 %v3496_v21  ;;  %v3015_v22 = vpack.i.bf16 %v245_v0, %v244_v57 }
  0x8a   : > { %2971 = vrot.lane.b32.xlu2 %v4072_v1, %s3510_s19  ;;  %293 = vst.msk [vmem:[#allocation2 + $0x90] sm:$0xff] %vm274_vm6, %v260_v38  ;;  %v4165_v53 = vpack.i.bf16 %v265_v52, %v264_v32  ;;  %v272_v48 = vunpack.c.l.bf16 %v3805_v34  ;;  %v273_v44 = vunpack.c.l.bf16 %v3810_v4  ;;  %v270_v56 = vunpack.c.l.bf16 %v3910_v2  ;;  %v3497_v34 = vld [vmem:[%s3551_s17 + $0x54] sm:$0xf]  ;;  %v3498_v2 = vld [vmem:[%s3551_s17 + $0x58] sm:$0xf] }
  0x8b   : > { %3021 = vrot.lane.b32.xlu0 %v4069_v8, %s3511_s20  ;;  %294 = vst.msk [vmem:[#allocation2 + $0x98] sm:$0xff] %vm274_vm6, %v261_v19  ;;  %v271_v0 = vunpack.c.l.bf16 %v3928_v5  ;;  %v256_v4 = vunpack.c.l.bf16 %v3497_v34  ;;  %v4187_v19 = vpack.i.bf16 %v251_v10, %v250_v13  ;;  %v257_v5 = vunpack.c.l.bf16 %v3498_v2 }
  0x8c   : > { %299 = vst.msk [vmem:[#allocation2 + $0xc0] sm:$0xff] %vm274_vm6, %v266_v46  ;;  %v4181_v57 = vpack.i.bf16 %v273_v44, %v272_v48 }
  0x8d   : > { %300 = vst.msk [vmem:[#allocation2 + $0xc8] sm:$0xff] %vm274_vm6, %v267_v51  ;;  %v4189_v45 = vpack.i.bf16 %v271_v0, %v270_v56  ;;  %v3499_v51 = vld [vmem:[%s3551_s17 + $0x78] sm:$0xf]  ;;  %v4208_v28 = vpack.i.bf16 %v257_v5, %v256_v4 }
  0x8e   : > { %297 = vst.msk [vmem:[#allocation2 + $0xb0] sm:$0xff] %vm274_vm6, %v264_v32 }
  0x8f   : > { %298 = vst.msk [vmem:[#allocation2 + $0xb8] sm:$0xff] %vm274_vm6, %v265_v52  ;;  %v3500_v52 = vld [vmem:[%s3551_s17 + $0x7c] sm:$0xf] }
  0x90   : > { %3041 = vrot.lane.b32.xlu1 %v4098_v39, %s3511_s20  ;;  %283 = vst.msk [vmem:[#allocation2 + $0x40] sm:$0xff] %vm274_vm6, %v250_v13  ;;  %v263_v13 = vunpack.c.l.bf16 %v3500_v52 }
  0x91   : > { %v2867_v35 = vpop.permute.xlu1 %2866  ;;  %284 = vst.msk [vmem:[#allocation2 + $0x48] sm:$0xff] %vm274_vm6, %v251_v10 }
  0x92   : > { %2986 = vrot.lane.b32.xlu2 %v4105_v63, %s3510_s19  ;;  %v2869_v41 = vunpack.i.h.bf16 %v2867_v35  ;;  %v2868_v18 = vunpack.i.l.bf16 %v2867_v35  ;;  %276 = vst.msk [vmem:[#allocation2 + $0x8] sm:$0xff] %vm274_vm6, %v243_v9 }
  0x93   : > { %3036 = vrot.lane.b32.xlu0 %v4107_v3, %s3511_s20  ;;  %275 = vst.msk [vmem:[#allocation2] sm:$0xff] %vm274_vm6, %v242_v27 }
  0x94   : > { %892 = vst.msk [vmem:[#allocation2 + $0x28] sm:$0xff] %vm886_vm7, %v2869_v41 }
  0x95   : > { %v2857_v43 = vpop.permute.xlu0 %2856  ;;  %891 = vst.msk [vmem:[#allocation2 + $0x20] sm:$0xff] %vm886_vm7, %v2868_v18 }
  0x96   : > { %v2859_v58 = vunpack.i.h.bf16 %v2857_v43  ;;  %v2858_v40 = vunpack.i.l.bf16 %v2857_v43  ;;  %305 = vst.msk [vmem:[#allocation2 + $0xf0] sm:$0xff] %vm274_vm6, %v272_v48  ;;  %v262_v43 = vunpack.c.l.bf16 %v3499_v51 }
  0x97   : > { %306 = vst.msk [vmem:[#allocation2 + $0xf8] sm:$0xff] %vm274_vm6, %v273_v44 }
  0x98   : > { %3056 = vrot.lane.b32.xlu1 %v4128_v55, %s3511_s20  ;;  %888 = vst.msk [vmem:[#allocation2 + $0x8] sm:$0xff] %vm886_vm7, %v2859_v58  ;;  %v5143_v58 = vld [vmem:[#allocation3_spill] sm:$0xff]  ;;  %v4226_v44 = vpack.i.bf16 %v263_v13, %v262_v43 }
  0x99   : > { %v2872_v24 = vpop.permute.xlu1 %2871  ;;  %887 = vst.msk [vmem:[#allocation2] sm:$0xff] %vm886_vm7, %v2858_v40 }
  0x9a   : > { %3001 = vrot.lane.b32.xlu2 %v4136_v25, %s3510_s19  ;;  %303 = vst.msk [vmem:[#allocation2 + $0xe0] sm:$0xff] %vm274_vm6, %v270_v56  ;;  %v2874_v62 = vunpack.i.h.bf16 %v2872_v24  ;;  %v2873_v54 = vunpack.i.l.bf16 %v2872_v24  ;;  %v5144_v24 = vld [vmem:[#allocation5_spill] sm:$0xff] }
  0x9b   : > { %3051 = vrot.lane.b32.xlu0 %v4138_v59, %s3511_s20  ;;  %304 = vst.msk [vmem:[#allocation2 + $0xe8] sm:$0xff] %vm274_vm6, %v271_v0  ;;  %v5145_v0 = vld [vmem:[#allocation15_spill] sm:$0xff] }
  0x9c   : > { %289 = vst.msk [vmem:[#allocation2 + $0x70] sm:$0xff] %vm274_vm6, %v256_v4  ;;  %v5146_v4 = vld [vmem:[#allocation12_spill] sm:$0xff] }
  0x9d   : > { %290 = vst.msk [vmem:[#allocation2 + $0x78] sm:$0xff] %vm274_vm6, %v257_v5 }
  0x9e   : > { %894 = vst.msk [vmem:[#allocation2 + $0x38] sm:$0xff] %vm886_vm7, %v2874_v62 }
  0x9f   : > { %v2877_v23 = vpop.permute.xlu2 %2876  ;;  %v2862_v30 = vpop.permute.xlu0 %2861  ;;  %893 = vst.msk [vmem:[#allocation2 + $0x30] sm:$0xff] %vm886_vm7, %v2873_v54  ;;  %v4242_v54 = vld [vmem:[%s3551_s17 + $0xc0] sm:$0xf] }
  0xa0   : > { %3071 = vrot.lane.b32.xlu1 %v4155_v42, %s3511_s20  ;;  %v2879_v14 = vunpack.i.h.bf16 %v2877_v23  ;;  %v2878_v38 = vunpack.i.l.bf16 %v2877_v23  ;;  %v2864_v16 = vunpack.i.h.bf16 %v2862_v30  ;;  %v2863_v35 = vunpack.i.l.bf16 %v2862_v30  ;;  %295 = vst.msk [vmem:[#allocation2 + $0xa0] sm:$0xff] %vm274_vm6, %v262_v43  ;;  %v5147_v43 = vld [vmem:[#allocation18_spill] sm:$0xff] }
  0xa1   : > { %296 = vst.msk [vmem:[#allocation2 + $0xa8] sm:$0xff] %vm274_vm6, %v263_v13  ;;  %v268_v23 = vunpack.c.l.bf16 %v5141_v12  ;;  %v1474_v51 = vshll.u32 %v4242_v54, 16 }
  0xa2   : > { %896 = vst.msk [vmem:[#allocation2 + $0x48] sm:$0xff] %vm886_vm7, %v2879_v14  ;;  %3016 = vrot.lane.b32.xlu2 %v3015_v22, %s3511_s20  ;;  %v269_v14 = vunpack.c.l.bf16 %v3743_v60 }
  0xa3   : > { %3066 = vrot.lane.b32.xlu0 %v4165_v53, %s3511_s20  ;;  %895 = vst.msk [vmem:[#allocation2 + $0x40] sm:$0xff] %vm886_vm7, %v2878_v38  ;;  %v2892_v20 = vpop.permute.xlu1 %2891 }
  0xa4   : > { %890 = vst.msk [vmem:[#allocation2 + $0x18] sm:$0xff] %vm886_vm7, %v2864_v16  ;;  %v2894_v18 = vunpack.i.h.bf16 %v2892_v20  ;;  %v2893_v9 = vunpack.i.l.bf16 %v2892_v20  ;;  %v4244_v20 = vpack.i.bf16 %v269_v14, %v268_v23  ;;  %v4247_v16 = vld [vmem:[%s3551_s17 + $0xc4] sm:$0xf] }
  0xa5   : > { %889 = vst.msk [vmem:[#allocation2 + $0x10] sm:$0xff] %vm886_vm7, %v2863_v35  ;;  %v1480_v13 = vshll.u32 %v4247_v16, 16 }
  0xa6   : > { %902 = vst.msk [vmem:[#allocation2 + $0x78] sm:$0xff] %vm886_vm7, %v2894_v18 }
  0xa7   : > { %901 = vst.msk [vmem:[#allocation2 + $0x70] sm:$0xff] %vm886_vm7, %v2893_v9  ;;  %v5148_v9 = vld [vmem:[#allocation6_spill] sm:$0xff] }
  0xa8   : > { %3086 = vrot.lane.b32.xlu1 %v4181_v57, %s3511_s20  ;;  %301 = vst.msk [vmem:[#allocation2 + $0xd0] sm:$0xff] %vm274_vm6, %v268_v23  ;;  %v1482_v23 = vrot.slane %v1480_v13, 5 }
  0xa9   : > { %v2887_v46 = vpop.permute.xlu0 %2886  ;;  %302 = vst.msk [vmem:[#allocation2 + $0xd8] sm:$0xff] %vm274_vm6, %v269_v14 }
  0xaa   : > { %3031 = vrot.lane.b32.xlu2 %v4187_v19, %s3511_s20  ;;  %v2889_v21 = vunpack.i.h.bf16 %v2887_v46  ;;  %v2888_v27 = vunpack.i.l.bf16 %v2887_v46  ;;  %v1471_v46 = vshrl.u32 %v4242_v54, 16 }
  0xab   : > { %3081 = vrot.lane.b32.xlu0 %v4189_v45, %s3511_s20 }
  0xac   : > { %900 = vst.msk [vmem:[#allocation2 + $0x68] sm:$0xff] %vm886_vm7, %v2889_v21  ;;  %v1308_v21 = vunpack.c.l.bf16 %v4247_v16 }
  0xad   : > { %v2882_v32 = vpop.permute.xlu2 %2881  ;;  %v2907_v40 = vpop.permute.xlu1 %2906  ;;  %899 = vst.msk [vmem:[#allocation2 + $0x60] sm:$0xff] %vm886_vm7, %v2888_v27  ;;  %v1473_v27 = vrot.slane %v1471_v46, 4 }
  0xae   : > { %v2884_v41 = vunpack.i.h.bf16 %v2882_v32  ;;  %v2883_v10 = vunpack.i.l.bf16 %v2882_v32  ;;  %v2909_v30 = vunpack.i.h.bf16 %v2907_v40  ;;  %v2908_v38 = vunpack.i.l.bf16 %v2907_v40 }
  0xaf   : > { %v1476_v40 = vrot.slane %v1474_v51, 5 }
  0xb0   : > { %898 = vst.msk [vmem:[#allocation2 + $0x58] sm:$0xff] %vm886_vm7, %v2884_v41  ;;  %3101 = vrot.lane.b32.xlu1 %v5143_v58, %s3512_s21  ;;  %v1484_v41 = vshrl.u32 %v4247_v16, 16 }
  0xb1   : > { %897 = vst.msk [vmem:[#allocation2 + $0x50] sm:$0xff] %vm886_vm7, %v2883_v10  ;;  %v2902_v22 = vpop.permute.xlu0 %2901  ;;  %v1307_v10 = vunpack.c.l.bf16 %v4242_v54 }
  0xb2   : > { %3046 = vrot.lane.b32.xlu2 %v4208_v28, %s3511_s20  ;;  %v2904_v48 = vunpack.i.h.bf16 %v2902_v22  ;;  %v2903_v56 = vunpack.i.l.bf16 %v2902_v22  ;;  %908 = vst.msk [vmem:[#allocation2 + $0xa8] sm:$0xff] %vm886_vm7, %v2909_v30  ;;  %v1486_v30 = vrot.slane %v1484_v41, 4 }
  0xb3   : > { %3096 = vrot.lane.b32.xlu0 %v5144_v24, %s3512_s21  ;;  %907 = vst.msk [vmem:[#allocation2 + $0xa0] sm:$0xff] %vm886_vm7, %v2908_v38  ;;  %v4266_v38 = vld [vmem:[%s3551_s17 + $0xc8] sm:$0x1] }
  0xb4   : > { %906 = vst.msk [vmem:[#allocation2 + $0x98] sm:$0xff] %vm886_vm7, %v2904_v48 }
  0xb5   : > { %905 = vst.msk [vmem:[#allocation2 + $0x90] sm:$0xff] %vm886_vm7, %v2903_v56 }
  0xb8   : > { %3116 = vrot.lane.b32.xlu1 %v5145_v0, %s3512_s21 }
  0xba   : > { %v2897_v12 = vpop.permute.xlu2 %2896  ;;  %3061 = vrot.lane.b32.xlu2 %v4226_v44, %s3511_s20 }
  0xbb   : > { %v2899_v60 = vunpack.i.h.bf16 %v2897_v12  ;;  %v2898_v34 = vunpack.i.l.bf16 %v2897_v12  ;;  %3111 = vrot.lane.b32.xlu0 %v5146_v4, %s3512_s21  ;;  %v2922_v62 = vpop.permute.xlu1 %2921  ;;  %v4270_v12 = vpack.i.bf16 %v1308_v21, %v1307_v10 }
  0xbc   : > { %v2924_v2 = vunpack.i.h.bf16 %v2922_v62  ;;  %v2923_v5 = vunpack.i.l.bf16 %v2922_v62  ;;  %v1490_v62 = vshll.u32 %v4266_v38, 16 }
  0xbd   : > { %904 = vst.msk [vmem:[#allocation2 + $0x88] sm:$0xff] %vm886_vm7, %v2899_v60  ;;  %v1477_v60 = vor.u32 %v1476_v40, %v1473_v27 }
  0xbe   : > { %903 = vst.msk [vmem:[#allocation2 + $0x80] sm:$0xff] %vm886_vm7, %v2898_v34  ;;  %v1487_v34 = vor.u32 %v1486_v30, %v1482_v23  ;;  %v1492_v46 = vrot.slane %v1490_v62, 5  ;;  %v5151_v30 = vld [vmem:[#allocation13_spill] sm:$0xff] }
  0xbf   : > { %914 = vst.msk [vmem:[#allocation2 + $0xd8] sm:$0xff] %vm886_vm7, %v2924_v2  ;;  %v2917_v35 = vpop.permute.xlu0 %2916  ;;  %v5149_v2 = vld [vmem:[#allocation9_spill] sm:$0xff] }
  0xc0   : > { %3131 = vrot.lane.b32.xlu1 %v5147_v43, %s3512_s21  ;;  %913 = vst.msk [vmem:[#allocation2 + $0xd0] sm:$0xff] %vm886_vm7, %v2923_v5  ;;  %v2919_v32 = vunpack.i.h.bf16 %v2917_v35  ;;  %v2918_v52 = vunpack.i.l.bf16 %v2917_v35  ;;  %v1478_v5 = vrot.slane %v1477_v60, 4  ;;  %v1488_v35 = vrot.slane %v1487_v34, 4 }
  0xc2   : > { %912 = vst.msk [vmem:[#allocation2 + $0xc8] sm:$0xff] %vm886_vm7, %v2919_v32  ;;  %3076 = vrot.lane.b32.xlu2 %v4244_v20, %s3511_s20  ;;  %v2912_v18 = vpop.permute.xlu2 %2911  ;;  %v1483_v27 = vsel %vm3589_vm2, %v1478_v5, %v1482_v23  ;;  %v1493_v40 = vsel %vm3589_vm2, %v1488_v35, %v1492_v46 }
  0xc3   : > { %3126 = vrot.lane.b32.xlu0 %v5148_v9, %s3512_s21  ;;  %911 = vst.msk [vmem:[#allocation2 + $0xc0] sm:$0xff] %vm886_vm7, %v2918_v52  ;;  %v2914_v24 = vunpack.i.h.bf16 %v2912_v18  ;;  %v2913_v22 = vunpack.i.l.bf16 %v2912_v18 }
  0xc5   : > { %v2937_v14 = vpop.permute.xlu1 %2936  ;;  %910 = vst.msk [vmem:[#allocation2 + $0xb8] sm:$0xff] %vm886_vm7, %v2914_v24 }
  0xc6   : > { %v2939_v48 = vunpack.i.h.bf16 %v2937_v14  ;;  %v2938_v56 = vunpack.i.l.bf16 %v2937_v14  ;;  %909 = vst.msk [vmem:[#allocation2 + $0xb0] sm:$0xff] %vm886_vm7, %v2913_v22  ;;  %v5150_v22 = vld [vmem:[#allocation4_spill] sm:$0xff]  ;;  %v1496_v14 = vunpack.c.l.bf16 %v1483_v27 }
  0xc8   : > { %3146 = vrot.lane.b32.xlu1 %v3947_v31, %s3512_s21  ;;  %1275 = vst.msk [vmem:[#allocation2] sm:$0xff] %vm1274_vm8, %v2938_v56 }
  0xc9   : > { %1276 = vst.msk [vmem:[#allocation2 + $0x8] sm:$0xff] %vm1274_vm8, %v2939_v48  ;;  %v1497_v48 = vunpack.c.l.bf16 %v1493_v40  ;;  %v5153_v40 = vld [vmem:[#allocation11_spill] sm:$0xff] }
  0xca   : > { %3091 = vrot.lane.b32.xlu2 %v4270_v12, %s3511_s20 }
  0xcb   : > { %3141 = vrot.lane.b32.xlu0 %v5149_v2, %s3512_s21  ;;  %v4297_v35 = vpack.i.bf16 %v1497_v48, %v1496_v14 }
  0xcc   : > { %v2927_v51 = vpop.permute.xlu2 %2926  ;;  %v2932_v32 = vpop.permute.xlu0 %2931 }
  0xcd   : > { %v2929_v52 = vunpack.i.h.bf16 %v2927_v51  ;;  %v2928_v13 = vunpack.i.l.bf16 %v2927_v51  ;;  %v2934_v41 = vunpack.i.h.bf16 %v2932_v32  ;;  %v2933_v10 = vunpack.i.l.bf16 %v2932_v32 }
  0xcf   : > { %v2952_v18 = vpop.permute.xlu1 %2951  ;;  %916 = vst.msk [vmem:[#allocation2 + $0xe8] sm:$0xff] %vm886_vm7, %v2929_v52  ;;  %v5152_v52 = vld [vmem:[#allocation7_spill] sm:$0xff] }
  0xd0   : > { %3161 = vrot.lane.b32.xlu1 %v3989_v49, %s3512_s21  ;;  %v2954_v21 = vunpack.i.h.bf16 %v2952_v18  ;;  %915 = vst.msk [vmem:[#allocation2 + $0xe0] sm:$0xff] %vm886_vm7, %v2928_v13  ;;  %v2953_v24 = vunpack.i.l.bf16 %v2952_v18 }
  0xd1   : > { %918 = vst.msk [vmem:[#allocation2 + $0xf8] sm:$0xff] %vm886_vm7, %v2934_v41 }
  0xd2   : > { %3106 = vrot.lane.b32.xlu2 %v5150_v22, %s3512_s21  ;;  %917 = vst.msk [vmem:[#allocation2 + $0xf0] sm:$0xff] %vm886_vm7, %v2933_v10 }
  0xd3   : > { %3156 = vrot.lane.b32.xlu0 %v5151_v30, %s3512_s21  ;;  %1282 = vst.msk [vmem:[#allocation2 + $0x38] sm:$0xff] %vm1274_vm8, %v2954_v21 }
  0xd4   : > { %v2942_v23 = vpop.permute.xlu2 %2941  ;;  %1281 = vst.msk [vmem:[#allocation2 + $0x30] sm:$0xff] %vm1274_vm8, %v2953_v24  ;;  %v2947_v56 = vpop.permute.xlu0 %2946 }
  0xd5   : > { %v2944_v60 = vunpack.i.h.bf16 %v2942_v23  ;;  %v2943_v34 = vunpack.i.l.bf16 %v2942_v23  ;;  %v2949_v62 = vunpack.i.h.bf16 %v2947_v56  ;;  %v2948_v5 = vunpack.i.l.bf16 %v2947_v56 }
  0xd7   : > { %1277 = vst.msk [vmem:[#allocation2 + $0x10] sm:$0xff] %vm1274_vm8, %v2943_v34 }
  0xd8   : > { %3176 = vrot.lane.b32.xlu1 %v4011_v61, %s3513_s22  ;;  %1278 = vst.msk [vmem:[#allocation2 + $0x18] sm:$0xff] %vm1274_vm8, %v2944_v60 }
  0xd9   : > { %v2967_v46 = vpop.permute.xlu1 %2966  ;;  %1280 = vst.msk [vmem:[#allocation2 + $0x28] sm:$0xff] %vm1274_vm8, %v2949_v62  ;;  %v5154_v62 = vld [vmem:[#allocation14_spill] sm:$0xff] }
  0xda   : > { %v2969_v51 = vunpack.i.h.bf16 %v2967_v46  ;;  %v2968_v32 = vunpack.i.l.bf16 %v2967_v46  ;;  %3121 = vrot.lane.b32.xlu2 %v5152_v52, %s3512_s21  ;;  %1279 = vst.msk [vmem:[#allocation2 + $0x20] sm:$0xff] %vm1274_vm8, %v2948_v5 }
  0xdb   : > { %3171 = vrot.lane.b32.xlu0 %v4297_v35, %s3512_s21 }
  0xdc   : > { %1287 = vst.msk [vmem:[#allocation2 + $0x60] sm:$0xff] %vm1274_vm8, %v2968_v32  ;;  %v2957_v13 = vpop.permute.xlu2 %2956  ;;  %v2962_v61 = vpop.permute.xlu0 %2961 }
  0xdd   : > { %1288 = vst.msk [vmem:[#allocation2 + $0x68] sm:$0xff] %vm1274_vm8, %v2969_v51  ;;  %v2959_v41 = vunpack.i.h.bf16 %v2957_v13  ;;  %v2958_v10 = vunpack.i.l.bf16 %v2957_v13  ;;  %v2964_v18 = vunpack.i.h.bf16 %v2962_v61  ;;  %v2963_v21 = vunpack.i.l.bf16 %v2962_v61 }
  0xdf   : > { %1284 = vst.msk [vmem:[#allocation2 + $0x48] sm:$0xff] %vm1274_vm8, %v2959_v41 }
  0xe0   : > { %3191 = vrot.lane.b32.xlu1 %v5143_v58, %s3514_s23  ;;  %1283 = vst.msk [vmem:[#allocation2 + $0x40] sm:$0xff] %vm1274_vm8, %v2958_v10 }
  0xe1   : > { %1286 = vst.msk [vmem:[#allocation2 + $0x58] sm:$0xff] %vm1274_vm8, %v2964_v18  ;;  %v5155_v18 = vld [vmem:[#allocation16_spill] sm:$0xff] }
  0xe2   : > { %v2982_v27 = vpop.permute.xlu1 %2981  ;;  %3136 = vrot.lane.b32.xlu2 %v5153_v40, %s3512_s21  ;;  %1285 = vst.msk [vmem:[#allocation2 + $0x50] sm:$0xff] %vm1274_vm8, %v2963_v21 }
  0xe3   : > { %3186 = vrot.lane.b32.xlu0 %v4069_v8, %s3515_s24  ;;  %v2984_v24 = vunpack.i.h.bf16 %v2982_v27  ;;  %v2983_v14 = vunpack.i.l.bf16 %v2982_v27 }
  0xe4   : > { %v2972_v48 = vpop.permute.xlu2 %2971 }
  0xe5   : > { %1293 = vst.msk [vmem:[#allocation2 + $0x90] sm:$0xff] %vm1274_vm8, %v2983_v14  ;;  %v2977_v58 = vpop.permute.xlu0 %2976  ;;  %v2974_v23 = vunpack.i.h.bf16 %v2972_v48  ;;  %v2973_v56 = vunpack.i.l.bf16 %v2972_v48 }
  0xe6   : > { %1294 = vst.msk [vmem:[#allocation2 + $0x98] sm:$0xff] %vm1274_vm8, %v2984_v24  ;;  %v2979_v60 = vunpack.i.h.bf16 %v2977_v58  ;;  %v2978_v34 = vunpack.i.l.bf16 %v2977_v58 }
  0xe7   : > { %1290 = vst.msk [vmem:[#allocation2 + $0x78] sm:$0xff] %vm1274_vm8, %v2974_v23 }
  0xe8   : > { %3206 = vrot.lane.b32.xlu1 %v4065_v17, %s3515_s24  ;;  %1289 = vst.msk [vmem:[#allocation2 + $0x70] sm:$0xff] %vm1274_vm8, %v2973_v56  ;;  %v5156_v56 = vld [vmem:[#allocation19_spill] sm:$0xff] }
  0xe9   : > { %1292 = vst.msk [vmem:[#allocation2 + $0x88] sm:$0xff] %vm1274_vm8, %v2979_v60 }
  0xea   : > { %v2997_v8 = vpop.permute.xlu1 %2996  ;;  %3151 = vrot.lane.b32.xlu2 %v5154_v62, %s3512_s21  ;;  %1291 = vst.msk [vmem:[#allocation2 + $0x80] sm:$0xff] %vm1274_vm8, %v2978_v34 }
  0xeb   : > { %3201 = vrot.lane.b32.xlu0 %v3953_v7, %s3513_s22  ;;  %v2999_v5 = vunpack.i.h.bf16 %v2997_v8  ;;  %v2998_v46 = vunpack.i.l.bf16 %v2997_v8 }
  0xec   : > { %v2987_v51 = vpop.permute.xlu2 %2986 }
  0xed   : > { %1299 = vst.msk [vmem:[#allocation2 + $0xc0] sm:$0xff] %vm1274_vm8, %v2998_v46  ;;  %v2992_v32 = vpop.permute.xlu0 %2991  ;;  %v2989_v17 = vunpack.i.h.bf16 %v2987_v51  ;;  %v2988_v13 = vunpack.i.l.bf16 %v2987_v51 }
  0xee   : > { %1300 = vst.msk [vmem:[#allocation2 + $0xc8] sm:$0xff] %vm1274_vm8, %v2999_v5  ;;  %v2994_v61 = vunpack.i.h.bf16 %v2992_v32  ;;  %v2993_v41 = vunpack.i.l.bf16 %v2992_v32 }
  0xef   : > { %1296 = vst.msk [vmem:[#allocation2 + $0xa8] sm:$0xff] %vm1274_vm8, %v2989_v17 }
  0xf0   : > { %3221 = vrot.lane.b32.xlu1 %v5152_v52, %s3514_s23  ;;  %1295 = vst.msk [vmem:[#allocation2 + $0xa0] sm:$0xff] %vm1274_vm8, %v2988_v13 }
  0xf1   : > { %1298 = vst.msk [vmem:[#allocation2 + $0xb8] sm:$0xff] %vm1274_vm8, %v2994_v61 }
  0xf2   : > { %v3012_v10 = vpop.permute.xlu1 %3011  ;;  %3166 = vrot.lane.b32.xlu2 %v5155_v18, %s3512_s21  ;;  %1297 = vst.msk [vmem:[#allocation2 + $0xb0] sm:$0xff] %vm1274_vm8, %v2993_v41 }
  0xf3   : > { %3216 = vrot.lane.b32.xlu0 %v5150_v22, %s3514_s23  ;;  %v3014_v21 = vunpack.i.h.bf16 %v3012_v10  ;;  %v3013_v27 = vunpack.i.l.bf16 %v3012_v10 }
  0xf4   : > { %v3002_v24 = vpop.permute.xlu2 %3001 }
  0xf5   : > { %1305 = vst.msk [vmem:[#allocation2 + $0xf0] sm:$0xff] %vm1274_vm8, %v3013_v27  ;;  %v3007_v14 = vpop.permute.xlu0 %3006  ;;  %v3004_v52 = vunpack.i.h.bf16 %v3002_v24  ;;  %v3003_v48 = vunpack.i.l.bf16 %v3002_v24 }
  0xf6   : > { %1306 = vst.msk [vmem:[#allocation2 + $0xf8] sm:$0xff] %vm1274_vm8, %v3014_v21  ;;  %v3009_v58 = vunpack.i.h.bf16 %v3007_v14  ;;  %v3008_v23 = vunpack.i.l.bf16 %v3007_v14 }
  0xf7   : > { %1302 = vst.msk [vmem:[#allocation2 + $0xd8] sm:$0xff] %vm1274_vm8, %v3004_v52 }
  0xf8   : > { %3236 = vrot.lane.b32.xlu1 %v3977_v15, %s3513_s22  ;;  %1301 = vst.msk [vmem:[#allocation2 + $0xd0] sm:$0xff] %vm1274_vm8, %v3003_v48 }
  0xf9   : > { %1304 = vst.msk [vmem:[#allocation2 + $0xe8] sm:$0xff] %vm1274_vm8, %v3009_v58 }
  0xfa   : > { %v3027_v22 = vpop.permute.xlu1 %3026  ;;  %3181 = vrot.lane.b32.xlu2 %v5156_v56, %s3513_s22  ;;  %1303 = vst.msk [vmem:[#allocation2 + $0xe0] sm:$0xff] %vm1274_vm8, %v3008_v23 }
  0xfb   : > { %3231 = vrot.lane.b32.xlu0 %v3940_v6, %s3516_s25  ;;  %v3029_v60 = vunpack.i.h.bf16 %v3027_v22  ;;  %v3028_v34 = vunpack.i.l.bf16 %v3027_v22 }
  0xfc   : > { %v3017_v8 = vpop.permute.xlu2 %3016 }
  0xfd   : > { %1442 = vst.msk [vmem:[#allocation2 + $0x20] sm:$0xff] %vm1437_vm9, %v3028_v34  ;;  %v3022_v5 = vpop.permute.xlu0 %3021  ;;  %v3019_v46 = vunpack.i.h.bf16 %v3017_v8  ;;  %v3018_v51 = vunpack.i.l.bf16 %v3017_v8 }
  0xfe   : > { %1443 = vst.msk [vmem:[#allocation2 + $0x28] sm:$0xff] %vm1437_vm9, %v3029_v60  ;;  %v3023_v32 = vunpack.i.l.bf16 %v3022_v5  ;;  %v3024_v17 = vunpack.i.h.bf16 %v3022_v5 }
  0xff   : > { %1438 = vst.msk [vmem:[#allocation2] sm:$0xff] %vm1437_vm9, %v3018_v51 }
 0x100   : > { %3251 = vrot.lane.b32.xlu1 %v4105_v63, %s3516_s25  ;;  %1439 = vst.msk [vmem:[#allocation2 + $0x8] sm:$0xff] %vm1437_vm9, %v3019_v46 }
 0x101   : > { %1440 = vst.msk [vmem:[#allocation2 + $0x10] sm:$0xff] %vm1437_vm9, %v3023_v32 }
 0x102   : > { %v3042_v13 = vpop.permute.xlu1 %3041  ;;  %3196 = vrot.lane.b32.xlu2 %v5156_v56, %s3516_s25  ;;  %1441 = vst.msk [vmem:[#allocation2 + $0x18] sm:$0xff] %vm1437_vm9, %v3024_v17 }
 0x103   : > { %3246 = vrot.lane.b32.xlu0 %v5149_v2, %s3514_s23  ;;  %v3044_v61 = vunpack.i.h.bf16 %v3042_v13  ;;  %v3043_v41 = vunpack.i.l.bf16 %v3042_v13 }
 0x104   : > { %v3032_v10 = vpop.permute.xlu2 %3031 }
 0x105   : > { %1448 = vst.msk [vmem:[#allocation2 + $0x50] sm:$0xff] %vm1437_vm9, %v3043_v41  ;;  %v3037_v21 = vpop.permute.xlu0 %3036  ;;  %v3034_v27 = vunpack.i.h.bf16 %v3032_v10  ;;  %v3033_v24 = vunpack.i.l.bf16 %v3032_v10 }
 0x106   : > { %1449 = vst.msk [vmem:[#allocation2 + $0x58] sm:$0xff] %vm1437_vm9, %v3044_v61  ;;  %v3039_v14 = vunpack.i.h.bf16 %v3037_v21  ;;  %v3038_v52 = vunpack.i.l.bf16 %v3037_v21 }
 0x107   : > { %1444 = vst.msk [vmem:[#allocation2 + $0x30] sm:$0xff] %vm1437_vm9, %v3033_v24 }
 0x108   : > { %3266 = vrot.lane.b32.xlu1 %v4187_v19, %s3515_s24  ;;  %1445 = vst.msk [vmem:[#allocation2 + $0x38] sm:$0xff] %vm1437_vm9, %v3034_v27 }
 0x109   : > { %1447 = vst.msk [vmem:[#allocation2 + $0x48] sm:$0xff] %vm1437_vm9, %v3039_v14 }
 0x10a   : > { %v3057_v2 = vpop.permute.xlu1 %3056  ;;  %3211 = vrot.lane.b32.xlu2 %v4098_v39, %s3515_s24  ;;  %1446 = vst.msk [vmem:[#allocation2 + $0x40] sm:$0xff] %vm1437_vm9, %v3038_v52  ;;  %v5157_v39 = vld [vmem:[#allocation17_spill] sm:$0xff] }
 0x10b   : > { %3261 = vrot.lane.b32.xlu0 %v3940_v6, %s3513_s22  ;;  %v3059_v48 = vunpack.i.h.bf16 %v3057_v2  ;;  %v3058_v58 = vunpack.i.l.bf16 %v3057_v2 }
 0x10c   : > { %v3047_v23 = vpop.permute.xlu2 %3046 }
 0x10d   : > { %1454 = vst.msk [vmem:[#allocation2 + $0x80] sm:$0xff] %vm1437_vm9, %v3058_v58  ;;  %v3052_v22 = vpop.permute.xlu0 %3051  ;;  %v3049_v19 = vunpack.i.h.bf16 %v3047_v23  ;;  %v3048_v56 = vunpack.i.l.bf16 %v3047_v23 }
 0x10e   : > { %1455 = vst.msk [vmem:[#allocation2 + $0x88] sm:$0xff] %vm1437_vm9, %v3059_v48  ;;  %v3054_v60 = vunpack.i.h.bf16 %v3052_v22  ;;  %v3053_v34 = vunpack.i.l.bf16 %v3052_v22 }
 0x10f   : > { %1450 = vst.msk [vmem:[#allocation2 + $0x60] sm:$0xff] %vm1437_vm9, %v3048_v56 }
 0x110   : > { %3281 = vrot.lane.b32.xlu1 %v5148_v9, %s3514_s23  ;;  %1451 = vst.msk [vmem:[#allocation2 + $0x68] sm:$0xff] %vm1437_vm9, %v3049_v19 }
 0x111   : > { %1453 = vst.msk [vmem:[#allocation2 + $0x78] sm:$0xff] %vm1437_vm9, %v3054_v60 }
 0x112   : > { %v3072_v6 = vpop.permute.xlu1 %3071  ;;  %3226 = vrot.lane.b32.xlu2 %v5157_v39, %s3516_s25  ;;  %1452 = vst.msk [vmem:[#allocation2 + $0x70] sm:$0xff] %vm1437_vm9, %v3053_v34 }
 0x113   : > { %3276 = vrot.lane.b32.xlu0 %v5146_v4, %s3514_s23  ;;  %v3074_v8 = vunpack.i.h.bf16 %v3072_v6  ;;  %v3073_v5 = vunpack.i.l.bf16 %v3072_v6 }
 0x114   : > { %v3062_v46 = vpop.permute.xlu2 %3061 }
 0x115   : > { %1460 = vst.msk [vmem:[#allocation2 + $0xb0] sm:$0xff] %vm1437_vm9, %v3073_v5  ;;  %v3067_v51 = vpop.permute.xlu0 %3066  ;;  %v3064_v9 = vunpack.i.h.bf16 %v3062_v46  ;;  %v3063_v32 = vunpack.i.l.bf16 %v3062_v46 }
 0x116   : > { %1461 = vst.msk [vmem:[#allocation2 + $0xb8] sm:$0xff] %vm1437_vm9, %v3074_v8  ;;  %v3069_v17 = vunpack.i.h.bf16 %v3067_v51  ;;  %v3068_v13 = vunpack.i.l.bf16 %v3067_v51 }
 0x117   : > { %1456 = vst.msk [vmem:[#allocation2 + $0x90] sm:$0xff] %vm1437_vm9, %v3063_v32 }
 0x118   : > { %3296 = vrot.lane.b32.xlu1 %v4105_v63, %s3513_s22  ;;  %1457 = vst.msk [vmem:[#allocation2 + $0x98] sm:$0xff] %vm1437_vm9, %v3064_v9 }
 0x119   : > { %1459 = vst.msk [vmem:[#allocation2 + $0xa8] sm:$0xff] %vm1437_vm9, %v3069_v17 }
 0x11a   : > { %v3087_v4 = vpop.permute.xlu1 %3086  ;;  %3241 = vrot.lane.b32.xlu2 %v4226_v44, %s3515_s24  ;;  %1458 = vst.msk [vmem:[#allocation2 + $0xa0] sm:$0xff] %vm1437_vm9, %v3068_v13 }
 0x11b   : > { %3291 = vrot.lane.b32.xlu0 %v4072_v1, %s3516_s25  ;;  %v3089_v61 = vunpack.i.h.bf16 %v3087_v4  ;;  %v3088_v41 = vunpack.i.l.bf16 %v3087_v4 }
 0x11c   : > { %v3077_v10 = vpop.permute.xlu2 %3076 }
 0x11d   : > { %1466 = vst.msk [vmem:[#allocation2 + $0xe0] sm:$0xff] %vm1437_vm9, %v3088_v41  ;;  %v3082_v21 = vpop.permute.xlu0 %3081  ;;  %v3079_v63 = vunpack.i.h.bf16 %v3077_v10  ;;  %v3078_v27 = vunpack.i.l.bf16 %v3077_v10 }
 0x11e   : > { %1467 = vst.msk [vmem:[#allocation2 + $0xe8] sm:$0xff] %vm1437_vm9, %v3089_v61  ;;  %v3084_v24 = vunpack.i.h.bf16 %v3082_v21  ;;  %v3083_v14 = vunpack.i.l.bf16 %v3082_v21  ;;  %v241_v61 = vld [vmem:[%s5085_s1 + $0x10] sm:$0x3] }
 0x11f   : > { %1462 = vst.msk [vmem:[#allocation2 + $0xc0] sm:$0xff] %vm1437_vm9, %v3078_v27 }
 0x120   : > { %3311 = vrot.lane.b32.xlu1 %v4189_v45, %s3515_s24  ;;  %1463 = vst.msk [vmem:[#allocation2 + $0xc8] sm:$0xff] %vm1437_vm9, %v3079_v63 }
 0x121   : > { %1465 = vst.msk [vmem:[#allocation2 + $0xd8] sm:$0xff] %vm1437_vm9, %v3084_v24 }
 0x122   : > { %v3102_v44 = vpop.permute.xlu1 %3101  ;;  %3256 = vrot.lane.b32.xlu2 %v5157_v39, %s3513_s22  ;;  %1464 = vst.msk [vmem:[#allocation2 + $0xd0] sm:$0xff] %vm1437_vm9, %v3083_v14 }
 0x123   : > { %3306 = vrot.lane.b32.xlu0 %v4165_v53, %s3515_s24  ;;  %v3104_v52 = vunpack.i.h.bf16 %v3102_v44  ;;  %v3103_v2 = vunpack.i.l.bf16 %v3102_v44 }
 0x124   : > { %v3092_v48 = vpop.permute.xlu2 %3091 }
 0x125   : > { %1599 = vst.msk [vmem:[#allocation2 + $0x10] sm:$0xff] %vm1596_vm10, %v3103_v2  ;;  %v3097_v45 = vpop.permute.xlu0 %3096  ;;  %v3094_v58 = vunpack.i.h.bf16 %v3092_v48  ;;  %v3093_v23 = vunpack.i.l.bf16 %v3092_v48  ;;  %v2828_v48 = vld [vmem:[%s5085_s1 + $0x8] sm:$0xff] }
 0x126   : > { %1600 = vst.msk [vmem:[#allocation2 + $0x18] sm:$0xff] %vm1596_vm10, %v3104_v52  ;;  %v3098_v22 = vunpack.i.l.bf16 %v3097_v45  ;;  %v3099_v19 = vunpack.i.h.bf16 %v3097_v45 }
 0x127   : > { %1468 = vst.msk [vmem:[#allocation2 + $0xf0] sm:$0xff] %vm1437_vm9, %v3093_v23 }
 0x128   : > { %3326 = vrot.lane.b32.xlu1 %v4028_v37, %s3516_s25  ;;  %1469 = vst.msk [vmem:[#allocation2 + $0xf8] sm:$0xff] %vm1437_vm9, %v3094_v58 }
 0x129   : > { %1597 = vst.msk [vmem:[#allocation2] sm:$0xff] %vm1596_vm10, %v3098_v22 }
 0x12a   : > { %v3117_v53 = vpop.permute.xlu1 %3116  ;;  %3271 = vrot.lane.b32.xlu2 %v4208_v28, %s3515_s24  ;;  %1598 = vst.msk [vmem:[#allocation2 + $0x8] sm:$0xff] %vm1596_vm10, %v3099_v19 }
 0x12b   : > { %3321 = vrot.lane.b32.xlu0 %v3989_v49, %s3514_s23  ;;  %v3119_v56 = vunpack.i.h.bf16 %v3117_v53  ;;  %v3118_v60 = vunpack.i.l.bf16 %v3117_v53 }
 0x12c   : > { %v3107_v34 = vpop.permute.xlu2 %3106 }
 0x12d   : > { %1605 = vst.msk [vmem:[#allocation2 + $0x40] sm:$0xff] %vm1596_vm10, %v3118_v60  ;;  %v3112_v6 = vpop.permute.xlu0 %3111  ;;  %v3109_v39 = vunpack.i.h.bf16 %v3107_v34  ;;  %v3108_v8 = vunpack.i.l.bf16 %v3107_v34 }
 0x12e   : > { %1606 = vst.msk [vmem:[#allocation2 + $0x48] sm:$0xff] %vm1596_vm10, %v3119_v56  ;;  %v3114_v5 = vunpack.i.h.bf16 %v3112_v6  ;;  %v3113_v46 = vunpack.i.l.bf16 %v3112_v6 }
 0x12f   : > { %1601 = vst.msk [vmem:[#allocation2 + $0x20] sm:$0xff] %vm1596_vm10, %v3108_v8 }
 0x130   : > { %3341 = vrot.lane.b32.xlu1 %v4072_v1, %s3513_s22  ;;  %1602 = vst.msk [vmem:[#allocation2 + $0x28] sm:$0xff] %vm1596_vm10, %v3109_v39 }
 0x131   : > { %1604 = vst.msk [vmem:[#allocation2 + $0x38] sm:$0xff] %vm1596_vm10, %v3114_v5 }
 0x132   : > { %v3132_v49 = vpop.permute.xlu1 %3131  ;;  %3286 = vrot.lane.b32.xlu2 %v4046_v33, %s3516_s25  ;;  %1603 = vst.msk [vmem:[#allocation2 + $0x30] sm:$0xff] %vm1596_vm10, %v3113_v46 }
 0x133   : > { %3336 = vrot.lane.b32.xlu0 %v4046_v33, %s3513_s22  ;;  %v3134_v28 = vunpack.i.h.bf16 %v3132_v49  ;;  %v3133_v51 = vunpack.i.l.bf16 %v3132_v49 }
 0x134   : > { %v3122_v9 = vpop.permute.xlu2 %3121 }
 0x135   : > { %1611 = vst.msk [vmem:[#allocation2 + $0x70] sm:$0xff] %vm1596_vm10, %v3133_v51  ;;  %v3127_v32 = vpop.permute.xlu0 %3126  ;;  %v3124_v1 = vunpack.i.h.bf16 %v3122_v9  ;;  %v3123_v17 = vunpack.i.l.bf16 %v3122_v9 }
 0x136   : > { %1612 = vst.msk [vmem:[#allocation2 + $0x78] sm:$0xff] %vm1596_vm10, %v3134_v28  ;;  %v3128_v13 = vunpack.i.l.bf16 %v3127_v32  ;;  %v3129_v4 = vunpack.i.h.bf16 %v3127_v32 }
 0x137   : > { %1607 = vst.msk [vmem:[#allocation2 + $0x50] sm:$0xff] %vm1596_vm10, %v3123_v17 }
 0x138   : > { %3356 = vrot.lane.b32.xlu1 %v5145_v0, %s3514_s23  ;;  %1608 = vst.msk [vmem:[#allocation2 + $0x58] sm:$0xff] %vm1596_vm10, %v3124_v1  ;;  %v2268_v0 = vunpack.c.l.b16 %v241_v61 }
 0x139   : > { %1609 = vst.msk [vmem:[#allocation2 + $0x60] sm:$0xff] %vm1596_vm10, %v3128_v13 }
 0x13a   : > { %v3147_v33 = vpop.permute.xlu1 %3146  ;;  %3301 = vrot.lane.b32.xlu2 %v4136_v25, %s3513_s22  ;;  %1610 = vst.msk [vmem:[#allocation2 + $0x68] sm:$0xff] %vm1596_vm10, %v3129_v4  ;;  %v2271_v52 = vpack.c.b16 %v2268_v0, %v2268_v0 }
 0x13b   : > { %3351 = vrot.lane.b32.xlu0 %v4138_v59, %s3515_s24  ;;  %v3149_v41 = vunpack.i.h.bf16 %v3147_v33  ;;  %v3148_v10 = vunpack.i.l.bf16 %v3147_v33 }
 0x13c   : > { %v3137_v21 = vpop.permute.xlu2 %3136  ;;  %v2325_v59 = vsel %vm2323_vm11, %v2271_v52, 0  ;;  %v1634_v52 = vrot.slane %v4247_v16, 5 }
 0x13d   : > { %1617 = vst.msk [vmem:[#allocation2 + $0xa0] sm:$0xff] %vm1596_vm10, %v3148_v10  ;;  %v3142_v63 = vpop.permute.xlu0 %3141  ;;  %v3139_v27 = vunpack.i.h.bf16 %v3137_v21  ;;  %v3138_v24 = vunpack.i.l.bf16 %v3137_v21  ;;  %2332 = vmatpush.bf16.msra.mxu0 %v2325_v59  ;;  %2829 = vmatpush.bf16.msra.mxu1 %v2325_v59  ;;  %v4523_v21 = vld [vmem:[%s3551_s17 + $0xcc] sm:$0xf] }
 0x13e   : > { %1618 = vst.msk [vmem:[#allocation2 + $0xa8] sm:$0xff] %vm1596_vm10, %v3149_v41  ;;  %v3143_v14 = vunpack.i.l.bf16 %v3142_v63  ;;  %v3144_v44 = vunpack.i.h.bf16 %v3142_v63  ;;  %2830 = vmatpush.bf16.msra.mxu2 %v2325_v59  ;;  %2831 = vmatpush.bf16.msra.mxu3 %v2325_v59 }
 0x13f   : > { %1613 = vst.msk [vmem:[#allocation2 + $0x80] sm:$0xff] %vm1596_vm10, %v3138_v24  ;;  %v4526_v24 = vld [vmem:[%s3551_s17 + $0xd0] sm:$0xf] }
 0x140   : > { %3371 = vrot.lane.b32.xlu1 %v3991_v47, %s3516_s25  ;;  %1614 = vst.msk [vmem:[#allocation2 + $0x88] sm:$0xff] %vm1596_vm10, %v3139_v27 }
 0x141   : > { %1615 = vst.msk [vmem:[#allocation2 + $0x90] sm:$0xff] %vm1596_vm10, %v3143_v14  ;;  %2333 = vmatpush.bf16.msra.mxu0 %v2828_v48  ;;  %2832 = vmatpush.bf16.msra.mxu1 %v2828_v48 }
 0x142   : > { %v3162_v2 = vpop.permute.xlu1 %3161  ;;  %3316 = vrot.lane.b32.xlu2 %v3947_v31, %s3514_s23  ;;  %1616 = vst.msk [vmem:[#allocation2 + $0x98] sm:$0xff] %vm1596_vm10, %v3144_v44  ;;  %v2827_v31 = vld [vmem:[%s5085_s1] sm:$0xff]  ;;  %2833 = vmatpush.bf16.msra.mxu2 %v2828_v48 }
 0x143   : > { %3366 = vrot.lane.b32.xlu0 %v3953_v7, %s3516_s25  ;;  %v3164_v45 = vunpack.i.h.bf16 %v3162_v2  ;;  %v3163_v58 = vunpack.i.l.bf16 %v3162_v2  ;;  %2834 = vmatpush.bf16.msra.mxu3 %v2828_v48 }
 0x144   : > { %v3152_v23 = vpop.permute.xlu2 %3151 }
 0x145   : > { %1623 = vst.msk [vmem:[#allocation2 + $0xd0] sm:$0xff] %vm1596_vm10, %v3163_v58  ;;  %v3157_v22 = vpop.permute.xlu0 %3156  ;;  %v3154_v19 = vunpack.i.h.bf16 %v3152_v23  ;;  %v3153_v53 = vunpack.i.l.bf16 %v3152_v23  ;;  %2334 = vmatpush.bf16.msra.mxu0 %v2827_v31  ;;  %2835 = vmatpush.bf16.msra.mxu1 %v2827_v31  ;;  %v1917_v58 = vshll.u32 %v4526_v24, 16  ;;  %v1921_v23 = vshrl.u32 %v4526_v24, 16 }
 0x146   : > { %1624 = vst.msk [vmem:[#allocation2 + $0xd8] sm:$0xff] %vm1596_vm10, %v3164_v45  ;;  %v3158_v56 = vunpack.i.l.bf16 %v3157_v22  ;;  %v3159_v7 = vunpack.i.h.bf16 %v3157_v22  ;;  %2836 = vmatpush.bf16.msra.mxu2 %v2827_v31  ;;  %v1911_v45 = vshll.u32 %v4523_v21, 16 }
 0x147   : > { %1619 = vst.msk [vmem:[#allocation2 + $0xb0] sm:$0xff] %vm1596_vm10, %v3153_v53  ;;  %2837 = vmatpush.bf16.msra.mxu3 %v2827_v31  ;;  %v2798_v53 = vrot.slane %v4242_v54, 9 }
 0x148   : > { %3386 = vrot.lane.b32.xlu1 %v4155_v42, %s3515_s24  ;;  %1620 = vst.msk [vmem:[#allocation2 + $0xb8] sm:$0xff] %vm1596_vm10, %v3154_v19  ;;  %v1913_v54 = vrot.slane %v1911_v45, 5 }
 0x149   : > { %1621 = vst.msk [vmem:[#allocation2 + $0xc0] sm:$0xff] %vm1596_vm10, %v3158_v56  ;;  %v1636_v56 = vrot.slane %v1634_v52, 4 }
 0x14a   : > { %v3177_v60 = vpop.permute.xlu1 %3176  ;;  %3331 = vrot.lane.b32.xlu2 %v4048_v29, %s3516_s25  ;;  %1622 = vst.msk [vmem:[#allocation2 + $0xc8] sm:$0xff] %vm1596_vm10, %v3159_v7  ;;  %v1637_v7 = vrot.slane %v4266_v38, 5 }
 0x14b   : > { %3381 = vrot.lane.b32.xlu0 %v4048_v29, %s3513_s22  ;;  %v3179_v34 = vunpack.i.h.bf16 %v3177_v60  ;;  %v3178_v42 = vunpack.i.l.bf16 %v3177_v60 }
 0x14c   : > { %v3167_v6 = vpop.permute.xlu2 %3166 }
 0x14d   : > { %1742 = vst.msk [vmem:[#allocation2] sm:$0xff] %vm1741_vm12, %v3178_v42  ;;  %v3172_v39 = vpop.permute.xlu0 %3171  ;;  %v3169_v8 = vunpack.i.h.bf16 %v3167_v6  ;;  %v3168_v5 = vunpack.i.l.bf16 %v3167_v6  ;;  %v1923_v42 = vrot.slane %v1921_v23, 4 }
 0x14e   : > { %1743 = vst.msk [vmem:[#allocation2 + $0x8] sm:$0xff] %vm1741_vm12, %v3179_v34  ;;  %v3173_v46 = vunpack.i.l.bf16 %v3172_v39  ;;  %v3174_v49 = vunpack.i.h.bf16 %v3172_v39  ;;  %v4547_v34 = vrot.slane %v1917_v58, 5  ;;  %v2071_v39 = vrot.slane %v4526_v24, 5 }
 0x14f   : > { %1625 = vst.msk [vmem:[#allocation2 + $0xe0] sm:$0xff] %vm1596_vm10, %v3168_v5 }
 0x150   : > { %3401 = vrot.lane.b32.xlu1 %v5155_v18, %s3514_s23  ;;  %1626 = vst.msk [vmem:[#allocation2 + $0xe8] sm:$0xff] %vm1596_vm10, %v3169_v8 }
 0x151   : > { %1627 = vst.msk [vmem:[#allocation2 + $0xf0] sm:$0xff] %vm1596_vm10, %v3173_v46  ;;  %v236_v46 = vld [vmem:[%s3551_s17 + $0xd4] sm:$0x1] }
 0x152   : > { %v3192_v29 = vpop.permute.xlu1 %3191  ;;  %3346 = vrot.lane.b32.xlu2 %v4107_v3, %s3515_s24  ;;  %1628 = vst.msk [vmem:[#allocation2 + $0xf8] sm:$0xff] %vm1596_vm10, %v3174_v49  ;;  %v1635_v49 = vsel %vm3816_vm5, %v2798_v53, %v1634_v52 }
 0x153   : > { %3396 = vrot.lane.b32.xlu0 %v5154_v62, %s3514_s23  ;;  %v3193_v17 = vunpack.i.l.bf16 %v3192_v29  ;;  %v3194_v3 = vunpack.i.h.bf16 %v3192_v29  ;;  %v1638_v29 = vsel %vm3816_vm5, %v1636_v56, %v1637_v7 }
 0x154   : > { %v3182_v28 = vpop.permute.xlu2 %3181 }
 0x155   : > { %v3187_v51 = vpop.permute.xlu0 %3186  ;;  %v3184_v9 = vunpack.i.h.bf16 %v3182_v28  ;;  %v3183_v32 = vunpack.i.l.bf16 %v3182_v28 }
 0x156   : > { %v3188_v1 = vunpack.i.l.bf16 %v3187_v51  ;;  %v3189_v18 = vunpack.i.h.bf16 %v3187_v51  ;;  %v1924_v51 = vor.u32 %v1923_v42, %v4547_v34 }
 0x157   : > { %1744 = vst.msk [vmem:[#allocation2 + $0x10] sm:$0xff] %vm1741_vm12, %v3183_v32  ;;  %v2799_v32 = vrot.slane %v4523_v21, 9 }
 0x158   : > { %3416 = vrot.lane.b32.xlu1 %v3991_v47, %s3513_s22  ;;  %1745 = vst.msk [vmem:[#allocation2 + $0x18] sm:$0xff] %vm1741_vm12, %v3184_v9  ;;  %v1927_v9 = vshll.u32 %v236_v46, 16 }
 0x159   : > { %1875 = vst.msk [vmem:[#allocation2] sm:$0xff] %vm1874_vm13, %v3188_v1  ;;  %v2073_v1 = vrot.slane %v2071_v39, 4 }
 0x15a   : > { %v3207_v62 = vpop.permute.xlu1 %3206  ;;  %3361 = vrot.lane.b32.xlu2 %v5147_v43, %s3514_s23  ;;  %1876 = vst.msk [vmem:[#allocation2 + $0x8] sm:$0xff] %vm1874_vm13, %v3189_v18  ;;  %v2074_v18 = vrot.slane %v236_v46, 5 }
 0x15b   : > { %3411 = vrot.lane.b32.xlu0 %v4044_v50, %s3516_s25  ;;  %v3209_v13 = vunpack.i.h.bf16 %v3207_v62  ;;  %v3208_v4 = vunpack.i.l.bf16 %v3207_v62  ;;  %2034 = vst.msk [vmem:[#allocation2] sm:$0xff] %vm2033_vm14, %v3193_v17  ;;  %v1642_v62 = vunpack.c.l.bf16 %v1638_v29 }
 0x15c   : > { %v3197_v47 = vpop.permute.xlu2 %3196  ;;  %2035 = vst.msk [vmem:[#allocation2 + $0x8] sm:$0xff] %vm2033_vm14, %v3194_v3  ;;  %v1641_v3 = vunpack.c.l.bf16 %v1635_v49 }
 0x15d   : > { %v3202_v33 = vpop.permute.xlu0 %3201  ;;  %v3199_v61 = vunpack.i.h.bf16 %v3197_v47  ;;  %v3198_v41 = vunpack.i.l.bf16 %v3197_v47  ;;  %1877 = vst.msk [vmem:[#allocation2 + $0x10] sm:$0xff] %vm1874_vm13, %v3208_v4 }
 0x15e   : > { %v3203_v43 = vunpack.i.l.bf16 %v3202_v33  ;;  %1878 = vst.msk [vmem:[#allocation2 + $0x18] sm:$0xff] %vm1874_vm13, %v3209_v13  ;;  %v3204_v10 = vunpack.i.h.bf16 %v3202_v33  ;;  %v1925_v33 = vrot.slane %v1924_v51, 4 }
 0x15f   : > { %2179 = vst.msk [vmem:[#allocation2] sm:$0xff] %vm2178_vm15, %v3198_v41  ;;  %v2072_v41 = vsel %vm3816_vm5, %v2799_v32, %v2071_v39 }
 0x160   : > { %3431 = vrot.lane.b32.xlu1 %v3977_v15, %s3516_s25  ;;  %2180 = vst.msk [vmem:[#allocation2 + $0x8] sm:$0xff] %vm2178_vm15, %v3199_v61  ;;  %v1929_v61 = vrot.slane %v1927_v9, 5 }
 0x161   : > { %1750 = vst.msk [vmem:[#allocation2 + $0x40] sm:$0xff] %vm1741_vm12, %v3203_v43  ;;  %v2075_v43 = vsel %vm3816_vm5, %v2073_v1, %v2074_v18 }
 0x162   : > { %v3222_v0 = vpop.permute.xlu1 %3221  ;;  %3376 = vrot.lane.b32.xlu2 %v4028_v37, %s3513_s22  ;;  %1751 = vst.msk [vmem:[#allocation2 + $0x48] sm:$0xff] %vm1741_vm12, %v3204_v10  ;;  %v1908_v37 = vshrl.u32 %v4523_v21, 16  ;;  %v2079_v52 = vunpack.c.l.bf16 %v2075_v43 }
 0x163   : > { %3426 = vrot.lane.b32.xlu0 %v5153_v40, %s3514_s23  ;;  %v3223_v44 = vunpack.i.l.bf16 %v3222_v0  ;;  %v3224_v2 = vunpack.i.h.bf16 %v3222_v0 }
 0x164   : > { %v3212_v63 = vpop.permute.xlu2 %3211  ;;  %v1910_v60 = vrot.slane %v1908_v37, 4 }
 0x165   : > { %v3217_v27 = vpop.permute.xlu0 %3216  ;;  %v3214_v15 = vunpack.i.h.bf16 %v3212_v63  ;;  %v3213_v14 = vunpack.i.l.bf16 %v3212_v63 }
 0x166   : > { %v2211_v59 = vld [vmem:[#allocation2] sm:$0xff]  ;;  %v3218_v40 = vunpack.i.l.bf16 %v3217_v27  ;;  %v3219_v22 = vunpack.i.h.bf16 %v3217_v27  ;;  %v1914_v28 = vor.u32 %v1913_v54, %v1910_v60 }
 0x167   : > { %1883 = vst.msk [vmem:[#allocation2 + $0x40] sm:$0xff] %vm1874_vm13, %v3213_v14  ;;  %v2212_v48 = vld [vmem:[#allocation2 + $0x8] sm:$0xff] }
 0x168   : > { %3446 = vrot.lane.b32.xlu1 %v4244_v20, %s3515_s24  ;;  %1884 = vst.msk [vmem:[#allocation2 + $0x48] sm:$0xff] %vm1874_vm13, %v3214_v15  ;;  %v2243_v16 = vpack.c.bf16 %v2212_v48, %v2211_v59  ;;  %v1915_v13 = vrot.slane %v1914_v28, 4  ;;  %v1930_v48 = vsel %vm3589_vm2, %v1925_v33, %v1929_v61 }
 0x169   : > { %2042 = vst.msk [vmem:[#allocation2 + $0x40] sm:$0xff] %vm2033_vm14, %v3223_v44  ;;  %v2078_v44 = vunpack.c.l.bf16 %v2072_v41 }
 0x16a   : > { %v3237_v19 = vpop.permute.xlu1 %3236  ;;  %3391 = vrot.lane.b32.xlu2 %v4181_v57, %s3515_s24  ;;  %2808 = vmatmul.msk.bf16.vlgmr.msra.gmra.mxu0 %vm2274_vm0, %v2243_v16  ;;  %2043 = vst.msk [vmem:[#allocation2 + $0x48] sm:$0xff] %vm2033_vm14, %v3224_v2  ;;  %v1920_v11 = vsel %vm3589_vm2, %v1915_v13, %v4547_v34  ;;  %v1934_v16 = vunpack.c.l.bf16 %v1930_v48  ;;  %vm2684_vm2 = vcmask 24576  }
 0x16b   : > { %v3239_v20 = vunpack.i.h.bf16 %v3237_v19  ;;  %v3238_v31 = vunpack.i.l.bf16 %v3237_v19  ;;  %2036 = vst.msk [vmem:[#allocation2 + $0x10] sm:$0xff] %vm2033_vm14, %v3218_v40  ;;  %3441 = vrot.lane.b32.xlu0 %v4044_v50, %s3513_s22  ;;  %v1933_v23 = vunpack.c.l.bf16 %v1920_v11  ;;  %v3490_v26 = vpack.i.bf16 %v2079_v52, %v2078_v44 }
 0x16c   : > { %2037 = vst.msk [vmem:[#allocation2 + $0x18] sm:$0xff] %vm2033_vm14, %v3219_v22  ;;  %v3227_v57 = vpop.permute.xlu2 %3226 }
 0x16d   : > { %v3232_v6 = vpop.permute.xlu0 %3231  ;;  %v3229_v8 = vunpack.i.h.bf16 %v3227_v57  ;;  %v3228_v5 = vunpack.i.l.bf16 %v3227_v57  ;;  %1758 = vst.msk [vmem:[#allocation2 + $0x80] sm:$0xff] %vm1741_vm12, %v3238_v31  ;;  %v3485_v7 = vpack.i.bf16 %v1934_v16, %v1933_v23 }
 0x16e   : > { %v3233_v38 = vunpack.i.l.bf16 %v3232_v6  ;;  %1759 = vst.msk [vmem:[#allocation2 + $0x88] sm:$0xff] %vm1741_vm12, %v3239_v20  ;;  %v3234_v50 = vunpack.i.h.bf16 %v3232_v6 }
 0x16f   : > { %2181 = vst.msk [vmem:[#allocation2 + $0x10] sm:$0xff] %vm2178_vm15, %v3228_v5 }
 0x170   : > { %3461 = vrot.lane.b32.xlu1 %v4297_v35, %s3514_s23  ;;  %2182 = vst.msk [vmem:[#allocation2 + $0x18] sm:$0xff] %vm2178_vm15, %v3229_v8  ;;  %v3475_v35 = vpack.i.bf16 %v1642_v62, %v1641_v3  ;;  %v1774_v3 = vunpack.c.l.bf16 %v4523_v21  ;;  %v1775_v62 = vunpack.c.l.bf16 %v4526_v24 }
 0x171   : > { %2187 = vst.msk [vmem:[#allocation2 + $0x40] sm:$0xff] %vm2178_vm15, %v3233_v38 }
 0x172   : > { %v3252_v17 = vpop.permute.xlu1 %3251  ;;  %3406 = vrot.lane.b32.xlu2 %v4009_v36, %s3516_s25  ;;  %2188 = vst.msk [vmem:[#allocation2 + $0x48] sm:$0xff] %vm2178_vm15, %v3234_v50  ;;  %v3480_v43 = vpack.i.bf16 %v1775_v62, %v1774_v3 }
 0x173   : > { %3456 = vrot.lane.b32.xlu0 %v5151_v30, %s3514_s23  ;;  %v3253_v14 = vunpack.i.l.bf16 %v3252_v17  ;;  %v3254_v2 = vunpack.i.h.bf16 %v3252_v17 }
 0x174   : > { %v3242_v4 = vpop.permute.xlu2 %3241 }
 0x175   : > { %v3247_v47 = vpop.permute.xlu0 %3246  ;;  %v3244_v10 = vunpack.i.h.bf16 %v3242_v4  ;;  %v3243_v0 = vunpack.i.l.bf16 %v3242_v4 }
 0x176   : > { %v3248_v63 = vunpack.i.l.bf16 %v3247_v47  ;;  %v2213_v27 = vld [vmem:[#allocation2 + $0x10] sm:$0xff]  ;;  %v3249_v15 = vunpack.i.h.bf16 %v3247_v47 }
 0x177   : > { %1891 = vst.msk [vmem:[#allocation2 + $0x80] sm:$0xff] %vm1874_vm13, %v3243_v0  ;;  %v2214_v30 = vld [vmem:[#allocation2 + $0x18] sm:$0xff] }
 0x178   : > { %3476 = vrot.lane.b32.xlu1 %v3475_v35, %s3513_s22  ;;  %1892 = vst.msk [vmem:[#allocation2 + $0x88] sm:$0xff] %vm1874_vm13, %v3244_v10  ;;  %v2244_v59 = vpack.c.bf16 %v2214_v30, %v2213_v27  ;;  %v2219_v37 = vld [vmem:[#allocation2 + $0x40] sm:$0xff] }
 0x179   : > { %2050 = vst.msk [vmem:[#allocation2 + $0x80] sm:$0xff] %vm2033_vm14, %v3248_v63  ;;  %v2220_v40 = vld [vmem:[#allocation2 + $0x48] sm:$0xff] }
 0x17a   : > { %v3267_v45 = vpop.permute.xlu1 %3266  ;;  %3421 = vrot.lane.b32.xlu2 %v4128_v55, %s3515_s24  ;;  %2809 = vmatmul.msk.bf16.gmra.mxu0 %vm2274_vm0, %v2244_v59  ;;  %2051 = vst.msk [vmem:[#allocation2 + $0x88] sm:$0xff] %vm2033_vm14, %v3249_v15  ;;  %v2247_v58 = vpack.c.bf16 %v2220_v40, %v2219_v37 }
 0x17b   : > { %2195 = vst.msk [vmem:[#allocation2 + $0x80] sm:$0xff] %vm2178_vm15, %v3253_v14  ;;  %3471 = vrot.lane.b32.xlu0 %v3475_v35, %s3516_s25  ;;  %v3268_v56 = vunpack.i.l.bf16 %v3267_v45  ;;  %v3269_v20 = vunpack.i.h.bf16 %v3267_v45 }
 0x17c   : > { %2196 = vst.msk [vmem:[#allocation2 + $0x88] sm:$0xff] %vm2178_vm15, %v3254_v2  ;;  %v3257_v22 = vpop.permute.xlu2 %3256  ;;  %2812 = vmatmul.msk.bf16.vlgmr.msra.gmra.mxu1 %vm2274_vm0, %v2247_v58 }
 0x17d   : > { %v3262_v19 = vpop.permute.xlu0 %3261  ;;  %v3259_v53 = vunpack.i.h.bf16 %v3257_v22  ;;  %v3258_v55 = vunpack.i.l.bf16 %v3257_v22 }
 0x17e   : > { %v3263_v31 = vunpack.i.l.bf16 %v3262_v19  ;;  %v3264_v60 = vunpack.i.h.bf16 %v3262_v19 }
 0x17f   : > { %1746 = vst.msk [vmem:[#allocation2 + $0x20] sm:$0xff] %vm1741_vm12, %v3258_v55 }
 0x180   : > { %3491 = vrot.lane.b32.xlu1 %v3490_v26, %s3516_s25  ;;  %1747 = vst.msk [vmem:[#allocation2 + $0x28] sm:$0xff] %vm1741_vm12, %v3259_v53 }
 0x181   : > { %1879 = vst.msk [vmem:[#allocation2 + $0x20] sm:$0xff] %vm1874_vm13, %v3268_v56 }
 0x182   : > { %v3282_v54 = vpop.permute.xlu1 %3281  ;;  %3436 = vrot.lane.b32.xlu2 %v4009_v36, %s3513_s22  ;;  %1880 = vst.msk [vmem:[#allocation2 + $0x28] sm:$0xff] %vm1874_vm13, %v3269_v20  ;;  %v2227_v34 = vld [vmem:[#allocation2 + $0x80] sm:$0xff] }
 0x183   : > { %1752 = vst.msk [vmem:[#allocation2 + $0x50] sm:$0xff] %vm1741_vm12, %v3263_v31  ;;  %v2228_v42 = vld [vmem:[#allocation2 + $0x88] sm:$0xff]  ;;  %3486 = vrot.lane.b32.xlu0 %v3485_v7, %s3514_s23  ;;  %v3283_v38 = vunpack.i.l.bf16 %v3282_v54  ;;  %v3284_v46 = vunpack.i.h.bf16 %v3282_v54 }
 0x184   : > { %1753 = vst.msk [vmem:[#allocation2 + $0x58] sm:$0xff] %vm1741_vm12, %v3264_v60  ;;  %v3272_v57 = vpop.permute.xlu2 %3271  ;;  %v2251_v6 = vpack.c.bf16 %v2228_v42, %v2227_v34 }
 0x185   : > { %v3277_v39 = vpop.permute.xlu0 %3276  ;;  %v3274_v8 = vunpack.i.h.bf16 %v3272_v57  ;;  %v3273_v5 = vunpack.i.l.bf16 %v3272_v57 }
 0x186   : > { %2816 = vmatmul.msk.bf16.vlgmr.msra.gmra.mxu2 %vm2274_vm0, %v2251_v6  ;;  %v3278_v36 = vunpack.i.l.bf16 %v3277_v39  ;;  %v3279_v50 = vunpack.i.h.bf16 %v3277_v39 }
 0x187   : > { %1885 = vst.msk [vmem:[#allocation2 + $0x50] sm:$0xff] %vm1874_vm13, %v3273_v5 }
 0x188   : > { %1886 = vst.msk [vmem:[#allocation2 + $0x58] sm:$0xff] %vm1874_vm13, %v3274_v8 }
 0x189   : > { %2044 = vst.msk [vmem:[#allocation2 + $0x50] sm:$0xff] %vm2033_vm14, %v3283_v38 }
 0x18a   : > { %v3297_v49 = vpop.permute.xlu1 %3296  ;;  %3451 = vrot.lane.b32.xlu2 %v4270_v12, %s3515_s24  ;;  %2045 = vst.msk [vmem:[#allocation2 + $0x58] sm:$0xff] %vm2033_vm14, %v3284_v46 }
 0x18b   : > { %v3299_v29 = vunpack.i.h.bf16 %v3297_v49  ;;  %v3298_v28 = vunpack.i.l.bf16 %v3297_v49  ;;  %2038 = vst.msk [vmem:[#allocation2 + $0x20] sm:$0xff] %vm2033_vm14, %v3278_v36 }
 0x18c   : > { %2039 = vst.msk [vmem:[#allocation2 + $0x28] sm:$0xff] %vm2033_vm14, %v3279_v50  ;;  %v3287_v51 = vpop.permute.xlu2 %3286 }
 0x18d   : > { %v3292_v9 = vpop.permute.xlu0 %3291  ;;  %v3289_v32 = vunpack.i.h.bf16 %v3287_v51  ;;  %v3288_v1 = vunpack.i.l.bf16 %v3287_v51  ;;  %1760 = vst.msk [vmem:[#allocation2 + $0x90] sm:$0xff] %vm1741_vm12, %v3298_v28 }
 0x18e   : > { %v3293_v18 = vunpack.i.l.bf16 %v3292_v9  ;;  %1761 = vst.msk [vmem:[#allocation2 + $0x98] sm:$0xff] %vm1741_vm12, %v3299_v29  ;;  %v3294_v17 = vunpack.i.h.bf16 %v3292_v9 }
 0x18f   : > { %2183 = vst.msk [vmem:[#allocation2 + $0x20] sm:$0xff] %vm2178_vm15, %v3288_v1 }
 0x190   : > { %2184 = vst.msk [vmem:[#allocation2 + $0x28] sm:$0xff] %vm2178_vm15, %v3289_v32 }
 0x191   : > { %2189 = vst.msk [vmem:[#allocation2 + $0x50] sm:$0xff] %vm2178_vm15, %v3293_v18 }
 0x192   : > { %v3312_v12 = vpop.permute.xlu1 %3311  ;;  %3466 = vrot.lane.b32.xlu2 %v4136_v25, %s3516_s25  ;;  %2190 = vst.msk [vmem:[#allocation2 + $0x58] sm:$0xff] %vm2178_vm15, %v3294_v17 }
 0x193   : > { %v3313_v33 = vunpack.i.l.bf16 %v3312_v12  ;;  %v3314_v41 = vunpack.i.h.bf16 %v3312_v12 }
 0x194   : > { %v3302_v35 = vpop.permute.xlu2 %3301 }
 0x195   : > { %v3307_v13 = vpop.permute.xlu0 %3306  ;;  %v3304_v4 = vunpack.i.h.bf16 %v3302_v35  ;;  %v3303_v47 = vunpack.i.l.bf16 %v3302_v35 }
 0x196   : > { %v2215_v61 = vld [vmem:[#allocation2 + $0x20] sm:$0xff]  ;;  %v3308_v0 = vunpack.i.l.bf16 %v3307_v13  ;;  %v3309_v63 = vunpack.i.h.bf16 %v3307_v13 }
 0x197   : > { %1766 = vst.msk [vmem:[#allocation2 + $0xc0] sm:$0xff] %vm1741_vm12, %v3303_v47  ;;  %v2216_v10 = vld [vmem:[#allocation2 + $0x28] sm:$0xff] }
 0x198   : > { %1767 = vst.msk [vmem:[#allocation2 + $0xc8] sm:$0xff] %vm1741_vm12, %v3304_v4  ;;  %v2245_v25 = vpack.c.bf16 %v2216_v10, %v2215_v61  ;;  %v2221_v27 = vld [vmem:[#allocation2 + $0x50] sm:$0xff] }
 0x199   : > { %1899 = vst.msk [vmem:[#allocation2 + $0xc0] sm:$0xff] %vm1874_vm13, %v3313_v33  ;;  %v2222_v21 = vld [vmem:[#allocation2 + $0x58] sm:$0xff] }
 0x19a   : > { %v3327_v24 = vpop.permute.xlu1 %3326  ;;  %2810 = vmatmul.msk.bf16.gmra.mxu0 %vm2274_vm0, %v2245_v25  ;;  %1900 = vst.msk [vmem:[#allocation2 + $0xc8] sm:$0xff] %vm1874_vm13, %v3314_v41  ;;  %v2248_v15 = vpack.c.bf16 %v2222_v21, %v2221_v27  ;;  %3481 = vrot.lane.b32.xlu2 %v3480_v43, %s3515_s24 }
 0x19b   : > { %1893 = vst.msk [vmem:[#allocation2 + $0x90] sm:$0xff] %vm1874_vm13, %v3308_v0  ;;  %v3328_v59 = vunpack.i.l.bf16 %v3327_v24  ;;  %v3329_v2 = vunpack.i.h.bf16 %v3327_v24 }
 0x19c   : > { %1894 = vst.msk [vmem:[#allocation2 + $0x98] sm:$0xff] %vm1874_vm13, %v3309_v63  ;;  %v3317_v30 = vpop.permute.xlu2 %3316  ;;  %2813 = vmatmul.msk.bf16.gmra.mxu1 %vm2274_vm0, %v2248_v15 }
 0x19d   : > { %v3322_v14 = vpop.permute.xlu0 %3321  ;;  %v3319_v44 = vunpack.i.h.bf16 %v3317_v30  ;;  %v3318_v52 = vunpack.i.l.bf16 %v3317_v30 }
 0x19e   : > { %v3323_v37 = vunpack.i.l.bf16 %v3322_v14  ;;  %v3324_v11 = vunpack.i.h.bf16 %v3322_v14 }
 0x19f   : > { %2052 = vst.msk [vmem:[#allocation2 + $0x90] sm:$0xff] %vm2033_vm14, %v3318_v52 }
 0x1a0   : > { %2053 = vst.msk [vmem:[#allocation2 + $0x98] sm:$0xff] %vm2033_vm14, %v3319_v44 }
 0x1a1   : > { %2197 = vst.msk [vmem:[#allocation2 + $0x90] sm:$0xff] %vm2178_vm15, %v3328_v59 }
 0x1a2   : > { %v3342_v48 = vpop.permute.xlu1 %3341  ;;  %2198 = vst.msk [vmem:[#allocation2 + $0x98] sm:$0xff] %vm2178_vm15, %v3329_v2 }
 0x1a3   : > { %v3344_v40 = vunpack.i.h.bf16 %v3342_v48  ;;  %v3343_v45 = vunpack.i.l.bf16 %v3342_v48  ;;  %2058 = vst.msk [vmem:[#allocation2 + $0xc0] sm:$0xff] %vm2033_vm14, %v3323_v37 }
 0x1a4   : > { %2059 = vst.msk [vmem:[#allocation2 + $0xc8] sm:$0xff] %vm2033_vm14, %v3324_v11  ;;  %v3332_v58 = vpop.permute.xlu2 %3331 }
 0x1a5   : > { %v3337_v23 = vpop.permute.xlu0 %3336  ;;  %v3334_v16 = vunpack.i.h.bf16 %v3332_v58  ;;  %v3333_v26 = vunpack.i.l.bf16 %v3332_v58  ;;  %1754 = vst.msk [vmem:[#allocation2 + $0x60] sm:$0xff] %vm1741_vm12, %v3343_v45 }
 0x1a6   : > { %v3338_v22 = vunpack.i.l.bf16 %v3337_v23  ;;  %1755 = vst.msk [vmem:[#allocation2 + $0x68] sm:$0xff] %vm1741_vm12, %v3344_v40  ;;  %v3339_v19 = vunpack.i.h.bf16 %v3337_v23 }
 0x1a7   : > { %2203 = vst.msk [vmem:[#allocation2 + $0xc0] sm:$0xff] %vm2178_vm15, %v3333_v26 }
 0x1a8   : > { %2204 = vst.msk [vmem:[#allocation2 + $0xc8] sm:$0xff] %vm2178_vm15, %v3334_v16  ;;  %v2229_v53 = vld [vmem:[#allocation2 + $0x90] sm:$0xff] }
 0x1a9   : > { %1748 = vst.msk [vmem:[#allocation2 + $0x30] sm:$0xff] %vm1741_vm12, %v3338_v22  ;;  %v2230_v55 = vld [vmem:[#allocation2 + $0x98] sm:$0xff] }
 0x1aa   : > { %v3357_v56 = vpop.permute.xlu1 %3356  ;;  %1749 = vst.msk [vmem:[#allocation2 + $0x38] sm:$0xff] %vm1741_vm12, %v3339_v19  ;;  %v2252_v20 = vpack.c.bf16 %v2230_v55, %v2229_v53 }
 0x1ab   : > { %v3358_v34 = vunpack.i.l.bf16 %v3357_v56  ;;  %v3359_v57 = vunpack.i.h.bf16 %v3357_v56 }
 0x1ac   : > { %v3347_v31 = vpop.permute.xlu2 %3346  ;;  %2817 = vmatmul.msk.bf16.gmra.mxu2 %vm2274_vm0, %v2252_v20 }
 0x1ad   : > { %v3352_v7 = vpop.permute.xlu0 %3351  ;;  %v3349_v60 = vunpack.i.h.bf16 %v3347_v31  ;;  %v3348_v54 = vunpack.i.l.bf16 %v3347_v31 }
 0x1ae   : > { %v2235_v42 = vld [vmem:[#allocation2 + $0xc0] sm:$0xff]  ;;  %v3353_v39 = vunpack.i.l.bf16 %v3352_v7  ;;  %v3354_v5 = vunpack.i.h.bf16 %v3352_v7 }
 0x1af   : > { %1881 = vst.msk [vmem:[#allocation2 + $0x30] sm:$0xff] %vm1874_vm13, %v3348_v54  ;;  %v2236_v6 = vld [vmem:[#allocation2 + $0xc8] sm:$0xff] }
 0x1b0   : > { %1882 = vst.msk [vmem:[#allocation2 + $0x38] sm:$0xff] %vm1874_vm13, %v3349_v60  ;;  %v2255_v8 = vpack.c.bf16 %v2236_v6, %v2235_v42 }
 0x1b1   : > { %2040 = vst.msk [vmem:[#allocation2 + $0x30] sm:$0xff] %vm2033_vm14, %v3358_v34 }
 0x1b2   : > { %v3372_v38 = vpop.permute.xlu1 %3371  ;;  %2820 = vmatmul.msk.bf16.vlgmr.msra.gmra.mxu3 %vm2274_vm0, %v2255_v8  ;;  %2041 = vst.msk [vmem:[#allocation2 + $0x38] sm:$0xff] %vm2033_vm14, %v3359_v57 }
 0x1b3   : > { %1887 = vst.msk [vmem:[#allocation2 + $0x60] sm:$0xff] %vm1874_vm13, %v3353_v39  ;;  %v3373_v29 = vunpack.i.l.bf16 %v3372_v38  ;;  %v3374_v28 = vunpack.i.h.bf16 %v3372_v38 }
 0x1b4   : > { %1888 = vst.msk [vmem:[#allocation2 + $0x68] sm:$0xff] %vm1874_vm13, %v3354_v5  ;;  %v3362_v46 = vpop.permute.xlu2 %3361 }
 0x1b5   : > { %v3367_v36 = vpop.permute.xlu0 %3366  ;;  %v3364_v50 = vunpack.i.h.bf16 %v3362_v46  ;;  %v3363_v49 = vunpack.i.l.bf16 %v3362_v46 }
 0x1b6   : > { %v3368_v51 = vunpack.i.l.bf16 %v3367_v36  ;;  %v3369_v9 = vunpack.i.h.bf16 %v3367_v36 }
 0x1b7   : > { %2046 = vst.msk [vmem:[#allocation2 + $0x60] sm:$0xff] %vm2033_vm14, %v3363_v49 }
 0x1b8   : > { %2047 = vst.msk [vmem:[#allocation2 + $0x68] sm:$0xff] %vm2033_vm14, %v3364_v50 }
 0x1b9   : > { %2191 = vst.msk [vmem:[#allocation2 + $0x60] sm:$0xff] %vm2178_vm15, %v3373_v29 }
 0x1ba   : > { %v3387_v32 = vpop.permute.xlu1 %3386  ;;  %2192 = vst.msk [vmem:[#allocation2 + $0x68] sm:$0xff] %vm2178_vm15, %v3374_v28 }
 0x1bb   : > { %2185 = vst.msk [vmem:[#allocation2 + $0x30] sm:$0xff] %vm2178_vm15, %v3368_v51  ;;  %v3388_v35 = vunpack.i.l.bf16 %v3387_v32  ;;  %v3389_v13 = vunpack.i.h.bf16 %v3387_v32 }
 0x1bc   : > { %2186 = vst.msk [vmem:[#allocation2 + $0x38] sm:$0xff] %vm2178_vm15, %v3369_v9  ;;  %v3377_v1 = vpop.permute.xlu2 %3376 }
 0x1bd   : > { %v3382_v18 = vpop.permute.xlu0 %3381  ;;  %v3379_v17 = vunpack.i.h.bf16 %v3377_v1  ;;  %v3378_v12 = vunpack.i.l.bf16 %v3377_v1 }
 0x1be   : > { %v3383_v3 = vunpack.i.l.bf16 %v3382_v18  ;;  %v3384_v62 = vunpack.i.h.bf16 %v3382_v18 }
 0x1bf   : > { %1762 = vst.msk [vmem:[#allocation2 + $0xa0] sm:$0xff] %vm1741_vm12, %v3378_v12 }
 0x1c0   : > { %1763 = vst.msk [vmem:[#allocation2 + $0xa8] sm:$0xff] %vm1741_vm12, %v3379_v17  ;;  %v2223_v4 = vld [vmem:[#allocation2 + $0x60] sm:$0xff] }
 0x1c1   : > { %1768 = vst.msk [vmem:[#allocation2 + $0xd0] sm:$0xff] %vm1741_vm12, %v3383_v3  ;;  %v2224_v47 = vld [vmem:[#allocation2 + $0x68] sm:$0xff] }
 0x1c2   : > { %v3402_v33 = vpop.permute.xlu1 %3401  ;;  %1769 = vst.msk [vmem:[#allocation2 + $0xd8] sm:$0xff] %vm1741_vm12, %v3384_v62  ;;  %v2217_v61 = vld [vmem:[#allocation2 + $0x30] sm:$0xff]  ;;  %v2249_v41 = vpack.c.bf16 %v2224_v47, %v2223_v4 }
 0x1c3   : > { %1895 = vst.msk [vmem:[#allocation2 + $0xa0] sm:$0xff] %vm1874_vm13, %v3388_v35  ;;  %v2218_v43 = vld [vmem:[#allocation2 + $0x38] sm:$0xff]  ;;  %v3403_v15 = vunpack.i.l.bf16 %v3402_v33  ;;  %v3404_v30 = vunpack.i.h.bf16 %v3402_v33 }
 0x1c4   : > { %v3392_v10 = vpop.permute.xlu2 %3391  ;;  %1896 = vst.msk [vmem:[#allocation2 + $0xa8] sm:$0xff] %vm1874_vm13, %v3389_v13  ;;  %v2246_v0 = vpack.c.bf16 %v2218_v43, %v2217_v61  ;;  %2814 = vmatmul.msk.bf16.gmra.mxu1 %vm2274_vm0, %v2249_v41 }
 0x1c5   : > { %v3397_v25 = vpop.permute.xlu0 %3396  ;;  %v3394_v63 = vunpack.i.h.bf16 %v3392_v10  ;;  %v3393_v27 = vunpack.i.l.bf16 %v3392_v10 }
 0x1c6   : > { %v3398_v21 = vunpack.i.l.bf16 %v3397_v25  ;;  %2811 = vmatmul.msk.bf16.gmra.mxu0 %vm2274_vm0, %v2246_v0  ;;  %v3399_v24 = vunpack.i.h.bf16 %v3397_v25 }
 0x1c7   : > { %1901 = vst.msk [vmem:[#allocation2 + $0xd0] sm:$0xff] %vm1874_vm13, %v3393_v27 }
 0x1c8   : > { %1902 = vst.msk [vmem:[#allocation2 + $0xd8] sm:$0xff] %vm1874_vm13, %v3394_v63 }
 0x1c9   : > { %2054 = vst.msk [vmem:[#allocation2 + $0xa0] sm:$0xff] %vm2033_vm14, %v3398_v21 }
 0x1ca   : > { %v3417_v14 = vpop.permute.xlu1 %3416  ;;  %2055 = vst.msk [vmem:[#allocation2 + $0xa8] sm:$0xff] %vm2033_vm14, %v3399_v24 }
 0x1cb   : > { %v3419_v44 = vunpack.i.h.bf16 %v3417_v14  ;;  %v3418_v52 = vunpack.i.l.bf16 %v3417_v14  ;;  %2060 = vst.msk [vmem:[#allocation2 + $0xd0] sm:$0xff] %vm2033_vm14, %v3403_v15 }
 0x1cc   : > { %v3407_v59 = vpop.permute.xlu2 %3406  ;;  %2061 = vst.msk [vmem:[#allocation2 + $0xd8] sm:$0xff] %vm2033_vm14, %v3404_v30 }
 0x1cd   : > { %v3412_v2 = vpop.permute.xlu0 %3411  ;;  %v3409_v37 = vunpack.i.h.bf16 %v3407_v59  ;;  %v3408_v11 = vunpack.i.l.bf16 %v3407_v59  ;;  %1756 = vst.msk [vmem:[#allocation2 + $0x70] sm:$0xff] %vm1741_vm12, %v3418_v52 }
 0x1ce   : > { %v3413_v48 = vunpack.i.l.bf16 %v3412_v2  ;;  %v3414_v40 = vunpack.i.h.bf16 %v3412_v2  ;;  %1757 = vst.msk [vmem:[#allocation2 + $0x78] sm:$0xff] %vm1741_vm12, %v3419_v44 }
 0x1cf   : > { %2199 = vst.msk [vmem:[#allocation2 + $0xa0] sm:$0xff] %vm2178_vm15, %v3408_v11 }
 0x1d0   : > { %2200 = vst.msk [vmem:[#allocation2 + $0xa8] sm:$0xff] %vm2178_vm15, %v3409_v37 }
 0x1d1   : > { %2205 = vst.msk [vmem:[#allocation2 + $0xd0] sm:$0xff] %vm2178_vm15, %v3413_v48 }
 0x1d2   : > { %v3432_v45 = vpop.permute.xlu1 %3431  ;;  %2206 = vst.msk [vmem:[#allocation2 + $0xd8] sm:$0xff] %vm2178_vm15, %v3414_v40 }
 0x1d3   : > { %v3433_v56 = vunpack.i.l.bf16 %v3432_v45  ;;  %v3434_v31 = vunpack.i.h.bf16 %v3432_v45 }
 0x1d4   : > { %v3422_v58 = vpop.permute.xlu2 %3421 }
 0x1d5   : > { %v3427_v23 = vpop.permute.xlu0 %3426  ;;  %v3424_v16 = vunpack.i.h.bf16 %v3422_v58  ;;  %v3423_v26 = vunpack.i.l.bf16 %v3422_v58 }
 0x1d6   : > { %v3428_v22 = vunpack.i.l.bf16 %v3427_v23  ;;  %v2231_v19 = vld [vmem:[#allocation2 + $0xa0] sm:$0xff]  ;;  %v3429_v53 = vunpack.i.h.bf16 %v3427_v23 }
 0x1d7   : > { %1889 = vst.msk [vmem:[#allocation2 + $0x70] sm:$0xff] %vm1874_vm13, %v3423_v26  ;;  %v2232_v55 = vld [vmem:[#allocation2 + $0xa8] sm:$0xff] }
 0x1d8   : > { %1890 = vst.msk [vmem:[#allocation2 + $0x78] sm:$0xff] %vm1874_vm13, %v3424_v16  ;;  %v2253_v20 = vpack.c.bf16 %v2232_v55, %v2231_v19  ;;  %v2237_v7 = vld [vmem:[#allocation2 + $0xd0] sm:$0xff] }
 0x1d9   : > { %2048 = vst.msk [vmem:[#allocation2 + $0x70] sm:$0xff] %vm2033_vm14, %v3428_v22  ;;  %v2238_v60 = vld [vmem:[#allocation2 + $0xd8] sm:$0xff] }
 0x1da   : > { %v3447_v54 = vpop.permute.xlu1 %3446  ;;  %2818 = vmatmul.msk.bf16.gmra.mxu2 %vm2274_vm0, %v2253_v20  ;;  %2049 = vst.msk [vmem:[#allocation2 + $0x78] sm:$0xff] %vm2033_vm14, %v3429_v53  ;;  %v2256_v34 = vpack.c.bf16 %v2238_v60, %v2237_v7 }
 0x1db   : > { %2193 = vst.msk [vmem:[#allocation2 + $0x70] sm:$0xff] %vm2178_vm15, %v3433_v56  ;;  %v3448_v38 = vunpack.i.l.bf16 %v3447_v54  ;;  %v3449_v46 = vunpack.i.h.bf16 %v3447_v54 }
 0x1dc   : > { %v3437_v42 = vpop.permute.xlu2 %3436  ;;  %2194 = vst.msk [vmem:[#allocation2 + $0x78] sm:$0xff] %vm2178_vm15, %v3434_v31  ;;  %2821 = vmatmul.msk.bf16.gmra.mxu3 %vm2274_vm0, %v2256_v34 }
 0x1dd   : > { %v3439_v57 = vunpack.i.h.bf16 %v3437_v42  ;;  %v3438_v6 = vunpack.i.l.bf16 %v3437_v42  ;;  %v3442_v39 = vpop.permute.xlu0 %3441 }
 0x1de   : > { %v3444_v8 = vunpack.i.h.bf16 %v3442_v39  ;;  %v3443_v5 = vunpack.i.l.bf16 %v3442_v39 }
 0x1df   : > { %1764 = vst.msk [vmem:[#allocation2 + $0xb0] sm:$0xff] %vm1741_vm12, %v3438_v6 }
 0x1e0   : > { %1765 = vst.msk [vmem:[#allocation2 + $0xb8] sm:$0xff] %vm1741_vm12, %v3439_v57 }
 0x1e1   : > { %1770 = vst.msk [vmem:[#allocation2 + $0xe0] sm:$0xff] %vm1741_vm12, %v3443_v5 }
 0x1e2   : > { %v3462_v36 = vpop.permute.xlu1 %3461  ;;  %1771 = vst.msk [vmem:[#allocation2 + $0xe8] sm:$0xff] %vm1741_vm12, %v3444_v8  ;;  %v2225_v50 = vld [vmem:[#allocation2 + $0x70] sm:$0xff] }
 0x1e3   : > { %v2226_v49 = vld [vmem:[#allocation2 + $0x78] sm:$0xff]  ;;  %1897 = vst.msk [vmem:[#allocation2 + $0xb0] sm:$0xff] %vm1874_vm13, %v3448_v38  ;;  %v3463_v3 = vunpack.i.l.bf16 %v3462_v36  ;;  %v3464_v62 = vunpack.i.h.bf16 %v3462_v36 }
 0x1e4   : > { %v3452_v29 = vpop.permute.xlu2 %3451  ;;  %v2250_v28 = vpack.c.bf16 %v2226_v49, %v2225_v50  ;;  %1898 = vst.msk [vmem:[#allocation2 + $0xb8] sm:$0xff] %vm1874_vm13, %v3449_v46 }
 0x1e5   : > { %v3454_v51 = vunpack.i.h.bf16 %v3452_v29  ;;  %v3453_v9 = vunpack.i.l.bf16 %v3452_v29  ;;  %v3457_v32 = vpop.permute.xlu0 %3456 }
 0x1e6   : > { %2815 = vmatmul.msk.bf16.gmra.mxu1 %vm2274_vm0, %v2250_v28  ;;  %v3458_v1 = vunpack.i.l.bf16 %v3457_v32  ;;  %v3459_v17 = vunpack.i.h.bf16 %v3457_v32 }
 0x1e7   : > { %1903 = vst.msk [vmem:[#allocation2 + $0xe0] sm:$0xff] %vm1874_vm13, %v3453_v9  ;;  %v4697_v18 = vpop.f32.mrf.mxu0 }
 0x1e8   : > { %1904 = vst.msk [vmem:[#allocation2 + $0xe8] sm:$0xff] %vm1874_vm13, %v3454_v51  ;;  %v2416_v12 = vpack.c.bf16 %v4697_v18, %v4697_v18 }
 0x1e9   : > { %2056 = vst.msk [vmem:[#allocation2 + $0xb0] sm:$0xff] %vm2033_vm14, %v3458_v1 }
 0x1ea   : > { %v3477_v35 = vpop.permute.xlu1 %3476  ;;  %2449 = vst.msk [vmem:[%s4695_s8] sm:$0xf] %vm2448_vm1, %v2416_v12 }
 0x1eb   : > { %v3478_v13 = vunpack.i.l.bf16 %v3477_v35  ;;  %2057 = vst.msk [vmem:[#allocation2 + $0xb8] sm:$0xff] %vm2033_vm14, %v3459_v17  ;;  %v3479_v25 = vunpack.i.h.bf16 %v3477_v35 }
 0x1ec   : > { %v3467_v4 = vpop.permute.xlu2 %3466  ;;  %2062 = vst.msk [vmem:[#allocation2 + $0xe0] sm:$0xff] %vm2033_vm14, %v3463_v3  ;;  %v2481_v3 = vsel %vm274_vm6, %v4697_v18, 0.0 }
 0x1ed   : > { %v3469_v47 = vunpack.i.h.bf16 %v3467_v4  ;;  %v3468_v33 = vunpack.i.l.bf16 %v3467_v4  ;;  %2063 = vst.msk [vmem:[#allocation2 + $0xe8] sm:$0xff] %vm2033_vm14, %v3464_v62  ;;  %v3472_v61 = vpop.permute.xlu0 %3471 }
 0x1ee   : > { %v3473_v41 = vunpack.i.l.bf16 %v3472_v61  ;;  %1772 = vst.msk [vmem:[#allocation2 + $0xf0] sm:$0xff] %vm1741_vm12, %v3478_v13  ;;  %v3474_v10 = vunpack.i.h.bf16 %v3472_v61 }
 0x1ef   : > { %2201 = vst.msk [vmem:[#allocation2 + $0xb0] sm:$0xff] %vm2178_vm15, %v3468_v33  ;;  %v4710_v43 = vpop.f32.mrf.mxu0 }
 0x1f0   : > { %2202 = vst.msk [vmem:[#allocation2 + $0xb8] sm:$0xff] %vm2178_vm15, %v3469_v47  ;;  %v2417_v0 = vpack.c.bf16 %v4710_v43, %v4710_v43  ;;  %v2482_v1 = vsel %vm274_vm6, %v4710_v43, 0.0 }
 0x1f1   : > { %2207 = vst.msk [vmem:[#allocation2 + $0xe0] sm:$0xff] %vm2178_vm15, %v3473_v41  ;;  %v2483_v13 = vadd.f32 %v2482_v1, %v2481_v3 }
 0x1f2   : > { %2450 = vst.msk [vmem:[%s4695_s8 + $0x4] sm:$0xf] %vm2448_vm1, %v2417_v0  ;;  %v3492_v14 = vpop.permute.xlu1 %3491 }
 0x1f3   : > { %2208 = vst.msk [vmem:[#allocation2 + $0xe8] sm:$0xff] %vm2178_vm15, %v3474_v10  ;;  %v3493_v40 = vunpack.i.l.bf16 %v3492_v14  ;;  %v3494_v23 = vunpack.i.h.bf16 %v3492_v14 }
 0x1f4   : > { %1773 = vst.msk [vmem:[#allocation2 + $0xf8] sm:$0xff] %vm1741_vm12, %v3479_v25  ;;  %v3482_v63 = vpop.permute.xlu2 %3481 }
 0x1f5   : > { %v3484_v27 = vunpack.i.h.bf16 %v3482_v63  ;;  %v3483_v21 = vunpack.i.l.bf16 %v3482_v63  ;;  %v3487_v24 = vpop.permute.xlu0 %3486 }
 0x1f6   : > { %v2233_v15 = vld [vmem:[#allocation2 + $0xb0] sm:$0xff]  ;;  %v3488_v30 = vunpack.i.l.bf16 %v3487_v24  ;;  %v3489_v59 = vunpack.i.h.bf16 %v3487_v24 }
 0x1f7   : > { %v4720_v44 = vpop.f32.mrf.mxu0  ;;  %v2234_v52 = vld [vmem:[#allocation2 + $0xb8] sm:$0xff]  ;;  %1905 = vst.msk [vmem:[#allocation2 + $0xf0] sm:$0xff] %vm1874_vm13, %v3483_v21 }
 0x1f8   : > { %v2418_v2 = vpack.c.bf16 %v4720_v44, %v4720_v44  ;;  %v2254_v37 = vpack.c.bf16 %v2234_v52, %v2233_v15  ;;  %v2239_v11 = vld [vmem:[#allocation2 + $0xe0] sm:$0xff]  ;;  %1906 = vst.msk [vmem:[#allocation2 + $0xf8] sm:$0xff] %vm1874_vm13, %v3484_v27  ;;  %v2484_v62 = vsel %vm274_vm6, %v4720_v44, 0.0 }
 0x1f9   : > { %v4726_v48 = vpop.f32.mrf.mxu1  ;;  %2064 = vst.msk [vmem:[#allocation2 + $0xf0] sm:$0xff] %vm2033_vm14, %v3488_v30  ;;  %v2485_v47 = vadd.f32 %v2484_v62, %v2483_v13 }
 0x1fa   : > { %2451 = vst.msk [vmem:[%s4695_s8 + $0x8] sm:$0xf] %vm2448_vm1, %v2418_v2  ;;  %2819 = vmatmul.msk.bf16.gmra.mxu2 %vm2274_vm0, %v2254_v37  ;;  %v2424_v45 = vpack.c.bf16 %v4726_v48, %v4726_v48  ;;  %v2240_v58 = vld [vmem:[#allocation2 + $0xe8] sm:$0xff]  ;;  %v2496_v52 = vsel %vm274_vm6, %v4726_v48, 0.0 }
 0x1fb   : > { %v2257_v16 = vpack.c.bf16 %v2240_v58, %v2239_v11  ;;  %2065 = vst.msk [vmem:[#allocation2 + $0xf8] sm:$0xff] %vm2033_vm14, %v3489_v59 }
 0x1fc   : > { %2457 = vst.msk [vmem:[%s4695_s8 + $0x20] sm:$0xf] %vm2448_vm1, %v2424_v45 }
 0x1fd   : > { %2822 = vmatmul.msk.bf16.gmra.mxu3 %vm2274_vm0, %v2257_v16  ;;  %2209 = vst.msk [vmem:[#allocation2 + $0xf0] sm:$0xff] %vm2178_vm15, %v3493_v40 }
 0x1fe   : > { %2210 = vst.msk [vmem:[#allocation2 + $0xf8] sm:$0xff] %vm2178_vm15, %v3494_v23 }
 0x1ff   : > { %v4740_v26 = vpop.f32.mrf.mxu0 }
 0x200   : > { %v2419_v22 = vpack.c.bf16 %v4740_v26, %v4740_v26  ;;  %v2486_v4 = vsel %vm274_vm6, %v4740_v26, 0.0 }
 0x201   : > { %v4744_v19 = vpop.f32.mrf.mxu1  ;;  %v2487_v61 = vadd.f32 %v2486_v4, %v2485_v47 }
 0x202   : > { %2452 = vst.msk [vmem:[%s4695_s8 + $0xc] sm:$0xf] %vm2448_vm1, %v2419_v22  ;;  %v2425_v53 = vpack.c.bf16 %v4744_v19, %v4744_v19  ;;  %v2498_v2 = vsel %vm274_vm6, %v4744_v19, 0.0 }
 0x204   : > { %2458 = vst.msk [vmem:[%s4695_s8 + $0x24] sm:$0xf] %vm2448_vm1, %v2425_v53  ;;  %v2241_v55 = vld [vmem:[#allocation2 + $0xf0] sm:$0xff] }
 0x205   : > { %v2242_v56 = vld [vmem:[#allocation2 + $0xf8] sm:$0xff] }
 0x206   : > { %v2258_v31 = vpack.c.bf16 %v2242_v56, %v2241_v55 }
 0x209   : > { %v4752_v20 = vpop.f32.mrf.mxu2 }
 0x20a   : > { %v2432_v7 = vpack.c.bf16 %v4752_v20, %v4752_v20  ;;  %v2512_v62 = vsel %vm274_vm6, %v4752_v20, 0.0 }
 0x20c   : > { %2465 = vst.msk [vmem:[%s4695_s8 + $0x40] sm:$0xf] %vm2448_vm1, %v2432_v7 }
 0x20d   : > { %2823 = vmatmul.msk.bf16.gmra.mxu3 %vm2274_vm0, %v2258_v31 }
 0x211   : > { %v4759_v60 = vpop.f32.mrf.mxu2 }
 0x212   : > { %v2433_v54 = vpack.c.bf16 %v4759_v60, %v4759_v60  ;;  %v2514_v13 = vsel %vm274_vm6, %v4759_v60, 0.0 }
 0x214   : > { %2466 = vst.msk [vmem:[%s4695_s8 + $0x44] sm:$0xf] %vm2448_vm1, %v2433_v54 }
 0x217   : > { %v4765_v34 = vpop.f32.mrf.mxu0 }
 0x218   : > { %v2420_v42 = vpack.c.bf16 %v4765_v34, %v4765_v34  ;;  %v2488_v33 = vsel %vm274_vm6, %v4765_v34, 0.0 }
 0x219   : > { %v4769_v57 = vpop.f32.mrf.mxu1  ;;  %v2489_v25 = vadd.f32 %v2488_v33, %v2487_v61 }
 0x21a   : > { %2453 = vst.msk [vmem:[%s4695_s8 + $0x10] sm:$0xf] %vm2448_vm1, %v2420_v42  ;;  %v2426_v6 = vpack.c.bf16 %v4769_v57, %v4769_v57  ;;  %v2500_v11 = vsel %vm274_vm6, %v4769_v57, 0.0 }
 0x21c   : > { %2459 = vst.msk [vmem:[%s4695_s8 + $0x28] sm:$0xf] %vm2448_vm1, %v2426_v6 }
 0x21f   : > { %v4777_v39 = vpop.f32.mrf.mxu0 }
 0x220   : > { %v2421_v8 = vpack.c.bf16 %v4777_v39, %v4777_v39  ;;  %v2490_v10 = vsel %vm274_vm6, %v4777_v39, 0.0 }
 0x221   : > { %v4781_v5 = vpop.f32.mrf.mxu1  ;;  %v2491_v24 = vadd.f32 %v2490_v10, %v2489_v25 }
 0x222   : > { %2454 = vst.msk [vmem:[%s4695_s8 + $0x14] sm:$0xf] %vm2448_vm1, %v2421_v8  ;;  %v2427_v38 = vpack.c.bf16 %v4781_v5, %v4781_v5  ;;  %v2502_v16 = vsel %vm274_vm6, %v4781_v5, 0.0 }
 0x224   : > { %2460 = vst.msk [vmem:[%s4695_s8 + $0x2c] sm:$0xf] %vm2448_vm1, %v2427_v38 }
 0x22f   : > { %v4789_v46 = vpop.f32.mrf.mxu2 }
 0x230   : > { %v2434_v36 = vpack.c.bf16 %v4789_v46, %v4789_v46  ;;  %v2516_v47 = vsel %vm274_vm6, %v4789_v46, 0.0 }
 0x232   : > { %2467 = vst.msk [vmem:[%s4695_s8 + $0x48] sm:$0xf] %vm2448_vm1, %v2434_v36 }
 0x235   : > { %v4795_v50 = vpop.f32.mrf.mxu3 }
 0x236   : > { %v2440_v49 = vpack.c.bf16 %v4795_v50, %v4795_v50 }
 0x237   : > { %v4799_v29 = vpop.f32.mrf.mxu2 }
 0x238   : > { %2473 = vst.msk [vmem:[%s4695_s8 + $0x60] sm:$0xf] %vm2448_vm1, %v2440_v49  ;;  %v2435_v28 = vpack.c.bf16 %v4799_v29, %v4799_v29  ;;  %v2518_v61 = vsel %vm274_vm6, %v4799_v29, 0.0 }
 0x23a   : > { %2468 = vst.msk [vmem:[%s4695_s8 + $0x4c] sm:$0xf] %vm2448_vm1, %v2435_v28 }
 0x23d   : > { %v4807_v51 = vpop.f32.mrf.mxu3 }
 0x23e   : > { %v2441_v9 = vpack.c.bf16 %v4807_v51, %v4807_v51 }
 0x240   : > { %2474 = vst.msk [vmem:[%s4695_s8 + $0x64] sm:$0xf] %vm2448_vm1, %v2441_v9 }
 0x241   : > { %v4813_v32 = vpop.f32.mrf.mxu1 }
 0x242   : > { %v2428_v17 = vpack.c.bf16 %v4813_v32, %v4813_v32  ;;  %v2504_v56 = vsel %vm274_vm6, %v4813_v32, 0.0 }
 0x243   : > { %v4819_v12 = vpop.f32.mrf.mxu0 }
 0x244   : > { %v2422_v35 = vpack.c.bf16 %v4819_v12, %v4819_v12  ;;  %2461 = vst.msk [vmem:[%s4695_s8 + $0x30] sm:$0xf] %vm2448_vm1, %v2428_v17  ;;  %v2492_v27 = vsel %vm274_vm6, %v4819_v12, 0.0 }
 0x245   : > { %v2493_v30 = vadd.f32 %v2492_v27, %v2491_v24 }
 0x246   : > { %2455 = vst.msk [vmem:[%s4695_s8 + $0x18] sm:$0xf] %vm2448_vm1, %v2422_v35 }
 0x249   : > { %v4835_v41 = vpop.f32.mrf.mxu1 }
 0x24a   : > { %v2429_v0 = vpack.c.bf16 %v4835_v41, %v4835_v41  ;;  %v2506_v8 = vsel %vm274_vm6, %v4835_v41, 0.0 }
 0x24b   : > { %v4841_v63 = vpop.f32.mrf.mxu0 }
 0x24c   : > { %v2423_v21 = vpack.c.bf16 %v4841_v63, %v4841_v63  ;;  %2462 = vst.msk [vmem:[%s4695_s8 + $0x34] sm:$0xf] %vm2448_vm1, %v2429_v0  ;;  %v2494_v15 = vsel %vm274_vm6, %v4841_v63, 0.0 }
 0x24d   : > { %v2495_v14 = vadd.f32 %v2494_v15, %v2493_v30 }
 0x24e   : > { %2456 = vst.msk [vmem:[%s4695_s8 + $0x1c] sm:$0xf] %vm2448_vm1, %v2423_v21 }
 0x24f   : > { %v2497_v59 = vadd.f32 %v2496_v52, %v2495_v14 }
 0x251   : > { %v2499_v37 = vadd.f32 %v2498_v2, %v2497_v59 }
 0x253   : > { %v2501_v40 = vadd.f32 %v2500_v11, %v2499_v37 }
 0x255   : > { %v2503_v53 = vadd.f32 %v2502_v16, %v2501_v40 }
 0x257   : > { %v2505_v7 = vadd.f32 %v2504_v56, %v2503_v53  ;;  %v2530_v56 = vsel %vm274_vm6, %v4807_v51, 0.0 }
 0x259   : > { %v2507_v49 = vadd.f32 %v2506_v8, %v2505_v7 }
 0x25d   : > { %v4859_v45 = vpop.f32.mrf.mxu2 }
 0x25e   : > { %v2436_v58 = vpack.c.bf16 %v4859_v45, %v4859_v45  ;;  %v2520_v0 = vsel %vm274_vm6, %v4859_v45, 0.0 }
 0x25f   : > { %v4863_v23 = vpop.f32.mrf.mxu3 }
 0x260   : > { %2469 = vst.msk [vmem:[%s4695_s8 + $0x50] sm:$0xf] %vm2448_vm1, %v2436_v58  ;;  %v2442_v22 = vpack.c.bf16 %v4863_v23, %v4863_v23  ;;  %v2528_v58 = vsel %vm274_vm6, %v4795_v50, 0.0  ;;  %v2532_v7 = vsel %vm274_vm6, %v4863_v23, 0.0 }
 0x262   : > { %2475 = vst.msk [vmem:[%s4695_s8 + $0x68] sm:$0xf] %vm2448_vm1, %v2442_v22 }
 0x263   : > { %v4873_v55 = vpop.f32.mrf.mxu1 }
 0x264   : > { %v2430_v31 = vpack.c.bf16 %v4873_v55, %v4873_v55  ;;  %v2508_v38 = vsel %vm274_vm6, %v4873_v55, 0.0 }
 0x265   : > { %v4879_v54 = vpop.f32.mrf.mxu2  ;;  %v2509_v28 = vadd.f32 %v2508_v38, %v2507_v49 }
 0x266   : > { %v2437_v42 = vpack.c.bf16 %v4879_v54, %v4879_v54  ;;  %2463 = vst.msk [vmem:[%s4695_s8 + $0x38] sm:$0xf] %vm2448_vm1, %v2430_v31  ;;  %v2522_v24 = vsel %vm274_vm6, %v4879_v54, 0.0 }
 0x267   : > { %v4885_v6 = vpop.f32.mrf.mxu3 }
 0x268   : > { %2470 = vst.msk [vmem:[%s4695_s8 + $0x54] sm:$0xf] %vm2448_vm1, %v2437_v42  ;;  %v2443_v36 = vpack.c.bf16 %v4885_v6, %v4885_v6  ;;  %v2534_v8 = vsel %vm274_vm6, %v4885_v6, 0.0 }
 0x26a   : > { %2476 = vst.msk [vmem:[%s4695_s8 + $0x6c] sm:$0xf] %vm2448_vm1, %v2443_v36 }
 0x26b   : > { %v4897_v9 = vpop.f32.mrf.mxu1 }
 0x26c   : > { %v2431_v1 = vpack.c.bf16 %v4897_v9, %v4897_v9  ;;  %v2510_v17 = vsel %vm274_vm6, %v4897_v9, 0.0 }
 0x26d   : > { %v2511_v3 = vadd.f32 %v2510_v17, %v2509_v28 }
 0x26e   : > { %2464 = vst.msk [vmem:[%s4695_s8 + $0x3c] sm:$0xf] %vm2448_vm1, %v2431_v1 }
 0x26f   : > { %v2513_v35 = vadd.f32 %v2512_v62, %v2511_v3 }
 0x271   : > { %v2515_v4 = vadd.f32 %v2514_v13, %v2513_v35 }
 0x273   : > { %v2517_v33 = vadd.f32 %v2516_v47, %v2515_v4 }
 0x275   : > { %v2519_v10 = vadd.f32 %v2518_v61, %v2517_v33 }
 0x277   : > { %v2521_v27 = vadd.f32 %v2520_v0, %v2519_v10 }
 0x279   : > { %v2523_v30 = vadd.f32 %v2522_v24, %v2521_v27 }
 0x27d   : > { %v4915_v25 = vpop.f32.mrf.mxu2 }
 0x27e   : > { %v2438_v21 = vpack.c.bf16 %v4915_v25, %v4915_v25  ;;  %v2524_v52 = vsel %vm274_vm6, %v4915_v25, 0.0 }
 0x27f   : > { %v2525_v59 = vadd.f32 %v2524_v52, %v2523_v30 }
 0x280   : > { %2471 = vst.msk [vmem:[%s4695_s8 + $0x58] sm:$0xf] %vm2448_vm1, %v2438_v21  ;;  %v4923_v15 = vpop.f32.mrf.mxu3 }
 0x281   : > { %v2444_v14 = vpack.c.bf16 %v4923_v15, %v4923_v15  ;;  %v2536_v36 = vsel %vm274_vm6, %v4923_v15, 0.0 }
 0x283   : > { %2477 = vst.msk [vmem:[%s4695_s8 + $0x70] sm:$0xf] %vm2448_vm1, %v2444_v14 }
 0x285   : > { %v4931_v2 = vpop.f32.mrf.mxu2 }
 0x286   : > { %v2439_v37 = vpack.c.bf16 %v4931_v2, %v4931_v2  ;;  %v2526_v11 = vsel %vm274_vm6, %v4931_v2, 0.0 }
 0x287   : > { %v2527_v40 = vadd.f32 %v2526_v11, %v2525_v59 }
 0x288   : > { %2472 = vst.msk [vmem:[%s4695_s8 + $0x5c] sm:$0xf] %vm2448_vm1, %v2439_v37  ;;  %v4941_v16 = vpop.f32.mrf.mxu3 }
 0x289   : > { %v2529_v22 = vadd.f32 %v2528_v58, %v2527_v40  ;;  %v2445_v53 = vpack.c.bf16 %v4941_v16, %v4941_v16  ;;  %v2538_v17 = vsel %vm274_vm6, %v4941_v16, 0.0 }
 0x28b   : > { %v2531_v31 = vadd.f32 %v2530_v56, %v2529_v22  ;;  %2478 = vst.msk [vmem:[%s4695_s8 + $0x74] sm:$0xf] %vm2448_vm1, %v2445_v53 }
 0x28d   : > { %v2533_v42 = vadd.f32 %v2532_v7, %v2531_v31 }
 0x28f   : > { %v2535_v38 = vadd.f32 %v2534_v8, %v2533_v42 }
 0x290   : > { %v4955_v49 = vpop.f32.mrf.mxu3 }
 0x291   : > { %v2537_v28 = vadd.f32 %v2536_v36, %v2535_v38  ;;  %v2446_v1 = vpack.c.bf16 %v4955_v49, %v4955_v49  ;;  %v2540_v62 = vsel %vm274_vm6, %v4955_v49, 0.0 }
 0x293   : > { %2479 = vst.msk [vmem:[%s4695_s8 + $0x78] sm:$0xf] %vm2448_vm1, %v2446_v1  ;;  %v2539_v3 = vadd.f32 %v2538_v17, %v2537_v28 }
 0x295   : > { %v2541_v35 = vadd.f32 %v2540_v62, %v2539_v3 }
 0x298   : > { %v4965_v13 = vpop.f32.mrf.mxu3 }
 0x299   : > { %v2447_v4 = vpack.c.bf16 %v4965_v13, %v4965_v13  ;;  %v2542_v47 = vsel %vm274_vm6, %v4965_v13, 0.0 }
 0x29a   : > { %v2543_v33 = vadd.f32 %v2542_v47, %v2541_v35 }
 0x29b   : > { %2480 = vst.msk [vmem:[%s4695_s8 + $0x7c] sm:$0xf] %vm2448_vm1, %v2447_v4 }
 0x29c   : > { %v2544_v61 = vrot.slane %v2543_v33, 4 }
 0x29e   : > { %v2545_v10 = vadd.f32 %v2544_v61, %v2543_v33 }
 0x2a0   : > { %v2546_v0 = vrot.slane %v2545_v10, 2 }
 0x2a2   : > { %v2547_v27 = vadd.f32 %v2546_v0, %v2545_v10 }
 0x2a4   : > { %v2548_v21 = vrot.slane %v2547_v27, 1 }
 0x2a6   : > { %v2549_v24 = vadd.f32 %v2548_v21, %v2547_v27 }
 0x2a8   : > { %2685 = vst.msk [vmem:[%s4977_s14] sm:$0x1] %vm2684_vm2, %v2549_v24  ;;  %v4981_v30 = vmul.f32 0.00390625, %v2549_v24 }
 0x2aa   : > { %v2551_v14 = vsub.f32 %v4697_v18, %v4981_v30  ;;  %v2552_v52 = vsub.f32 %v4710_v43, %v4981_v30  ;;  %v2553_v59 = vsub.f32 %v4720_v44, %v4981_v30  ;;  %v2554_v37 = vsub.f32 %v4740_v26, %v4981_v30 }
 0x2ab   : > { %v2555_v58 = vsub.f32 %v4765_v34, %v4981_v30  ;;  %v2556_v53 = vsub.f32 %v4777_v39, %v4981_v30  ;;  %v2557_v44 = vsub.f32 %v4819_v12, %v4981_v30  ;;  %v2558_v34 = vsub.f32 %v4841_v63, %v4981_v30 }
 0x2ac   : > { %v2583_v11 = vmul.f32 %v2551_v14, %v2551_v14  ;;  %v2584_v40 = vmul.f32 %v2552_v52, %v2552_v52  ;;  %v2585_v22 = vmul.f32 %v2553_v59, %v2553_v59  ;;  %v2586_v56 = vmul.f32 %v2554_v37, %v2554_v37 }
 0x2ad   : > { %v2587_v7 = vmul.f32 %v2555_v58, %v2555_v58  ;;  %v2588_v8 = vmul.f32 %v2556_v53, %v2556_v53  ;;  %v2559_v36 = vsub.f32 %v4726_v48, %v4981_v30  ;;  %v2589_v28 = vmul.f32 %v2557_v44, %v2557_v44 }
 0x2ae   : > { %v2615_v18 = vsel %vm274_vm6, %v2583_v11, 0.0  ;;  %v2616_v43 = vsel %vm274_vm6, %v2584_v40, 0.0  ;;  %v2618_v26 = vsel %vm274_vm6, %v2585_v22, 0.0  ;;  %v2620_v38 = vsel %vm274_vm6, %v2586_v56, 0.0 }
 0x2af   : > { %v2617_v31 = vadd.f32 %v2616_v43, %v2615_v18  ;;  %v2622_v1 = vsel %vm274_vm6, %v2587_v7, 0.0  ;;  %v2560_v12 = vsub.f32 %v4744_v19, %v4981_v30  ;;  %v2590_v3 = vmul.f32 %v2558_v34, %v2558_v34 }
 0x2b0   : > { %v2624_v62 = vsel %vm274_vm6, %v2588_v8, 0.0  ;;  %v2561_v63 = vsub.f32 %v4769_v57, %v4981_v30  ;;  %v2591_v4 = vmul.f32 %v2559_v36, %v2559_v36  ;;  %v2626_v47 = vsel %vm274_vm6, %v2589_v28, 0.0 }
 0x2b1   : > { %v2619_v42 = vadd.f32 %v2618_v26, %v2617_v31  ;;  %v2562_v48 = vsub.f32 %v4781_v5, %v4981_v30  ;;  %v2592_v61 = vmul.f32 %v2560_v12, %v2560_v12  ;;  %v2628_v10 = vsel %vm274_vm6, %v2590_v3, 0.0 }
 0x2b2   : > { %v2563_v19 = vsub.f32 %v4813_v32, %v4981_v30  ;;  %v2593_v27 = vmul.f32 %v2561_v63, %v2561_v63  ;;  %v2630_v21 = vsel %vm274_vm6, %v2591_v4, 0.0  ;;  %v2564_v57 = vsub.f32 %v4835_v41, %v4981_v30 }
 0x2b3   : > { %v2621_v39 = vadd.f32 %v2620_v38, %v2619_v42  ;;  %v2594_v14 = vmul.f32 %v2562_v48, %v2562_v48  ;;  %v2632_v52 = vsel %vm274_vm6, %v2592_v61, 0.0  ;;  %v2565_v5 = vsub.f32 %v4873_v55, %v4981_v30 }
 0x2b4   : > { %v2595_v37 = vmul.f32 %v2563_v19, %v2563_v19  ;;  %v2634_v11 = vsel %vm274_vm6, %v2593_v27, 0.0  ;;  %v2566_v32 = vsub.f32 %v4897_v9, %v4981_v30  ;;  %v2596_v58 = vmul.f32 %v2564_v57, %v2564_v57 }
 0x2b5   : > { %v2623_v17 = vadd.f32 %v2622_v1, %v2621_v39  ;;  %v2636_v22 = vsel %vm274_vm6, %v2594_v14, 0.0  ;;  %v2567_v41 = vsub.f32 %v4752_v20, %v4981_v30  ;;  %v2597_v56 = vmul.f32 %v2565_v5, %v2565_v5 }
 0x2b6   : > { %v2638_v18 = vsel %vm274_vm6, %v2595_v37, 0.0  ;;  %v2568_v55 = vsub.f32 %v4759_v60, %v4981_v30  ;;  %v2598_v31 = vmul.f32 %v2566_v32, %v2566_v32  ;;  %v2640_v44 = vsel %vm274_vm6, %v2596_v58, 0.0 }
 0x2b7   : > { %v2625_v35 = vadd.f32 %v2624_v62, %v2623_v17  ;;  %v2569_v9 = vsub.f32 %v4789_v46, %v4981_v30  ;;  %v2599_v26 = vmul.f32 %v2567_v41, %v2567_v41  ;;  %v2642_v42 = vsel %vm274_vm6, %v2597_v56, 0.0 }
 0x2b8   : > { %v2570_v20 = vsub.f32 %v4799_v29, %v4981_v30  ;;  %v2600_v8 = vmul.f32 %v2568_v55, %v2568_v55  ;;  %v2644_v38 = vsel %vm274_vm6, %v2598_v31, 0.0  ;;  %v2571_v60 = vsub.f32 %v4859_v45, %v4981_v30 }
 0x2b9   : > { %v2627_v33 = vadd.f32 %v2626_v47, %v2625_v35  ;;  %v2601_v36 = vmul.f32 %v2569_v9, %v2569_v9  ;;  %v2646_v28 = vsel %vm274_vm6, %v2599_v26, 0.0  ;;  %v2572_v46 = vsub.f32 %v4879_v54, %v4981_v30 }
 0x2ba   : > { %v2602_v17 = vmul.f32 %v2570_v20, %v2570_v20  ;;  %v2648_v12 = vsel %vm274_vm6, %v2600_v8, 0.0  ;;  %v2573_v29 = vsub.f32 %v4915_v25, %v4981_v30  ;;  %v2603_v62 = vmul.f32 %v2571_v60, %v2571_v60 }
 0x2bb   : > { %v2629_v0 = vadd.f32 %v2628_v10, %v2627_v33  ;;  %v2650_v35 = vsel %vm274_vm6, %v2601_v36, 0.0  ;;  %v2574_v45 = vsub.f32 %v4931_v2, %v4981_v30  ;;  %v2604_v4 = vmul.f32 %v2572_v46, %v2572_v46 }
 0x2bc   : > { %v2652_v47 = vsel %vm274_vm6, %v2602_v17, 0.0  ;;  %v2575_v54 = vsub.f32 %v4795_v50, %v4981_v30  ;;  %v2605_v48 = vmul.f32 %v2573_v29, %v2573_v29  ;;  %v2654_v61 = vsel %vm274_vm6, %v2603_v62, 0.0 }
 0x2bd   : > { %v2631_v24 = vadd.f32 %v2630_v21, %v2629_v0  ;;  %v2576_v25 = vsub.f32 %v4807_v51, %v4981_v30  ;;  %v2606_v0 = vmul.f32 %v2574_v45, %v2574_v45  ;;  %v2656_v19 = vsel %vm274_vm6, %v2604_v4, 0.0 }
 0x2be   : > { %v2577_v2 = vsub.f32 %v4863_v23, %v4981_v30  ;;  %v2607_v21 = vmul.f32 %v2575_v54, %v2575_v54  ;;  %v2578_v50 = vsub.f32 %v4885_v6, %v4981_v30  ;;  %v2579_v51 = vsub.f32 %v4923_v15, %v4981_v30 }
 0x2bf   : > { %v2633_v59 = vadd.f32 %v2632_v52, %v2631_v24  ;;  %v2658_v24 = vsel %vm274_vm6, %v2605_v48, 0.0  ;;  %v2608_v14 = vmul.f32 %v2576_v25, %v2576_v25  ;;  %v2660_v52 = vsel %vm274_vm6, %v2606_v0, 0.0 }
 0x2c0   : > { %v2609_v5 = vmul.f32 %v2577_v2, %v2577_v2  ;;  %v2662_v37 = vsel %vm274_vm6, %v2607_v21, 0.0  ;;  %v2580_v23 = vsub.f32 %v4941_v16, %v4981_v30  ;;  %v2581_v6 = vsub.f32 %v4955_v49, %v4981_v30 }
 0x2c1   : > { %v2635_v40 = vadd.f32 %v2634_v11, %v2633_v59  ;;  %v2664_v32 = vsel %vm274_vm6, %v2608_v14, 0.0  ;;  %v2582_v15 = vsub.f32 %v4965_v13, %v4981_v30 }
 0x2c2   : > { %v2612_v56 = vmul.f32 %v2580_v23, %v2580_v23  ;;  %v2613_v55 = vmul.f32 %v2581_v6, %v2581_v6 }
 0x2c3   : > { %v2637_v53 = vadd.f32 %v2636_v22, %v2635_v40  ;;  %v2610_v40 = vmul.f32 %v2578_v50, %v2578_v50  ;;  %v2611_v22 = vmul.f32 %v2579_v51, %v2579_v51 }
 0x2c4   : > { %v2674_v9 = vsel %vm274_vm6, %v2613_v55, 0.0 }
 0x2c5   : > { %v2639_v43 = vadd.f32 %v2638_v18, %v2637_v53  ;;  %v2666_v53 = vsel %vm274_vm6, %v2609_v5, 0.0  ;;  %v2668_v18 = vsel %vm274_vm6, %v2610_v40, 0.0  ;;  %v2670_v16 = vsel %vm274_vm6, %v2611_v22, 0.0 }
 0x2c7   : > { %v2641_v7 = vadd.f32 %v2640_v44, %v2639_v43  ;;  %v2614_v44 = vmul.f32 %v2582_v15, %v2582_v15 }
 0x2c9   : > { %v2643_v34 = vadd.f32 %v2642_v42, %v2641_v7  ;;  %v2672_v7 = vsel %vm274_vm6, %v2612_v56, 0.0  ;;  %v2676_v42 = vsel %vm274_vm6, %v2614_v44, 0.0 }
 0x2cb   : > { %v2645_v39 = vadd.f32 %v2644_v38, %v2643_v34 }
 0x2cd   : > { %v2647_v1 = vadd.f32 %v2646_v28, %v2645_v39 }
 0x2cf   : > { %v2649_v3 = vadd.f32 %v2648_v12, %v2647_v1 }
 0x2d1   : > { %v2651_v63 = vadd.f32 %v2650_v35, %v2649_v3 }
 0x2d3   : > { %v2653_v33 = vadd.f32 %v2652_v47, %v2651_v63 }
 0x2d5   : > { %v2655_v10 = vadd.f32 %v2654_v61, %v2653_v33 }
 0x2d7   : > { %v2657_v27 = vadd.f32 %v2656_v19, %v2655_v10 }
 0x2d9   : > { %v2659_v57 = vadd.f32 %v2658_v24, %v2657_v27 }
 0x2db   : > { %v2661_v59 = vadd.f32 %v2660_v52, %v2659_v57 }
 0x2dd   : > { %v2663_v11 = vadd.f32 %v2662_v37, %v2661_v59 }
 0x2df   : > { %v2665_v58 = vadd.f32 %v2664_v32, %v2663_v11 }
 0x2e1   : > { %v2667_v41 = vadd.f32 %v2666_v53, %v2665_v58 }
 0x2e3   : > { %v2669_v43 = vadd.f32 %v2668_v18, %v2667_v41 }
 0x2e5   : > { %v2671_v31 = vadd.f32 %v2670_v16, %v2669_v43 }
 0x2e7   : > { %v2673_v49 = vadd.f32 %v2672_v7, %v2671_v31 }
 0x2e9   : > { %v2675_v26 = vadd.f32 %v2674_v9, %v2673_v49 }
 0x2eb   : > { %v2677_v34 = vadd.f32 %v2676_v42, %v2675_v26 }
 0x2ed   : > { %v2678_v13 = vrot.slane %v2677_v34, 4 }
 0x2ef   : > { %v2679_v30 = vadd.f32 %v2678_v13, %v2677_v34 }
 0x2f1   : > { %v2680_v20 = vrot.slane %v2679_v30, 2 }
 0x2f3   : > { %v2681_v8 = vadd.f32 %v2680_v20, %v2679_v30 }
 0x2f5   : > { %v2682_v38 = vrot.slane %v2681_v8, 1 }
 0x2f7   : > { %v2683_v39 = vadd.f32 %v2682_v38, %v2681_v8 }
 0x2f9   : > { %2686 = vst.msk [vmem:[%s4977_s14 + $0x1] sm:$0x1] %vm2684_vm2, %v2683_v39 }
 0x2fa PF: > { %s14_s12 = sadd.s32 1, %s3507_s12  }
 0x2fb   : > { %p11_p4 = scmp.ge.s32.totalorder %s14_s12, 4  }
 0x2fd   :  { %13 = sbr.rel (!%p11_p4) target bundleno = 1 (0x1), region = 70 }

</bundles_post_ra>
